<compile_context>
chip_gen: v7x
topology: tpu7x:2x2x1
jax: 0.10.0
libtpu: 0.0.40
codegen_flags: <defaults>
</compile_context>

<pallas_src>
import functools

import jax
import jax.numpy as jnp
from jax.experimental import pallas as pl
from jax.experimental.pallas import tpu as pltpu

# ------------------------- "args" of AugModel (small, deterministic) --------
IMG_SIZE   = 16
ENC_DIM    = 32
N_CLS      = 2
RMID       = (2, 3)          # args.rmid
N_SHOT     = 2               # number of support shots (len(f_s))
ADAPT_ITER = 3               # args.adapt_iter
LR_CLS     = 0.1             # args.lr_cls
ATT_WT     = 0.3             # args.att_wt (att_ad=False -> plain float)
NORM_S     = True            # args.norm_s
NORM_Q     = True            # args.norm_q
META_AUG   = False           # args.get('meta_aug', False)

T = IMG_SIZE * IMG_SIZE      # tokens per image; feature res == im_size so the
                             # DecoderSimple F.interpolate is the identity here.
L = len(RMID)                # number of rmid levels

# whole-array-in-VMEM spec (no grid -> single block per operand)
_VMEM_SPEC = pl.BlockSpec(memory_space=pltpu.MemorySpace.VMEM)


# ================================ Pallas kernel =============================
def _aug_forward_kernel(tok_ref, wf_ref, bf_ref, wm_ref, bm_ref,
                        ys_ref, gsc_ref, ohq3_ref, w0_ref, b0_ref,
                        logits_ref, loss_ref,
                        *, n_shot, n_lvl, t, d, att_wt, lr, n_iter,
                        norm_s, norm_q):
    """Entire AugModel forward in one kernel.

    tok  [(S+1)*T, 3] tokens: [shot0 | shot1 | query] rows, channels last
    wf   [3, D], bf [1, D]            main feature projection
    wm   [3, L*D], bm [1, L*D]        rmid projections concatenated on features
    ys   [1, S*T]  support class-1 indicator (== one-hot row 1)
    gsc  [1, S*T]  per-pixel class weight / sum(weights)  (weighted-CE grad scale)
    ohq3 [2, 3*T]  query one-hot, tiled for the 3 fused heads
    w0   [2, D], b0 [2, 1]            classifier init (torch 1x1-conv layout)
    -> logits [2, 3*T] lane-dense slab (head1|head2|head3), loss [1, 3]
    """
    st = n_shot * t
    tok = tok_ref[...]

    # ---- backbone stand-in: two fused projections over all images ----------
    f_all = jnp.dot(tok, wf_ref[...], preferred_element_type=jnp.float32) + bf_ref[...]
    mid_all = jnp.dot(tok, wm_ref[...], preferred_element_type=jnp.float32) + bm_ref[...]

    def l2norm(x):
        # F.normalize(x, dim=channel): x / max(||x||, 1e-12) == x * rsqrt(max(ss,1e-24))
        ss = jnp.sum(x * x, axis=-1, keepdims=True)
        return x * jax.lax.rsqrt(jnp.maximum(ss, 1e-24))

    if norm_s and norm_q:
        f_all = l2norm(f_all)                     # both flags set -> one pass
    else:
        fs_part = l2norm(f_all[:st]) if norm_s else f_all[:st]
        fq_part = l2norm(f_all[st:]) if norm_q else f_all[st:]
        f_all = jnp.concatenate([fs_part, fq_part], axis=0)

    xs = f_all[:st]            # [S*T, D] support feats (classifier inputs + attn values)
    fq = f_all[st:]            # [T, D]   query features

    # ---- inner_loop(): SGD on weighted CE, 2-class sigmoid formulation -----
    # softmax over 2 classes == sigmoid(lg1 - lg0); grad rows are +/- one row,
    # so W1+W0 / b1+b0 are invariant and only the difference is carried.
    y1 = ys_ref[...]           # [1, S*T]
    gsc = gsc_ref[...]         # [1, S*T]
    w0 = w0_ref[...]
    b0 = b0_ref[...]
    w_sum = w0[0:1] + w0[1:2]
    w_dif0 = w0[1:2] - w0[0:1]
    b_sum = b0[0:1] + b0[1:2]
    b_dif0 = b0[1:2] - b0[0:1]
    two_lr = 2.0 * lr

    def sgd_step(_, carry):
        w_dif, b_dif = carry                                    # [1, D], [1, 1]
        dlg = jax.lax.dot_general(w_dif, xs, (((1,), (1,)), ((), ())),
                                  preferred_element_type=jnp.float32) + b_dif  # [1, S*T]
        p1 = 1.0 / (1.0 + jnp.exp(-dlg))                        # softmax class-1 prob
        g1 = (p1 - y1) * gsc                                    # d(weighted mean CE)/d lg1
        gw1 = jax.lax.dot_general(g1, xs, (((1,), (0,)), ((), ())),
                                  preferred_element_type=jnp.float32)          # [1, D]
        gb1 = jnp.sum(g1, axis=1, keepdims=True)                # [1, 1]
        return w_dif - two_lr * gw1, b_dif - two_lr * gb1

    w_dif, b_dif = jax.lax.fori_loop(0, n_iter, sgd_step, (w_dif0, b_dif0),
                                     unroll=True)
    w_cls = jnp.concatenate([0.5 * (w_sum - w_dif), 0.5 * (w_sum + w_dif)], axis=0)  # [2, D]
    b_cls = jnp.concatenate([0.5 * (b_sum - b_dif), 0.5 * (b_sum + b_dif)], axis=0)  # [2, 1]

    # ---- MMN surrogate: level-concat / shot-stacked cross attention --------
    scale = 1.0 / (float(n_lvl) * (float(d) ** 0.5))
    mq = mid_all[st:] * scale               # [T, L*D]   (scale folded into queries)
    ms = mid_all[:st]                       # [S*T, L*D] shots stacked on key tokens
    scores = jax.lax.dot_general(mq, ms, (((1,), (1,)), ((), ())),
                                 preferred_element_type=jnp.float32)   # [T, S*T]
    probs = []
    for k in range(n_shot):                 # static unroll: per-shot softmax
        sk = scores[:, k * t:(k + 1) * t]
        ek = jnp.exp(sk - jnp.max(sk, axis=-1, keepdims=True))
        probs.append(ek * pl.reciprocal(jnp.sum(ek, axis=-1, keepdims=True),
                                        approx=True))
    pp = jnp.concatenate(probs, axis=1)     # [T, S*T]
    # one value matmul; mean over shots folded into the 1/S scale
    att_f_q = jnp.dot(pp, xs, preferred_element_type=jnp.float32) * (1.0 / float(n_shot))

    # ---- three classifier heads fused into one matmul + one CE pass --------
    fq_blend = (1.0 - att_wt) * fq + att_wt * att_f_q
    feat_cat = jnp.concatenate([fq, att_f_q, fq_blend], axis=0)            # [3T, D]
    lg = jax.lax.dot_general(w_cls, feat_cat, (((1,), (1,)), ((), ())),
                             preferred_element_type=jnp.float32) + b_cls   # [2, 3T]
    z = lg - jnp.max(lg, axis=0, keepdims=True)
    lse = jnp.log(jnp.sum(jnp.exp(z), axis=0, keepdims=True))
    nll = -jnp.sum(ohq3_ref[...] * (z - lse), axis=0, keepdims=True)       # [1, 3T]
    inv_t = 1.0 / float(t)
    l1 = jnp.sum(nll[:, :t]) * inv_t
    l2 = jnp.sum(nll[:, t:2 * t]) * inv_t
    l3 = jnp.sum(nll[:, 2 * t:]) * inv_t

    logits_ref[...] = lg                    # lane-dense [2, 3T] prediction slab
    lane = jax.lax.broadcasted_iota(jnp.int32, (1, 3), 1)
    loss_ref[...] = jnp.where(lane == 0, l1, jnp.where(lane == 1, l2, l3))


# ================================ model glue ================================
def compute_weight(label, n_cls=N_CLS):
    flat = label.reshape(-1)
    count = jnp.stack([jnp.sum(flat == i).astype(jnp.float32) for i in range(n_cls)])
    # torch path falls back to ones on failure; guard the zero-count case the same way
    return jnp.where(count > 0, count[0] / jnp.maximum(count, 1.0), 1.0)


def aug_model_forward(params, img_s, img_q, label_s, label_q):
    s = img_s.shape[0]

    # token slab [shot0 | shot1 | query], channels last (~9 KB XLA transpose)
    tok = jnp.concatenate(
        [jnp.transpose(img_s, (0, 2, 3, 1)).reshape(s * T, 3),
         jnp.transpose(img_q, (0, 2, 3, 1)).reshape(T, 3)], axis=0)

    # rmid projection weights concatenated along output features: [3, L*D]
    wm = jnp.concatenate([params[f"bb_wm{i}"] for i in RMID], axis=1)
    bm = jnp.concatenate([params[f"bb_bm{i}"] for i in RMID], axis=1)

    # tiny label prep: class weights, normalized grad scale, one-hots
    ys_int = label_s.reshape(s * T)
    cls_w = compute_weight(label_s)
    wts = cls_w[ys_int]
    gsc = (wts / jnp.sum(wts)).reshape(1, s * T)
    ys_row = ys_int.astype(jnp.float32).reshape(1, s * T)
    ohq = jax.nn.one_hot(label_q.reshape(T), N_CLS, dtype=jnp.float32).T   # [2, T]
    ohq3 = jnp.tile(ohq, (1, 3))                                           # [2, 3T]

    logits, losses = pl.pallas_call(
        functools.partial(_aug_forward_kernel, n_shot=s, n_lvl=L, t=T, d=ENC_DIM,
                          att_wt=float(ATT_WT), lr=float(LR_CLS),
                          n_iter=ADAPT_ITER, norm_s=NORM_S, norm_q=NORM_Q),
        out_shape=(jax.ShapeDtypeStruct((N_CLS, 3 * T), jnp.float32),
                   jax.ShapeDtypeStruct((1, 3), jnp.float32)),
        in_specs=[_VMEM_SPEC] * 10,
        out_specs=(_VMEM_SPEC, _VMEM_SPEC),
        cost_estimate=pl.CostEstimate(flops=27_000_000, transcendentals=150_000,
                                      bytes_accessed=64_000),
    )(tok, params["bb_wf"], params["bb_bf"], wm, bm,
      ys_row, gsc, ohq3, params["cls_w_init"], params["cls_b_init"])

    # [2, T] logits slices reshape straight to NCHW [1, 2, H, W] (no transpose)
    pred_q = [logits[:, i * T:(i + 1) * T].reshape(1, N_CLS, IMG_SIZE, IMG_SIZE)
              for i in range(3)]
    loss_q = [losses[0, i] for i in range(3)]
    return pred_q, loss_q


# ================================ main ======================================
def _init_params():
    key = jax.random.PRNGKey(0)
    ks = jax.random.split(key, 8)
    p = {
        "bb_wf":  0.05 * jax.random.normal(ks[0], (3, ENC_DIM), jnp.float32),
        "bb_bf":  jnp.zeros((1, ENC_DIM), jnp.float32),
        "bb_wm2": 0.05 * jax.random.normal(ks[1], (3, ENC_DIM), jnp.float32),
        "bb_bm2": jnp.zeros((1, ENC_DIM), jnp.float32),
        "bb_wm3": 0.05 * jax.random.normal(ks[2], (3, ENC_DIM), jnp.float32),
        "bb_bm3": jnp.zeros((1, ENC_DIM), jnp.float32),
        # DecoderSimple.reset_parameters() equivalent (fresh each forward),
        # stored transposed [n_cls, D] (== torch 1x1 conv weight [out, in]).
        "cls_w_init": 0.02 * jax.random.normal(ks[3], (N_CLS, ENC_DIM), jnp.float32),
        "cls_b_init": jnp.zeros((N_CLS, 1), jnp.float32),
    }
    return p


if __name__ == "__main__":
    params = _init_params()

    key = jax.random.PRNGKey(0)
    k_imgs, k_imgq, k_labs, k_labq = jax.random.split(key, 4)
    img_s = jax.random.normal(k_imgs, (N_SHOT, 3, IMG_SIZE, IMG_SIZE), jnp.float32)
    img_q = jax.random.normal(k_imgq, (1, 3, IMG_SIZE, IMG_SIZE), jnp.float32)
    label_s = jax.random.bernoulli(k_labs, 0.4, (N_SHOT, IMG_SIZE, IMG_SIZE)).astype(jnp.int32)
    label_q = jax.random.bernoulli(k_labq, 0.4, (1, IMG_SIZE, IMG_SIZE)).astype(jnp.int32)

    fwd = jax.jit(aug_model_forward)
    pred_q, loss_q = fwd(params, img_s, img_q, label_s, label_q)

    for p in pred_q:
        jax.block_until_ready(p)
    for l in loss_q:
        jax.block_until_ready(l)

    assert len(pred_q) == 3 and len(loss_q) == 3
    assert all(p.shape == (1, N_CLS, IMG_SIZE, IMG_SIZE) for p in pred_q)
    assert all(bool(jnp.isfinite(l)) for l in loss_q)

    print("KERNEL_OK")
</pallas_src>

<mosaic_0001>
module attributes {stable_mosaic.version = 11 : i64} {
  func.func @_aug_forward_kernel(%arg0: memref<768x3xf32, #tpu.memory_space<vmem>>, %arg1: memref<3x32xf32, #tpu.memory_space<vmem>>, %arg2: memref<1x32xf32, #tpu.memory_space<vmem>>, %arg3: memref<3x64xf32, #tpu.memory_space<vmem>>, %arg4: memref<1x64xf32, #tpu.memory_space<vmem>>, %arg5: memref<1x512xf32, #tpu.memory_space<vmem>>, %arg6: memref<1x512xf32, #tpu.memory_space<vmem>>, %arg7: memref<2x768xf32, #tpu.memory_space<vmem>>, %arg8: memref<2x32xf32, #tpu.memory_space<vmem>>, %arg9: memref<2x1xf32, #tpu.memory_space<vmem>>, %arg10: memref<2x768xf32, #tpu.memory_space<vmem>>, %arg11: memref<1x3xf32, #tpu.memory_space<vmem>>) attributes {dimension_semantics = [], scalar_prefetch = 0 : i64, scratch_operands = 0 : i64, tpu.core_type = #tpu.core_type<tc>} {
    %c0 = arith.constant 0 : index
    %c0_0 = arith.constant 0 : index
    %0 = vector.load %arg0[%c0, %c0_0] : memref<768x3xf32, #tpu.memory_space<vmem>>, vector<768x3xf32>
    %c0_1 = arith.constant 0 : index
    %c0_2 = arith.constant 0 : index
    %1 = vector.load %arg1[%c0_1, %c0_2] : memref<3x32xf32, #tpu.memory_space<vmem>>, vector<3x32xf32>
    %cst = arith.constant dense<0.000000e+00> : vector<768x32xf32>
    %2 = tpu.matmul %0, %1, %cst {dimension_numbers = #tpu.dot_dimension_numbers<[1], [0], [0], [1], [0, 0, 1, 1], [], []>} : vector<768x3xf32>, vector<3x32xf32>, vector<768x32xf32> -> vector<768x32xf32>
    %c0_3 = arith.constant 0 : index
    %c0_4 = arith.constant 0 : index
    %3 = vector.load %arg2[%c0_3, %c0_4] : memref<1x32xf32, #tpu.memory_space<vmem>>, vector<1x32xf32>
    %4 = vector.broadcast %3 : vector<1x32xf32> to vector<768x32xf32>
    %5 = arith.addf %2, %4 : vector<768x32xf32>
    %c0_5 = arith.constant 0 : index
    %c0_6 = arith.constant 0 : index
    %6 = vector.load %arg3[%c0_5, %c0_6] : memref<3x64xf32, #tpu.memory_space<vmem>>, vector<3x64xf32>
    %cst_7 = arith.constant dense<0.000000e+00> : vector<768x64xf32>
    %7 = tpu.matmul %0, %6, %cst_7 {dimension_numbers = #tpu.dot_dimension_numbers<[1], [0], [0], [1], [0, 0, 1, 1], [], []>} : vector<768x3xf32>, vector<3x64xf32>, vector<768x64xf32> -> vector<768x64xf32>
    %c0_8 = arith.constant 0 : index
    %c0_9 = arith.constant 0 : index
    %8 = vector.load %arg4[%c0_8, %c0_9] : memref<1x64xf32, #tpu.memory_space<vmem>>, vector<1x64xf32>
    %9 = vector.broadcast %8 : vector<1x64xf32> to vector<768x64xf32>
    %10 = arith.addf %7, %9 : vector<768x64xf32>
    %11 = arith.mulf %5, %5 : vector<768x32xf32>
    %cst_10 = arith.constant dense<0.000000e+00> : vector<768xf32>
    %12 = vector.multi_reduction <add>, %11, %cst_10 [1] : vector<768x32xf32> to vector<768xf32>
    %13 = vector.shape_cast %12 : vector<768xf32> to vector<768x1xf32>
    %cst_11 = arith.constant 1.000000e-24 : f32
    %14 = vector.broadcast %cst_11 : f32 to vector<768x1xf32>
    %15 = arith.maximumf %13, %14 : vector<768x1xf32>
    %16 = math.rsqrt %15 : vector<768x1xf32>
    %17 = vector.broadcast %16 : vector<768x1xf32> to vector<768x32xf32>
    %18 = arith.mulf %5, %17 : vector<768x32xf32>
    %19 = vector.extract_strided_slice %18 {offsets = [0, 0], sizes = [512, 32], strides = [1, 1]} : vector<768x32xf32> to vector<512x32xf32>
    %20 = vector.extract_strided_slice %18 {offsets = [512, 0], sizes = [256, 32], strides = [1, 1]} : vector<768x32xf32> to vector<256x32xf32>
    %c0_12 = arith.constant 0 : index
    %c0_13 = arith.constant 0 : index
    %21 = vector.load %arg5[%c0_12, %c0_13] : memref<1x512xf32, #tpu.memory_space<vmem>>, vector<1x512xf32>
    %c0_14 = arith.constant 0 : index
    %c0_15 = arith.constant 0 : index
    %22 = vector.load %arg6[%c0_14, %c0_15] : memref<1x512xf32, #tpu.memory_space<vmem>>, vector<1x512xf32>
    %c0_16 = arith.constant 0 : index
    %c0_17 = arith.constant 0 : index
    %23 = vector.load %arg8[%c0_16, %c0_17] : memref<2x32xf32, #tpu.memory_space<vmem>>, vector<2x32xf32>
    %c0_18 = arith.constant 0 : index
    %c0_19 = arith.constant 0 : index
    %24 = vector.load %arg9[%c0_18, %c0_19] : memref<2x1xf32, #tpu.memory_space<vmem>>, vector<2x1xf32>
    %25 = vector.extract_strided_slice %23 {offsets = [0, 0], sizes = [1, 32], strides = [1, 1]} : vector<2x32xf32> to vector<1x32xf32>
    %26 = vector.extract_strided_slice %23 {offsets = [1, 0], sizes = [1, 32], strides = [1, 1]} : vector<2x32xf32> to vector<1x32xf32>
    %27 = arith.addf %25, %26 : vector<1x32xf32>
    %28 = vector.extract_strided_slice %23 {offsets = [1, 0], sizes = [1, 32], strides = [1, 1]} : vector<2x32xf32> to vector<1x32xf32>
    %29 = vector.extract_strided_slice %23 {offsets = [0, 0], sizes = [1, 32], strides = [1, 1]} : vector<2x32xf32> to vector<1x32xf32>
    %30 = arith.subf %28, %29 : vector<1x32xf32>
    %31 = vector.extract_strided_slice %24 {offsets = [0, 0], sizes = [1, 1], strides = [1, 1]} : vector<2x1xf32> to vector<1x1xf32>
    %32 = vector.extract_strided_slice %24 {offsets = [1, 0], sizes = [1, 1], strides = [1, 1]} : vector<2x1xf32> to vector<1x1xf32>
    %33 = arith.addf %31, %32 : vector<1x1xf32>
    %34 = vector.extract_strided_slice %24 {offsets = [1, 0], sizes = [1, 1], strides = [1, 1]} : vector<2x1xf32> to vector<1x1xf32>
    %35 = vector.extract_strided_slice %24 {offsets = [0, 0], sizes = [1, 1], strides = [1, 1]} : vector<2x1xf32> to vector<1x1xf32>
    %36 = arith.subf %34, %35 : vector<1x1xf32>
    %c0_i32 = arith.constant 0 : i32
    %cst_20 = arith.constant dense<0.000000e+00> : vector<1x512xf32>
    %37 = tpu.matmul %30, %19, %cst_20 {dimension_numbers = #tpu.dot_dimension_numbers<[1], [1], [0], [0], [0, 0, 1, 0], [], []>} : vector<1x32xf32>, vector<512x32xf32>, vector<1x512xf32> -> vector<1x512xf32>
    %38 = vector.broadcast %36 : vector<1x1xf32> to vector<1x512xf32>
    %39 = arith.addf %37, %38 : vector<1x512xf32>
    %cst_21 = arith.constant 0.000000e+00 : f32
    %40 = vector.broadcast %cst_21 : f32 to vector<1x512xf32>
    %41 = arith.subf %40, %39 : vector<1x512xf32>
    %42 = math.exp %41 : vector<1x512xf32>
    %cst_22 = arith.constant 1.000000e+00 : f32
    %43 = vector.broadcast %cst_22 : f32 to vector<1x512xf32>
    %44 = arith.addf %43, %42 : vector<1x512xf32>
    %cst_23 = arith.constant 1.000000e+00 : f32
    %45 = vector.broadcast %cst_23 : f32 to vector<1x512xf32>
    %46 = arith.divf %45, %44 : vector<1x512xf32>
    %47 = arith.subf %46, %21 : vector<1x512xf32>
    %48 = arith.mulf %47, %22 : vector<1x512xf32>
    %cst_24 = arith.constant dense<0.000000e+00> : vector<1x32xf32>
    %49 = tpu.matmul %48, %19, %cst_24 {dimension_numbers = #tpu.dot_dimension_numbers<[1], [0], [0], [1], [0, 0, 1, 1], [], []>} : vector<1x512xf32>, vector<512x32xf32>, vector<1x32xf32> -> vector<1x32xf32>
    %cst_25 = arith.constant dense<0.000000e+00> : vector<1xf32>
    %50 = vector.multi_reduction <add>, %48, %cst_25 [1] : vector<1x512xf32> to vector<1xf32>
    %51 = vector.shape_cast %50 : vector<1xf32> to vector<1x1xf32>
    %cst_26 = arith.constant 2.000000e-01 : f32
    %52 = vector.broadcast %cst_26 : f32 to vector<1x32xf32>
    %53 = arith.mulf %52, %49 : vector<1x32xf32>
    %54 = arith.subf %30, %53 : vector<1x32xf32>
    %cst_27 = arith.constant 2.000000e-01 : f32
    %55 = vector.broadcast %cst_27 : f32 to vector<1x1xf32>
    %56 = arith.mulf %55, %51 : vector<1x1xf32>
    %57 = arith.subf %36, %56 : vector<1x1xf32>
    %c1_i32 = arith.constant 1 : i32
    %cst_28 = arith.constant dense<0.000000e+00> : vector<1x512xf32>
    %58 = tpu.matmul %54, %19, %cst_28 {dimension_numbers = #tpu.dot_dimension_numbers<[1], [1], [0], [0], [0, 0, 1, 0], [], []>} : vector<1x32xf32>, vector<512x32xf32>, vector<1x512xf32> -> vector<1x512xf32>
    %59 = vector.broadcast %57 : vector<1x1xf32> to vector<1x512xf32>
    %60 = arith.addf %58, %59 : vector<1x512xf32>
    %cst_29 = arith.constant 0.000000e+00 : f32
    %61 = vector.broadcast %cst_29 : f32 to vector<1x512xf32>
    %62 = arith.subf %61, %60 : vector<1x512xf32>
    %63 = math.exp %62 : vector<1x512xf32>
    %cst_30 = arith.constant 1.000000e+00 : f32
    %64 = vector.broadcast %cst_30 : f32 to vector<1x512xf32>
    %65 = arith.addf %64, %63 : vector<1x512xf32>
    %cst_31 = arith.constant 1.000000e+00 : f32
    %66 = vector.broadcast %cst_31 : f32 to vector<1x512xf32>
    %67 = arith.divf %66, %65 : vector<1x512xf32>
    %68 = arith.subf %67, %21 : vector<1x512xf32>
    %69 = arith.mulf %68, %22 : vector<1x512xf32>
    %cst_32 = arith.constant dense<0.000000e+00> : vector<1x32xf32>
    %70 = tpu.matmul %69, %19, %cst_32 {dimension_numbers = #tpu.dot_dimension_numbers<[1], [0], [0], [1], [0, 0, 1, 1], [], []>} : vector<1x512xf32>, vector<512x32xf32>, vector<1x32xf32> -> vector<1x32xf32>
    %cst_33 = arith.constant dense<0.000000e+00> : vector<1xf32>
    %71 = vector.multi_reduction <add>, %69, %cst_33 [1] : vector<1x512xf32> to vector<1xf32>
    %72 = vector.shape_cast %71 : vector<1xf32> to vector<1x1xf32>
    %cst_34 = arith.constant 2.000000e-01 : f32
    %73 = vector.broadcast %cst_34 : f32 to vector<1x32xf32>
    %74 = arith.mulf %73, %70 : vector<1x32xf32>
    %75 = arith.subf %54, %74 : vector<1x32xf32>
    %cst_35 = arith.constant 2.000000e-01 : f32
    %76 = vector.broadcast %cst_35 : f32 to vector<1x1xf32>
    %77 = arith.mulf %76, %72 : vector<1x1xf32>
    %78 = arith.subf %57, %77 : vector<1x1xf32>
    %c2_i32 = arith.constant 2 : i32
    %cst_36 = arith.constant dense<0.000000e+00> : vector<1x512xf32>
    %79 = tpu.matmul %75, %19, %cst_36 {dimension_numbers = #tpu.dot_dimension_numbers<[1], [1], [0], [0], [0, 0, 1, 0], [], []>} : vector<1x32xf32>, vector<512x32xf32>, vector<1x512xf32> -> vector<1x512xf32>
    %80 = vector.broadcast %78 : vector<1x1xf32> to vector<1x512xf32>
    %81 = arith.addf %79, %80 : vector<1x512xf32>
    %cst_37 = arith.constant 0.000000e+00 : f32
    %82 = vector.broadcast %cst_37 : f32 to vector<1x512xf32>
    %83 = arith.subf %82, %81 : vector<1x512xf32>
    %84 = math.exp %83 : vector<1x512xf32>
    %cst_38 = arith.constant 1.000000e+00 : f32
    %85 = vector.broadcast %cst_38 : f32 to vector<1x512xf32>
    %86 = arith.addf %85, %84 : vector<1x512xf32>
    %cst_39 = arith.constant 1.000000e+00 : f32
    %87 = vector.broadcast %cst_39 : f32 to vector<1x512xf32>
    %88 = arith.divf %87, %86 : vector<1x512xf32>
    %89 = arith.subf %88, %21 : vector<1x512xf32>
    %90 = arith.mulf %89, %22 : vector<1x512xf32>
    %cst_40 = arith.constant dense<0.000000e+00> : vector<1x32xf32>
    %91 = tpu.matmul %90, %19, %cst_40 {dimension_numbers = #tpu.dot_dimension_numbers<[1], [0], [0], [1], [0, 0, 1, 1], [], []>} : vector<1x512xf32>, vector<512x32xf32>, vector<1x32xf32> -> vector<1x32xf32>
    %cst_41 = arith.constant dense<0.000000e+00> : vector<1xf32>
    %92 = vector.multi_reduction <add>, %90, %cst_41 [1] : vector<1x512xf32> to vector<1xf32>
    %93 = vector.shape_cast %92 : vector<1xf32> to vector<1x1xf32>
    %cst_42 = arith.constant 2.000000e-01 : f32
    %94 = vector.broadcast %cst_42 : f32 to vector<1x32xf32>
    %95 = arith.mulf %94, %91 : vector<1x32xf32>
    %96 = arith.subf %75, %95 : vector<1x32xf32>
    %cst_43 = arith.constant 2.000000e-01 : f32
    %97 = vector.broadcast %cst_43 : f32 to vector<1x1xf32>
    %98 = arith.mulf %97, %93 : vector<1x1xf32>
    %99 = arith.subf %78, %98 : vector<1x1xf32>
    %100 = arith.subf %27, %96 : vector<1x32xf32>
    %cst_44 = arith.constant 5.000000e-01 : f32
    %101 = vector.broadcast %cst_44 : f32 to vector<1x32xf32>
    %102 = arith.mulf %101, %100 : vector<1x32xf32>
    %103 = arith.addf %27, %96 : vector<1x32xf32>
    %cst_45 = arith.constant 5.000000e-01 : f32
    %104 = vector.broadcast %cst_45 : f32 to vector<1x32xf32>
    %105 = arith.mulf %104, %103 : vector<1x32xf32>
    %106 = tpu.concatenate %102, %105 in 0 : vector<1x32xf32>, vector<1x32xf32> -> vector<2x32xf32>
    %107 = arith.subf %33, %99 : vector<1x1xf32>
    %cst_46 = arith.constant 5.000000e-01 : f32
    %108 = vector.broadcast %cst_46 : f32 to vector<1x1xf32>
    %109 = arith.mulf %108, %107 : vector<1x1xf32>
    %110 = arith.addf %33, %99 : vector<1x1xf32>
    %cst_47 = arith.constant 5.000000e-01 : f32
    %111 = vector.broadcast %cst_47 : f32 to vector<1x1xf32>
    %112 = arith.mulf %111, %110 : vector<1x1xf32>
    %113 = tpu.concatenate %109, %112 in 0 : vector<1x1xf32>, vector<1x1xf32> -> vector<2x1xf32>
    %114 = vector.extract_strided_slice %10 {offsets = [512, 0], sizes = [256, 64], strides = [1, 1]} : vector<768x64xf32> to vector<256x64xf32>
    %cst_48 = arith.constant 0.0883883461 : f32
    %115 = vector.broadcast %cst_48 : f32 to vector<256x64xf32>
    %116 = arith.mulf %114, %115 : vector<256x64xf32>
    %117 = vector.extract_strided_slice %10 {offsets = [0, 0], sizes = [512, 64], strides = [1, 1]} : vector<768x64xf32> to vector<512x64xf32>
    %cst_49 = arith.constant dense<0.000000e+00> : vector<256x512xf32>
    %118 = tpu.matmul %116, %117, %cst_49 {dimension_numbers = #tpu.dot_dimension_numbers<[1], [1], [0], [0], [0, 0, 1, 0], [], []>} : vector<256x64xf32>, vector<512x64xf32>, vector<256x512xf32> -> vector<256x512xf32>
    %119 = vector.extract_strided_slice %118 {offsets = [0, 0], sizes = [256, 256], strides = [1, 1]} : vector<256x512xf32> to vector<256x256xf32>
    %cst_50 = arith.constant dense<0xFF800000> : vector<256xf32>
    %120 = vector.multi_reduction <maximumf>, %119, %cst_50 [1] : vector<256x256xf32> to vector<256xf32>
    %121 = vector.shape_cast %120 : vector<256xf32> to vector<256x1xf32>
    %122 = vector.broadcast %121 : vector<256x1xf32> to vector<256x256xf32>
    %123 = arith.subf %119, %122 : vector<256x256xf32>
    %124 = math.exp %123 : vector<256x256xf32>
    %cst_51 = arith.constant dense<0.000000e+00> : vector<256xf32>
    %125 = vector.multi_reduction <add>, %124, %cst_51 [1] : vector<256x256xf32> to vector<256xf32>
    %126 = vector.shape_cast %125 : vector<256xf32> to vector<256x1xf32>
    %127 = tpu.reciprocal %126 {approx = true} : vector<256x1xf32> -> vector<256x1xf32>
    %128 = vector.broadcast %127 : vector<256x1xf32> to vector<256x256xf32>
    %129 = arith.mulf %124, %128 : vector<256x256xf32>
    %130 = vector.extract_strided_slice %118 {offsets = [0, 256], sizes = [256, 256], strides = [1, 1]} : vector<256x512xf32> to vector<256x256xf32>
    %cst_52 = arith.constant dense<0xFF800000> : vector<256xf32>
    %131 = vector.multi_reduction <maximumf>, %130, %cst_52 [1] : vector<256x256xf32> to vector<256xf32>
    %132 = vector.shape_cast %131 : vector<256xf32> to vector<256x1xf32>
    %133 = vector.broadcast %132 : vector<256x1xf32> to vector<256x256xf32>
    %134 = arith.subf %130, %133 : vector<256x256xf32>
    %135 = math.exp %134 : vector<256x256xf32>
    %cst_53 = arith.constant dense<0.000000e+00> : vector<256xf32>
    %136 = vector.multi_reduction <add>, %135, %cst_53 [1] : vector<256x256xf32> to vector<256xf32>
    %137 = vector.shape_cast %136 : vector<256xf32> to vector<256x1xf32>
    %138 = tpu.reciprocal %137 {approx = true} : vector<256x1xf32> -> vector<256x1xf32>
    %139 = vector.broadcast %138 : vector<256x1xf32> to vector<256x256xf32>
    %140 = arith.mulf %135, %139 : vector<256x256xf32>
    %141 = tpu.concatenate %129, %140 in 1 : vector<256x256xf32>, vector<256x256xf32> -> vector<256x512xf32>
    %cst_54 = arith.constant dense<0.000000e+00> : vector<256x32xf32>
    %142 = tpu.matmul %141, %19, %cst_54 {dimension_numbers = #tpu.dot_dimension_numbers<[1], [0], [0], [1], [0, 0, 1, 1], [], []>} : vector<256x512xf32>, vector<512x32xf32>, vector<256x32xf32> -> vector<256x32xf32>
    %cst_55 = arith.constant 5.000000e-01 : f32
    %143 = vector.broadcast %cst_55 : f32 to vector<256x32xf32>
    %144 = arith.mulf %142, %143 : vector<256x32xf32>
    %cst_56 = arith.constant 0.699999988 : f32
    %145 = vector.broadcast %cst_56 : f32 to vector<256x32xf32>
    %146 = arith.mulf %145, %20 : vector<256x32xf32>
    %cst_57 = arith.constant 3.000000e-01 : f32
    %147 = vector.broadcast %cst_57 : f32 to vector<256x32xf32>
    %148 = arith.mulf %147, %144 : vector<256x32xf32>
    %149 = arith.addf %146, %148 : vector<256x32xf32>
    %150 = tpu.concatenate %20, %144, %149 in 0 : vector<256x32xf32>, vector<256x32xf32>, vector<256x32xf32> -> vector<768x32xf32>
    %cst_58 = arith.constant dense<0.000000e+00> : vector<2x768xf32>
    %151 = tpu.matmul %106, %150, %cst_58 {dimension_numbers = #tpu.dot_dimension_numbers<[1], [1], [0], [0], [0, 0, 1, 0], [], []>} : vector<2x32xf32>, vector<768x32xf32>, vector<2x768xf32> -> vector<2x768xf32>
    %152 = vector.broadcast %113 : vector<2x1xf32> to vector<2x768xf32>
    %153 = arith.addf %151, %152 : vector<2x768xf32>
    %cst_59 = arith.constant dense<0xFF800000> : vector<768xf32>
    %154 = vector.multi_reduction <maximumf>, %153, %cst_59 [0] : vector<2x768xf32> to vector<768xf32>
    %155 = vector.shape_cast %154 : vector<768xf32> to vector<1x768xf32>
    %156 = vector.broadcast %155 : vector<1x768xf32> to vector<2x768xf32>
    %157 = arith.subf %153, %156 : vector<2x768xf32>
    %158 = math.exp %157 : vector<2x768xf32>
    %cst_60 = arith.constant dense<0.000000e+00> : vector<768xf32>
    %159 = vector.multi_reduction <add>, %158, %cst_60 [0] : vector<2x768xf32> to vector<768xf32>
    %160 = vector.shape_cast %159 : vector<768xf32> to vector<1x768xf32>
    %161 = math.log %160 : vector<1x768xf32>
    %c0_61 = arith.constant 0 : index
    %c0_62 = arith.constant 0 : index
    %162 = vector.load %arg7[%c0_61, %c0_62] : memref<2x768xf32, #tpu.memory_space<vmem>>, vector<2x768xf32>
    %163 = vector.broadcast %161 : vector<1x768xf32> to vector<2x768xf32>
    %164 = arith.subf %157, %163 : vector<2x768xf32>
    %165 = arith.mulf %162, %164 : vector<2x768xf32>
    %cst_63 = arith.constant dense<0.000000e+00> : vector<768xf32>
    %166 = vector.multi_reduction <add>, %165, %cst_63 [0] : vector<2x768xf32> to vector<768xf32>
    %167 = vector.shape_cast %166 : vector<768xf32> to vector<1x768xf32>
    %cst_64 = arith.constant 0.000000e+00 : f32
    %168 = vector.broadcast %cst_64 : f32 to vector<1x768xf32>
    %169 = arith.subf %168, %167 : vector<1x768xf32>
    %170 = vector.extract_strided_slice %169 {offsets = [0, 0], sizes = [1, 256], strides = [1, 1]} : vector<1x768xf32> to vector<1x256xf32>
    %171 = vector.shape_cast %170 : vector<1x256xf32> to vector<1x1x256xf32>
    %cst_65 = arith.constant dense<0.000000e+00> : vector<1xf32>
    %172 = vector.multi_reduction <add>, %171, %cst_65 [1, 2] : vector<1x1x256xf32> to vector<1xf32>
    %173 = vector.shape_cast %172 : vector<1xf32> to vector<1x1x1xf32>
    %174 = vector.extract %173[0, 0, 0] : f32 from vector<1x1x1xf32>
    %cst_66 = arith.constant 3.906250e-03 : f32
    %175 = arith.mulf %174, %cst_66 : f32
    %176 = vector.extract_strided_slice %169 {offsets = [0, 256], sizes = [1, 256], strides = [1, 1]} : vector<1x768xf32> to vector<1x256xf32>
    %177 = vector.shape_cast %176 : vector<1x256xf32> to vector<1x1x256xf32>
    %cst_67 = arith.constant dense<0.000000e+00> : vector<1xf32>
    %178 = vector.multi_reduction <add>, %177, %cst_67 [1, 2] : vector<1x1x256xf32> to vector<1xf32>
    %179 = vector.shape_cast %178 : vector<1xf32> to vector<1x1x1xf32>
    %180 = vector.extract %179[0, 0, 0] : f32 from vector<1x1x1xf32>
    %cst_68 = arith.constant 3.906250e-03 : f32
    %181 = arith.mulf %180, %cst_68 : f32
    %182 = vector.extract_strided_slice %169 {offsets = [0, 512], sizes = [1, 256], strides = [1, 1]} : vector<1x768xf32> to vector<1x256xf32>
    %183 = vector.shape_cast %182 : vector<1x256xf32> to vector<1x1x256xf32>
    %cst_69 = arith.constant dense<0.000000e+00> : vector<1xf32>
    %184 = vector.multi_reduction <add>, %183, %cst_69 [1, 2] : vector<1x1x256xf32> to vector<1xf32>
    %185 = vector.shape_cast %184 : vector<1xf32> to vector<1x1x1xf32>
    %186 = vector.extract %185[0, 0, 0] : f32 from vector<1x1x1xf32>
    %cst_70 = arith.constant 3.906250e-03 : f32
    %187 = arith.mulf %186, %cst_70 : f32
    %c0_71 = arith.constant 0 : index
    %c0_72 = arith.constant 0 : index
    %188 = vector.load %arg10[%c0_71, %c0_72] : memref<2x768xf32, #tpu.memory_space<vmem>>, vector<2x768xf32>
    tpu.vector_store %arg10[%c0_71, %c0_72], %153 {strides = array<i32>} : memref<2x768xf32, #tpu.memory_space<vmem>>, vector<2x768xf32>,
    %189 = tpu.iota {dimensions = array<i32: 1>} : vector<1x3xi32>
    %c0_i32_73 = arith.constant 0 : i32
    %190 = vector.broadcast %c0_i32_73 : i32 to vector<1x3xi32>
    %191 = arith.cmpi eq, %189, %190 : vector<1x3xi32>
    %c1_i32_74 = arith.constant 1 : i32
    %192 = vector.broadcast %c1_i32_74 : i32 to vector<1x3xi32>
    %193 = arith.cmpi eq, %189, %192 : vector<1x3xi32>
    %194 = vector.broadcast %181 : f32 to vector<1x3xf32>
    %195 = vector.broadcast %187 : f32 to vector<1x3xf32>
    %196 = arith.select %193, %194, %195 : vector<1x3xi1>, vector<1x3xf32>
    %197 = vector.broadcast %175 : f32 to vector<1x3xf32>
    %198 = arith.select %191, %197, %196 : vector<1x3xi1>, vector<1x3xf32>
    %c0_75 = arith.constant 0 : index
    %c0_76 = arith.constant 0 : index
    %199 = vector.load %arg11[%c0_75, %c0_76] : memref<1x3xf32, #tpu.memory_space<vmem>>, vector<1x3xf32>
    tpu.vector_store %arg11[%c0_75, %c0_76], %198 {strides = array<i32>} : memref<1x3xf32, #tpu.memory_space<vmem>>, vector<1x3xf32>,
    return
  }
}

</mosaic_0001>

<bundles_post_ra>
// kernel: aug_model_forward.1
= control target key start
LH: loop header
LB: loop body
LE: loop exit
PB: predicated region body
PF: predicated region fallthrough
CT: control target
= control target key end

     0   :  { %vm430_vm0 = vcmask 1042432   ;;  %vm141_vm1 = vcmask 23552   ;;  %vm1631_vm2 = vcmask 261120   ;;  %vm2784_vm4 = vcmask 1040384   ;;  %s14858_s1 = inlined_call_operand.vmem [shape: f32[3,32], index: 1, kind: input, shape index: {}]   ;;  %s14859_s0 = inlined_call_operand.vmem [shape: f32[768,3], index: 0, kind: input, shape index: {}]   ;;  %s14860_s2 = inlined_call_operand.vmem [shape: f32[1,32], index: 2, kind: input, shape index: {}]   ;;  %s14861_s3 = inlined_call_operand.vmem [shape: f32[3,64], index: 3, kind: input, shape index: {}]   ;;  %s14862_s8 = inlined_call_operand.vmem [shape: f32[2,32], index: 8, kind: input, shape index: {}]   ;;  %s14863_s4 = inlined_call_operand.vmem [shape: f32[1,64], index: 4, kind: input, shape index: {}]   ;;  %s14864_s9 = inlined_call_operand.vmem [shape: f32[2,1], index: 9, kind: input, shape index: {}]   ;;  %s14865_s5 = inlined_call_operand.vmem [shape: f32[1,512], index: 5, kind: input, shape index: {}]   ;;  %s14866_s6 = inlined_call_operand.vmem [shape: f32[1,512], index: 6, kind: input, shape index: {}]   ;;  %s14867_s10 = inlined_call_operand.vmem [shape: f32[2,768], index: 10, kind: output, shape index: {0}]   ;;  %s14868_s7 = inlined_call_operand.vmem [shape: f32[2,768], index: 7, kind: input, shape index: {}]   ;;  %s14869_s11 = inlined_call_operand.vmem [shape: f32[1,3], index: 11, kind: output, shape index: {1}]  }
   0x1   :  { %v133_v0 = vld [vmem:[%s14858_s1] sm:$0x7]  ;;  %v10161_v2 = vld [vmem:[%s14859_s0 + $0x8] sm:$0xff]  ;;  %v10169_v3 = vld [vmem:[%s14859_s0 + $0x10] sm:$0xff]  ;;  %vm3544_vm5 = vcmask 523264   ;;  %vm6394_vm7 = vcmask 1041408  }
   0x2   :  { %v10156_v1 = vld [vmem:[%s14859_s0] sm:$0xff]  ;;  %8250 = vmatprep.subr.msk.mxu0 %vm430_vm0, %v133_v0  ;;  %9358 = vmatprep.subr.msk.mxu1 %vm430_vm0, %v133_v0  ;;  %v10181_v4 = vld [vmem:[%s14859_s0 + $0x18] sm:$0xff]  ;;  %v10195_v6 = vld [vmem:[%s14859_s0 + $0x28] sm:$0xff]  ;;  %vm6716_vm10 = vcmask 16384  }
   0x3   :  { %8252 = vmatprep.mubr.msk.f32.mxu0 %vm141_vm1, %v10156_v1  ;;  %8251 = vmatpush3.msk.msra.mxu0 %vm430_vm0, %v133_v0  ;;  %v10186_v5 = vld [vmem:[%s14859_s0 + $0x20] sm:$0xff]  ;;  %v10200_v7 = vld [vmem:[%s14859_s0 + $0x30] sm:$0xff]  ;;  %v10209_v8 = vld [vmem:[%s14859_s0 + $0x38] sm:$0xff] }
   0x4   :  { %8253 = vmatmul.mubr.msk.f32.vlgmr.msra.gmra.mrb[0].mxu0 %vm141_vm1, %v10161_v2  ;;  %9359 = vmatpush3.msk.msra.mxu1 %vm430_vm0, %v133_v0  ;;  %v10214_v9 = vld [vmem:[%s14859_s0 + $0x40] sm:$0xff]  ;;  %v10223_v10 = vld [vmem:[%s14859_s0 + $0x48] sm:$0xff]  ;;  %v10228_v11 = vld [vmem:[%s14859_s0 + $0x50] sm:$0xff] }
   0x5   :  { %8255 = vmatprep.mubr.msk.f32.mxu0 %vm141_vm1, %v10169_v3  ;;  %v10237_v12 = vld [vmem:[%s14859_s0 + $0x58] sm:$0xff]  ;;  %v10242_v13 = vld [vmem:[%s14859_s0 + $0x60] sm:$0xff]  ;;  %v10251_v14 = vld [vmem:[%s14859_s0 + $0x68] sm:$0xff] }
   0x6   :  { %v10256_v15 = vld [vmem:[%s14859_s0 + $0x70] sm:$0xff]  ;;  %v10265_v16 = vld [vmem:[%s14859_s0 + $0x78] sm:$0xff]  ;;  %v10270_v17 = vld [vmem:[%s14859_s0 + $0x80] sm:$0xff] }
   0x7   :  { %v10279_v18 = vld [vmem:[%s14859_s0 + $0x88] sm:$0xff]  ;;  %v10284_v19 = vld [vmem:[%s14859_s0 + $0x90] sm:$0xff]  ;;  %v10293_v20 = vld [vmem:[%s14859_s0 + $0x98] sm:$0xff] }
   0x8   :  { %8256 = vmatmul.mubr.msk.f32.gmra.mrb[2].mxu0 %vm141_vm1, %v10181_v4  ;;  %v10298_v21 = vld [vmem:[%s14859_s0 + $0xa0] sm:$0xff]  ;;  %v10307_v22 = vld [vmem:[%s14859_s0 + $0xa8] sm:$0xff]  ;;  %v10312_v23 = vld [vmem:[%s14859_s0 + $0xb0] sm:$0xff] }
   0x9   :  { %8258 = vmatprep.mubr.msk.f32.mxu0 %vm141_vm1, %v10186_v5  ;;  %v10321_v24 = vld [vmem:[%s14859_s0 + $0xb8] sm:$0xff]  ;;  %v10326_v25 = vld [vmem:[%s14859_s0 + $0xc0] sm:$0xff]  ;;  %v10335_v26 = vld [vmem:[%s14859_s0 + $0xc8] sm:$0xff] }
   0xa   :  { %v10340_v27 = vld [vmem:[%s14859_s0 + $0xd0] sm:$0xff]  ;;  %v10349_v28 = vld [vmem:[%s14859_s0 + $0xd8] sm:$0xff]  ;;  %v10354_v29 = vld [vmem:[%s14859_s0 + $0xe0] sm:$0xff] }
   0xb   :  { %v10363_v30 = vld [vmem:[%s14859_s0 + $0xe8] sm:$0xff]  ;;  %v10368_v31 = vld [vmem:[%s14859_s0 + $0xf0] sm:$0xff]  ;;  %v10377_v32 = vld [vmem:[%s14859_s0 + $0xf8] sm:$0xff] }
   0xc   :  { %8259 = vmatmul.mubr.msk.f32.gmra.mrb[4].mxu0 %vm141_vm1, %v10195_v6  ;;  %v10382_v33 = vld [vmem:[%s14859_s0 + $0x100] sm:$0xff]  ;;  %v10391_v34 = vld [vmem:[%s14859_s0 + $0x108] sm:$0xff]  ;;  %v10396_v35 = vld [vmem:[%s14859_s0 + $0x110] sm:$0xff] }
   0xd   :  { %8261 = vmatprep.mubr.msk.f32.mxu0 %vm141_vm1, %v10200_v7  ;;  %v10405_v36 = vld [vmem:[%s14859_s0 + $0x118] sm:$0xff]  ;;  %v10410_v37 = vld [vmem:[%s14859_s0 + $0x120] sm:$0xff]  ;;  %v10419_v38 = vld [vmem:[%s14859_s0 + $0x128] sm:$0xff] }
   0xe   :  { %v10424_v39 = vld [vmem:[%s14859_s0 + $0x130] sm:$0xff]  ;;  %v10433_v40 = vld [vmem:[%s14859_s0 + $0x138] sm:$0xff]  ;;  %v10438_v41 = vld [vmem:[%s14859_s0 + $0x140] sm:$0xff] }
   0xf   :  { %v10447_v42 = vld [vmem:[%s14859_s0 + $0x148] sm:$0xff]  ;;  %v10452_v43 = vld [vmem:[%s14859_s0 + $0x150] sm:$0xff]  ;;  %v10461_v44 = vld [vmem:[%s14859_s0 + $0x158] sm:$0xff] }
  0x10   :  { %8262 = vmatmul.mubr.msk.f32.gmra.mrb[6].mxu0 %vm141_vm1, %v10209_v8  ;;  %v10466_v45 = vld [vmem:[%s14859_s0 + $0x160] sm:$0xff]  ;;  %v10475_v46 = vld [vmem:[%s14859_s0 + $0x168] sm:$0xff]  ;;  %v10480_v47 = vld [vmem:[%s14859_s0 + $0x170] sm:$0xff] }
  0x11   :  { %8264 = vmatprep.mubr.msk.f32.mxu0 %vm141_vm1, %v10214_v9  ;;  %v10489_v48 = vld [vmem:[%s14859_s0 + $0x178] sm:$0xff]  ;;  %v10494_v49 = vld [vmem:[%s14859_s0 + $0x180] sm:$0xff]  ;;  %v10503_v50 = vld [vmem:[%s14859_s0 + $0x188] sm:$0xff] }
  0x12   :  { %v10508_v51 = vld [vmem:[%s14859_s0 + $0x190] sm:$0xff]  ;;  %v10517_v52 = vld [vmem:[%s14859_s0 + $0x198] sm:$0xff]  ;;  %v10522_v53 = vld [vmem:[%s14859_s0 + $0x1a0] sm:$0xff] }
  0x13   :  { %v10531_v54 = vld [vmem:[%s14859_s0 + $0x1a8] sm:$0xff]  ;;  %v10536_v55 = vld [vmem:[%s14859_s0 + $0x1b0] sm:$0xff]  ;;  %v10545_v56 = vld [vmem:[%s14859_s0 + $0x1b8] sm:$0xff] }
  0x14   :  { %8265 = vmatmul.mubr.msk.f32.gmra.mrb[8].mxu0 %vm141_vm1, %v10223_v10  ;;  %15216 = vst [vmem:[#allocation2_spill] sm:$0xff] %v10531_v54  ;;  %15217 = vst [vmem:[#allocation3_spill] sm:$0xff] %v10536_v55  ;;  %v10550_v57 = vld [vmem:[%s14859_s0 + $0x1c0] sm:$0xff]  ;;  %v10559_v58 = vld [vmem:[%s14859_s0 + $0x1c8] sm:$0xff] }
  0x15   :  { %8267 = vmatprep.mubr.msk.f32.mxu0 %vm141_vm1, %v10228_v11  ;;  %15218 = vst [vmem:[#allocation4_spill] sm:$0xff] %v10545_v56  ;;  %15219 = vst [vmem:[#allocation5_spill] sm:$0xff] %v10550_v57  ;;  %v10564_v59 = vld [vmem:[%s14859_s0 + $0x1d0] sm:$0xff]  ;;  %v10573_v60 = vld [vmem:[%s14859_s0 + $0x1d8] sm:$0xff] }
  0x16   :  { %15220 = vst [vmem:[#allocation6_spill] sm:$0xff] %v10559_v58  ;;  %15221 = vst [vmem:[#allocation7_spill] sm:$0xff] %v10564_v59  ;;  %v10578_v61 = vld [vmem:[%s14859_s0 + $0x1e0] sm:$0xff]  ;;  %v10587_v62 = vld [vmem:[%s14859_s0 + $0x1e8] sm:$0xff] }
  0x17   :  { %15222 = vst [vmem:[#allocation8_spill] sm:$0xff] %v10573_v60  ;;  %15223 = vst [vmem:[#allocation9_spill] sm:$0xff] %v10578_v61  ;;  %v10592_v63 = vld [vmem:[%s14859_s0 + $0x1f0] sm:$0xff]  ;;  %v10601_v0 = vld [vmem:[%s14859_s0 + $0x1f8] sm:$0xff] }
  0x18   :  { %8268 = vmatmul.mubr.msk.f32.gmra.mrb[10].mxu0 %vm141_vm1, %v10237_v12  ;;  %15224 = vst [vmem:[#allocation10_spill] sm:$0xff] %v10587_v62  ;;  %15225 = vst [vmem:[#allocation11_spill] sm:$0xff] %v10592_v63 }
  0x19   :  { %8270 = vmatprep.mubr.msk.f32.mxu0 %vm141_vm1, %v10242_v13  ;;  %15226 = vst [vmem:[#allocation12_spill] sm:$0xff] %v10601_v0  ;;  %vm11521_vm3 = vmpackc.low %vm1631_vm2, %vm1631_vm2 }
  0x1a   :  { %vm12521_vm6 = vmpackc.low %vm3544_vm5, %vm3544_vm5 }
  0x1c   :  { %8271 = vmatmul.mubr.msk.f32.gmra.mrb[12].mxu0 %vm141_vm1, %v10251_v14 }
  0x1d   :  { %8273 = vmatprep.mubr.msk.f32.mxu0 %vm141_vm1, %v10256_v15 }
  0x20   :  { %8274 = vmatmul.mubr.msk.f32.gmra.mrb[14].mxu0 %vm141_vm1, %v10265_v16 }
  0x21   :  { %8276 = vmatprep.mubr.msk.f32.mxu0 %vm141_vm1, %v10270_v17 }
  0x24   :  { %8277 = vmatmul.mubr.msk.f32.gmra.mrb[16].mxu0 %vm141_vm1, %v10279_v18 }
  0x25   :  { %8279 = vmatprep.mubr.msk.f32.mxu0 %vm141_vm1, %v10284_v19 }
  0x28   :  { %8280 = vmatmul.mubr.msk.f32.gmra.mrb[18].mxu0 %vm141_vm1, %v10293_v20 }
  0x29   :  { %8282 = vmatprep.mubr.msk.f32.mxu0 %vm141_vm1, %v10298_v21 }
  0x2c   :  { %8283 = vmatmul.mubr.msk.f32.gmra.mrb[20].mxu0 %vm141_vm1, %v10307_v22 }
  0x2d   :  { %8285 = vmatprep.mubr.msk.f32.mxu0 %vm141_vm1, %v10312_v23 }
  0x30   :  { %8286 = vmatmul.mubr.msk.f32.gmra.mrb[22].mxu0 %vm141_vm1, %v10321_v24 }
  0x31   :  { %8288 = vmatprep.mubr.msk.f32.mxu0 %vm141_vm1, %v10326_v25 }
  0x34   :  { %8289 = vmatmul.mubr.msk.f32.gmra.mrb[24].mxu0 %vm141_vm1, %v10335_v26 }
  0x35   :  { %8291 = vmatprep.mubr.msk.f32.mxu0 %vm141_vm1, %v10340_v27 }
  0x38   :  { %8292 = vmatmul.mubr.msk.f32.gmra.mrb[26].mxu0 %vm141_vm1, %v10349_v28 }
  0x39   :  { %8294 = vmatprep.mubr.msk.f32.mxu0 %vm141_vm1, %v10354_v29 }
  0x3c   :  { %8295 = vmatmul.mubr.msk.f32.gmra.mrb[28].mxu0 %vm141_vm1, %v10363_v30 }
  0x3d   :  { %8297 = vmatprep.mubr.msk.f32.mxu0 %vm141_vm1, %v10368_v31 }
  0x40   :  { %8298 = vmatmul.mubr.msk.f32.gmra.mrb[30].mxu0 %vm141_vm1, %v10377_v32 }
  0x41   :  { %8300 = vmatprep.mubr.msk.f32.mxu0 %vm141_vm1, %v10382_v33 }
  0x44   :  { %8301 = vmatmul.mubr.msk.f32.gmra.mrb[32].mxu0 %vm141_vm1, %v10391_v34 }
  0x45   :  { %8303 = vmatprep.mubr.msk.f32.mxu0 %vm141_vm1, %v10396_v35 }
  0x48   :  { %8304 = vmatmul.mubr.msk.f32.gmra.mrb[34].mxu0 %vm141_vm1, %v10405_v36 }
  0x49   :  { %8306 = vmatprep.mubr.msk.f32.mxu0 %vm141_vm1, %v10410_v37 }
  0x4c   :  { %8307 = vmatmul.mubr.msk.f32.gmra.mrb[36].mxu0 %vm141_vm1, %v10419_v38 }
  0x4d   :  { %8309 = vmatprep.mubr.msk.f32.mxu0 %vm141_vm1, %v10424_v39 }
  0x50   :  { %8310 = vmatmul.mubr.msk.f32.gmra.mrb[38].mxu0 %vm141_vm1, %v10433_v40 }
  0x51   :  { %8312 = vmatprep.mubr.msk.f32.mxu0 %vm141_vm1, %v10438_v41 }
  0x54   :  { %8313 = vmatmul.mubr.msk.f32.gmra.mrb[40].mxu0 %vm141_vm1, %v10447_v42 }
  0x55   :  { %8315 = vmatprep.mubr.msk.f32.mxu0 %vm141_vm1, %v10452_v43 }
  0x58   :  { %8316 = vmatmul.mubr.msk.f32.gmra.mrb[42].mxu0 %vm141_vm1, %v10461_v44 }
  0x59   :  { %8318 = vmatprep.mubr.msk.f32.mxu0 %vm141_vm1, %v10466_v45 }
  0x5c   :  { %8319 = vmatmul.mubr.msk.f32.gmra.mrb[44].mxu0 %vm141_vm1, %v10475_v46 }
  0x5d   :  { %8321 = vmatprep.mubr.msk.f32.mxu0 %vm141_vm1, %v10480_v47 }
  0x60   :  { %8322 = vmatmul.mubr.msk.f32.gmra.mrb[46].mxu0 %vm141_vm1, %v10489_v48 }
  0x61   :  { %8324 = vmatprep.mubr.msk.f32.mxu0 %vm141_vm1, %v10494_v49 }
  0x64   :  { %8325 = vmatmul.mubr.msk.f32.gmra.mrb[48].mxu0 %vm141_vm1, %v10503_v50 }
  0x65   :  { %8327 = vmatprep.mubr.msk.f32.mxu0 %vm141_vm1, %v10508_v51 }
  0x68   :  { %8328 = vmatmul.mubr.msk.f32.gmra.mrb[50].mxu0 %vm141_vm1, %v10517_v52 }
  0x69   :  { %8330 = vmatprep.mubr.msk.f32.mxu0 %vm141_vm1, %v10522_v53 }
  0x6c   :  { %8331 = vmatmul.mubr.msk.f32.gmra.mrb[52].mxu0 %vm141_vm1, %v10531_v54  ;;  %v10823_v54 = vld [vmem:[%s14859_s0 + $0x2f0] sm:$0xff] }
  0x6d   :  { %8333 = vmatprep.mubr.msk.f32.mxu0 %vm141_vm1, %v10536_v55  ;;  %15257 = vst [vmem:[#allocation43_spill] sm:$0xff] %v10823_v54 }
  0x70   :  { %8334 = vmatmul.mubr.msk.f32.gmra.mrb[54].mxu0 %vm141_vm1, %v10545_v56 }
  0x71   :  { %8336 = vmatprep.mubr.msk.f32.mxu0 %vm141_vm1, %v10550_v57 }
  0x74   :  { %8337 = vmatmul.mubr.msk.f32.gmra.mrb[56].mxu0 %vm141_vm1, %v10559_v58  ;;  %v10798_v58 = vld [vmem:[%s14859_s0 + $0x2e0] sm:$0xff] }
  0x75   :  { %8339 = vmatprep.mubr.msk.f32.mxu0 %vm141_vm1, %v10564_v59  ;;  %15254 = vst [vmem:[#allocation40_spill] sm:$0xff] %v10798_v58 }
  0x78   :  { %8340 = vmatmul.mubr.msk.f32.gmra.mrb[58].mxu0 %vm141_vm1, %v10573_v60 }
  0x79   :  { %8342 = vmatprep.mubr.msk.f32.mxu0 %vm141_vm1, %v10578_v61  ;;  %v10608_v61 = vld [vmem:[%s14859_s0 + $0x210] sm:$0xff] }
  0x7a   :  { %15227 = vst [vmem:[#allocation13_spill] sm:$0xff] %v10608_v61  ;;  %8351 = vmatprep.mubr.msk.f32.mxu1 %vm141_vm1, %v10608_v61  ;;  %v10629_v61 = vld [vmem:[%s14859_s0 + $0x228] sm:$0xff] }
  0x7b   :  { %15230 = vst [vmem:[#allocation16_spill] sm:$0xff] %v10629_v61 }
  0x7c   :  { %8343 = vmatmul.mubr.msk.f32.gmra.mrb[60].mxu0 %vm141_vm1, %v10587_v62  ;;  %v10781_v62 = vld [vmem:[%s14860_s2] ss:$0 sm:$0xff] }
  0x7d   :  { %8345 = vmatprep.mubr.msk.f32.mxu0 %vm141_vm1, %v10592_v63  ;;  %v10615_v63 = vld [vmem:[%s14859_s0 + $0x218] sm:$0xff] }
  0x7e   :  { %15228 = vst [vmem:[#allocation14_spill] sm:$0xff] %v10615_v63  ;;  %8352 = vmatmul.mubr.msk.f32.vlgmr.msra.gmra.mrb[0].mxu1 %vm141_vm1, %v10615_v63  ;;  %v10636_v63 = vld [vmem:[%s14859_s0 + $0x230] sm:$0xff] }
  0x7f   :  { %15231 = vst [vmem:[#allocation17_spill] sm:$0xff] %v10636_v63 }
  0x80   :  { %8346 = vmatmul.mubr.msk.f32.gmra.mrb[62].mxu0 %vm141_vm1, %v10601_v0  ;;  %v10622_v0 = vld [vmem:[%s14859_s0 + $0x220] sm:$0xff] }
  0x81   :  { %15229 = vst [vmem:[#allocation15_spill] sm:$0xff] %v10622_v0  ;;  %8354 = vmatprep.mubr.msk.f32.mxu1 %vm141_vm1, %v10622_v0  ;;  %v10643_v0 = vld [vmem:[%s14859_s0 + $0x238] sm:$0xff] }
  0x82   :  { %8355 = vmatmul.mubr.msk.f32.gmra.mrb[2].mxu1 %vm141_vm1, %v10629_v61  ;;  %15232 = vst [vmem:[#allocation18_spill] sm:$0xff] %v10643_v0  ;;  %v10650_v61 = vld [vmem:[%s14859_s0 + $0x240] sm:$0xff] }
  0x83   :  { %8357 = vmatprep.mubr.msk.f32.mxu1 %vm141_vm1, %v10636_v63  ;;  %15233 = vst [vmem:[#allocation19_spill] sm:$0xff] %v10650_v61  ;;  %v10657_v63 = vld [vmem:[%s14859_s0 + $0x248] sm:$0xff] }
  0x84   :  { %15234 = vst [vmem:[#allocation20_spill] sm:$0xff] %v10657_v63 }
  0x86   :  { %8358 = vmatmul.mubr.msk.f32.gmra.mrb[4].mxu1 %vm141_vm1, %v10643_v0  ;;  %v10664_v0 = vld [vmem:[%s14859_s0 + $0x250] sm:$0xff] }
  0x87   :  { %8360 = vmatprep.mubr.msk.f32.mxu1 %vm141_vm1, %v10650_v61  ;;  %15235 = vst [vmem:[#allocation21_spill] sm:$0xff] %v10664_v0  ;;  %v10671_v61 = vld [vmem:[%s14859_s0 + $0x258] sm:$0xff] }
  0x88   :  { %15236 = vst [vmem:[#allocation22_spill] sm:$0xff] %v10671_v61 }
  0x8a   :  { %8361 = vmatmul.mubr.msk.f32.gmra.mrb[6].mxu1 %vm141_vm1, %v10657_v63  ;;  %v10678_v63 = vld [vmem:[%s14859_s0 + $0x260] sm:$0xff] }
  0x8b   :  { %8363 = vmatprep.mubr.msk.f32.mxu1 %vm141_vm1, %v10664_v0  ;;  %15237 = vst [vmem:[#allocation23_spill] sm:$0xff] %v10678_v63  ;;  %v10685_v0 = vld [vmem:[%s14859_s0 + $0x268] sm:$0xff] }
  0x8c   :  { %15238 = vst [vmem:[#allocation24_spill] sm:$0xff] %v10685_v0 }
  0x8e   :  { %8364 = vmatmul.mubr.msk.f32.gmra.mrb[8].mxu1 %vm141_vm1, %v10671_v61  ;;  %v10692_v61 = vld [vmem:[%s14859_s0 + $0x270] sm:$0xff] }
  0x8f   :  { %8366 = vmatprep.mubr.msk.f32.mxu1 %vm141_vm1, %v10678_v63  ;;  %15239 = vst [vmem:[#allocation25_spill] sm:$0xff] %v10692_v61  ;;  %v10699_v63 = vld [vmem:[%s14859_s0 + $0x278] sm:$0xff] }
  0x90   :  { %15240 = vst [vmem:[#allocation26_spill] sm:$0xff] %v10699_v63 }
  0x92   :  { %8367 = vmatmul.mubr.msk.f32.gmra.mrb[10].mxu1 %vm141_vm1, %v10685_v0  ;;  %v10706_v0 = vld [vmem:[%s14859_s0 + $0x280] sm:$0xff] }
  0x93   :  { %8369 = vmatprep.mubr.msk.f32.mxu1 %vm141_vm1, %v10692_v61  ;;  %15241 = vst [vmem:[#allocation27_spill] sm:$0xff] %v10706_v0  ;;  %v10713_v61 = vld [vmem:[%s14859_s0 + $0x288] sm:$0xff] }
  0x94   :  { %15242 = vst [vmem:[#allocation28_spill] sm:$0xff] %v10713_v61 }
  0x96   :  { %8370 = vmatmul.mubr.msk.f32.gmra.mrb[12].mxu1 %vm141_vm1, %v10699_v63  ;;  %v10720_v63 = vld [vmem:[%s14859_s0 + $0x290] sm:$0xff] }
  0x97   :  { %8372 = vmatprep.mubr.msk.f32.mxu1 %vm141_vm1, %v10706_v0  ;;  %15243 = vst [vmem:[#allocation29_spill] sm:$0xff] %v10720_v63  ;;  %v10727_v0 = vld [vmem:[%s14859_s0 + $0x298] sm:$0xff] }
  0x98   :  { %15244 = vst [vmem:[#allocation30_spill] sm:$0xff] %v10727_v0 }
  0x9a   :  { %8373 = vmatmul.mubr.msk.f32.gmra.mrb[14].mxu1 %vm141_vm1, %v10713_v61  ;;  %v10734_v61 = vld [vmem:[%s14859_s0 + $0x2a0] sm:$0xff] }
  0x9b   :  { %8375 = vmatprep.mubr.msk.f32.mxu1 %vm141_vm1, %v10720_v63  ;;  %15245 = vst [vmem:[#allocation31_spill] sm:$0xff] %v10734_v61  ;;  %v10741_v63 = vld [vmem:[%s14859_s0 + $0x2a8] sm:$0xff] }
  0x9c   :  { %15246 = vst [vmem:[#allocation32_spill] sm:$0xff] %v10741_v63 }
  0x9e   :  { %8376 = vmatmul.mubr.msk.f32.gmra.mrb[16].mxu1 %vm141_vm1, %v10727_v0  ;;  %v10748_v0 = vld [vmem:[%s14859_s0 + $0x2b0] sm:$0xff] }
  0x9f   :  { %8378 = vmatprep.mubr.msk.f32.mxu1 %vm141_vm1, %v10734_v61  ;;  %15247 = vst [vmem:[#allocation33_spill] sm:$0xff] %v10748_v0  ;;  %v10755_v61 = vld [vmem:[%s14859_s0 + $0x2b8] sm:$0xff] }
  0xa0   :  { %15248 = vst [vmem:[#allocation34_spill] sm:$0xff] %v10755_v61 }
  0xa2   :  { %8379 = vmatmul.mubr.msk.f32.gmra.mrb[18].mxu1 %vm141_vm1, %v10741_v63  ;;  %v10762_v63 = vld [vmem:[%s14859_s0 + $0x2c0] sm:$0xff] }
  0xa3   :  { %8381 = vmatprep.mubr.msk.f32.mxu1 %vm141_vm1, %v10748_v0  ;;  %15249 = vst [vmem:[#allocation35_spill] sm:$0xff] %v10762_v63  ;;  %v10769_v0 = vld [vmem:[%s14859_s0 + $0x2c8] sm:$0xff] }
  0xa4   :  { %15250 = vst [vmem:[#allocation36_spill] sm:$0xff] %v10769_v0 }
  0xa6   :  { %8382 = vmatmul.mubr.msk.f32.gmra.mrb[20].mxu1 %vm141_vm1, %v10755_v61  ;;  %v10776_v61 = vld [vmem:[%s14859_s0 + $0x2d0] sm:$0xff] }
  0xa7   :  { %8384 = vmatprep.mubr.msk.f32.mxu1 %vm141_vm1, %v10762_v63  ;;  %15251 = vst [vmem:[#allocation37_spill] sm:$0xff] %v10776_v61  ;;  %v10788_v63 = vld [vmem:[%s14859_s0 + $0x2d8] sm:$0xff] }
  0xa8   :  { %15252 = vst [vmem:[#allocation38_spill] sm:$0xff] %v10788_v63 }
  0xaa   :  { %8385 = vmatmul.mubr.msk.f32.gmra.mrb[22].mxu1 %vm141_vm1, %v10769_v0 }
  0xab   :  { %8387 = vmatprep.mubr.msk.f32.mxu1 %vm141_vm1, %v10776_v61 }
  0xae   :  { %8388 = vmatmul.mubr.msk.f32.gmra.mrb[24].mxu1 %vm141_vm1, %v10788_v63  ;;  %v10808_v63 = vld [vmem:[%s14859_s0 + $0x2e8] sm:$0xff] }
  0xaf   :  { %8390 = vmatprep.mubr.msk.f32.mxu1 %vm141_vm1, %v10798_v58  ;;  %15255 = vst [vmem:[#allocation41_spill] sm:$0xff] %v10808_v63 }
  0xb2   :  { %8391 = vmatmul.mubr.msk.f32.gmra.mrb[26].mxu1 %vm141_vm1, %v10808_v63 }
  0xb3   :  { %8393 = vmatprep.mubr.msk.f32.mxu1 %vm141_vm1, %v10823_v54 }
  0xd7   :  { %v8254_v0 = vpop.f32.mrb[0].mxu0 }
  0xd8   :  { %v10793_v60 = vadd.f32 %v8254_v0, %v10781_v62  ;;  %v500_v59 = vpop.f32.mrb[1].mxu0 }
  0xd9   :  { %v10801_v61 = vadd.f32 %v10781_v62, %v500_v59 }
  0xda   :  { %15253 = vst [vmem:[#allocation39_spill] sm:$0xff] %v10793_v60  ;;  %v1536_v0 = vmul.f32 %v10793_v60, %v10793_v60 }
  0xdb   :  { %v8257_v57 = vpop.f32.mrb[2].mxu0  ;;  %v1535_v59 = vmul.f32 %v10801_v61, %v10801_v61 }
  0xdc   :  { %v10817_v56 = vadd.f32 %v8257_v57, %v10781_v62  ;;  %v510_v55 = vpop.f32.mrb[3].mxu0  ;;  %v1635_v58 = vsel %vm1631_vm2, %v1536_v0, 0.0  ;;  %v10834_v57 = vld [vmem:[%s14859_s0 + $0x2f8] sm:$0xff] }
  0xdd   :  { %v10826_v60 = vadd.f32 %v10781_v62, %v510_v55  ;;  %1636 = vadd.xlane.f32.xlu1 %v1635_v58  ;;  %v1632_v63 = vsel %vm1631_vm2, %v1535_v59, 0.0  ;;  %15259 = vst [vmem:[#allocation45_spill] sm:$0xff] %v10834_v57  ;;  %8394 = vmatmul.mubr.msk.f32.gmra.mrb[28].mxu1 %vm141_vm1, %v10834_v57  ;;  %v979_v59 = vld [vmem:[%s14861_s3] sm:$0x7] }
  0xde   :  { %15256 = vst [vmem:[#allocation42_spill] sm:$0xff] %v10817_v56  ;;  %1633 = vadd.xlane.f32.xlu0 %v1632_v63  ;;  %v1538_v0 = vmul.f32 %v10817_v56, %v10817_v56  ;;  %8398 = vmatprep.mubr.msk.f32.mxu1 %vm141_vm1, %v10156_v1 }
  0xdf   :  { %15258 = vst [vmem:[#allocation44_spill] sm:$0xff] %v10826_v60  ;;  %v8260_v55 = vpop.f32.mrb[4].mxu0  ;;  %v1537_v58 = vmul.f32 %v10826_v60, %v10826_v60  ;;  %8396 = vmatprep.subr.msk.mxu1 %vm430_vm0, %v979_v59 }
  0xe0   :  { %v10848_v54 = vadd.f32 %v8260_v55, %v10781_v62  ;;  %v520_v63 = vpop.f32.mrb[5].mxu0  ;;  %v1641_v56 = vsel %vm1631_vm2, %v1538_v0, 0.0  ;;  %8397 = vmatpush3.msk.msra.mxu1 %vm430_vm0, %v979_v59 }
  0xe1   :  { %v10853_v57 = vadd.f32 %v10781_v62, %v520_v63  ;;  %1642 = vadd.xlane.f32.xlu1 %v1641_v56  ;;  %v1638_v60 = vsel %vm1631_vm2, %v1537_v58, 0.0  ;;  %8399 = vmatmul.mubr.msk.f32.vlgmr.msra.gmra.mrb[30].mxu1 %vm141_vm1, %v10161_v2 }
  0xe2   :  { %1639 = vadd.xlane.f32.xlu0 %v1638_v60  ;;  %v1540_v1 = vmul.f32 %v10848_v54, %v10848_v54  ;;  %8401 = vmatprep.mubr.msk.f32.mxu1 %vm141_vm1, %v10169_v3 }
  0xe3   :  { %v8263_v55 = vpop.f32.mrb[6].mxu0  ;;  %v1539_v0 = vmul.f32 %v10853_v57, %v10853_v57 }
  0xe4   :  { %v10866_v56 = vadd.f32 %v8263_v55, %v10781_v62  ;;  %v530_v58 = vpop.f32.mrb[7].mxu0  ;;  %v1647_v59 = vsel %vm1631_vm2, %v1540_v1, 0.0 }
  0xe5   :  { %v10870_v60 = vadd.f32 %v10781_v62, %v530_v58  ;;  %1648 = vadd.xlane.f32.xlu1 %v1647_v59  ;;  %v1644_v63 = vsel %vm1631_vm2, %v1539_v0, 0.0  ;;  %8402 = vmatmul.mubr.msk.f32.gmra.mrb[32].mxu1 %vm141_vm1, %v10181_v4 }
  0xe6   :  { %1645 = vadd.xlane.f32.xlu0 %v1644_v63  ;;  %v1542_v2 = vmul.f32 %v10866_v56, %v10866_v56  ;;  %8404 = vmatprep.mubr.msk.f32.mxu1 %vm141_vm1, %v10186_v5 }
  0xe7   :  { %v8266_v3 = vpop.f32.mrb[8].mxu0  ;;  %v1541_v55 = vmul.f32 %v10870_v60, %v10870_v60 }
  0xe8   :  { %v10882_v1 = vadd.f32 %v8266_v3, %v10781_v62  ;;  %v540_v58 = vpop.f32.mrb[9].mxu0  ;;  %v1653_v0 = vsel %vm1631_vm2, %v1542_v2, 0.0 }
  0xe9   :  { %v10886_v59 = vadd.f32 %v10781_v62, %v540_v58  ;;  %1654 = vadd.xlane.f32.xlu1 %v1653_v0  ;;  %v1650_v63 = vsel %vm1631_vm2, %v1541_v55, 0.0  ;;  %8405 = vmatmul.mubr.msk.f32.gmra.mrb[34].mxu1 %vm141_vm1, %v10195_v6 }
  0xea   :  { %1651 = vadd.xlane.f32.xlu0 %v1650_v63  ;;  %v1544_v4 = vmul.f32 %v10882_v1, %v10882_v1  ;;  %8407 = vmatprep.mubr.msk.f32.mxu1 %vm141_vm1, %v10200_v7 }
  0xeb   :  { %v10893_v5 = vpop.f32.mrb[10].mxu0  ;;  %v1543_v3 = vmul.f32 %v10886_v59, %v10886_v59 }
  0xec   :  { %v550_v2 = vpop.f32.mrb[11].mxu0  ;;  %v1659_v58 = vsel %vm1631_vm2, %v1544_v4, 0.0 }
  0xed   :  { %v10901_v55 = vadd.f32 %v10781_v62, %v550_v2  ;;  %1660 = vadd.xlane.f32.xlu1 %v1659_v58  ;;  %v1656_v0 = vsel %vm1631_vm2, %v1543_v3, 0.0  ;;  %8408 = vmatmul.mubr.msk.f32.gmra.mrb[36].mxu1 %vm141_vm1, %v10209_v8 }
  0xee   :  { %1657 = vadd.xlane.f32.xlu0 %v1656_v0  ;;  %8410 = vmatprep.mubr.msk.f32.mxu1 %vm141_vm1, %v10214_v9 }
  0xef   :  { %15260 = vst [vmem:[#allocation46_spill] sm:$0xff] %v10901_v55  ;;  %v10906_v6 = vpop.f32.mrb[12].mxu0  ;;  %v1545_v63 = vmul.f32 %v10901_v55, %v10901_v55 }
  0xf0   :  { %v10912_v7 = vpop.f32.mrb[13].mxu0 }
  0xf1   :  { %v1662_v4 = vsel %vm1631_vm2, %v1545_v63, 0.0  ;;  %8411 = vmatmul.mubr.msk.f32.gmra.mrb[38].mxu1 %vm141_vm1, %v10223_v10 }
  0xf2   :  { %1663 = vadd.xlane.f32.xlu0 %v1662_v4  ;;  %8413 = vmatprep.mubr.msk.f32.mxu1 %vm141_vm1, %v10228_v11 }
  0xf3   :  { %v10917_v3 = vpop.f32.mrb[14].mxu0 }
  0xf4   :  { %v10921_v8 = vpop.f32.mrb[15].mxu0 }
  0xf5   :  { %8414 = vmatmul.mubr.msk.f32.gmra.mrb[40].mxu1 %vm141_vm1, %v10237_v12 }
  0xf6   :  { %8416 = vmatprep.mubr.msk.f32.mxu1 %vm141_vm1, %v10242_v13 }
  0xf7   :  { %v8278_v2 = vpop.f32.mrb[16].mxu0 }
  0xf8   :  { %v10928_v9 = vadd.f32 %v8278_v2, %v10781_v62  ;;  %v580_v58 = vpop.f32.mrb[17].mxu0 }
  0xf9   :  { %v10931_v10 = vadd.f32 %v10781_v62, %v580_v58  ;;  %8417 = vmatmul.mubr.msk.f32.gmra.mrb[42].mxu1 %vm141_vm1, %v10251_v14 }
  0xfa   :  { %v1552_v0 = vmul.f32 %v10928_v9, %v10928_v9  ;;  %8419 = vmatprep.mubr.msk.f32.mxu1 %vm141_vm1, %v10256_v15 }
  0xfb   :  { %v8281_v11 = vpop.f32.mrb[18].mxu0  ;;  %v1551_v4 = vmul.f32 %v10931_v10, %v10931_v10 }
  0xfc   :  { %v10940_v12 = vadd.f32 %v8281_v11, %v10781_v62  ;;  %v590_v13 = vpop.f32.mrb[19].mxu0  ;;  %v1683_v63 = vsel %vm1631_vm2, %v1552_v0, 0.0 }
  0xfd   :  { %v10946_v2 = vadd.f32 %v10781_v62, %v590_v13  ;;  %1684 = vadd.xlane.f32.xlu0 %v1683_v63  ;;  %8420 = vmatmul.mubr.msk.f32.gmra.mrb[44].mxu1 %vm141_vm1, %v10265_v16  ;;  %v1680_v13 = vsel %vm1631_vm2, %v1551_v4, 0.0 }
  0xfe   :  { %v1554_v14 = vmul.f32 %v10940_v12, %v10940_v12  ;;  %8422 = vmatprep.mubr.msk.f32.mxu1 %vm141_vm1, %v10270_v17 }
  0xff   :  { %v8284_v15 = vpop.f32.mrb[20].mxu0  ;;  %v1553_v63 = vmul.f32 %v10946_v2, %v10946_v2 }
 0x100   :  { %v10955_v58 = vadd.f32 %v8284_v15, %v10781_v62  ;;  %v600_v0 = vpop.f32.mrb[21].mxu0  ;;  %v1689_v11 = vsel %vm1631_vm2, %v1554_v14, 0.0 }
 0x101   :  { %v10962_v55 = vadd.f32 %v10781_v62, %v600_v0  ;;  %1690 = vadd.xlane.f32.xlu1 %v1689_v11  ;;  %1681 = vadd.xlane.f32.xlu0 %v1680_v13  ;;  %v1686_v0 = vsel %vm1631_vm2, %v1553_v63, 0.0 }
 0x102   :  { %v1556_v16 = vmul.f32 %v10955_v58, %v10955_v58  ;;  %8423 = vmatmul.mubr.msk.f32.gmra.mrb[46].mxu1 %vm141_vm1, %v10279_v18 }
 0x103   :  { %v8287_v17 = vpop.f32.mrb[22].mxu0  ;;  %8425 = vmatprep.mubr.msk.f32.mxu1 %vm141_vm1, %v10284_v19  ;;  %v1555_v11 = vmul.f32 %v10962_v55, %v10962_v55 }
 0x104   :  { %v10971_v4 = vadd.f32 %v8287_v17, %v10781_v62  ;;  %v610_v14 = vpop.f32.mrb[23].mxu0  ;;  %v1695_v15 = vsel %vm1631_vm2, %v1556_v16, 0.0 }
 0x105   :  { %v10978_v13 = vadd.f32 %v10781_v62, %v610_v14  ;;  %1696 = vadd.xlane.f32.xlu1 %v1695_v15  ;;  %1687 = vadd.xlane.f32.xlu0 %v1686_v0  ;;  %v1692_v14 = vsel %vm1631_vm2, %v1555_v11, 0.0 }
 0x106   :  { %v1558_v18 = vmul.f32 %v10971_v4, %v10971_v4  ;;  %8426 = vmatmul.mubr.msk.f32.gmra.mrb[48].mxu1 %vm141_vm1, %v10293_v20 }
 0x107   :  { %v8290_v19 = vpop.f32.mrb[24].mxu0  ;;  %8428 = vmatprep.mubr.msk.f32.mxu1 %vm141_vm1, %v10298_v21  ;;  %v1557_v15 = vmul.f32 %v10978_v13, %v10978_v13 }
 0x108   :  { %v10987_v63 = vadd.f32 %v8290_v19, %v10781_v62  ;;  %v620_v16 = vpop.f32.mrb[25].mxu0  ;;  %v1701_v17 = vsel %vm1631_vm2, %v1558_v18, 0.0 }
 0x109   :  { %v10994_v0 = vadd.f32 %v10781_v62, %v620_v16  ;;  %1702 = vadd.xlane.f32.xlu1 %v1701_v17  ;;  %1693 = vadd.xlane.f32.xlu0 %v1692_v14  ;;  %v1698_v16 = vsel %vm1631_vm2, %v1557_v15, 0.0 }
 0x10a   :  { %v1560_v20 = vmul.f32 %v10987_v63, %v10987_v63  ;;  %8429 = vmatmul.mubr.msk.f32.gmra.mrb[50].mxu1 %vm141_vm1, %v10307_v22 }
 0x10b   :  { %v8293_v21 = vpop.f32.mrb[26].mxu0  ;;  %8431 = vmatprep.mubr.msk.f32.mxu1 %vm141_vm1, %v10312_v23  ;;  %v1559_v17 = vmul.f32 %v10994_v0, %v10994_v0 }
 0x10c   :  { %v11003_v11 = vadd.f32 %v8293_v21, %v10781_v62  ;;  %v630_v18 = vpop.f32.mrb[27].mxu0  ;;  %v1707_v19 = vsel %vm1631_vm2, %v1560_v20, 0.0 }
 0x10d   :  { %v11010_v14 = vadd.f32 %v10781_v62, %v630_v18  ;;  %1708 = vadd.xlane.f32.xlu1 %v1707_v19  ;;  %1699 = vadd.xlane.f32.xlu0 %v1698_v16  ;;  %v1704_v21 = vsel %vm1631_vm2, %v1559_v17, 0.0 }
 0x10e   :  { %v1562_v22 = vmul.f32 %v11003_v11, %v11003_v11  ;;  %8432 = vmatmul.mubr.msk.f32.gmra.mrb[52].mxu1 %vm141_vm1, %v10321_v24 }
 0x10f   :  { %v11016_v23 = vpop.f32.mrb[28].mxu0  ;;  %8434 = vmatprep.mubr.msk.f32.mxu1 %vm141_vm1, %v10326_v25  ;;  %v1561_v18 = vmul.f32 %v11010_v14, %v11010_v14 }
 0x110   :  { %v11020_v15 = vpop.f32.mrb[29].mxu0  ;;  %v1713_v20 = vsel %vm1631_vm2, %v1562_v22, 0.0 }
 0x111   :  { %1714 = vadd.xlane.f32.xlu1 %v1713_v20  ;;  %1705 = vadd.xlane.f32.xlu0 %v1704_v21  ;;  %v1710_v19 = vsel %vm1631_vm2, %v1561_v18, 0.0 }
 0x112   :  { %8435 = vmatmul.mubr.msk.f32.gmra.mrb[54].mxu1 %vm141_vm1, %v10335_v26 }
 0x113   :  { %v11028_v24 = vpop.f32.mrb[30].mxu0  ;;  %8437 = vmatprep.mubr.msk.f32.mxu1 %vm141_vm1, %v10340_v27 }
 0x114   :  { %v11032_v25 = vpop.f32.mrb[31].mxu0 }
 0x115   :  { %1711 = vadd.xlane.f32.xlu0 %v1710_v19 }
 0x116   :  { %8438 = vmatmul.mubr.msk.f32.gmra.mrb[56].mxu1 %vm141_vm1, %v10349_v28 }
 0x117   :  { %v8302_v16 = vpop.f32.mrb[32].mxu0  ;;  %8440 = vmatprep.mubr.msk.f32.mxu1 %vm141_vm1, %v10354_v29 }
 0x118   :  { %v11040_v17 = vadd.f32 %v8302_v16, %v10781_v62  ;;  %v660_v26 = vpop.f32.mrb[33].mxu0 }
 0x119   :  { %v11043_v22 = vadd.f32 %v10781_v62, %v660_v26 }
 0x11a   :  { %v1568_v27 = vmul.f32 %v11040_v17, %v11040_v17  ;;  %8441 = vmatmul.mubr.msk.f32.gmra.mrb[58].mxu1 %vm141_vm1, %v10363_v30 }
 0x11b   :  { %v8305_v20 = vpop.f32.mrb[34].mxu0  ;;  %v1567_v28 = vmul.f32 %v11043_v22, %v11043_v22  ;;  %8443 = vmatprep.mubr.msk.f32.mxu1 %vm141_vm1, %v10368_v31 }
 0x11c   :  { %v11054_v29 = vadd.f32 %v8305_v20, %v10781_v62  ;;  %v670_v21 = vpop.f32.mrb[35].mxu0  ;;  %v1731_v18 = vsel %vm1631_vm2, %v1568_v27, 0.0 }
 0x11d   :  { %v11058_v19 = vadd.f32 %v10781_v62, %v670_v21  ;;  %1732 = vadd.xlane.f32.xlu1 %v1731_v18  ;;  %v1728_v16 = vsel %vm1631_vm2, %v1567_v28, 0.0 }
 0x11e   :  { %1729 = vadd.xlane.f32.xlu0 %v1728_v16  ;;  %v1570_v30 = vmul.f32 %v11054_v29, %v11054_v29  ;;  %8444 = vmatmul.mubr.msk.f32.gmra.mrb[60].mxu1 %vm141_vm1, %v10377_v32 }
 0x11f   :  { %v8308_v31 = vpop.f32.mrb[36].mxu0  ;;  %v1569_v26 = vmul.f32 %v11058_v19, %v11058_v19  ;;  %8446 = vmatprep.mubr.msk.f32.mxu1 %vm141_vm1, %v10382_v33 }
 0x120   :  { %v11070_v27 = vadd.f32 %v8308_v31, %v10781_v62  ;;  %v680_v20 = vpop.f32.mrb[37].mxu0  ;;  %v1737_v28 = vsel %vm1631_vm2, %v1570_v30, 0.0 }
 0x121   :  { %v11074_v21 = vadd.f32 %v10781_v62, %v680_v20  ;;  %1738 = vadd.xlane.f32.xlu1 %v1737_v28  ;;  %v1734_v18 = vsel %vm1631_vm2, %v1569_v26, 0.0 }
 0x122   :  { %1735 = vadd.xlane.f32.xlu0 %v1734_v18  ;;  %v1572_v32 = vmul.f32 %v11070_v27, %v11070_v27  ;;  %8447 = vmatmul.mubr.msk.f32.gmra.mrb[62].mxu1 %vm141_vm1, %v10391_v34 }
 0x123   :  { %v8311_v33 = vpop.f32.mrb[38].mxu0  ;;  %v1571_v16 = vmul.f32 %v11074_v21, %v11074_v21  ;;  %8449 = vmatprep.mubr.msk.f32.mxu1 %vm141_vm1, %v10396_v35 }
 0x124   :  { %v11086_v30 = vadd.f32 %v8311_v33, %v10781_v62  ;;  %v690_v31 = vpop.f32.mrb[39].mxu0  ;;  %v1743_v26 = vsel %vm1631_vm2, %v1572_v32, 0.0 }
 0x125   :  { %v11090_v20 = vadd.f32 %v10781_v62, %v690_v31  ;;  %1744 = vadd.xlane.f32.xlu1 %v1743_v26  ;;  %v1740_v28 = vsel %vm1631_vm2, %v1571_v16, 0.0 }
 0x126   :  { %1741 = vadd.xlane.f32.xlu0 %v1740_v28  ;;  %v1574_v34 = vmul.f32 %v11086_v30, %v11086_v30  ;;  %8450 = vmatmul.mubr.msk.f32.gmra.mrb[64].mxu1 %vm141_vm1, %v10405_v36 }
 0x127   :  { %15261 = vst [vmem:[#allocation47_spill] sm:$0xff] %v11090_v20  ;;  %v8314_v35 = vpop.f32.mrb[40].mxu0  ;;  %v1573_v18 = vmul.f32 %v11090_v20, %v11090_v20  ;;  %8452 = vmatprep.mubr.msk.f32.mxu1 %vm141_vm1, %v10410_v37  ;;  %v15278_v20 = vld [vmem:[#allocation9_spill] sm:$0xff] }
 0x128   :  { %v11102_v32 = vadd.f32 %v8314_v35, %v10781_v62  ;;  %v700_v33 = vpop.f32.mrb[41].mxu0  ;;  %v1749_v16 = vsel %vm1631_vm2, %v1574_v34, 0.0 }
 0x129   :  { %v11106_v31 = vadd.f32 %v10781_v62, %v700_v33  ;;  %1750 = vadd.xlane.f32.xlu1 %v1749_v16  ;;  %v1746_v26 = vsel %vm1631_vm2, %v1573_v18, 0.0 }
 0x12a   :  { %15262 = vst [vmem:[#allocation48_spill] sm:$0xff] %v11102_v32  ;;  %1747 = vadd.xlane.f32.xlu0 %v1746_v26  ;;  %v1576_v36 = vmul.f32 %v11102_v32, %v11102_v32  ;;  %8453 = vmatmul.mubr.msk.f32.gmra.mrb[66].mxu1 %vm141_vm1, %v10419_v38  ;;  %v15271_v32 = vld [vmem:[#allocation4_spill] sm:$0xff] }
 0x12b   :  { %15263 = vst [vmem:[#allocation49_spill] sm:$0xff] %v11106_v31  ;;  %v8317_v37 = vpop.f32.mrb[42].mxu0  ;;  %v1575_v28 = vmul.f32 %v11106_v31, %v11106_v31  ;;  %8455 = vmatprep.mubr.msk.f32.mxu1 %vm141_vm1, %v10424_v39 }
 0x12c   :  { %v710_v34 = vpop.f32.mrb[43].mxu0  ;;  %v1755_v35 = vsel %vm1631_vm2, %v1576_v36, 0.0 }
 0x12d   :  { %1756 = vadd.xlane.f32.xlu1 %v1755_v35  ;;  %v1752_v18 = vsel %vm1631_vm2, %v1575_v28, 0.0 }
 0x12e   :  { %1753 = vadd.xlane.f32.xlu0 %v1752_v18  ;;  %8456 = vmatmul.mubr.msk.f32.gmra.mrb[68].mxu1 %vm141_vm1, %v10433_v40  ;;  %v11159_v18 = vadd.f32 %v10781_v62, %v710_v34 }
 0x12f   :  { %v11121_v33 = vpop.f32.mrb[44].mxu0  ;;  %8458 = vmatprep.mubr.msk.f32.mxu1 %vm141_vm1, %v10438_v41 }
 0x130   :  { %v11125_v38 = vpop.f32.mrb[45].mxu0  ;;  %15264 = vst [vmem:[#allocation50_spill] sm:$0xff] %v11159_v18 }
 0x132   :  { %8459 = vmatmul.mubr.msk.f32.gmra.mrb[70].mxu1 %vm141_vm1, %v10447_v42 }
 0x133   :  { %v11129_v39 = vpop.f32.mrb[46].mxu0  ;;  %8461 = vmatprep.mubr.msk.f32.mxu1 %vm141_vm1, %v10452_v43 }
 0x134   :  { %v11133_v16 = vpop.f32.mrb[47].mxu0 }
 0x136   :  { %8462 = vmatmul.mubr.msk.f32.gmra.mrb[72].mxu1 %vm141_vm1, %v10461_v44  ;;  %v11153_v44 = vadd.f32 %v10893_v5, %v10781_v62 }
 0x137   :  { %v8326_v40 = vpop.f32.mrb[48].mxu0  ;;  %8464 = vmatprep.mubr.msk.f32.mxu1 %vm141_vm1, %v10466_v45 }
 0x138   :  { %v11140_v41 = vadd.f32 %v8326_v40, %v10781_v62  ;;  %v740_v26 = vpop.f32.mrb[49].mxu0 }
 0x139   :  { %v11143_v42 = vadd.f32 %v10781_v62, %v740_v26 }
 0x13a   :  { %v1584_v36 = vmul.f32 %v11140_v41, %v11140_v41  ;;  %8465 = vmatmul.mubr.msk.f32.gmra.mrb[74].mxu1 %vm141_vm1, %v10475_v46 }
 0x13b   :  { %v8329_v43 = vpop.f32.mrb[50].mxu0  ;;  %8467 = vmatprep.mubr.msk.f32.mxu1 %vm141_vm1, %v10480_v47  ;;  %v1583_v35 = vmul.f32 %v11143_v42, %v11143_v42 }
 0x13c   :  { %v750_v45 = vpop.f32.mrb[51].mxu0  ;;  %v1779_v28 = vsel %vm1631_vm2, %v1584_v36, 0.0  ;;  %v11165_v46 = vadd.f32 %v8329_v43, %v10781_v62  ;;  %v1546_v36 = vmul.f32 %v11153_v44, %v11153_v44 }
 0x13d   :  { %v11162_v40 = vadd.f32 %v10781_v62, %v750_v45  ;;  %1780 = vadd.xlane.f32.xlu1 %v1779_v28  ;;  %v1776_v34 = vsel %vm1631_vm2, %v1583_v35, 0.0 }
 0x13e   :  { %8468 = vmatmul.mubr.msk.f32.gmra.mrb[76].mxu1 %vm141_vm1, %v10489_v48  ;;  %v1577_v48 = vmul.f32 %v11159_v18, %v11159_v18  ;;  %v1586_v28 = vmul.f32 %v11165_v46, %v11165_v46 }
 0x13f   :  { %v1585_v47 = vmul.f32 %v11162_v40, %v11162_v40  ;;  %v8332_v5 = vpop.f32.mrb[52].mxu0  ;;  %8470 = vmatprep.mubr.msk.f32.mxu1 %vm141_vm1, %v10494_v49 }
 0x140   :  { %v760_v26 = vpop.f32.mrb[53].mxu0  ;;  %v11200_v18 = vadd.f32 %v8332_v5, %v10781_v62  ;;  %v1785_v31 = vsel %vm1631_vm2, %v1586_v28, 0.0  ;;  %v15267_v28 = vld [vmem:[#allocation2_spill] sm:$0xff] }
 0x141   :  { %1777 = vadd.xlane.f32.xlu1 %v1776_v34  ;;  %v1782_v43 = vsel %vm1631_vm2, %v1585_v47, 0.0  ;;  %v11178_v45 = vadd.f32 %v10781_v62, %v760_v26  ;;  %v11191_v47 = vadd.f32 %v8317_v37, %v10781_v62  ;;  %v1665_v34 = vsel %vm1631_vm2, %v1546_v36, 0.0 }
 0x142   :  { %1783 = vadd.xlane.f32.xlu0 %v1782_v43  ;;  %8471 = vmatmul.mubr.msk.f32.gmra.mrb[78].mxu1 %vm141_vm1, %v10503_v50  ;;  %v11196_v43 = vadd.f32 %v10781_v62, %v11020_v15  ;;  %v1758_v50 = vsel %vm1631_vm2, %v1577_v48, 0.0 }
 0x143   :  { %v1587_v49 = vmul.f32 %v11178_v45, %v11178_v45  ;;  %v8335_v35 = vpop.f32.mrb[54].mxu0  ;;  %8473 = vmatprep.mubr.msk.f32.mxu1 %vm141_vm1, %v10508_v51  ;;  %15265 = vst [vmem:[#allocation51_spill] sm:$0xff] %v11191_v47  ;;  %v1578_v15 = vmul.f32 %v11191_v47, %v11191_v47 }
 0x144   :  { %v770_v26 = vpop.f32.mrb[55].mxu0  ;;  %v1563_v48 = vmul.f32 %v11196_v43, %v11196_v43  ;;  %v11234_v47 = vadd.f32 %v8335_v35, %v10781_v62 }
 0x145   :  { %1666 = vadd.xlane.f32.xlu1 %v1665_v34  ;;  %v1788_v51 = vsel %vm1631_vm2, %v1587_v49, 0.0  ;;  %v11207_v37 = vadd.f32 %v10781_v62, %v770_v26  ;;  %v1761_v26 = vsel %vm1631_vm2, %v1578_v15, 0.0 }
 0x146   :  { %1759 = vadd.xlane.f32.xlu0 %v1758_v50  ;;  %8474 = vmatmul.mubr.msk.f32.gmra.mrb[80].mxu1 %vm141_vm1, %v10517_v52  ;;  %v1588_v52 = vmul.f32 %v11200_v18, %v11200_v18 }
 0x147   :  { %15266 = vst [vmem:[#allocation52_spill] sm:$0xff] %v11207_v37  ;;  %v8338_v36 = vpop.f32.mrb[56].mxu0  ;;  %8476 = vmatprep.mubr.msk.f32.mxu1 %vm141_vm1, %v10522_v53  ;;  %v1589_v49 = vmul.f32 %v11207_v37, %v11207_v37  ;;  %v15268_v53 = vld [vmem:[#allocation3_spill] sm:$0xff] }
 0x148   :  { %v780_v5 = vpop.f32.mrb[57].mxu0  ;;  %15270 = vst [vmem:[#allocation3_spill] sm:$0xff] %v11234_v47 }
 0x149   :  { %1786 = vadd.xlane.f32.xlu1 %v1785_v31  ;;  %v11225_v31 = vadd.f32 %v11016_v23, %v10781_v62  ;;  %v1794_v23 = vsel %vm1631_vm2, %v1589_v49, 0.0  ;;  %v11241_v15 = vadd.f32 %v10781_v62, %v780_v5  ;;  %v15274_v49 = vld [vmem:[#allocation6_spill] sm:$0xff] }
 0x14a   :  { %1789 = vadd.xlane.f32.xlu0 %v1788_v51  ;;  %8477 = vmatmul.mubr.msk.f32.gmra.mrb[82].mxu1 %vm141_vm1, %v15267_v28  ;;  %v11230_v51 = vadd.f32 %v10781_v62, %v10912_v7  ;;  %v1716_v28 = vsel %vm1631_vm2, %v1563_v48, 0.0  ;;  %v15273_v7 = vld [vmem:[#allocation5_spill] sm:$0xff] }
 0x14b   :  { %v8341_v34 = vpop.f32.mrb[58].mxu0  ;;  %8479 = vmatprep.mubr.msk.f32.mxu1 %vm141_vm1, %v15268_v53  ;;  %v1791_v53 = vsel %vm1631_vm2, %v1588_v52, 0.0  ;;  %15272 = vst [vmem:[#allocation4_spill] sm:$0xff] %v11241_v15  ;;  %v1564_v48 = vmul.f32 %v11225_v31, %v11225_v31  ;;  %v1591_v5 = vmul.f32 %v11241_v15, %v11241_v15  ;;  %v11270_v15 = vadd.f32 %v8338_v36, %v10781_v62 }
 0x14c   :  { %v790_v50 = vpop.f32.mrb[59].mxu0  ;;  %15269 = vst [vmem:[#allocation2_spill] sm:$0xff] %v11230_v51  ;;  %v1547_v52 = vmul.f32 %v11230_v51, %v11230_v51  ;;  %v11266_v51 = vadd.f32 %v10781_v62, %v11125_v38 }
 0x14d   :  { %1762 = vadd.xlane.f32.xlu1 %v1761_v26 }
 0x14e   :  { %1717 = vadd.xlane.f32.xlu0 %v1716_v28  ;;  %8480 = vmatmul.mubr.msk.f32.gmra.mrb[84].mxu1 %vm141_vm1, %v15271_v32  ;;  %v1590_v32 = vmul.f32 %v11234_v47, %v11234_v47  ;;  %v15275_v28 = vld [vmem:[#allocation7_spill] sm:$0xff]  ;;  %15276 = vst [vmem:[#allocation5_spill] sm:$0xff] %v11266_v51  ;;  %v15277_v47 = vld [vmem:[#allocation8_spill] sm:$0xff]  ;;  %v1579_v36 = vmul.f32 %v11266_v51, %v11266_v51 }
 0x14f   :  { %v8344_v37 = vpop.f32.mrb[60].mxu0  ;;  %8482 = vmatprep.mubr.msk.f32.mxu1 %vm141_vm1, %v15273_v7  ;;  %v15321_v51 = vld [vmem:[#allocation32_spill] sm:$0xff] }
 0x150   :  { %v800_v35 = vpop.f32.mrb[61].mxu0 }
 0x151   :  { %1792 = vadd.xlane.f32.xlu1 %v1791_v53  ;;  %v11261_v53 = vadd.f32 %v10906_v6, %v10781_v62  ;;  %v1800_v6 = vsel %vm1631_vm2, %v1591_v5, 0.0 }
 0x152   :  { %1795 = vadd.xlane.f32.xlu0 %v1794_v23  ;;  %8483 = vmatmul.mubr.msk.f32.gmra.mrb[86].mxu1 %vm141_vm1, %v15274_v49  ;;  %v1719_v23 = vsel %vm1631_vm2, %v1564_v48, 0.0  ;;  %v1668_v49 = vsel %vm1631_vm2, %v1547_v52, 0.0  ;;  %v11277_v48 = vadd.f32 %v10781_v62, %v790_v50  ;;  %v1592_v52 = vmul.f32 %v11270_v15, %v11270_v15 }
 0x153   :  { %v11255_v26 = vpop.f32.mrb[62].mxu0  ;;  %8485 = vmatprep.mubr.msk.f32.mxu1 %vm141_vm1, %v15275_v28  ;;  %v1797_v28 = vsel %vm1631_vm2, %v1590_v32, 0.0  ;;  %v1548_v38 = vmul.f32 %v11261_v53, %v11261_v53  ;;  %v15280_v32 = vld [vmem:[#allocation11_spill] sm:$0xff] }
 0x154   :  { %v810_v7 = vpop.f32.mrb[63].mxu0  ;;  %v1593_v50 = vmul.f32 %v11277_v48, %v11277_v48 }
 0x155   :  { %1720 = vadd.xlane.f32.xlu1 %v1719_v23  ;;  %v1671_v5 = vsel %vm1631_vm2, %v1548_v38, 0.0  ;;  %v11300_v23 = vadd.f32 %v10781_v62, %v11032_v25  ;;  %v11311_v38 = vadd.f32 %v10781_v62, %v800_v35  ;;  %v102_v35 = vld [vmem:[%s14859_s0 + $0x208] sm:$0xff] }
 0x156   :  { %1669 = vadd.xlane.f32.xlu0 %v1668_v49  ;;  %8486 = vmatmul.mubr.msk.f32.gmra.mrb[88].mxu1 %vm141_vm1, %v15277_v47  ;;  %v15279_v47 = vld [vmem:[#allocation10_spill] sm:$0xff]  ;;  %v1764_v49 = vsel %vm1631_vm2, %v1579_v36, 0.0 }
 0x157   :  { %8488 = vmatprep.mubr.msk.f32.mxu1 %vm141_vm1, %v15278_v20  ;;  %v11295_v20 = vadd.f32 %v11121_v33, %v10781_v62  ;;  %15282 = vst [vmem:[#allocation7_spill] sm:$0xff] %v11300_v23  ;;  %v1806_v33 = vsel %vm1631_vm2, %v1593_v50, 0.0  ;;  %15284 = vst [vmem:[#allocation8_spill] sm:$0xff] %v11311_v38  ;;  %v1565_v36 = vmul.f32 %v11300_v23, %v11300_v23 }
 0x158   :  { %v1595_v50 = vmul.f32 %v11311_v38, %v11311_v38 }
 0x159   :  { %1798 = vadd.xlane.f32.xlu1 %v1797_v28  ;;  %15281 = vst [vmem:[#allocation6_spill] sm:$0xff] %v11295_v20  ;;  %v11304_v28 = vadd.f32 %v8341_v34, %v10781_v62  ;;  %v1580_v25 = vmul.f32 %v11295_v20, %v11295_v20  ;;  %v101_v34 = vld [vmem:[%s14859_s0 + $0x200] sm:$0xff]  ;;  %v15326_v20 = vld [vmem:[#allocation35_spill] sm:$0xff] }
 0x15a   :  { %1801 = vadd.xlane.f32.xlu0 %v1800_v6  ;;  %8489 = vmatmul.mubr.msk.f32.gmra.mrb[90].mxu1 %vm141_vm1, %v15279_v47  ;;  %v1803_v6 = vsel %vm1631_vm2, %v1592_v52, 0.0  ;;  %v15283_v47 = vld [vmem:[#allocation12_spill] sm:$0xff] }
 0x15b   :  { %8491 = vmatprep.mubr.msk.f32.mxu1 %vm141_vm1, %v15280_v32  ;;  %v1594_v52 = vmul.f32 %v11304_v28, %v11304_v28  ;;  %8348 = vmatprep.mubr.msk.f32.mxu0 %vm141_vm1, %v101_v34  ;;  %v11332_v32 = vadd.f32 %v11028_v24, %v10781_v62 }
 0x15c   :  { %8349 = vmatmul.mubr.msk.f32.gmra.mrb[64].mxu0 %vm141_vm1, %v102_v35 }
 0x15d   :  { %1672 = vadd.xlane.f32.xlu1 %v1671_v5  ;;  %15285 = vst [vmem:[#allocation9_spill] sm:$0xff] %v11332_v32  ;;  %v1767_v5 = vsel %vm1631_vm2, %v1580_v25, 0.0  ;;  %v1809_v24 = vsel %vm1631_vm2, %v1594_v52, 0.0  ;;  %v1812_v25 = vsel %vm1631_vm2, %v1595_v50, 0.0  ;;  %v15292_v50 = vld [vmem:[#allocation16_spill] sm:$0xff] }
 0x15e   :  { %1765 = vadd.xlane.f32.xlu0 %v1764_v49  ;;  %8492 = vmatmul.mubr.msk.f32.gmra.mrb[92].mxu1 %vm141_vm1, %v15283_v47  ;;  %v15286_v49 = vld [vmem:[#allocation13_spill] sm:$0xff]  ;;  %v1722_v47 = vsel %vm1631_vm2, %v1565_v36, 0.0 }
 0x15f   :  { %8494 = vmatprep.mubr.msk.f32.mxu1 %vm141_vm1, %v101_v34  ;;  %v11349_v34 = vadd.f32 %v10781_v62, %v810_v7 }
 0x161   :  { %1804 = vadd.xlane.f32.xlu1 %v1803_v6  ;;  %v11340_v6 = vadd.f32 %v10781_v62, %v10921_v8  ;;  %15289 = vst [vmem:[#allocation12_spill] sm:$0xff] %v11349_v34  ;;  %v1566_v8 = vmul.f32 %v11332_v32, %v11332_v32  ;;  %v1597_v7 = vmul.f32 %v11349_v34, %v11349_v34  ;;  %v15297_v34 = vld [vmem:[#allocation18_spill] sm:$0xff] }
 0x162   :  { %1807 = vadd.xlane.f32.xlu0 %v1806_v33  ;;  %8495 = vmatmul.mubr.msk.f32.gmra.mrb[94].mxu1 %vm141_vm1, %v102_v35  ;;  %v11344_v33 = vadd.f32 %v8344_v37, %v10781_v62  ;;  %v15291_v35 = vld [vmem:[#allocation15_spill] sm:$0xff] }
 0x163   :  { %8497 = vmatprep.mubr.msk.f32.mxu1 %vm141_vm1, %v15286_v49  ;;  %15287 = vst [vmem:[#allocation10_spill] sm:$0xff] %v11340_v6  ;;  %v15290_v49 = vld [vmem:[#allocation14_spill] sm:$0xff]  ;;  %v1549_v37 = vmul.f32 %v11340_v6, %v11340_v6 }
 0x164   :  { %15288 = vst [vmem:[#allocation11_spill] sm:$0xff] %v11344_v33  ;;  %v1596_v36 = vmul.f32 %v11344_v33, %v11344_v33 }
 0x165   :  { %1768 = vadd.xlane.f32.xlu1 %v1767_v5  ;;  %v11369_v5 = vadd.f32 %v10917_v3, %v10781_v62 }
 0x166   :  { %1723 = vadd.xlane.f32.xlu0 %v1722_v47  ;;  %8498 = vmatmul.mubr.msk.f32.gmra.mrb[96].mxu1 %vm141_vm1, %v15290_v49  ;;  %v1725_v47 = vsel %vm1631_vm2, %v1566_v8, 0.0  ;;  %v1674_v49 = vsel %vm1631_vm2, %v1549_v37, 0.0  ;;  %v1815_v3 = vsel %vm1631_vm2, %v1596_v36, 0.0  ;;  %v1818_v8 = vsel %vm1631_vm2, %v1597_v7, 0.0 }
 0x167   :  { %8500 = vmatprep.mubr.msk.f32.mxu1 %vm141_vm1, %v15291_v35  ;;  %15293 = vst [vmem:[#allocation13_spill] sm:$0xff] %v11369_v5  ;;  %v11381_v35 = vadd.f32 %v11255_v26, %v10781_v62 }
 0x169   :  { %1810 = vadd.xlane.f32.xlu1 %v1809_v24  ;;  %v15294_v24 = vld [vmem:[#allocation17_spill] sm:$0xff]  ;;  %15296 = vst [vmem:[#allocation15_spill] sm:$0xff] %v11381_v35  ;;  %v1598_v36 = vmul.f32 %v11381_v35, %v11381_v35  ;;  %v15302_v35 = vld [vmem:[#allocation22_spill] sm:$0xff] }
 0x16a   :  { %1813 = vadd.xlane.f32.xlu0 %v1812_v25  ;;  %8501 = vmatmul.mubr.msk.f32.gmra.mrb[98].mxu1 %vm141_vm1, %v15292_v50  ;;  %v11376_v25 = vadd.f32 %v10781_v62, %v11133_v16  ;;  %v1550_v16 = vmul.f32 %v11369_v5, %v11369_v5  ;;  %v1637_v37 = vpop.xlane.xlu1 %1636 }
 0x16b   :  { %v11361_v52 = vpop.xlane.xlu0 %1633  ;;  %8503 = vmatprep.mubr.msk.f32.mxu1 %vm141_vm1, %v15294_v24  ;;  %v15299_v24 = vld [vmem:[#allocation20_spill] sm:$0xff] }
 0x16c   :  { %15295 = vst [vmem:[#allocation14_spill] sm:$0xff] %v11376_v25  ;;  %v1581_v26 = vmul.f32 %v11376_v25, %v11376_v25 }
 0x16d   :  { %1726 = vadd.xlane.f32.xlu1 %v1725_v47  ;;  %v15298_v47 = vld [vmem:[#allocation19_spill] sm:$0xff] }
 0x16e   :  { %1675 = vadd.xlane.f32.xlu0 %v1674_v49  ;;  %8504 = vmatmul.mubr.msk.f32.gmra.mrb[100].mxu1 %vm141_vm1, %v15297_v34  ;;  %v11401_v34 = vadd.f32 %v11129_v39, %v10781_v62  ;;  %v1677_v49 = vsel %vm1631_vm2, %v1550_v16, 0.0  ;;  %v1643_v25 = vpop.xlane.xlu1 %1642  ;;  %v15303_v39 = vld [vmem:[#allocation23_spill] sm:$0xff] }
 0x16f   :  { %v11384_v50 = vpop.xlane.xlu0 %1639  ;;  %8506 = vmatprep.mubr.msk.f32.mxu1 %vm141_vm1, %v15298_v47  ;;  %v15301_v47 = vld [vmem:[#allocation21_spill] sm:$0xff] }
 0x170   :  { %15300 = vst [vmem:[#allocation16_spill] sm:$0xff] %v11401_v34  ;;  %v1582_v62 = vmul.f32 %v11401_v34, %v11401_v34  ;;  %v15317_v34 = vld [vmem:[#allocation30_spill] sm:$0xff] }
 0x171   :  { %1816 = vadd.xlane.f32.xlu1 %v1815_v3  ;;  %v1770_v3 = vsel %vm1631_vm2, %v1581_v26, 0.0 }
 0x172   :  { %1819 = vadd.xlane.f32.xlu0 %v1818_v8  ;;  %8507 = vmatmul.mubr.msk.f32.gmra.mrb[102].mxu1 %vm141_vm1, %v15299_v24  ;;  %v1821_v8 = vsel %vm1631_vm2, %v1598_v36, 0.0  ;;  %v11418_v24 = vpop.f32.mrb[0].mxu1  ;;  %v1773_v36 = vsel %vm1631_vm2, %v1582_v62, 0.0 }
 0x173   :  { %v11403_v7 = vpop.xlane.xlu0 %1645  ;;  %8509 = vmatprep.mubr.msk.f32.mxu1 %vm141_vm1, %v15301_v47  ;;  %15304 = vst [vmem:[#allocation17_spill] sm:$0xff] %v11418_v24  ;;  %v11422_v26 = vpop.f32.mrb[1].mxu1  ;;  %v15307_v47 = vld [vmem:[#allocation25_spill] sm:$0xff] }
 0x174   :  { %15306 = vst [vmem:[#allocation18_spill] sm:$0xff] %v11422_v26 }
 0x175   :  { %1678 = vadd.xlane.f32.xlu1 %v1677_v49  ;;  %v15305_v49 = vld [vmem:[#allocation24_spill] sm:$0xff] }
 0x176   :  { %1771 = vadd.xlane.f32.xlu0 %v1770_v3  ;;  %8510 = vmatmul.mubr.msk.f32.gmra.mrb[104].mxu1 %vm141_vm1, %v15302_v35  ;;  %v11427_v35 = vpop.xlane.xlu1 %1648  ;;  %v11429_v3 = vpop.f32.mrb[2].mxu1 }
 0x177   :  { %8512 = vmatprep.mubr.msk.f32.mxu1 %vm141_vm1, %v15303_v39  ;;  %v11416_v16 = vpop.xlane.xlu0 %1651  ;;  %15308 = vst [vmem:[#allocation19_spill] sm:$0xff] %v11429_v3  ;;  %v11433_v39 = vpop.f32.mrb[3].mxu1  ;;  %v15315_v3 = vld [vmem:[#allocation29_spill] sm:$0xff] }
 0x178   :  { %15310 = vst [vmem:[#allocation20_spill] sm:$0xff] %v11433_v39  ;;  %v11439_v26 = vpop.f32.mrb[4].mxu1 }
 0x179   :  { %1822 = vadd.xlane.f32.xlu1 %v1821_v8  ;;  %v15309_v8 = vld [vmem:[#allocation26_spill] sm:$0xff]  ;;  %15312 = vst [vmem:[#allocation21_spill] sm:$0xff] %v11439_v26  ;;  %v15319_v26 = vld [vmem:[#allocation31_spill] sm:$0xff] }
 0x17a   :  { %8513 = vmatmul.mubr.msk.f32.gmra.mrb[106].mxu1 %vm141_vm1, %v15305_v49  ;;  %v15311_v49 = vld [vmem:[#allocation27_spill] sm:$0xff]  ;;  %v11441_v62 = vpop.xlane.xlu1 %1654 }
 0x17b   :  { %8515 = vmatprep.mubr.msk.f32.mxu1 %vm141_vm1, %v15307_v47  ;;  %v11435_v24 = vpop.xlane.xlu0 %1657  ;;  %v15313_v47 = vld [vmem:[#allocation28_spill] sm:$0xff] }
 0x17d   :  { %1774 = vadd.xlane.f32.xlu1 %v1773_v36  ;;  %v11445_v36 = vpop.f32.mrb[5].mxu1 }
 0x17e   :  { %8516 = vmatmul.mubr.msk.f32.gmra.mrb[108].mxu1 %vm141_vm1, %v15309_v8  ;;  %15314 = vst [vmem:[#allocation22_spill] sm:$0xff] %v11445_v36  ;;  %v11451_v39 = vpop.f32.mrb[6].mxu1  ;;  %v11459_v5 = vpop.xlane.xlu1 %1660 }
 0x17f   :  { %8518 = vmatprep.mubr.msk.f32.mxu1 %vm141_vm1, %v15311_v49  ;;  %v11449_v8 = vpop.xlane.xlu0 %1663  ;;  %15316 = vst [vmem:[#allocation23_spill] sm:$0xff] %v11451_v39  ;;  %v11455_v49 = vpop.f32.mrb[7].mxu1 }
 0x180   :  { %15318 = vst [vmem:[#allocation24_spill] sm:$0xff] %v11455_v49  ;;  %v11461_v36 = vpop.f32.mrb[8].mxu1 }
 0x181   :  { %15320 = vst [vmem:[#allocation25_spill] sm:$0xff] %v11461_v36  ;;  %v11466_v39 = vpop.f32.mrb[9].mxu1 }
 0x182   :  { %8519 = vmatmul.mubr.msk.f32.gmra.mrb[110].mxu1 %vm141_vm1, %v15313_v47  ;;  %v1921_v47 = vmax.f32 %v1637_v37, 1e-24  ;;  %15322 = vst [vmem:[#allocation26_spill] sm:$0xff] %v11466_v39  ;;  %v15324_v37 = vld [vmem:[#allocation34_spill] sm:$0xff]  ;;  %v11472_v36 = vpop.f32.mrb[10].mxu1 }
 0x183   :  { %8521 = vmatprep.mubr.msk.f32.mxu1 %vm141_vm1, %v15315_v3  ;;  %v1920_v3 = vmax.f32 %v11361_v52, 1e-24  ;;  %15325 = vst [vmem:[#allocation27_spill] sm:$0xff] %v11472_v36  ;;  %v1922_v39 = vmax.f32 %v11384_v50, 1e-24  ;;  %v15335_v36 = vld [vmem:[#allocation40_spill] sm:$0xff] }
 0x184   :  { %9435 = vrsqrt.f32 %v1921_v47 }
 0x185   :  { %9437 = vrsqrt.f32 %v1920_v3 }
 0x186   :  { %8522 = vmatmul.mubr.msk.f32.gmra.mrb[112].mxu1 %vm141_vm1, %v15317_v34  ;;  %v15323_v34 = vld [vmem:[#allocation33_spill] sm:$0xff] }
 0x187   :  { %8524 = vmatprep.mubr.msk.f32.mxu1 %vm141_vm1, %v15319_v26 }
 0x18a   :  { %v1685_v6 = vpop.xlane.xlu0 %1684  ;;  %8525 = vmatmul.mubr.msk.f32.gmra.mrb[114].mxu1 %vm141_vm1, %v15321_v51  ;;  %v11476_v51 = vpop.f32.mrb[11].mxu1 }
 0x18b   :  { %v1937_v33 = vmax.f32 %v1685_v6, 1e-24  ;;  %8527 = vmatprep.mubr.msk.f32.mxu1 %vm141_vm1, %v15323_v34  ;;  %15327 = vst [vmem:[#allocation28_spill] sm:$0xff] %v11476_v51  ;;  %v1923_v6 = vmax.f32 %v1643_v25, 1e-24 }
 0x18d   :  { %9439 = vrsqrt.f32 %v1937_v33  ;;  %v15330_v33 = vld [vmem:[#allocation37_spill] sm:$0xff] }
 0x18e   :  { %v1691_v49 = vpop.xlane.xlu1 %1690  ;;  %v1682_v26 = vpop.xlane.xlu0 %1681  ;;  %8528 = vmatmul.mubr.msk.f32.gmra.mrb[116].mxu1 %vm141_vm1, %v15324_v37 }
 0x18f   :  { %v1936_v38 = vmax.f32 %v1682_v26, 1e-24  ;;  %v1939_v52 = vmax.f32 %v1691_v49, 1e-24  ;;  %8530 = vmatprep.mubr.msk.f32.mxu1 %vm141_vm1, %v15326_v20  ;;  %v15328_v26 = vld [vmem:[#allocation36_spill] sm:$0xff]  ;;  %v11481_v37 = vpop.f32.mrb[12].mxu1 }
 0x190   :  { %15329 = vst [vmem:[#allocation29_spill] sm:$0xff] %v11481_v37  ;;  %v2210_v20 = vld [vmem:[%s14862_s8] sm:$0x3]  ;;  %v11488_v25 = vpop.f32.mrb[13].mxu1 }
 0x191   :  { %9441 = vrsqrt.f32 %v1936_v38  ;;  %15331 = vst [vmem:[#allocation30_spill] sm:$0xff] %v11488_v25  ;;  %v2216_v49 = vrot.slane %v2210_v20, 7  ;;  %v11494_v37 = vpop.f32.mrb[14].mxu1  ;;  %v15339_v25 = vld [vmem:[#allocation39_spill] sm:$0xff] }
 0x192   :  { %v1697_v34 = vpop.xlane.xlu1 %1696  ;;  %v1688_v47 = vpop.xlane.xlu0 %1687  ;;  %8531 = vmatmul.mubr.msk.f32.gmra.mrb[118].mxu1 %vm141_vm1, %v15328_v26  ;;  %9443 = vrsqrt.f32 %v1939_v52  ;;  %v15332_v26 = vld [vmem:[#allocation38_spill] sm:$0xff]  ;;  %15334 = vst [vmem:[#allocation32_spill] sm:$0xff] %v11494_v37 }
 0x193   :  { %v1938_v3 = vmax.f32 %v1688_v47, 1e-24  ;;  %8533 = vmatprep.mubr.msk.f32.mxu1 %vm141_vm1, %v15330_v33  ;;  %9445 = vrsqrt.f32 %v1923_v6  ;;  %v1941_v38 = vmax.f32 %v1697_v34, 1e-24  ;;  %v11492_v52 = vsub.f32 %v2210_v20, %v2216_v49  ;;  %v9436_v33 = vpop.eup %9435  ;;  %v11498_v51 = vpop.f32.mrb[15].mxu1 }
 0x194   :  { %15336 = vst [vmem:[#allocation33_spill] sm:$0xff] %v11498_v51  ;;  %v9438_v6 = vpop.eup %9437  ;;  %v1924_v20 = vmax.f32 %v11403_v7, 1e-24  ;;  %v2113_v37 = vmul.f32 %v9436_v33, %v15339_v25  ;;  %v15345_v33 = vld [vmem:[#allocation45_spill] sm:$0xff] }
 0x195   :  { %9447 = vrsqrt.f32 %v1938_v3  ;;  %15333 = vst [vmem:[#allocation31_spill] sm:$0xff] %v11492_v52  ;;  %v11501_v34 = vrot.slane %v11492_v52, 1  ;;  %v1925_v3 = vmax.f32 %v11427_v35, 1e-24  ;;  %v2112_v51 = vmul.f32 %v9438_v6, %v10801_v61  ;;  %v15340_v35 = vld [vmem:[#allocation43_spill] sm:$0xff] }
 0x196   :  { %v1694_v50 = vpop.xlane.xlu0 %1693  ;;  %9449 = vrsqrt.f32 %v1922_v39  ;;  %8534 = vmatmul.mubr.msk.f32.gmra.mrb[120].mxu1 %vm141_vm1, %v15332_v26  ;;  %v1703_v49 = vpop.xlane.xlu1 %1702  ;;  %v15337_v26 = vld [vmem:[#allocation41_spill] sm:$0xff] }
 0x197   :  { %v1940_v47 = vmax.f32 %v1694_v50, 1e-24  ;;  %8536 = vmatprep.mubr.msk.f32.mxu1 %vm141_vm1, %v15335_v36  ;;  %9451 = vrsqrt.f32 %v1941_v38  ;;  %v9440_v39 = vpop.eup %9439  ;;  %7574 = vmatprep.mubr.msk.f32.mxu0 %vm1631_vm2, %v11501_v34  ;;  %v11509_v36 = vpop.f32.mrb[16].mxu1 }
 0x198   :  { %15338 = vst [vmem:[#allocation34_spill] sm:$0xff] %v11509_v36  ;;  %v2129_v7 = vmul.f32 %v9440_v39, %v10928_v9  ;;  %v15342_v36 = vmov 0 }
 0x199   :  { %9453 = vrsqrt.f32 %v1940_v47  ;;  %v11515_v47 = vpop.f32.mrb[17].mxu1  ;;  %v15343_v36 = vsel %vm11521_vm3, 4294967295, %v15342_v36 }
 0x19a   :  { %v1700_v50 = vpop.xlane.xlu0 %1699  ;;  %8537 = vmatmul.mubr.msk.f32.gmra.mrb[122].mxu1 %vm141_vm1, %v15337_v26  ;;  %15341 = vst [vmem:[#allocation35_spill] sm:$0xff] %v11515_v47  ;;  %9455 = vrsqrt.f32 %v1925_v3  ;;  %v1943_v26 = vmax.f32 %v1703_v49, 1e-24  ;;  %15344 = vst [vmem:[#allocation36_spill] sm:$0xff] %v15343_v36  ;;  %v11529_v6 = vpop.f32.mrb[18].mxu1 }
 0x19b   :  { %v9442_v38 = vpop.eup %9441  ;;  %v1942_v52 = vmax.f32 %v1700_v50, 1e-24  ;;  %8539 = vmatprep.mubr.msk.f32.mxu1 %vm141_vm1, %v15340_v35  ;;  %9457 = vrsqrt.f32 %v1924_v20  ;;  %15346 = vst [vmem:[#allocation37_spill] sm:$0xff] %v11529_v6  ;;  %v11535_v39 = vpop.f32.mrb[19].mxu1  ;;  %v1927_v49 = vmax.f32 %v11441_v62, 1e-24 }
 0x19c   :  { %v2128_v32 = vmul.f32 %v9442_v38, %v10931_v10  ;;  %v9444_v23 = vpop.eup %9443  ;;  %v11531_v10 = vpack.c.bf16 %v2113_v37, %v2112_v51  ;;  %15347 = vst [vmem:[#allocation38_spill] sm:$0xff] %v11535_v39  ;;  %v11546_v51 = vpop.f32.mrb[20].mxu1  ;;  %v15350_v35 = vld [vmem:[#allocation42_spill] sm:$0xff] }
 0x19d   :  { %v9446_v61 = vpop.eup %9445  ;;  %9459 = vrsqrt.f32 %v1942_v52  ;;  %v2131_v50 = vmul.f32 %v9444_v23, %v10940_v12  ;;  %15348 = vst [vmem:[#allocation40_spill] sm:$0xff] %v11546_v51  ;;  %v1926_v52 = vmax.f32 %v11416_v16, 1e-24  ;;  %v11551_v23 = vpop.f32.mrb[21].mxu1 }
 0x19e   :  { %v11525_v25 = vpack.c.bf16 %v2129_v7, %v2128_v32  ;;  %8540 = vmatmul.mubr.msk.f32.gmra.mrb[124].mxu1 %vm141_vm1, %v15345_v33  ;;  %v1706_v20 = vpop.xlane.xlu0 %1705  ;;  %9461 = vrsqrt.f32 %v1943_v26  ;;  %15349 = vst [vmem:[#allocation41_spill] sm:$0xff] %v11551_v23  ;;  %v2115_v7 = vmul.f32 %v9446_v61, %v15350_v35  ;;  %v15351_v33 = vld [vmem:[#allocation44_spill] sm:$0xff]  ;;  %v11559_v16 = vpop.f32.mrb[22].mxu1  ;;  %v1929_v35 = vmax.f32 %v11459_v5, 1e-24 }
 0x19f   :  { %v9448_v9 = vpop.eup %9447  ;;  %7608 = vmatprep.mubr.msk.f32.mxu1 %vm1631_vm2, %v11501_v34  ;;  %v1944_v26 = vmax.f32 %v1706_v20, 1e-24  ;;  %9463 = vrsqrt.f32 %v1927_v49  ;;  %15352 = vst [vmem:[#allocation39_spill] sm:$0xff] %v11559_v16 }
 0x1a0   :  { %v9450_v3 = vpop.eup %9449  ;;  %v2130_v32 = vmul.f32 %v9448_v9, %v10946_v2  ;;  %8544 = vmatprep.subr.msk.bf16.mxu0 %vm11521_vm3, %v11525_v25  ;;  %v1709_v2 = vpop.xlane.xlu1 %1708  ;;  %9465 = vrsqrt.f32 %v1926_v52 }
 0x1a1   :  { %8547 = vmatpush3.bf16.xpose.msk.msra.mxu0 %vm11521_vm3, %v11531_v10  ;;  %v9452_v37 = vpop.eup %9451  ;;  %v2114_v62 = vmul.f32 %v9450_v3, %v15351_v33  ;;  %v1945_v51 = vmax.f32 %v1709_v2, 1e-24  ;;  %9467 = vrsqrt.f32 %v1944_v26 }
 0x1a2   :  { %v11549_v12 = vpack.c.bf16 %v2131_v50, %v2130_v32  ;;  %v2133_v50 = vmul.f32 %v9452_v37, %v10955_v58  ;;  %v11562_v32 = vpop.f32.mrb[23].mxu1  ;;  %v1928_v37 = vmax.f32 %v11435_v24, 1e-24 }
 0x1a3   :  { %v9454_v38 = vpop.eup %9453  ;;  %15353 = vst [vmem:[#allocation43_spill] sm:$0xff] %v11562_v32  ;;  %v11564_v61 = vpack.c.bf16 %v2115_v7, %v2114_v62  ;;  %9469 = vrsqrt.f32 %v1945_v51  ;;  %v11572_v58 = vpop.f32.mrb[24].mxu1 }
 0x1a4   :  { %v2132_v9 = vmul.f32 %v9454_v38, %v10962_v55  ;;  %8550 = vmatprep.subr.msk.bf16.mxu0 %vm11521_vm3, %v11549_v12  ;;  %v9456_v23 = vpop.eup %9455  ;;  %v1712_v55 = vpop.xlane.xlu0 %1711  ;;  %15354 = vst [vmem:[#allocation45_spill] sm:$0xff] %v11572_v58  ;;  %9471 = vrsqrt.f32 %v1929_v35 }
 0x1a5   :  { %v9458_v3 = vpop.eup %9457  ;;  %v1715_v49 = vpop.xlane.xlu1 %1714  ;;  %v2117_v7 = vmul.f32 %v9456_v23, %v10848_v54  ;;  %v1946_v51 = vmax.f32 %v1712_v55, 1e-24  ;;  %9473 = vrsqrt.f32 %v1928_v37 }
 0x1a6   :  { %v11566_v20 = vpack.c.bf16 %v2133_v50, %v2132_v9  ;;  %v11578_v52 = vpop.f32.mrb[25].mxu1  ;;  %v2116_v5 = vmul.f32 %v9458_v3, %v10853_v57  ;;  %v1947_v62 = vmax.f32 %v1715_v49, 1e-24 }
 0x1a7   :  { %v9460_v38 = vpop.eup %9459  ;;  %15355 = vst [vmem:[#allocation42_spill] sm:$0xff] %v11578_v52  ;;  %v11585_v9 = vpop.f32.mrb[26].mxu1  ;;  %9475 = vrsqrt.f32 %v1946_v51 }
 0x1a8   :  { %v9462_v2 = vpop.eup %9461  ;;  %v2134_v33 = vmul.f32 %v9460_v38, %v10978_v13  ;;  %15356 = vst [vmem:[#allocation44_spill] sm:$0xff] %v11585_v9  ;;  %v11588_v50 = vpop.f32.mrb[27].mxu1  ;;  %v11590_v52 = vpack.c.bf16 %v2117_v7, %v2116_v5  ;;  %9477 = vrsqrt.f32 %v1947_v62  ;;  %v11615_v5 = vld [vmem:[%s14863_s4] ss:$0 sm:$0xff] }
 0x1a9   :  { %8553 = vmatpush3.bf16.xpose.msk.msra.mxu0 %vm11521_vm3, %v11564_v61  ;;  %v2135_v24 = vmul.f32 %v9462_v2, %v10971_v4  ;;  %15357 = vst [vmem:[#allocation53_spill] sm:$0xff] %v11588_v50  ;;  %v9464_v58 = vpop.eup %9463 }
 0x1aa   :  { %8556 = vmatprep.subr.msk.bf16.mxu0 %vm11521_vm3, %v11566_v20  ;;  %v11583_v26 = vpop.xlane.xlu1 %1732  ;;  %v9466_v54 = vpop.eup %9465  ;;  %v2119_v38 = vmul.f32 %v9464_v58, %v10866_v56 }
 0x1ab   :  { %v11592_v57 = vpack.c.bf16 %v2135_v24, %v2134_v33  ;;  %v9468_v23 = vpop.eup %9467  ;;  %v11599_v3 = vpop.xlane.xlu0 %1729  ;;  %v2118_v35 = vmul.f32 %v9466_v54, %v10870_v60 }
 0x1ac   :  { %v2136_v37 = vmul.f32 %v9468_v23, %v10994_v0 }
 0x1ad   :  { %v9470_v55 = vpop.eup %9469  ;;  %v11617_v62 = vpack.c.bf16 %v2119_v38, %v2118_v35 }
 0x1ae   :  { %v11608_v49 = vpop.xlane.xlu1 %1738  ;;  %v2137_v7 = vmul.f32 %v9470_v55, %v10987_v63  ;;  %v9472_v33 = vpop.eup %9471 }
 0x1af   :  { %v9474_v58 = vpop.eup %9473  ;;  %v11627_v24 = vpop.xlane.xlu0 %1735 }
 0x1b0   :  { %v11597_v13 = vpop.f32.mrb[28].mxu1  ;;  %v11625_v0 = vpack.c.bf16 %v2137_v7, %v2136_v37  ;;  %v2121_v37 = vmul.f32 %v9472_v33, %v10882_v1 }
 0x1b1   :  { %8559 = vmatpush3.bf16.xpose.msk.msra.mxu0 %vm11521_vm3, %v11590_v52  ;;  %15358 = vst [vmem:[#allocation54_spill] sm:$0xff] %v11597_v13  ;;  %v11604_v4 = vpop.f32.mrb[29].mxu1  ;;  %v9476_v63 = vpop.eup %9475 }
 0x1b2   :  { %8562 = vmatprep.subr.msk.bf16.mxu0 %vm11521_vm3, %v11592_v57  ;;  %15359 = vst [vmem:[#allocation55_spill] sm:$0xff] %v11604_v4  ;;  %v11629_v54 = vpop.xlane.xlu1 %1744  ;;  %v9478_v35 = vpop.eup %9477  ;;  %v2138_v13 = vmul.f32 %v9476_v63, %v11010_v14 }
 0x1b3   :  { %v2139_v9 = vmul.f32 %v9478_v35, %v11003_v11  ;;  %v11651_v50 = vpop.xlane.xlu0 %1741  ;;  %v10087_v11 = vmov 0  }
 0x1b4   :  { %v8400_v2 = vpop.f32.mrb[30].mxu1  ;;  %9433 = vset.pattern.permute.xlu0 %v10087_v11  ;;  %9434 = vset.pattern.permute.xlu1 %v10087_v11  ;;  %v1953_v11 = vmax.f32 %v11583_v26, 1e-24 }
 0x1b5   :  { %v1056_v51 = vpop.f32.mrb[31].mxu1  ;;  %v11620_v56 = vadd.f32 %v8400_v2, %v11615_v5  ;;  %v2120_v2 = vmul.f32 %v9474_v58, %v10886_v59  ;;  %v11663_v14 = vpack.c.bf16 %v2139_v9, %v2138_v13 }
 0x1b6   :  { %v11623_v60 = vadd.f32 %v11615_v5, %v1056_v51  ;;  %v11655_v59 = vpop.xlane.xlu1 %1750  ;;  %9479 = vrsqrt.f32 %v1953_v11  ;;  %v1954_v11 = vmax.f32 %v11627_v24, 1e-24 }
 0x1b7   :  { %15360 = vst [vmem:[#allocation56_spill] sm:$0xff] %v11620_v56  ;;  %v11653_v1 = vpack.c.bf16 %v2121_v37, %v2120_v2  ;;  %v11682_v35 = vpop.xlane.xlu0 %1747  ;;  %v1959_v24 = vmax.f32 %v11655_v59, 1e-24 }
 0x1b8   :  { %15361 = vst [vmem:[#allocation57_spill] sm:$0xff] %v11623_v60  ;;  %v8403_v55 = vpop.f32.mrb[32].mxu1 }
 0x1b9   :  { %8565 = vmatpush3.bf16.xpose.msk.msra.mxu0 %vm11521_vm3, %v11617_v62  ;;  %v1066_v38 = vpop.f32.mrb[33].mxu1  ;;  %v11642_v7 = vadd.f32 %v8403_v55, %v11615_v5  ;;  %v2211_v55 = vld [vmem:[%s14864_s9] sm:$0x3] }
 0x1ba   :  { %8568 = vmatprep.subr.msk.bf16.mxu0 %vm11521_vm3, %v11625_v0  ;;  %v11645_v51 = vadd.f32 %v11615_v5, %v1066_v38  ;;  %v2223_v9 = vrot.slane %v2211_v55, 7 }
 0x1bb   :  { %15362 = vst [vmem:[#allocation58_spill] sm:$0xff] %v11642_v7  ;;  %v11704_v47 = vpop.xlane.xlu0 %1753 }
 0x1bc   :  { %15363 = vst [vmem:[#allocation59_spill] sm:$0xff] %v11645_v51  ;;  %v8406_v4 = vpop.f32.mrb[34].mxu1  ;;  %v11684_v37 = vsub.f32 %v2211_v55, %v2223_v9  ;;  %v1952_v55 = vmax.f32 %v11599_v3, 1e-24  ;;  %v1930_v3 = vmax.f32 %v11449_v8, 1e-24 }
 0x1bd   :  { %v1076_v16 = vpop.f32.mrb[35].mxu1  ;;  %v11658_v33 = vadd.f32 %v8406_v4, %v11615_v5 }
 0x1be   :  { %v11661_v58 = vadd.f32 %v11615_v5, %v1076_v16  ;;  %2228 = vperm.xlu0 %9433, %v11684_v37   ;;  %9481 = vrsqrt.f32 %v1952_v55 }
 0x1bf   :  { %15364 = vst [vmem:[#allocation60_spill] sm:$0xff] %v11658_v33 }
 0x1c0   :  { %15365 = vst [vmem:[#allocation61_spill] sm:$0xff] %v11661_v58  ;;  %v8409_v63 = vpop.f32.mrb[36].mxu1 }
 0x1c1   :  { %8571 = vmatpush3.bf16.xpose.msk.msra.mxu0 %vm11521_vm3, %v11653_v1  ;;  %v11674_v38 = vadd.f32 %v8409_v63, %v11615_v5  ;;  %v1086_v16 = vpop.f32.mrb[37].mxu1  ;;  %v11688_v63 = vpop.xlane.xlu1 %1756 }
 0x1c2   :  { %8574 = vmatprep.subr.msk.bf16.mxu0 %vm11521_vm3, %v11663_v14  ;;  %v11680_v13 = vadd.f32 %v11615_v5, %v1086_v16 }
 0x1c3   :  { %15366 = vst [vmem:[#allocation62_spill] sm:$0xff] %v11674_v38 }
 0x1c4   :  { %15367 = vst [vmem:[#allocation63_spill] sm:$0xff] %v11680_v13  ;;  %v8412_v4 = vpop.f32.mrb[38].mxu1 }
 0x1c5   :  { %v11691_v23 = vadd.f32 %v8412_v4, %v11615_v5  ;;  %v1096_v32 = vpop.f32.mrb[39].mxu1 }
 0x1c6   :  { %v11695_v16 = vadd.f32 %v11615_v5, %v1096_v32 }
 0x1c7   :  { %15368 = vst [vmem:[#allocation64_spill] sm:$0xff] %v11691_v23  ;;  %v1955_v23 = vmax.f32 %v11608_v49, 1e-24 }
 0x1c8   :  { %15369 = vst [vmem:[#allocation65_spill] sm:$0xff] %v11695_v16  ;;  %v8415_v2 = vpop.f32.mrb[40].mxu1 }
 0x1c9   :  { %v11702_v39 = vadd.f32 %v8415_v2, %v11615_v5  ;;  %v1106_v4 = vpop.f32.mrb[41].mxu1 }
 0x1ca   :  { %v1781_v6 = vpop.xlane.xlu1 %1780  ;;  %v11707_v38 = vadd.f32 %v11615_v5, %v1106_v4 }
 0x1cb   :  { %15370 = vst [vmem:[#allocation66_spill] sm:$0xff] %v11702_v39  ;;  %v1969_v13 = vmax.f32 %v1781_v6, 1e-24 }
 0x1cc   :  { %15371 = vst [vmem:[#allocation67_spill] sm:$0xff] %v11707_v38  ;;  %v8418_v26 = vpop.f32.mrb[42].mxu1 }
 0x1cd   :  { %v11713_v16 = vadd.f32 %v8418_v26, %v11615_v5  ;;  %v1116_v2 = vpop.f32.mrb[43].mxu1  ;;  %9483 = vrsqrt.f32 %v1969_v13 }
 0x1ce   :  { %v1778_v9 = vpop.xlane.xlu1 %1777  ;;  %v11717_v4 = vadd.f32 %v11615_v5, %v1116_v2 }
 0x1cf   :  { %15372 = vst [vmem:[#allocation68_spill] sm:$0xff] %v11713_v16  ;;  %v1968_v6 = vmax.f32 %v1778_v9, 1e-24  ;;  %v1784_v58 = vpop.xlane.xlu0 %1783 }
 0x1d0   :  { %15373 = vst [vmem:[#allocation69_spill] sm:$0xff] %v11717_v4  ;;  %v8421_v8 = vpop.f32.mrb[44].mxu1  ;;  %v1970_v49 = vmax.f32 %v1784_v58, 1e-24 }
 0x1d1   :  { %9485 = vrsqrt.f32 %v1968_v6  ;;  %v11723_v26 = vadd.f32 %v8421_v8, %v11615_v5  ;;  %v1126_v38 = vpop.f32.mrb[45].mxu1 }
 0x1d2   :  { %9487 = vrsqrt.f32 %v1930_v3  ;;  %v1667_v32 = vpop.xlane.xlu1 %1666  ;;  %v11728_v2 = vadd.f32 %v11615_v5, %v1126_v38  ;;  %v9480_v3 = vpop.eup %9479  ;;  %v1957_v38 = vmax.f32 %v11629_v54, 1e-24 }
 0x1d3   :  { %15374 = vst [vmem:[#allocation70_spill] sm:$0xff] %v11723_v26  ;;  %9489 = vrsqrt.f32 %v1955_v23  ;;  %v1931_v13 = vmax.f32 %v1667_v32, 1e-24  ;;  %v11725_v9 = vpop.xlane.xlu0 %1759  ;;  %v9482_v23 = vpop.eup %9481 }
 0x1d4   :  { %15375 = vst [vmem:[#allocation71_spill] sm:$0xff] %v11728_v2  ;;  %9491 = vrsqrt.f32 %v1954_v11  ;;  %v2144_v26 = vmul.f32 %v9482_v23, %v11043_v22 }
 0x1d5   :  { %9493 = vrsqrt.f32 %v1931_v13  ;;  %v8424_v6 = vpop.f32.mrb[46].mxu1  ;;  %v1956_v13 = vmax.f32 %v11651_v50, 1e-24 }
 0x1d6   :  { %v1787_v55 = vpop.xlane.xlu1 %1786  ;;  %v11733_v8 = vadd.f32 %v8424_v6, %v11615_v5  ;;  %v1136_v4 = vpop.f32.mrb[47].mxu1  ;;  %9495 = vrsqrt.f32 %v1970_v49  ;;  %v2145_v6 = vmul.f32 %v9480_v3, %v11040_v17 }
 0x1d7   :  { %v1971_v58 = vmax.f32 %v1787_v55, 1e-24  ;;  %v1790_v32 = vpop.xlane.xlu0 %1789  ;;  %v11736_v16 = vadd.f32 %v11615_v5, %v1136_v4  ;;  %v9484_v11 = vpop.eup %9483 }
 0x1d8   :  { %15376 = vst [vmem:[#allocation72_spill] sm:$0xff] %v11733_v8  ;;  %v1972_v54 = vmax.f32 %v1790_v32, 1e-24  ;;  %v2161_v17 = vmul.f32 %v9484_v11, %v11140_v41  ;;  %v11757_v32 = vpack.c.bf16 %v2145_v6, %v2144_v26  ;;  %v1958_v26 = vmax.f32 %v11682_v35, 1e-24 }
 0x1d9   :  { %15377 = vst [vmem:[#allocation73_spill] sm:$0xff] %v11736_v16  ;;  %9497 = vrsqrt.f32 %v1971_v58  ;;  %v8427_v2 = vpop.f32.mrb[48].mxu1 }
 0x1da   :  { %v11744_v49 = vpop.xlane.xlu1 %1762  ;;  %v11747_v55 = vadd.f32 %v8427_v2, %v11615_v5  ;;  %v1146_v4 = vpop.f32.mrb[49].mxu1  ;;  %9499 = vrsqrt.f32 %v1957_v38  ;;  %15380 = vst [vmem:[#allocation76_spill] sm:$0xff] %v11757_v32 }
 0x1db   :  { %v9486_v39 = vpop.eup %9485  ;;  %v1718_v33 = vpop.xlane.xlu0 %1717  ;;  %v11750_v50 = vadd.f32 %v11615_v5, %v1146_v4  ;;  %9501 = vrsqrt.f32 %v1956_v13  ;;  %v15384_v13 = vld [vmem:[#allocation46_spill] sm:$0xff] }
 0x1dc   :  { %15378 = vst [vmem:[#allocation74_spill] sm:$0xff] %v11747_v55  ;;  %v9488_v58 = vpop.eup %9487  ;;  %v2160_v22 = vmul.f32 %v9486_v39, %v11143_v42  ;;  %9503 = vrsqrt.f32 %v1972_v54  ;;  %v1948_v41 = vmax.f32 %v1718_v33, 1e-24  ;;  %v15497_v55 = vld [vmem:[#allocation31_spill] sm:$0xff] }
 0x1dd   :  { %15379 = vst [vmem:[#allocation75_spill] sm:$0xff] %v11750_v50  ;;  %v9490_v3 = vpop.eup %9489  ;;  %v8430_v23 = vpop.f32.mrb[50].mxu1  ;;  %v2122_v2 = vmul.f32 %v9488_v58, %v15384_v13  ;;  %9505 = vrsqrt.f32 %v1959_v24 }
 0x1de   :  { %v9492_v51 = vpop.eup %9491  ;;  %v11759_v7 = vpack.c.bf16 %v2161_v17, %v2160_v22  ;;  %v1793_v4 = vpop.xlane.xlu1 %1792  ;;  %v11762_v38 = vadd.f32 %v8430_v23, %v11615_v5  ;;  %v2147_v24 = vmul.f32 %v9490_v3, %v11054_v29 }
 0x1df   :  { %v1156_v59 = vpop.f32.mrb[51].mxu1  ;;  %v9494_v60 = vpop.eup %9493  ;;  %v1973_v42 = vmax.f32 %v1793_v4, 1e-24  ;;  %v2146_v35 = vmul.f32 %v9492_v51, %v11058_v19 }
 0x1e0   :  { %15381 = vst [vmem:[#allocation77_spill] sm:$0xff] %v11759_v7  ;;  %15382 = vst [vmem:[#allocation78_spill] sm:$0xff] %v11762_v38  ;;  %v1796_v39 = vpop.xlane.xlu0 %1795  ;;  %v11765_v11 = vadd.f32 %v11615_v5, %v1156_v59  ;;  %v2123_v6 = vmul.f32 %v9494_v60, %v11153_v44  ;;  %8592 = vmatprep.subr.msk.bf16.mxu1 %vm11521_vm3, %v11759_v7  ;;  %v9496_v17 = vpop.eup %9495 }
 0x1e1   :  { %9507 = vrsqrt.f32 %v1973_v42  ;;  %8595 = vmatpush3.bf16.xpose.msk.msra.mxu1 %vm11521_vm3, %v11757_v32  ;;  %v8433_v54 = vpop.f32.mrb[52].mxu1  ;;  %v1974_v4 = vmax.f32 %v1796_v39, 1e-24  ;;  %v2162_v29 = vmul.f32 %v9496_v17, %v11162_v40  ;;  %v1961_v39 = vmax.f32 %v11688_v63, 1e-24 }
 0x1e2   :  { %15383 = vst [vmem:[#allocation79_spill] sm:$0xff] %v11765_v11  ;;  %v11780_v58 = vpack.c.bf16 %v2123_v6, %v2122_v2  ;;  %v1721_v44 = vpop.xlane.xlu1 %1720  ;;  %v11783_v60 = vadd.f32 %v8433_v54, %v11615_v5  ;;  %v1166_v22 = vpop.f32.mrb[53].mxu1  ;;  %9509 = vrsqrt.f32 %v1948_v41  ;;  %v11795_v41 = vpack.c.bf16 %v2147_v24, %v2146_v35 }
 0x1e3   :  { %v9498_v23 = vpop.eup %9497  ;;  %v1949_v59 = vmax.f32 %v1721_v44, 1e-24  ;;  %v11786_v13 = vadd.f32 %v11615_v5, %v1166_v22  ;;  %9511 = vrsqrt.f32 %v1958_v26  ;;  %v1960_v24 = vmax.f32 %v11704_v47, 1e-24 }
 0x1e4   :  { %15385 = vst [vmem:[#allocation46_spill] sm:$0xff] %v11783_v60  ;;  %v1670_v42 = vpop.xlane.xlu0 %1669  ;;  %v2163_v19 = vmul.f32 %v9498_v23, %v11165_v46  ;;  %8577 = vmatpush3.bf16.xpose.msk.msra.mxu0 %vm11521_vm3, %v11780_v58  ;;  %v9500_v2 = vpop.eup %9499  ;;  %15387 = vst [vmem:[#allocation81_spill] sm:$0xff] %v11795_v41 }
 0x1e5   :  { %15386 = vst [vmem:[#allocation80_spill] sm:$0xff] %v11786_v13  ;;  %9513 = vrsqrt.f32 %v1949_v59  ;;  %v8436_v3 = vpop.f32.mrb[54].mxu1  ;;  %v9502_v17 = vpop.eup %9501  ;;  %v1932_v54 = vmax.f32 %v1670_v42, 1e-24  ;;  %v2149_v42 = vmul.f32 %v9500_v2, %v11070_v27 }
 0x1e6   :  { %v11798_v6 = vpack.c.bf16 %v2163_v19, %v2162_v29  ;;  %v1799_v26 = vpop.xlane.xlu1 %1798  ;;  %v11801_v40 = vadd.f32 %v8436_v3, %v11615_v5  ;;  %v1176_v46 = vpop.f32.mrb[55].mxu1  ;;  %9515 = vrsqrt.f32 %v1974_v4  ;;  %v2148_v29 = vmul.f32 %v9502_v17, %v11074_v21 }
 0x1e7   :  { %v1975_v44 = vmax.f32 %v1799_v26, 1e-24  ;;  %v11804_v23 = vadd.f32 %v11615_v5, %v1176_v46  ;;  %v9504_v63 = vpop.eup %9503 }
 0x1e8   :  { %15388 = vst [vmem:[#allocation82_spill] sm:$0xff] %v11798_v6  ;;  %15389 = vst [vmem:[#allocation83_spill] sm:$0xff] %v11801_v40  ;;  %v1802_v22 = vpop.xlane.xlu0 %1801  ;;  %8598 = vmatprep.subr.msk.bf16.mxu1 %vm11521_vm3, %v11798_v6  ;;  %v9506_v59 = vpop.eup %9505  ;;  %v2164_v27 = vmul.f32 %v9504_v63, %v11178_v45 }
 0x1e9   :  { %15390 = vst [vmem:[#allocation84_spill] sm:$0xff] %v11804_v23  ;;  %9517 = vrsqrt.f32 %v1975_v44  ;;  %8601 = vmatpush3.bf16.xpose.msk.msra.mxu1 %vm11521_vm3, %v11795_v41  ;;  %v8439_v4 = vpop.f32.mrb[56].mxu1  ;;  %v1976_v46 = vmax.f32 %v1802_v22, 1e-24 }
 0x1ea   :  { %9519 = vrsqrt.f32 %v1961_v39  ;;  %v1673_v47 = vpop.xlane.xlu1 %1672  ;;  %v11818_v19 = vadd.f32 %v8439_v4, %v11615_v5  ;;  %v1186_v3 = vpop.f32.mrb[57].mxu1 }
 0x1eb   :  { %v9508_v26 = vpop.eup %9507  ;;  %9521 = vrsqrt.f32 %v1932_v54  ;;  %v1933_v44 = vmax.f32 %v1673_v47, 1e-24  ;;  %v11823_v35 = vadd.f32 %v11615_v5, %v1186_v3 }
 0x1ec   :  { %15391 = vst [vmem:[#allocation85_spill] sm:$0xff] %v11818_v19  ;;  %v11820_v51 = vpop.xlane.xlu0 %1765  ;;  %9523 = vrsqrt.f32 %v1960_v24  ;;  %v2165_v21 = vmul.f32 %v9508_v26, %v11200_v18  ;;  %v9510_v2 = vpop.eup %9509  ;;  %v11834_v24 = vpack.c.bf16 %v2149_v42, %v2148_v29  ;;  %v1963_v42 = vmax.f32 %v11744_v49, 1e-24  ;;  %v15400_v29 = vld [vmem:[#allocation52_spill] sm:$0xff] }
 0x1ed   :  { %15392 = vst [vmem:[#allocation86_spill] sm:$0xff] %v11823_v35  ;;  %9525 = vrsqrt.f32 %v1933_v44  ;;  %v8442_v17 = vpop.f32.mrb[58].mxu1  ;;  %v9512_v4 = vpop.eup %9511  ;;  %v2140_v26 = vmul.f32 %v9510_v2, %v11196_v43 }
 0x1ee   :  { %v11829_v54 = vpack.c.bf16 %v2165_v21, %v2164_v27  ;;  %v1805_v22 = vpop.xlane.xlu1 %1804  ;;  %v11832_v47 = vadd.f32 %v8442_v17, %v11615_v5  ;;  %v1196_v3 = vpop.f32.mrb[59].mxu1  ;;  %15395 = vst [vmem:[#allocation89_spill] sm:$0xff] %v11834_v24  ;;  %9527 = vrsqrt.f32 %v1976_v46  ;;  %v2151_v21 = vmul.f32 %v9506_v59, %v11086_v30  ;;  %v15397_v46 = vld [vmem:[#allocation47_spill] sm:$0xff] }
 0x1ef   :  { %v9514_v33 = vpop.eup %9513  ;;  %v1977_v45 = vmax.f32 %v1805_v22, 1e-24  ;;  %v11837_v63 = vadd.f32 %v11615_v5, %v1196_v3 }
 0x1f0   :  { %15393 = vst [vmem:[#allocation87_spill] sm:$0xff] %v11829_v54  ;;  %15394 = vst [vmem:[#allocation88_spill] sm:$0xff] %v11832_v47  ;;  %v1808_v18 = vpop.xlane.xlu0 %1807  ;;  %v2141_v44 = vmul.f32 %v9514_v33, %v11225_v31  ;;  %8604 = vmatprep.subr.msk.bf16.mxu1 %vm11521_vm3, %v11829_v54  ;;  %v9516_v27 = vpop.eup %9515  ;;  %v2150_v31 = vmul.f32 %v9512_v4, %v15397_v46  ;;  %v1962_v33 = vmax.f32 %v11725_v9, 1e-24  ;;  %v15401_v47 = vld [vmem:[#allocation3_spill] sm:$0xff] }
 0x1f1   :  { %15396 = vst [vmem:[#allocation90_spill] sm:$0xff] %v11837_v63  ;;  %9529 = vrsqrt.f32 %v1977_v45  ;;  %8607 = vmatpush3.bf16.xpose.msk.msra.mxu1 %vm11521_vm3, %v11834_v24  ;;  %v8445_v43 = vpop.f32.mrb[60].mxu1  ;;  %v1978_v22 = vmax.f32 %v1808_v18, 1e-24  ;;  %v2166_v63 = vmul.f32 %v9516_v27, %v15400_v29 }
 0x1f2   :  { %v11853_v2 = vpack.c.bf16 %v2141_v44, %v2140_v26  ;;  %v1769_v17 = vpop.xlane.xlu1 %1768  ;;  %v11856_v30 = vadd.f32 %v8445_v43, %v11615_v5  ;;  %v1206_v49 = vpop.f32.mrb[61].mxu1  ;;  %9531 = vrsqrt.f32 %v1963_v42  ;;  %v11868_v43 = vpack.c.bf16 %v2151_v21, %v2150_v31  ;;  %v15406_v26 = vld [vmem:[#allocation2_spill] sm:$0xff]  ;;  %v15407_v31 = vld [vmem:[#allocation48_spill] sm:$0xff] }
 0x1f3   :  { %v9518_v59 = vpop.eup %9517  ;;  %v11859_v45 = vadd.f32 %v11615_v5, %v1206_v49  ;;  %9533 = vrsqrt.f32 %v1962_v33 }
 0x1f4   :  { %15398 = vst [vmem:[#allocation47_spill] sm:$0xff] %v11856_v30  ;;  %v1724_v3 = vpop.xlane.xlu0 %1723  ;;  %v9520_v39 = vpop.eup %9519  ;;  %v2167_v4 = vmul.f32 %v9518_v59, %v15401_v47  ;;  %8580 = vmatprep.subr.msk.bf16.mxu0 %vm11521_vm3, %v11853_v2  ;;  %15402 = vst [vmem:[#allocation52_spill] sm:$0xff] %v11868_v43  ;;  %9535 = vrsqrt.f32 %v1978_v22  ;;  %v15411_v22 = vld [vmem:[#allocation4_spill] sm:$0xff] }
 0x1f5   :  { %15399 = vst [vmem:[#allocation91_spill] sm:$0xff] %v11859_v45  ;;  %v9522_v9 = vpop.eup %9521  ;;  %v8448_v44 = vpop.f32.mrb[62].mxu1  ;;  %v1950_v59 = vmax.f32 %v1724_v3, 1e-24  ;;  %v2153_v33 = vmul.f32 %v9520_v39, %v15407_v31 }
 0x1f6   :  { %v9524_v18 = vpop.eup %9523  ;;  %v11870_v46 = vpack.c.bf16 %v2167_v4, %v2166_v63  ;;  %v1811_v49 = vpop.xlane.xlu1 %1810  ;;  %v11873_v27 = vadd.f32 %v8448_v44, %v11615_v5  ;;  %v2124_v45 = vmul.f32 %v9522_v9, %v15406_v26  ;;  %v15408_v4 = vld [vmem:[#allocation49_spill] sm:$0xff] }
 0x1f7   :  { %v1216_v47 = vpop.f32.mrb[63].mxu1  ;;  %v9526_v29 = vpop.eup %9525  ;;  %v1979_v35 = vmax.f32 %v1811_v49, 1e-24  ;;  %v2152_v9 = vmul.f32 %v9524_v18, %v15408_v4  ;;  %v1964_v18 = vmax.f32 %v11820_v51, 1e-24 }
 0x1f8   :  { %15403 = vst [vmem:[#allocation3_spill] sm:$0xff] %v11870_v46  ;;  %15404 = vst [vmem:[#allocation92_spill] sm:$0xff] %v11873_v27  ;;  %v1814_v42 = vpop.xlane.xlu0 %1813  ;;  %v11876_v19 = vadd.f32 %v11615_v5, %v1216_v47  ;;  %v2125_v21 = vmul.f32 %v9526_v29, %v11261_v53  ;;  %8610 = vmatprep.subr.msk.bf16.mxu1 %vm11521_vm3, %v11870_v46  ;;  %v9528_v63 = vpop.eup %9527  ;;  %v1965_v53 = vmax.f32 %v1769_v17, 1e-24 }
 0x1f9   :  { %9537 = vrsqrt.f32 %v1979_v35  ;;  %8613 = vmatpush3.bf16.xpose.msk.msra.mxu1 %vm11521_vm3, %v11868_v43  ;;  %v8451_v3 = vpop.f32.mrb[64].mxu1  ;;  %v1980_v35 = vmax.f32 %v1814_v42, 1e-24  ;;  %v2168_v23 = vmul.f32 %v9528_v63, %v15411_v22  ;;  %v11906_v42 = vpack.c.bf16 %v2153_v33, %v2152_v9 }
 0x1fa   :  { %15405 = vst [vmem:[#allocation93_spill] sm:$0xff] %v11876_v19  ;;  %v11890_v26 = vpack.c.bf16 %v2125_v21, %v2124_v45  ;;  %v1727_v44 = vpop.xlane.xlu1 %1726  ;;  %v11893_v49 = vadd.f32 %v8451_v3, %v11615_v5  ;;  %v1226_v47 = vpop.f32.mrb[65].mxu1  ;;  %9539 = vrsqrt.f32 %v1950_v59 }
 0x1fb   :  { %v9530_v39 = vpop.eup %9529  ;;  %v1951_v29 = vmax.f32 %v1727_v44, 1e-24  ;;  %v11896_v30 = vadd.f32 %v11615_v5, %v1226_v47  ;;  %15412 = vst [vmem:[#allocation49_spill] sm:$0xff] %v11906_v42 }
 0x1fc   :  { %15409 = vst [vmem:[#allocation2_spill] sm:$0xff] %v11893_v49  ;;  %v1676_v31 = vpop.xlane.xlu0 %1675  ;;  %v2169_v45 = vmul.f32 %v9530_v39, %v11270_v15  ;;  %8583 = vmatpush3.bf16.xpose.msk.msra.mxu0 %vm11521_vm3, %v11890_v26  ;;  %v9532_v15 = vpop.eup %9531 }
 0x1fd   :  { %15410 = vst [vmem:[#allocation48_spill] sm:$0xff] %v11896_v30  ;;  %9541 = vrsqrt.f32 %v1951_v29  ;;  %v8454_v59 = vpop.f32.mrb[66].mxu1  ;;  %v1934_v22 = vmax.f32 %v1676_v31, 1e-24  ;;  %v9534_v39 = vpop.eup %9533 }
 0x1fe   :  { %v11908_v21 = vpack.c.bf16 %v2169_v45, %v2168_v23  ;;  %9543 = vrsqrt.f32 %v1965_v53  ;;  %v1817_v3 = vpop.xlane.xlu1 %1816  ;;  %v11911_v63 = vadd.f32 %v8454_v59, %v11615_v5  ;;  %v1236_v51 = vpop.f32.mrb[67].mxu1  ;;  %v15416_v53 = vld [vmem:[#allocation51_spill] sm:$0xff] }
 0x1ff   :  { %9545 = vrsqrt.f32 %v1980_v35  ;;  %v1981_v4 = vmax.f32 %v1817_v3, 1e-24  ;;  %v11914_v47 = vadd.f32 %v11615_v5, %v1236_v51  ;;  %v9536_v23 = vpop.eup %9535  ;;  %v2155_v35 = vmul.f32 %v9532_v15, %v15416_v53 }
 0x200   :  { %15413 = vst [vmem:[#allocation4_spill] sm:$0xff] %v11908_v21  ;;  %15414 = vst [vmem:[#allocation94_spill] sm:$0xff] %v11911_v63  ;;  %v1820_v44 = vpop.xlane.xlu0 %1819  ;;  %9547 = vrsqrt.f32 %v1964_v18  ;;  %8616 = vmatprep.subr.msk.bf16.mxu1 %vm11521_vm3, %v11908_v21  ;;  %v2170_v40 = vmul.f32 %v9536_v23, %v11277_v48 }
 0x201   :  { %15415 = vst [vmem:[#allocation95_spill] sm:$0xff] %v11914_v47  ;;  %9549 = vrsqrt.f32 %v1981_v4  ;;  %8619 = vmatpush3.bf16.xpose.msk.msra.mxu1 %vm11521_vm3, %v11906_v42  ;;  %v8457_v9 = vpop.f32.mrb[68].mxu1  ;;  %v1982_v59 = vmax.f32 %v1820_v44, 1e-24  ;;  %v15419_v4 = vld [vmem:[#allocation50_spill] sm:$0xff] }
 0x202   :  { %v1679_v29 = vpop.xlane.xlu1 %1678  ;;  %v11926_v31 = vadd.f32 %v8457_v9, %v11615_v5  ;;  %v1246_v18 = vpop.f32.mrb[69].mxu1  ;;  %9551 = vrsqrt.f32 %v1934_v22  ;;  %v2154_v17 = vmul.f32 %v9534_v39, %v15419_v4  ;;  %v15425_v9 = vld [vmem:[#allocation9_spill] sm:$0xff] }
 0x203   :  { %v9538_v45 = vpop.eup %9537  ;;  %v1935_v3 = vmax.f32 %v1679_v29, 1e-24  ;;  %v11929_v51 = vadd.f32 %v11615_v5, %v1246_v18 }
 0x204   :  { %15417 = vst [vmem:[#allocation51_spill] sm:$0xff] %v11926_v31  ;;  %v2171_v33 = vmul.f32 %v9538_v45, %v11304_v28  ;;  %v1772_v13 = vpop.xlane.xlu0 %1771  ;;  %v9540_v15 = vpop.eup %9539  ;;  %v11936_v60 = vpack.c.bf16 %v2155_v35, %v2154_v17 }
 0x205   :  { %15418 = vst [vmem:[#allocation96_spill] sm:$0xff] %v11929_v51  ;;  %9553 = vrsqrt.f32 %v1935_v3  ;;  %v8460_v53 = vpop.f32.mrb[70].mxu1  ;;  %v1966_v48 = vmax.f32 %v1772_v13, 1e-24  ;;  %v15424_v3 = vld [vmem:[#allocation7_spill] sm:$0xff]  ;;  %v15429_v51 = vld [vmem:[#allocation8_spill] sm:$0xff] }
 0x206   :  { %15420 = vst [vmem:[#allocation50_spill] sm:$0xff] %v11936_v60  ;;  %v11938_v22 = vpack.c.bf16 %v2171_v33, %v2170_v40  ;;  %v1823_v44 = vpop.xlane.xlu1 %1822  ;;  %v11941_v29 = vadd.f32 %v8460_v53, %v11615_v5  ;;  %v1256_v39 = vpop.f32.mrb[71].mxu1  ;;  %9555 = vrsqrt.f32 %v1982_v59  ;;  %v2142_v4 = vmul.f32 %v9540_v15, %v15424_v3  ;;  %v15430_v13 = vld [vmem:[#allocation11_spill] sm:$0xff] }
 0x207   :  { %v9542_v18 = vpop.eup %9541  ;;  %v1983_v28 = vmax.f32 %v1823_v44, 1e-24  ;;  %v11944_v23 = vadd.f32 %v11615_v5, %v1256_v39  ;;  %v15427_v39 = vld [vmem:[#allocation6_spill] sm:$0xff] }
 0x208   :  { %15421 = vst [vmem:[#allocation97_spill] sm:$0xff] %v11938_v22  ;;  %15422 = vst [vmem:[#allocation98_spill] sm:$0xff] %v11941_v29  ;;  %v9544_v45 = vpop.eup %9543  ;;  %v2143_v17 = vmul.f32 %v9542_v18, %v15425_v9  ;;  %8622 = vmatprep.subr.msk.bf16.mxu1 %vm11521_vm3, %v11938_v22 }
 0x209   :  { %15423 = vst [vmem:[#allocation99_spill] sm:$0xff] %v11944_v23  ;;  %v9546_v40 = vpop.eup %9545  ;;  %9557 = vrsqrt.f32 %v1983_v28  ;;  %8625 = vmatpush3.bf16.xpose.msk.msra.mxu1 %vm11521_vm3, %v11936_v60  ;;  %v8463_v33 = vpop.f32.mrb[72].mxu1  ;;  %v2157_v18 = vmul.f32 %v9544_v45, %v15427_v39  ;;  %v15436_v39 = vld [vmem:[#allocation10_spill] sm:$0xff] }
 0x20a   :  { %v9548_v35 = vpop.eup %9547  ;;  %v11956_v59 = vpack.c.bf16 %v2143_v17, %v2142_v4  ;;  %v1775_v15 = vpop.xlane.xlu1 %1774  ;;  %v11959_v9 = vadd.f32 %v8463_v33, %v11615_v5  ;;  %9559 = vrsqrt.f32 %v1966_v48  ;;  %v2172_v31 = vmul.f32 %v9546_v40, %v15429_v51  ;;  %v15431_v17 = vld [vmem:[#allocation5_spill] sm:$0xff] }
 0x20b   :  { %v1266_v53 = vpop.f32.mrb[73].mxu1  ;;  %v9550_v44 = vpop.eup %9549  ;;  %v1967_v28 = vmax.f32 %v1775_v15, 1e-24  ;;  %v2156_v33 = vmul.f32 %v9548_v35, %v15431_v17  ;;  %v15437_v35 = vld [vmem:[#allocation13_spill] sm:$0xff] }
 0x20c   :  { %15426 = vst [vmem:[#allocation7_spill] sm:$0xff] %v11959_v9  ;;  %v11963_v3 = vadd.f32 %v11615_v5, %v1266_v53  ;;  %v2173_v23 = vmul.f32 %v9550_v44, %v15430_v13  ;;  %8586 = vmatprep.subr.msk.bf16.mxu0 %vm11521_vm3, %v11956_v59  ;;  %v9552_v4 = vpop.eup %9551 }
 0x20d   :  { %9561 = vrsqrt.f32 %v1967_v28  ;;  %v8466_v48 = vpop.f32.mrb[74].mxu1  ;;  %v11978_v13 = vpack.c.bf16 %v2157_v18, %v2156_v33  ;;  %v2126_v29 = vmul.f32 %v9552_v4, %v15436_v39 }
 0x20e   :  { %15428 = vst [vmem:[#allocation9_spill] sm:$0xff] %v11963_v3  ;;  %v11973_v15 = vpack.c.bf16 %v2173_v23, %v2172_v31  ;;  %v11976_v53 = vadd.f32 %v8466_v48, %v11615_v5  ;;  %v1276_v51 = vpop.f32.mrb[75].mxu1 }
 0x20f   :  { %v9554_v40 = vpop.eup %9553  ;;  %15434 = vst [vmem:[#allocation11_spill] sm:$0xff] %v11978_v13  ;;  %v11981_v44 = vadd.f32 %v11615_v5, %v1276_v51 }
 0x210   :  { %15432 = vst [vmem:[#allocation6_spill] sm:$0xff] %v11973_v15  ;;  %15433 = vst [vmem:[#allocation8_spill] sm:$0xff] %v11976_v53  ;;  %v2127_v28 = vmul.f32 %v9554_v40, %v15437_v35  ;;  %8628 = vmatprep.subr.msk.bf16.mxu1 %vm11521_vm3, %v11973_v15  ;;  %v9556_v31 = vpop.eup %9555  ;;  %v15440_v40 = vld [vmem:[#allocation12_spill] sm:$0xff]  ;;  %v15441_v35 = vld [vmem:[#allocation15_spill] sm:$0xff] }
 0x211   :  { %15435 = vst [vmem:[#allocation5_spill] sm:$0xff] %v11981_v44  ;;  %8631 = vmatpush3.bf16.xpose.msk.msra.mxu1 %vm11521_vm3, %v11978_v13  ;;  %v8469_v18 = vpop.f32.mrb[76].mxu1  ;;  %v2174_v39 = vmul.f32 %v9556_v31, %v15440_v40  ;;  %v15445_v40 = vld [vmem:[#allocation14_spill] sm:$0xff]  ;;  %v15446_v53 = vld [vmem:[#allocation16_spill] sm:$0xff] }
 0x212   :  { %v11993_v17 = vpack.c.bf16 %v2127_v28, %v2126_v29  ;;  %v11996_v33 = vadd.f32 %v8469_v18, %v11615_v5  ;;  %v1286_v4 = vpop.f32.mrb[77].mxu1 }
 0x213   :  { %v9558_v48 = vpop.eup %9557  ;;  %v11999_v51 = vadd.f32 %v11615_v5, %v1286_v4 }
 0x214   :  { %15438 = vst [vmem:[#allocation10_spill] sm:$0xff] %v11996_v33  ;;  %v2175_v45 = vmul.f32 %v9558_v48, %v15441_v35  ;;  %8589 = vmatpush3.bf16.xpose.msk.msra.mxu0 %vm11521_vm3, %v11993_v17  ;;  %v9560_v23 = vpop.eup %9559 }
 0x215   :  { %15439 = vst [vmem:[#allocation13_spill] sm:$0xff] %v11999_v51  ;;  %8639 = vmatprep.subr.bf16.mxu0 %v11525_v25  ;;  %v8472_v28 = vpop.f32.mrb[78].mxu1  ;;  %v2158_v35 = vmul.f32 %v9560_v23, %v15445_v40 }
 0x216   :  { %v12009_v18 = vpack.c.bf16 %v2175_v45, %v2174_v39  ;;  %v12012_v4 = vadd.f32 %v8472_v28, %v11615_v5  ;;  %v1296_v44 = vpop.f32.mrb[79].mxu1 }
 0x217   :  { %v9562_v31 = vpop.eup %9561  ;;  %v12015_v48 = vadd.f32 %v11615_v5, %v1296_v44 }
 0x218   :  { %15442 = vst [vmem:[#allocation12_spill] sm:$0xff] %v12009_v18  ;;  %15443 = vst [vmem:[#allocation15_spill] sm:$0xff] %v12012_v4  ;;  %v2159_v3 = vmul.f32 %v9562_v31, %v15446_v53  ;;  %8634 = vmatprep.subr.msk.bf16.mxu1 %vm11521_vm3, %v12009_v18 }
 0x219   :  { %15444 = vst [vmem:[#allocation100_spill] sm:$0xff] %v12015_v48  ;;  %v8475_v39 = vpop.f32.mrb[80].mxu1 }
 0x21a   :  { %v12024_v29 = vpack.c.bf16 %v2159_v3, %v2158_v35  ;;  %v12027_v28 = vadd.f32 %v8475_v39, %v11615_v5  ;;  %v1306_v51 = vpop.f32.mrb[81].mxu1 }
 0x21b   :  { %7575 = vmatmul.mubr.msk.f32.vlgmr.msra.gmra.mrb[66].mxu0 %vm1631_vm2, %v11501_v34  ;;  %v12032_v44 = vadd.f32 %v11615_v5, %v1306_v51 }
 0x21c   :  { %15447 = vst [vmem:[#allocation14_spill] sm:$0xff] %v12024_v29  ;;  %15448 = vst [vmem:[#allocation16_spill] sm:$0xff] %v12027_v28  ;;  %8637 = vmatpush3.bf16.xpose.msk.msra.mxu1 %vm11521_vm3, %v12024_v29  ;;  %8641 = vmatpush3.bf16.msra.mxu0 %v11531_v10 }
 0x21d   :  { %15449 = vst [vmem:[#allocation101_spill] sm:$0xff] %v12032_v44  ;;  %8643 = vmatprep.subr.bf16.mxu0 %v11549_v12  ;;  %8671 = vmatprep.subr.bf16.mxu1 %v11759_v7  ;;  %v8478_v53 = vpop.f32.mrb[82].mxu1 }
 0x21e   :  { %v12043_v23 = vadd.f32 %v8478_v53, %v11615_v5  ;;  %v1316_v31 = vpop.f32.mrb[83].mxu1 }
 0x21f   :  { %v12046_v51 = vadd.f32 %v11615_v5, %v1316_v31 }
 0x220   :  { %15450 = vst [vmem:[#allocation102_spill] sm:$0xff] %v12043_v23  ;;  %8645 = vmatpush3.bf16.msra.mxu0 %v11564_v61 }
 0x221   :  { %15451 = vst [vmem:[#allocation103_spill] sm:$0xff] %v12046_v51  ;;  %8647 = vmatprep.subr.bf16.mxu0 %v11566_v20  ;;  %v8481_v35 = vpop.f32.mrb[84].mxu1 }
 0x222   :  { %v12053_v39 = vadd.f32 %v8481_v35, %v11615_v5  ;;  %v1326_v3 = vpop.f32.mrb[85].mxu1 }
 0x223   :  { %7609 = vmatmul.mubr.msk.f32.vlgmr.msra.gmra.mrb[126].mxu1 %vm1631_vm2, %v11501_v34  ;;  %v12058_v53 = vadd.f32 %v11615_v5, %v1326_v3 }
 0x224   :  { %15452 = vst [vmem:[#allocation104_spill] sm:$0xff] %v12053_v39  ;;  %8649 = vmatpush3.bf16.msra.mxu0 %v11590_v52  ;;  %8673 = vmatpush3.bf16.msra.mxu1 %v11757_v32 }
 0x225   :  { %15453 = vst [vmem:[#allocation105_spill] sm:$0xff] %v12058_v53  ;;  %8651 = vmatprep.subr.bf16.mxu0 %v11592_v57  ;;  %8675 = vmatprep.subr.bf16.mxu1 %v11798_v6  ;;  %v8484_v35 = vpop.f32.mrb[86].mxu1 }
 0x226   :  { %v12067_v40 = vadd.f32 %v8484_v35, %v11615_v5  ;;  %v1336_v45 = vpop.f32.mrb[87].mxu1 }
 0x227   :  { %v12070_v34 = vadd.f32 %v11615_v5, %v1336_v45 }
 0x228   :  { %15454 = vst [vmem:[#allocation106_spill] sm:$0xff] %v12067_v40  ;;  %8653 = vmatpush3.bf16.msra.mxu0 %v11617_v62  ;;  %8677 = vmatpush3.bf16.msra.mxu1 %v11795_v41 }
 0x229   :  { %15455 = vst [vmem:[#allocation107_spill] sm:$0xff] %v12070_v34  ;;  %8655 = vmatprep.subr.bf16.mxu0 %v11625_v0  ;;  %8679 = vmatprep.subr.bf16.mxu1 %v11829_v54  ;;  %v8487_v31 = vpop.f32.mrb[88].mxu1 }
 0x22a   :  { %v12079_v33 = vadd.f32 %v8487_v31, %v11615_v5  ;;  %v1346_v35 = vpop.f32.mrb[89].mxu1 }
 0x22b   :  { %v12082_v9 = vadd.f32 %v11615_v5, %v1346_v35 }
 0x22c   :  { %15456 = vst [vmem:[#allocation108_spill] sm:$0xff] %v12079_v33  ;;  %8657 = vmatpush3.bf16.msra.mxu0 %v11653_v1  ;;  %8681 = vmatpush3.bf16.msra.mxu1 %v11834_v24 }
 0x22d   :  { %15457 = vst [vmem:[#allocation109_spill] sm:$0xff] %v12082_v9  ;;  %8659 = vmatprep.subr.bf16.mxu0 %v11663_v14  ;;  %8683 = vmatprep.subr.bf16.mxu1 %v11870_v46  ;;  %v8490_v3 = vpop.f32.mrb[90].mxu1 }
 0x22e   :  { %v12091_v34 = vadd.f32 %v8490_v3, %v11615_v5  ;;  %v1356_v31 = vpop.f32.mrb[91].mxu1 }
 0x22f   :  { %v12094_v40 = vadd.f32 %v11615_v5, %v1356_v31 }
 0x230   :  { %15458 = vst [vmem:[#allocation110_spill] sm:$0xff] %v12091_v34  ;;  %8661 = vmatpush3.bf16.msra.mxu0 %v11780_v58  ;;  %8685 = vmatpush3.bf16.msra.mxu1 %v11868_v43 }
 0x231   :  { %15459 = vst [vmem:[#allocation111_spill] sm:$0xff] %v12094_v40  ;;  %8663 = vmatprep.subr.bf16.mxu0 %v11853_v2  ;;  %8687 = vmatprep.subr.bf16.mxu1 %v11908_v21  ;;  %v8493_v45 = vpop.f32.mrb[92].mxu1 }
 0x232   :  { %v12103_v9 = vadd.f32 %v8493_v45, %v11615_v5  ;;  %v1366_v3 = vpop.f32.mrb[93].mxu1  ;;  %v12118_v45 = vpop.f32.mrb[64].mxu0 }
 0x233   :  { %v12106_v33 = vadd.f32 %v11615_v5, %v1366_v3  ;;  %15464 = vst [vmem:[#allocation116_spill] sm:$0xff] %v12118_v45  ;;  %v12122_v5 = vpop.f32.mrb[65].mxu0 }
 0x234   :  { %15460 = vst [vmem:[#allocation112_spill] sm:$0xff] %v12103_v9  ;;  %8665 = vmatpush3.bf16.msra.mxu0 %v11890_v26  ;;  %8689 = vmatpush3.bf16.msra.mxu1 %v11906_v42  ;;  %15465 = vst [vmem:[#allocation117_spill] sm:$0xff] %v12122_v5 }
 0x235   :  { %15461 = vst [vmem:[#allocation113_spill] sm:$0xff] %v12106_v33  ;;  %8667 = vmatprep.subr.bf16.mxu0 %v11956_v59  ;;  %8691 = vmatprep.subr.bf16.mxu1 %v11938_v22  ;;  %v12114_v35 = vpop.f32.mrb[94].mxu1 }
 0x236   :  { %15462 = vst [vmem:[#allocation114_spill] sm:$0xff] %v12114_v35  ;;  %v12116_v40 = vpop.f32.mrb[95].mxu1 }
 0x237   :  { %15463 = vst [vmem:[#allocation115_spill] sm:$0xff] %v12116_v40 }
 0x238   :  { %8669 = vmatpush3.bf16.msra.mxu0 %v11993_v17  ;;  %8693 = vmatpush3.bf16.msra.mxu1 %v11936_v60 }
 0x239   :  { %8695 = vmatprep.subr.bf16.mxu1 %v11973_v15  ;;  %8704 = vmatprep.subr.msk.bf16.mxu0 %vm11521_vm3, %v11525_v25  ;;  %v12128_v3 = vpop.f32.mrb[96].mxu1 }
 0x23a   :  { %15466 = vst [vmem:[#allocation118_spill] sm:$0xff] %v12128_v3  ;;  %v12130_v31 = vpop.f32.mrb[97].mxu1 }
 0x23b   :  { %15467 = vst [vmem:[#allocation119_spill] sm:$0xff] %v12130_v31 }
 0x23c   :  { %8697 = vmatpush3.bf16.msra.mxu1 %v11978_v13 }
 0x23d   :  { %8699 = vmatprep.subr.bf16.mxu1 %v12009_v18  ;;  %v12134_v45 = vpop.f32.mrb[98].mxu1 }
 0x23e   :  { %15468 = vst [vmem:[#allocation120_spill] sm:$0xff] %v12134_v45  ;;  %v12136_v35 = vpop.f32.mrb[99].mxu1 }
 0x23f   :  { %15469 = vst [vmem:[#allocation121_spill] sm:$0xff] %v12136_v35 }
 0x240   :  { %8701 = vmatpush3.bf16.msra.mxu1 %v12024_v29 }
 0x241   :  { %8752 = vmatprep.subr.msk.bf16.mxu1 %vm11521_vm3, %v11759_v7  ;;  %v12142_v5 = vpop.f32.mrb[100].mxu1 }
 0x242   :  { %15470 = vst [vmem:[#allocation122_spill] sm:$0xff] %v12142_v5  ;;  %v12144_v33 = vpop.f32.mrb[101].mxu1 }
 0x243   :  { %15471 = vst [vmem:[#allocation123_spill] sm:$0xff] %v12144_v33 }
 0x245   :  { %v12146_v3 = vpop.f32.mrb[102].mxu1 }
 0x246   :  { %15472 = vst [vmem:[#allocation124_spill] sm:$0xff] %v12146_v3  ;;  %v12148_v31 = vpop.f32.mrb[103].mxu1 }
 0x247   :  { %15473 = vst [vmem:[#allocation125_spill] sm:$0xff] %v12148_v31 }
 0x249   :  { %v12150_v9 = vpop.f32.mrb[104].mxu1 }
 0x24a   :  { %15474 = vst [vmem:[#allocation126_spill] sm:$0xff] %v12150_v9  ;;  %v12152_v34 = vpop.f32.mrb[105].mxu1 }
 0x24b   :  { %15475 = vst [vmem:[#allocation127_spill] sm:$0xff] %v12152_v34 }
 0x24d   :  { %v12154_v45 = vpop.f32.mrb[106].mxu1 }
 0x24e   :  { %15476 = vst [vmem:[#allocation128_spill] sm:$0xff] %v12154_v45  ;;  %v12156_v35 = vpop.f32.mrb[107].mxu1 }
 0x24f   :  { %15477 = vst [vmem:[#allocation129_spill] sm:$0xff] %v12156_v35 }
 0x251   :  { %v12158_v53 = vpop.f32.mrb[108].mxu1 }
 0x252   :  { %15478 = vst [vmem:[#allocation130_spill] sm:$0xff] %v12158_v53  ;;  %v12160_v39 = vpop.f32.mrb[109].mxu1 }
 0x253   :  { %15479 = vst [vmem:[#allocation131_spill] sm:$0xff] %v12160_v39 }
 0x255   :  { %v12162_v47 = vpop.f32.mrb[110].mxu1 }
 0x256   :  { %15480 = vst [vmem:[#allocation132_spill] sm:$0xff] %v12162_v47  ;;  %v12164_v5 = vpop.f32.mrb[111].mxu1 }
 0x257   :  { %15481 = vst [vmem:[#allocation133_spill] sm:$0xff] %v12164_v5 }
 0x259   :  { %v12166_v33 = vpop.f32.mrb[112].mxu1 }
 0x25a   :  { %15482 = vst [vmem:[#allocation134_spill] sm:$0xff] %v12166_v33  ;;  %v12168_v3 = vpop.f32.mrb[113].mxu1 }
 0x25b   :  { %15483 = vst [vmem:[#allocation135_spill] sm:$0xff] %v12168_v3 }
 0x25d   :  { %v12170_v31 = vpop.f32.mrb[114].mxu1 }
 0x25e   :  { %15484 = vst [vmem:[#allocation136_spill] sm:$0xff] %v12170_v31  ;;  %v12172_v9 = vpop.f32.mrb[115].mxu1 }
 0x25f   :  { %15485 = vst [vmem:[#allocation137_spill] sm:$0xff] %v12172_v9  ;;  %v2229_v9 = vpop.permute.xlu0 %2228 }
 0x261   :  { %v12174_v34 = vpop.f32.mrb[116].mxu1 }
 0x262   :  { %15486 = vst [vmem:[#allocation138_spill] sm:$0xff] %v12174_v34  ;;  %v12176_v45 = vpop.f32.mrb[117].mxu1  ;;  %v2232_v34 = vrot.slane %v2229_v9, 1  ;;  %v14991_v9 = vlaneseq }
 0x263   :  { %15487 = vst [vmem:[#allocation139_spill] sm:$0xff] %v12176_v45 }
 0x265   :  { %v12178_v35 = vpop.f32.mrb[118].mxu1 }
 0x266   :  { %15488 = vst [vmem:[#allocation140_spill] sm:$0xff] %v12178_v35  ;;  %v12180_v53 = vpop.f32.mrb[119].mxu1 }
 0x267   :  { %15489 = vst [vmem:[#allocation141_spill] sm:$0xff] %v12180_v53 }
 0x269   :  { %v12182_v39 = vpop.f32.mrb[120].mxu1 }
 0x26a   :  { %15490 = vst [vmem:[#allocation142_spill] sm:$0xff] %v12182_v39  ;;  %v12184_v47 = vpop.f32.mrb[121].mxu1 }
 0x26b   :  { %15491 = vst [vmem:[#allocation143_spill] sm:$0xff] %v12184_v47 }
 0x26d   :  { %v12186_v5 = vpop.f32.mrb[122].mxu1 }
 0x26e   :  { %15492 = vst [vmem:[#allocation144_spill] sm:$0xff] %v12186_v5  ;;  %v12188_v33 = vpop.f32.mrb[123].mxu1 }
 0x26f   :  { %15493 = vst [vmem:[#allocation145_spill] sm:$0xff] %v12188_v33 }
 0x271   :  { %v12190_v3 = vpop.f32.mrb[124].mxu1 }
 0x272   :  { %15494 = vst [vmem:[#allocation146_spill] sm:$0xff] %v12190_v3  ;;  %v12192_v31 = vpop.f32.mrb[125].mxu1 }
 0x273   :  { %15495 = vst [vmem:[#allocation147_spill] sm:$0xff] %v12192_v31 }
 0x2ee   :  { %v2494_v63 = vpop.f32.mrb[66].mxu0 }
 0x2ef   :  { %v2495_v45 = vadd.f32 %v2494_v63, %v2232_v34  ;;  %v2496_v51 = vpop.f32.mrb[67].mxu0 }
 0x2f0   :  { %v2497_v35 = vadd.f32 %v2496_v51, %v2232_v34 }
 0x2f1   :  { %v2570_v23 = vsub.f32 0.0, %v2495_v45 }
 0x2f2   :  { %v2571_v53 = vsub.f32 0.0, %v2497_v35 }
 0x2f3   :  { %v2574_v11 = vmul.f32 1.442695, %v2570_v23  ;;  %v12195_v23 = vshrl.u32 %v14991_v9, 7 }
 0x2f4   :  { %v2576_v39 = vmul.f32 1.442695, %v2571_v53 }
 0x2f5   :  { %9563 = vpow2.f32 %v2574_v11  ;;  %15496 = vst [vmem:[#allocation148_spill] sm:$0xff] %v12195_v23  ;;  %v2597_v11 = vsub.s32 0, %v12195_v23 }
 0x2f6   :  { %9565 = vpow2.f32 %v2576_v39  ;;  %v2565_v47 = vpop.f32.mrb[126].mxu1 }
 0x2f7   :  { %v2566_v5 = vadd.f32 %v2565_v47, %v2232_v34  ;;  %v2567_v38 = vpop.f32.mrb[127].mxu1 }
 0x2f8   :  { %v2568_v33 = vadd.f32 %v2567_v38, %v2232_v34  ;;  %v2208_v38 = vld [vmem:[%s14865_s5] sm:$0xf] }
 0x2f9   :  { %v2572_v30 = vsub.f32 0.0, %v2566_v5  ;;  %v12205_v53 = vrot.slane %v2208_v38, %v2597_v11 }
 0x2fa   :  { %v2573_v3 = vsub.f32 0.0, %v2568_v33 }
 0x2fb   :  { %v2578_v49 = vmul.f32 1.442695, %v2572_v30  ;;  %v2601_v30 = vsub.s32 1, %v12195_v23 }
 0x2fc   :  { %v2580_v31 = vmul.f32 1.442695, %v2573_v3 }
 0x2fd   :  { %9567 = vpow2.f32 %v2578_v49  ;;  %v12207_v34 = vrot.slane %v2208_v38, %v2601_v30 }
 0x2fe   :  { %9569 = vpow2.f32 %v2580_v31 }
 0x2ff   :  { %v9564_v63 = vpop.eup %9563 }
 0x300   :  { %v9566_v44 = vpop.eup %9565  ;;  %v2582_v51 = vadd.f32 1.0, %v9564_v63 }
 0x301   :  { %v2583_v45 = vadd.f32 1.0, %v9566_v44  ;;  %v2209_v44 = vld [vmem:[%s14866_s6] sm:$0xf] }
 0x302   :  { %9571 = vrcp.f32 %v2582_v51  ;;  %v12209_v35 = vrot.slane %v2209_v44, %v2597_v11  ;;  %v12211_v5 = vrot.slane %v2209_v44, %v2601_v30  ;;  %v2605_v51 = vsub.s32 2, %v12195_v23 }
 0x303   :  { %9573 = vrcp.f32 %v2583_v45 }
 0x307   :  { %v9568_v49 = vpop.eup %9567 }
 0x308   :  { %v9570_v47 = vpop.eup %9569  ;;  %v2584_v33 = vadd.f32 1.0, %v9568_v49  ;;  %v2609_v49 = vsub.s32 3, %v12195_v23 }
 0x309   :  { %v2585_v39 = vadd.f32 1.0, %v9570_v47 }
 0x30a   :  { %9575 = vrcp.f32 %v2584_v33  ;;  %v12223_v9 = vrot.slane %v2208_v38, %v2609_v49 }
 0x30b   :  { %9577 = vrcp.f32 %v2585_v39  ;;  %v12219_v39 = vrot.slane %v2208_v38, %v2605_v51 }
 0x30c   :  { %v9572_v31 = vpop.eup %9571 }
 0x30d   :  { %v9574_v3 = vpop.eup %9573  ;;  %v2615_v63 = vsub.f32 %v9572_v31, %v12205_v53  ;;  %v12225_v31 = vrot.slane %v2209_v44, %v2605_v51 }
 0x30e   :  { %v2616_v45 = vsub.f32 %v9574_v3, %v12207_v34 }
 0x30f   :  { %v2640_v47 = vmul.f32 %v12209_v35, %v2615_v63  ;;  %v12230_v63 = vrot.slane %v2209_v44, %v2609_v49 }
 0x310   :  { %v2641_v33 = vmul.f32 %v12211_v5, %v2616_v45 }
 0x311   :  { %v2785_v11 = vsel %vm2784_vm4, %v2640_v47, 0.0 }
 0x312   :  { %2708 = vmatprep.mubr.f32.mxu0 %v2641_v33  ;;  %v2786_v30 = vsel %vm2784_vm4, %v2641_v33, 0.0 }
 0x313   :  { %2709 = vmatmul.mubr.f32.vlgmr.msra.gmra.mrb[68].mxu0 %v2640_v47  ;;  %v2787_v3 = vadd.f32 %v2786_v30, %v2785_v11 }
 0x314   :  { %v9576_v28 = vpop.eup %9575  ;;  %8707 = vmatpush3.bf16.xpose.msk.msra.mxu0 %vm11521_vm3, %v11531_v10 }
 0x315   :  { %v9578_v45 = vpop.eup %9577  ;;  %8710 = vmatprep.subr.msk.bf16.mxu0 %vm11521_vm3, %v11549_v12  ;;  %v2617_v33 = vsub.f32 %v9576_v28, %v12219_v39 }
 0x316   :  { %v2618_v38 = vsub.f32 %v9578_v45, %v12223_v9 }
 0x317   :  { %v2642_v51 = vmul.f32 %v12225_v31, %v2617_v33 }
 0x318   :  { %v2643_v47 = vmul.f32 %v12230_v63, %v2618_v38 }
 0x319   :  { %v2788_v11 = vsel %vm2784_vm4, %v2642_v51, 0.0 }
 0x31a   :  { %2778 = vmatprep.mubr.f32.mxu1 %v2643_v47  ;;  %v2789_v30 = vadd.f32 %v2788_v11, %v2787_v3  ;;  %v2790_v44 = vsel %vm2784_vm4, %v2643_v47, 0.0 }
 0x31b   :  { %2779 = vmatmul.mubr.f32.vlgmr.msra.gmra.mrb[128].mxu1 %v2642_v51 }
 0x31c   :  { %8713 = vmatpush3.bf16.xpose.msk.msra.mxu0 %vm11521_vm3, %v11564_v61  ;;  %8755 = vmatpush3.bf16.xpose.msk.msra.mxu1 %vm11521_vm3, %v11757_v32  ;;  %v2791_v28 = vadd.f32 %v2790_v44, %v2789_v30 }
 0x31d   :  { %8716 = vmatprep.subr.msk.bf16.mxu0 %vm11521_vm3, %v11566_v20  ;;  %8758 = vmatprep.subr.msk.bf16.mxu1 %vm11521_vm3, %v11798_v6 }
 0x31e   :  { %2792 = vadd.xlane.f32.xlu1 %v2791_v28 }
 0x324   :  { %8719 = vmatpush3.bf16.xpose.msk.msra.mxu0 %vm11521_vm3, %v11590_v52  ;;  %8761 = vmatpush3.bf16.xpose.msk.msra.mxu1 %vm11521_vm3, %v11795_v41 }
 0x325   :  { %8722 = vmatprep.subr.msk.bf16.mxu0 %vm11521_vm3, %v11592_v57  ;;  %8764 = vmatprep.subr.msk.bf16.mxu1 %vm11521_vm3, %v11829_v54 }
 0x32c   :  { %8725 = vmatpush3.bf16.xpose.msk.msra.mxu0 %vm11521_vm3, %v11617_v62  ;;  %8767 = vmatpush3.bf16.xpose.msk.msra.mxu1 %vm11521_vm3, %v11834_v24 }
 0x32d   :  { %8728 = vmatprep.subr.msk.bf16.mxu0 %vm11521_vm3, %v11625_v0  ;;  %8770 = vmatprep.subr.msk.bf16.mxu1 %vm11521_vm3, %v11870_v46 }
 0x334   :  { %8731 = vmatpush3.bf16.xpose.msk.msra.mxu0 %vm11521_vm3, %v11653_v1  ;;  %8773 = vmatpush3.bf16.xpose.msk.msra.mxu1 %vm11521_vm3, %v11868_v43 }
 0x335   :  { %8734 = vmatprep.subr.msk.bf16.mxu0 %vm11521_vm3, %v11663_v14  ;;  %8776 = vmatprep.subr.msk.bf16.mxu1 %vm11521_vm3, %v11908_v21 }
 0x33c   :  { %8737 = vmatpush3.bf16.xpose.msk.msra.mxu0 %vm11521_vm3, %v11780_v58  ;;  %8779 = vmatpush3.bf16.xpose.msk.msra.mxu1 %vm11521_vm3, %v11906_v42 }
 0x33d   :  { %8740 = vmatprep.subr.msk.bf16.mxu0 %vm11521_vm3, %v11853_v2  ;;  %8782 = vmatprep.subr.msk.bf16.mxu1 %vm11521_vm3, %v11938_v22 }
 0x344   :  { %8743 = vmatpush3.bf16.xpose.msk.msra.mxu0 %vm11521_vm3, %v11890_v26  ;;  %8785 = vmatpush3.bf16.xpose.msk.msra.mxu1 %vm11521_vm3, %v11936_v60 }
 0x345   :  { %8746 = vmatprep.subr.msk.bf16.mxu0 %vm11521_vm3, %v11956_v59  ;;  %8788 = vmatprep.subr.msk.bf16.mxu1 %vm11521_vm3, %v11973_v15 }
 0x34c   :  { %8749 = vmatpush3.bf16.xpose.msk.msra.mxu0 %vm11521_vm3, %v11993_v17  ;;  %8791 = vmatpush3.bf16.xpose.msk.msra.mxu1 %vm11521_vm3, %v11978_v13 }
 0x34d   :  { %8794 = vmatprep.subr.msk.bf16.mxu1 %vm11521_vm3, %v12009_v18  ;;  %8799 = vmatprep.subr.bf16.mxu0 %v11525_v25 }
 0x354   :  { %8797 = vmatpush3.bf16.xpose.msk.msra.mxu1 %vm11521_vm3, %v12024_v29 }
 0x355   :  { %8831 = vmatprep.subr.bf16.mxu1 %v11759_v7 }
 0x3ab   :  { %v2793_v49 = vpop.xlane.xlu1 %2792 }
 0x3ac   :  { %v2799_v3 = vmul.f32 0.2, %v2793_v49 }
 0x3ae   :  { %v2801_v45 = vrot.slane %v2799_v3, 7 }
 0x3b0   :  { %v12328_v33 = vsub.f32 %v11684_v37, %v2801_v45 }
 0x3b2   :  { %2806 = vperm.xlu1 %9434, %v12328_v33  }
 0x3e6   :  { %v7642_v38 = vpop.f32.mrb[68].mxu0 }
 0x3e7   :  { %v7643_v51 = vpop.f32.mrb[69].mxu0 }
 0x3e8   :  { %v7644_v47 = vadd.f32 %v7643_v51, %v7642_v38 }
 0x3ee   :  { %v7677_v11 = vpop.f32.mrb[128].mxu1 }
 0x3ef   :  { %v7678_v30 = vpop.f32.mrb[129].mxu1 }
 0x3f0   :  { %v7679_v44 = vadd.f32 %v7678_v30, %v7677_v11 }
 0x3f2   :  { %v2781_v28 = vadd.f32 %v7679_v44, %v7644_v47 }
 0x3f4   :  { %v2794_v23 = vmul.f32 0.2, %v2781_v28 }
 0x3f6   :  { %v2796_v50 = vrot.slane %v2794_v23, 7 }
 0x3f8   :  { %v12332_v19 = vsub.f32 %v15497_v55, %v2796_v50 }
 0x3fa   :  { %v2809_v49 = vrot.slane %v12332_v19, 1 }
 0x3fc   :  { %7712 = vmatprep.mubr.msk.f32.mxu0 %vm1631_vm2, %v2809_v49  ;;  %7746 = vmatprep.mubr.msk.f32.mxu1 %vm1631_vm2, %v2809_v49 }
 0x3fd   :  { %7713 = vmatmul.mubr.msk.f32.vlgmr.msra.gmra.mrb[70].mxu0 %vm1631_vm2, %v2809_v49  ;;  %7747 = vmatmul.mubr.msk.f32.vlgmr.msra.gmra.mrb[130].mxu1 %vm1631_vm2, %v2809_v49 }
 0x3fe   :  { %8801 = vmatpush3.bf16.msra.mxu0 %v11531_v10  ;;  %8833 = vmatpush3.bf16.msra.mxu1 %v11757_v32 }
 0x3ff   :  { %8803 = vmatprep.subr.bf16.mxu0 %v11549_v12  ;;  %8835 = vmatprep.subr.bf16.mxu1 %v11798_v6 }
 0x402   :  { %8805 = vmatpush3.bf16.msra.mxu0 %v11564_v61  ;;  %8837 = vmatpush3.bf16.msra.mxu1 %v11795_v41 }
 0x403   :  { %8807 = vmatprep.subr.bf16.mxu0 %v11566_v20  ;;  %8839 = vmatprep.subr.bf16.mxu1 %v11829_v54 }
 0x406   :  { %8809 = vmatpush3.bf16.msra.mxu0 %v11590_v52  ;;  %8841 = vmatpush3.bf16.msra.mxu1 %v11834_v24 }
 0x407   :  { %8811 = vmatprep.subr.bf16.mxu0 %v11592_v57  ;;  %8843 = vmatprep.subr.bf16.mxu1 %v11870_v46 }
 0x40a   :  { %8813 = vmatpush3.bf16.msra.mxu0 %v11617_v62  ;;  %8845 = vmatpush3.bf16.msra.mxu1 %v11868_v43 }
 0x40b   :  { %8815 = vmatprep.subr.bf16.mxu0 %v11625_v0  ;;  %8847 = vmatprep.subr.bf16.mxu1 %v11908_v21 }
 0x40e   :  { %8817 = vmatpush3.bf16.msra.mxu0 %v11653_v1  ;;  %8849 = vmatpush3.bf16.msra.mxu1 %v11906_v42 }
 0x40f   :  { %8819 = vmatprep.subr.bf16.mxu0 %v11663_v14  ;;  %8851 = vmatprep.subr.bf16.mxu1 %v11938_v22 }
 0x412   :  { %8821 = vmatpush3.bf16.msra.mxu0 %v11780_v58  ;;  %8853 = vmatpush3.bf16.msra.mxu1 %v11936_v60 }
 0x413   :  { %8823 = vmatprep.subr.bf16.mxu0 %v11853_v2  ;;  %8855 = vmatprep.subr.bf16.mxu1 %v11973_v15 }
 0x416   :  { %8825 = vmatpush3.bf16.msra.mxu0 %v11890_v26  ;;  %8857 = vmatpush3.bf16.msra.mxu1 %v11978_v13 }
 0x417   :  { %8827 = vmatprep.subr.bf16.mxu0 %v11956_v59  ;;  %8859 = vmatprep.subr.bf16.mxu1 %v12009_v18 }
 0x41a   :  { %8829 = vmatpush3.bf16.msra.mxu0 %v11993_v17  ;;  %8861 = vmatpush3.bf16.msra.mxu1 %v12024_v29 }
 0x41b   :  { %8864 = vmatprep.subr.msk.bf16.mxu0 %vm11521_vm3, %v11525_v25  ;;  %8912 = vmatprep.subr.msk.bf16.mxu1 %vm11521_vm3, %v11759_v7 }
 0x431   :  { %v2807_v37 = vpop.permute.xlu1 %2806 }
 0x432   :  { %v2810_v55 = vrot.slane %v2807_v37, 1 }
 0x4d0   :  { %v2880_v50 = vpop.f32.mrb[70].mxu0  ;;  %v2951_v23 = vpop.f32.mrb[130].mxu1 }
 0x4d1   :  { %v2881_v3 = vadd.f32 %v2880_v50, %v2810_v55  ;;  %v2952_v45 = vadd.f32 %v2951_v23, %v2810_v55  ;;  %v2882_v38 = vpop.f32.mrb[71].mxu0  ;;  %v2953_v51 = vpop.f32.mrb[131].mxu1 }
 0x4d2   :  { %v2883_v47 = vadd.f32 %v2882_v38, %v2810_v55  ;;  %v2954_v11 = vadd.f32 %v2953_v51, %v2810_v55 }
 0x4d3   :  { %v2956_v30 = vsub.f32 0.0, %v2881_v3  ;;  %v2958_v44 = vsub.f32 0.0, %v2952_v45 }
 0x4d4   :  { %v2957_v28 = vsub.f32 0.0, %v2883_v47  ;;  %v2959_v49 = vsub.f32 0.0, %v2954_v11 }
 0x4d5   :  { %v2960_v27 = vmul.f32 1.442695, %v2956_v30  ;;  %v2964_v56 = vmul.f32 1.442695, %v2958_v44 }
 0x4d6   :  { %v2962_v40 = vmul.f32 1.442695, %v2957_v28  ;;  %v2966_v48 = vmul.f32 1.442695, %v2959_v49 }
 0x4d7   :  { %9579 = vpow2.f32 %v2960_v27 }
 0x4d8   :  { %9581 = vpow2.f32 %v2964_v56 }
 0x4d9   :  { %9583 = vpow2.f32 %v2962_v40 }
 0x4da   :  { %9585 = vpow2.f32 %v2966_v48 }
 0x4e1   :  { %v9580_v37 = vpop.eup %9579 }
 0x4e2   :  { %v9582_v4 = vpop.eup %9581  ;;  %v2968_v50 = vadd.f32 1.0, %v9580_v37 }
 0x4e3   :  { %v9584_v23 = vpop.eup %9583  ;;  %v2970_v16 = vadd.f32 1.0, %v9582_v4 }
 0x4e4   :  { %v9586_v8 = vpop.eup %9585  ;;  %9587 = vrcp.f32 %v2968_v50  ;;  %v2969_v55 = vadd.f32 1.0, %v9584_v23 }
 0x4e5   :  { %9589 = vrcp.f32 %v2970_v16  ;;  %v2971_v3 = vadd.f32 1.0, %v9586_v8 }
 0x4e6   :  { %9591 = vrcp.f32 %v2969_v55 }
 0x4e7   :  { %9593 = vrcp.f32 %v2971_v3 }
 0x4ee   :  { %v9588_v45 = vpop.eup %9587 }
 0x4ef   :  { %v9590_v38 = vpop.eup %9589  ;;  %v2980_v51 = vsub.f32 %v9588_v45, %v12205_v53 }
 0x4f0   :  { %v9592_v27 = vpop.eup %9591  ;;  %v2982_v56 = vsub.f32 %v9590_v38, %v12219_v39 }
 0x4f1   :  { %v9594_v48 = vpop.eup %9593  ;;  %v2981_v40 = vsub.f32 %v9592_v27, %v12207_v34  ;;  %v2984_v47 = vmul.f32 %v2980_v51, %v12209_v35 }
 0x4f2   :  { %v2983_v4 = vsub.f32 %v9594_v48, %v12223_v9  ;;  %v2986_v16 = vmul.f32 %v2982_v56, %v12225_v31 }
 0x4f3   :  { %v2985_v11 = vmul.f32 %v2981_v40, %v12211_v5  ;;  %v3128_v8 = vsel %vm2784_vm4, %v2984_v47, 0.0 }
 0x4f4   :  { %v2987_v30 = vmul.f32 %v2983_v4, %v12230_v63  ;;  %v3131_v49 = vsel %vm2784_vm4, %v2986_v16, 0.0 }
 0x4f5   :  { %3052 = vmatprep.mubr.f32.mxu0 %v2985_v11  ;;  %v3129_v44 = vsel %vm2784_vm4, %v2985_v11, 0.0 }
 0x4f6   :  { %3122 = vmatprep.mubr.f32.mxu1 %v2987_v30  ;;  %3053 = vmatmul.mubr.f32.vlgmr.msra.gmra.mrb[72].mxu0 %v2984_v47  ;;  %v3130_v28 = vadd.f32 %v3129_v44, %v3128_v8  ;;  %v3133_v50 = vsel %vm2784_vm4, %v2987_v30, 0.0  ;;  %v15502_v44 = vld [vmem:[#allocation73_spill] sm:$0xff] }
 0x4f7   :  { %3123 = vmatmul.mubr.f32.vlgmr.msra.gmra.mrb[132].mxu1 %v2986_v16  ;;  %8867 = vmatpush3.bf16.xpose.msk.msra.mxu0 %vm11521_vm3, %v11531_v10 }
 0x4f8   :  { %8915 = vmatpush3.bf16.xpose.msk.msra.mxu1 %vm11521_vm3, %v11757_v32  ;;  %8870 = vmatprep.subr.msk.bf16.mxu0 %vm11521_vm3, %v11549_v12  ;;  %v3132_v37 = vadd.f32 %v3131_v49, %v3130_v28  ;;  %v15504_v49 = vld [vmem:[#allocation15_spill] sm:$0xff] }
 0x4f9   :  { %8918 = vmatprep.subr.msk.bf16.mxu1 %vm11521_vm3, %v11798_v6 }
 0x4fa   :  { %v3134_v23 = vadd.f32 %v3133_v50, %v3132_v37  ;;  %v15505_v37 = vld [vmem:[#allocation100_spill] sm:$0xff] }
 0x4fb   :  { %v15506_v50 = vpack.c.bf16 %v15504_v49, %v15505_v37 }
 0x4fc   :  { %3135 = vadd.xlane.f32.xlu1 %v3134_v23 }
 0x4ff   :  { %8873 = vmatpush3.bf16.xpose.msk.msra.mxu0 %vm11521_vm3, %v11564_v61 }
 0x500   :  { %8921 = vmatpush3.bf16.xpose.msk.msra.mxu1 %vm11521_vm3, %v11795_v41  ;;  %8876 = vmatprep.subr.msk.bf16.mxu0 %vm11521_vm3, %v11566_v20 }
 0x501   :  { %8924 = vmatprep.subr.msk.bf16.mxu1 %vm11521_vm3, %v11829_v54 }
 0x507   :  { %8879 = vmatpush3.bf16.xpose.msk.msra.mxu0 %vm11521_vm3, %v11590_v52 }
 0x508   :  { %8927 = vmatpush3.bf16.xpose.msk.msra.mxu1 %vm11521_vm3, %v11834_v24  ;;  %8882 = vmatprep.subr.msk.bf16.mxu0 %vm11521_vm3, %v11592_v57 }
 0x509   :  { %8930 = vmatprep.subr.msk.bf16.mxu1 %vm11521_vm3, %v11870_v46 }
 0x50f   :  { %8885 = vmatpush3.bf16.xpose.msk.msra.mxu0 %vm11521_vm3, %v11617_v62 }
 0x510   :  { %8933 = vmatpush3.bf16.xpose.msk.msra.mxu1 %vm11521_vm3, %v11868_v43  ;;  %8888 = vmatprep.subr.msk.bf16.mxu0 %vm11521_vm3, %v11625_v0 }
 0x511   :  { %8936 = vmatprep.subr.msk.bf16.mxu1 %vm11521_vm3, %v11908_v21 }
 0x517   :  { %8891 = vmatpush3.bf16.xpose.msk.msra.mxu0 %vm11521_vm3, %v11653_v1 }
 0x518   :  { %8939 = vmatpush3.bf16.xpose.msk.msra.mxu1 %vm11521_vm3, %v11906_v42  ;;  %8894 = vmatprep.subr.msk.bf16.mxu0 %vm11521_vm3, %v11663_v14 }
 0x519   :  { %8942 = vmatprep.subr.msk.bf16.mxu1 %vm11521_vm3, %v11938_v22 }
 0x51f   :  { %8897 = vmatpush3.bf16.xpose.msk.msra.mxu0 %vm11521_vm3, %v11780_v58 }
 0x520   :  { %8945 = vmatpush3.bf16.xpose.msk.msra.mxu1 %vm11521_vm3, %v11936_v60  ;;  %8900 = vmatprep.subr.msk.bf16.mxu0 %vm11521_vm3, %v11853_v2 }
 0x521   :  { %8948 = vmatprep.subr.msk.bf16.mxu1 %vm11521_vm3, %v11973_v15 }
 0x527   :  { %8903 = vmatpush3.bf16.xpose.msk.msra.mxu0 %vm11521_vm3, %v11890_v26 }
 0x528   :  { %8951 = vmatpush3.bf16.xpose.msk.msra.mxu1 %vm11521_vm3, %v11978_v13  ;;  %8906 = vmatprep.subr.msk.bf16.mxu0 %vm11521_vm3, %v11956_v59 }
 0x529   :  { %8954 = vmatprep.subr.msk.bf16.mxu1 %vm11521_vm3, %v12009_v18 }
 0x52f   :  { %8909 = vmatpush3.bf16.xpose.msk.msra.mxu0 %vm11521_vm3, %v11993_v17 }
 0x530   :  { %8957 = vmatpush3.bf16.xpose.msk.msra.mxu1 %vm11521_vm3, %v12024_v29  ;;  %8959 = vmatprep.subr.bf16.mxu0 %v11525_v25 }
 0x531   :  { %8991 = vmatprep.subr.bf16.mxu1 %v11759_v7 }
 0x589   :  { %v3136_v55 = vpop.xlane.xlu1 %3135 }
 0x58a   :  { %v3142_v3 = vmul.f32 0.2, %v3136_v55 }
 0x58c   :  { %v3144_v45 = vrot.slane %v3142_v3, 7 }
 0x58e   :  { %v12480_v38 = vsub.f32 %v12328_v33, %v3144_v45  ;;  %v15501_v33 = vld [vmem:[#allocation72_spill] sm:$0xff] }
 0x58f   :  { %v15503_v28 = vpack.c.bf16 %v15501_v33, %v15502_v44 }
 0x590   :  { %15498 = vst [vmem:[#allocation31_spill] sm:$0xff] %v12480_v38  ;;  %3149 = vperm.xlu0 %9433, %v12480_v38  }
 0x5c9   :  { %v7780_v51 = vpop.f32.mrb[72].mxu0 }
 0x5ca   :  { %v7815_v27 = vpop.f32.mrb[132].mxu1  ;;  %v7781_v56 = vpop.f32.mrb[73].mxu0 }
 0x5cb   :  { %v7782_v48 = vadd.f32 %v7781_v56, %v7780_v51  ;;  %v7816_v40 = vpop.f32.mrb[133].mxu1 }
 0x5cc   :  { %v7817_v47 = vadd.f32 %v7816_v40, %v7815_v27 }
 0x5ce   :  { %v3125_v4 = vadd.f32 %v7817_v47, %v7782_v48 }
 0x5d0   :  { %v3137_v11 = vmul.f32 0.2, %v3125_v4 }
 0x5d2   :  { %v3139_v16 = vrot.slane %v3137_v11, 7 }
 0x5d4   :  { %v12484_v8 = vsub.f32 %v12332_v19, %v3139_v16  ;;  %v15601_v19 = vld [vmem:[#allocation118_spill] sm:$0xff] }
 0x5d6   :  { %v3152_v30 = vrot.slane %v12484_v8, 1 }
 0x5d8   :  { %7850 = vmatprep.mubr.msk.f32.mxu0 %vm1631_vm2, %v3152_v30  ;;  %7884 = vmatprep.mubr.msk.f32.mxu1 %vm1631_vm2, %v3152_v30 }
 0x5d9   :  { %7851 = vmatmul.mubr.msk.f32.vlgmr.msra.gmra.mrb[74].mxu0 %vm1631_vm2, %v3152_v30  ;;  %7885 = vmatmul.mubr.msk.f32.vlgmr.msra.gmra.mrb[134].mxu1 %vm1631_vm2, %v3152_v30 }
 0x5da   :  { %8961 = vmatpush3.bf16.msra.mxu0 %v11531_v10  ;;  %8993 = vmatpush3.bf16.msra.mxu1 %v11757_v32 }
 0x5db   :  { %8963 = vmatprep.subr.bf16.mxu0 %v11549_v12  ;;  %8995 = vmatprep.subr.bf16.mxu1 %v11798_v6 }
 0x5de   :  { %8965 = vmatpush3.bf16.msra.mxu0 %v11564_v61  ;;  %8997 = vmatpush3.bf16.msra.mxu1 %v11795_v41 }
 0x5df   :  { %8967 = vmatprep.subr.bf16.mxu0 %v11566_v20  ;;  %8999 = vmatprep.subr.bf16.mxu1 %v11829_v54 }
 0x5e2   :  { %8969 = vmatpush3.bf16.msra.mxu0 %v11590_v52  ;;  %9001 = vmatpush3.bf16.msra.mxu1 %v11834_v24 }
 0x5e3   :  { %8971 = vmatprep.subr.bf16.mxu0 %v11592_v57  ;;  %9003 = vmatprep.subr.bf16.mxu1 %v11870_v46 }
 0x5e6   :  { %8973 = vmatpush3.bf16.msra.mxu0 %v11617_v62  ;;  %9005 = vmatpush3.bf16.msra.mxu1 %v11868_v43 }
 0x5e7   :  { %8975 = vmatprep.subr.bf16.mxu0 %v11625_v0  ;;  %9007 = vmatprep.subr.bf16.mxu1 %v11908_v21 }
 0x5ea   :  { %8977 = vmatpush3.bf16.msra.mxu0 %v11653_v1  ;;  %9009 = vmatpush3.bf16.msra.mxu1 %v11906_v42 }
 0x5eb   :  { %8979 = vmatprep.subr.bf16.mxu0 %v11663_v14  ;;  %9011 = vmatprep.subr.bf16.mxu1 %v11938_v22 }
 0x5ee   :  { %8981 = vmatpush3.bf16.msra.mxu0 %v11780_v58  ;;  %9013 = vmatpush3.bf16.msra.mxu1 %v11936_v60 }
 0x5ef   :  { %8983 = vmatprep.subr.bf16.mxu0 %v11853_v2  ;;  %9015 = vmatprep.subr.bf16.mxu1 %v11973_v15 }
 0x5f2   :  { %8985 = vmatpush3.bf16.msra.mxu0 %v11890_v26  ;;  %9017 = vmatpush3.bf16.msra.mxu1 %v11978_v13 }
 0x5f3   :  { %8987 = vmatprep.subr.bf16.mxu0 %v11956_v59  ;;  %9019 = vmatprep.subr.bf16.mxu1 %v12009_v18 }
 0x5f6   :  { %8989 = vmatpush3.bf16.msra.mxu0 %v11993_v17  ;;  %9021 = vmatpush3.bf16.msra.mxu1 %v12024_v29 }
 0x5f7   :  { %9024 = vmatprep.subr.msk.bf16.mxu0 %vm12521_vm6, %v15503_v28  ;;  %9072 = vmatprep.subr.msk.bf16.mxu1 %vm12521_vm6, %v15506_v50 }
 0x60f   :  { %v3150_v23 = vpop.permute.xlu0 %3149 }
 0x610   :  { %v3153_v55 = vrot.slane %v3150_v23, 1 }
 0x6ac   :  { %v3223_v3 = vpop.f32.mrb[74].mxu0  ;;  %v3294_v45 = vpop.f32.mrb[134].mxu1 }
 0x6ad   :  { %v3224_v51 = vadd.f32 %v3223_v3, %v3153_v55  ;;  %v3295_v27 = vadd.f32 %v3294_v45, %v3153_v55  ;;  %v3225_v56 = vpop.f32.mrb[75].mxu0  ;;  %v3296_v48 = vpop.f32.mrb[135].mxu1 }
 0x6ae   :  { %v3226_v40 = vadd.f32 %v3225_v56, %v3153_v55  ;;  %v3297_v47 = vadd.f32 %v3296_v48, %v3153_v55 }
 0x6af   :  { %v3299_v4 = vsub.f32 0.0, %v3224_v51  ;;  %v3301_v11 = vsub.f32 0.0, %v3295_v27 }
 0x6b0   :  { %v3300_v16 = vsub.f32 0.0, %v3226_v40  ;;  %v3302_v30 = vsub.f32 0.0, %v3297_v47 }
 0x6b1   :  { %v3303_v33 = vmul.f32 1.442695, %v3299_v4  ;;  %v3307_v44 = vmul.f32 1.442695, %v3301_v11 }
 0x6b2   :  { %v3305_v28 = vmul.f32 1.442695, %v3300_v16  ;;  %v3309_v49 = vmul.f32 1.442695, %v3302_v30 }
 0x6b3   :  { %9595 = vpow2.f32 %v3303_v33  ;;  %v15507_v33 = vld [vmem:[#allocation115_spill] sm:$0xff] }
 0x6b4   :  { %9597 = vpow2.f32 %v3307_v44 }
 0x6b5   :  { %9599 = vpow2.f32 %v3305_v28 }
 0x6b6   :  { %9601 = vpow2.f32 %v3309_v49 }
 0x6bd   :  { %v9596_v37 = vpop.eup %9595 }
 0x6be   :  { %v9598_v50 = vpop.eup %9597  ;;  %v3311_v23 = vadd.f32 1.0, %v9596_v37  ;;  %v15508_v37 = vld [vmem:[#allocation56_spill] sm:$0xff] }
 0x6bf   :  { %v9600_v3 = vpop.eup %9599  ;;  %v3313_v45 = vadd.f32 1.0, %v9598_v50  ;;  %v15509_v50 = vld [vmem:[#allocation57_spill] sm:$0xff] }
 0x6c0   :  { %v9602_v38 = vpop.eup %9601  ;;  %9603 = vrcp.f32 %v3311_v23  ;;  %v3312_v55 = vadd.f32 1.0, %v9600_v3  ;;  %v15510_v23 = vpack.c.bf16 %v15508_v37, %v15509_v50  ;;  %v15511_v3 = vld [vmem:[#allocation92_spill] sm:$0xff] }
 0x6c1   :  { %9605 = vrcp.f32 %v3313_v45  ;;  %v3314_v51 = vadd.f32 1.0, %v9602_v38  ;;  %v12545_v38 = vld [vmem:[%s14863_s4] ss:$0 sm:$0xff]  ;;  %v15533_v50 = vld [vmem:[#allocation60_spill] sm:$0xff] }
 0x6c2   :  { %9607 = vrcp.f32 %v3312_v55  ;;  %v1377_v44 = vadd.f32 %v12545_v38, %v15507_v33  ;;  %v15515_v55 = vld [vmem:[#allocation75_spill] sm:$0xff]  ;;  %v15524_v33 = vld [vmem:[#allocation2_spill] sm:$0xff] }
 0x6c3   :  { %9609 = vrcp.f32 %v3314_v51 }
 0x6c4   :  { %v3512_v49 = vmul.f32 0.088388346, %v1377_v44  ;;  %v15525_v44 = vld [vmem:[#allocation48_spill] sm:$0xff] }
 0x6ca   :  { %v9604_v27 = vpop.eup %9603 }
 0x6cb   :  { %v9606_v56 = vpop.eup %9605  ;;  %v3323_v48 = vsub.f32 %v9604_v27, %v12205_v53 }
 0x6cc   :  { %v9608_v40 = vpop.eup %9607  ;;  %v3325_v47 = vsub.f32 %v9606_v56, %v12219_v39  ;;  %v15517_v56 = vld [vmem:[#allocation16_spill] sm:$0xff] }
 0x6cd   :  { %v9610_v4 = vpop.eup %9609  ;;  %v3324_v11 = vsub.f32 %v9608_v40, %v12207_v34  ;;  %v3327_v16 = vmul.f32 %v3323_v48, %v12209_v35  ;;  %v15518_v48 = vld [vmem:[#allocation101_spill] sm:$0xff] }
 0x6ce   :  { %v3326_v30 = vsub.f32 %v9610_v4, %v12223_v9  ;;  %v3329_v39 = vmul.f32 %v3325_v47, %v12225_v31  ;;  %v15512_v31 = vld [vmem:[#allocation93_spill] sm:$0xff]  ;;  %v15519_v40 = vpack.c.bf16 %v15517_v56, %v15518_v48 }
 0x6cf   :  { %v3328_v53 = vmul.f32 %v3324_v11, %v12211_v5  ;;  %v3471_v28 = vsel %vm2784_vm4, %v3327_v16, 0.0  ;;  %v15513_v45 = vpack.c.bf16 %v15511_v3, %v15512_v31  ;;  %v15521_v11 = vld [vmem:[#allocation58_spill] sm:$0xff]  ;;  %v15537_v31 = vld [vmem:[#allocation95_spill] sm:$0xff]  ;;  %v15543_v56 = vld [vmem:[#allocation105_spill] sm:$0xff] }
 0x6d0   :  { %v3330_v34 = vmul.f32 %v3326_v30, %v12230_v63  ;;  %v3474_v5 = vsel %vm2784_vm4, %v3329_v39, 0.0  ;;  %v15514_v63 = vld [vmem:[#allocation74_spill] sm:$0xff] }
 0x6d1   :  { %3395 = vmatprep.mubr.f32.mxu0 %v3328_v53  ;;  %v3472_v35 = vsel %vm2784_vm4, %v3328_v53, 0.0  ;;  %v15516_v51 = vpack.c.bf16 %v15514_v63, %v15515_v55  ;;  %v15526_v53 = vpack.c.bf16 %v15524_v33, %v15525_v44  ;;  %v15536_v3 = vld [vmem:[#allocation94_spill] sm:$0xff]  ;;  %v15540_v55 = vld [vmem:[#allocation80_spill] sm:$0xff]  ;;  %v15551_v44 = vld [vmem:[#allocation83_spill] sm:$0xff] }
 0x6d2   :  { %v3473_v9 = vadd.f32 %v3472_v35, %v3471_v28  ;;  %3465 = vmatprep.mubr.f32.mxu1 %v3330_v34  ;;  %3396 = vmatmul.mubr.f32.vlgmr.msra.gmra.mrb[76].mxu0 %v3327_v16  ;;  %v3476_v47 = vsel %vm2784_vm4, %v3330_v34, 0.0  ;;  %v15522_v16 = vld [vmem:[#allocation59_spill] sm:$0xff]  ;;  %v15527_v28 = vld [vmem:[#allocation78_spill] sm:$0xff] }
 0x6d3   :  { %3466 = vmatmul.mubr.f32.vlgmr.msra.gmra.mrb[136].mxu1 %v3329_v39  ;;  %9027 = vmatpush3.bf16.xpose.msk.msra.mxu0 %vm12521_vm6, %v15510_v23  ;;  %v15523_v30 = vpack.c.bf16 %v15521_v11, %v15522_v16  ;;  %v15528_v39 = vld [vmem:[#allocation79_spill] sm:$0xff]  ;;  %v15530_v34 = vld [vmem:[#allocation102_spill] sm:$0xff]  ;;  %v15534_v23 = vld [vmem:[#allocation61_spill] sm:$0xff] }
 0x6d4   :  { %9075 = vmatpush3.bf16.xpose.msk.msra.mxu1 %vm12521_vm6, %v15513_v45  ;;  %9030 = vmatprep.subr.msk.bf16.mxu0 %vm12521_vm6, %v15516_v51  ;;  %v3475_v27 = vadd.f32 %v3474_v5, %v3473_v9  ;;  %v15529_v35 = vpack.c.bf16 %v15527_v28, %v15528_v39  ;;  %v15531_v9 = vld [vmem:[#allocation103_spill] sm:$0xff]  ;;  %v15535_v5 = vpack.c.bf16 %v15533_v50, %v15534_v23  ;;  %v15539_v63 = vld [vmem:[#allocation46_spill] sm:$0xff] }
 0x6d5   :  { %7988 = vmatprep.mubr.msk.f32.mxu0 %vm3544_vm5, %v3512_v49  ;;  %9078 = vmatprep.subr.msk.bf16.mxu1 %vm12521_vm6, %v15519_v40  ;;  %v15532_v37 = vpack.c.bf16 %v15530_v34, %v15531_v9  ;;  %v15538_v45 = vpack.c.bf16 %v15536_v3, %v15537_v31  ;;  %v15541_v51 = vpack.c.bf16 %v15539_v63, %v15540_v55  ;;  %v15545_v40 = vld [vmem:[#allocation62_spill] sm:$0xff]  ;;  %v15548_v16 = vld [vmem:[#allocation51_spill] sm:$0xff]  ;;  %v15557_v9 = vld [vmem:[#allocation64_spill] sm:$0xff] }
 0x6d6   :  { %8084 = vmatprep.mubr.msk.f32.mxu1 %vm3544_vm5, %v3512_v49  ;;  %v12578_v4 = vadd.f32 %v3476_v47, %v3475_v27  ;;  %v15542_v27 = vld [vmem:[#allocation104_spill] sm:$0xff]  ;;  %v15546_v47 = vld [vmem:[#allocation63_spill] sm:$0xff]  ;;  %v15554_v39 = vld [vmem:[#allocation106_spill] sm:$0xff] }
 0x6d7   :  { %v15544_v48 = vpack.c.bf16 %v15542_v27, %v15543_v56  ;;  %v15547_v11 = vpack.c.bf16 %v15545_v40, %v15546_v47  ;;  %v15560_v23 = vld [vmem:[#allocation98_spill] sm:$0xff]  ;;  %v15563_v31 = vld [vmem:[#allocation85_spill] sm:$0xff]  ;;  %v15566_v55 = vld [vmem:[#allocation108_spill] sm:$0xff] }
 0x6d8   :  { %15520 = vst [vmem:[#allocation72_spill] sm:$0xff] %v12578_v4  ;;  %v15569_v56 = vld [vmem:[#allocation66_spill] sm:$0xff]  ;;  %v15572_v47 = vld [vmem:[#allocation7_spill] sm:$0xff] }
 0x6db   :  { %9033 = vmatpush3.bf16.xpose.msk.msra.mxu0 %vm12521_vm6, %v15523_v30  ;;  %v15549_v30 = vld [vmem:[#allocation96_spill] sm:$0xff] }
 0x6dc   :  { %9081 = vmatpush3.bf16.xpose.msk.msra.mxu1 %vm12521_vm6, %v15526_v53  ;;  %9036 = vmatprep.subr.msk.bf16.mxu0 %vm12521_vm6, %v15529_v35  ;;  %v15550_v33 = vpack.c.bf16 %v15548_v16, %v15549_v30  ;;  %v15552_v53 = vld [vmem:[#allocation84_spill] sm:$0xff]  ;;  %v15555_v35 = vld [vmem:[#allocation107_spill] sm:$0xff] }
 0x6dd   :  { %9084 = vmatprep.subr.msk.bf16.mxu1 %vm12521_vm6, %v15532_v37  ;;  %v15553_v28 = vpack.c.bf16 %v15551_v44, %v15552_v53  ;;  %v15556_v34 = vpack.c.bf16 %v15554_v39, %v15555_v35  ;;  %v15558_v37 = vld [vmem:[#allocation65_spill] sm:$0xff]  ;;  %v15575_v30 = vld [vmem:[#allocation88_spill] sm:$0xff]  ;;  %v15578_v53 = vld [vmem:[#allocation110_spill] sm:$0xff] }
 0x6de   :  { %v15559_v50 = vpack.c.bf16 %v15557_v9, %v15558_v37  ;;  %v15581_v35 = vld [vmem:[#allocation68_spill] sm:$0xff] }
 0x6df   :  { %v15584_v37 = vld [vmem:[#allocation8_spill] sm:$0xff] }
 0x6e3   :  { %9039 = vmatpush3.bf16.xpose.msk.msra.mxu0 %vm12521_vm6, %v15535_v5  ;;  %v15561_v5 = vld [vmem:[#allocation99_spill] sm:$0xff] }
 0x6e4   :  { %9087 = vmatpush3.bf16.xpose.msk.msra.mxu1 %vm12521_vm6, %v15538_v45  ;;  %9042 = vmatprep.subr.msk.bf16.mxu0 %vm12521_vm6, %v15541_v51  ;;  %v15562_v3 = vpack.c.bf16 %v15560_v23, %v15561_v5  ;;  %v15564_v45 = vld [vmem:[#allocation86_spill] sm:$0xff]  ;;  %v15567_v51 = vld [vmem:[#allocation109_spill] sm:$0xff]  ;;  %v15587_v5 = vld [vmem:[#allocation47_spill] sm:$0xff] }
 0x6e5   :  { %9090 = vmatprep.subr.msk.bf16.mxu1 %vm12521_vm6, %v15544_v48  ;;  %v15565_v63 = vpack.c.bf16 %v15563_v31, %v15564_v45  ;;  %v15568_v27 = vpack.c.bf16 %v15566_v55, %v15567_v51  ;;  %v15570_v48 = vld [vmem:[#allocation67_spill] sm:$0xff]  ;;  %v15590_v45 = vld [vmem:[#allocation112_spill] sm:$0xff]  ;;  %v15593_v51 = vld [vmem:[#allocation70_spill] sm:$0xff] }
 0x6e6   :  { %v15571_v40 = vpack.c.bf16 %v15569_v56, %v15570_v48  ;;  %v15596_v48 = vld [vmem:[#allocation10_spill] sm:$0xff] }
 0x6eb   :  { %9045 = vmatpush3.bf16.xpose.msk.msra.mxu0 %vm12521_vm6, %v15547_v11  ;;  %v15573_v11 = vld [vmem:[#allocation9_spill] sm:$0xff] }
 0x6ec   :  { %9093 = vmatpush3.bf16.xpose.msk.msra.mxu1 %vm12521_vm6, %v15550_v33  ;;  %9048 = vmatprep.subr.msk.bf16.mxu0 %vm12521_vm6, %v15553_v28  ;;  %v15574_v16 = vpack.c.bf16 %v15572_v47, %v15573_v11  ;;  %v15576_v33 = vld [vmem:[#allocation90_spill] sm:$0xff]  ;;  %v15579_v28 = vld [vmem:[#allocation111_spill] sm:$0xff]  ;;  %v15004_v11 = vmov 0.0|0.0  }
 0x6ed   :  { %9096 = vmatprep.subr.msk.bf16.mxu1 %vm12521_vm6, %v15556_v34  ;;  %v15577_v44 = vpack.c.bf16 %v15575_v30, %v15576_v33  ;;  %v15580_v39 = vpack.c.bf16 %v15578_v53, %v15579_v28  ;;  %v15582_v34 = vld [vmem:[#allocation69_spill] sm:$0xff]  ;;  %v1392_v28 = vadd.f32 %v12545_v38, %v15601_v19 }
 0x6ee   :  { %v15583_v9 = vpack.c.bf16 %v15581_v35, %v15582_v34  ;;  %v15602_v35 = vld [vmem:[#allocation121_spill] sm:$0xff]  ;;  %v15603_v34 = vld [vmem:[#allocation120_spill] sm:$0xff] }
 0x6f3   :  { %9051 = vmatpush3.bf16.xpose.msk.msra.mxu0 %vm12521_vm6, %v15559_v50  ;;  %v15585_v50 = vld [vmem:[#allocation5_spill] sm:$0xff] }
 0x6f4   :  { %9099 = vmatpush3.bf16.xpose.msk.msra.mxu1 %vm12521_vm6, %v15562_v3  ;;  %9054 = vmatprep.subr.msk.bf16.mxu0 %vm12521_vm6, %v15565_v63  ;;  %v15586_v23 = vpack.c.bf16 %v15584_v37, %v15585_v50  ;;  %v15588_v3 = vld [vmem:[#allocation91_spill] sm:$0xff]  ;;  %v15591_v63 = vld [vmem:[#allocation113_spill] sm:$0xff] }
 0x6f5   :  { %9102 = vmatprep.subr.msk.bf16.mxu1 %vm12521_vm6, %v15568_v27  ;;  %v15589_v31 = vpack.c.bf16 %v15587_v5, %v15588_v3  ;;  %v15592_v55 = vpack.c.bf16 %v15590_v45, %v15591_v63  ;;  %v15594_v27 = vld [vmem:[#allocation71_spill] sm:$0xff]  ;;  %v15607_v45 = vld [vmem:[#allocation124_spill] sm:$0xff] }
 0x6f6   :  { %v15595_v56 = vpack.c.bf16 %v15593_v51, %v15594_v27  ;;  %v15604_v50 = vld [vmem:[#allocation123_spill] sm:$0xff]  ;;  %v1422_v63 = vadd.f32 %v12545_v38, %v15607_v45  ;;  %v15609_v27 = vld [vmem:[#allocation126_spill] sm:$0xff] }
 0x6f7   :  { %v15608_v51 = vld [vmem:[#allocation127_spill] sm:$0xff] }
 0x6fb   :  { %9057 = vmatpush3.bf16.xpose.msk.msra.mxu0 %vm12521_vm6, %v15571_v40  ;;  %v15597_v40 = vld [vmem:[#allocation13_spill] sm:$0xff] }
 0x6fc   :  { %9105 = vmatpush3.bf16.xpose.msk.msra.mxu1 %vm12521_vm6, %v15574_v16  ;;  %9060 = vmatprep.subr.msk.bf16.mxu0 %vm12521_vm6, %v15577_v44  ;;  %v15598_v47 = vpack.c.bf16 %v15596_v48, %v15597_v40  ;;  %v15599_v16 = vld [vmem:[#allocation114_spill] sm:$0xff]  ;;  %v15600_v44 = vld [vmem:[#allocation119_spill] sm:$0xff]  ;;  %v15610_v40 = vld [vmem:[#allocation129_spill] sm:$0xff] }
 0x6fd   :  { %9108 = vmatprep.subr.msk.bf16.mxu1 %vm12521_vm6, %v15580_v39  ;;  %v1382_v30 = vadd.f32 %v12545_v38, %v15599_v16  ;;  %v1387_v53 = vadd.f32 %v12545_v38, %v15600_v44  ;;  %v15613_v44 = vld [vmem:[#allocation130_spill] sm:$0xff] }
 0x6ff   :  { %v3513_v33 = vmul.f32 0.088388346, %v1382_v30  ;;  %v3514_v39 = vmul.f32 0.088388346, %v1387_v53  ;;  %v1452_v53 = vadd.f32 %v12545_v38, %v15613_v44 }
 0x701   :  { %v3527_v19 = vmul.f32 0.088388346, %v1452_v53 }
 0x703   :  { %9063 = vmatpush3.bf16.xpose.msk.msra.mxu0 %vm12521_vm6, %v15583_v9  ;;  %v1402_v9 = vadd.f32 %v12545_v38, %v15603_v34  ;;  %v15617_v34 = vld [vmem:[#allocation134_spill] sm:$0xff] }
 0x704   :  { %9111 = vmatpush3.bf16.xpose.msk.msra.mxu1 %vm12521_vm6, %v15586_v23  ;;  %9066 = vmatprep.subr.msk.bf16.mxu0 %vm12521_vm6, %v15589_v31  ;;  %v15605_v23 = vld [vmem:[#allocation122_spill] sm:$0xff]  ;;  %v15606_v31 = vld [vmem:[#allocation125_spill] sm:$0xff] }
 0x705   :  { %9114 = vmatprep.subr.msk.bf16.mxu1 %vm12521_vm6, %v15592_v55  ;;  %v3517_v37 = vmul.f32 0.088388346, %v1402_v9  ;;  %v1412_v5 = vadd.f32 %v12545_v38, %v15605_v23  ;;  %v3521_v55 = vmul.f32 0.088388346, %v1422_v63  ;;  %v1472_v9 = vadd.f32 %v12545_v38, %v15617_v34 }
 0x707   :  { %v3519_v3 = vmul.f32 0.088388346, %v1412_v5 }
 0x70b   :  { %9069 = vmatpush3.bf16.xpose.msk.msra.mxu0 %vm12521_vm6, %v15595_v56  ;;  %v1432_v56 = vadd.f32 %v12545_v38, %v15609_v27 }
 0x70c   :  { %9117 = vmatpush3.bf16.xpose.msk.msra.mxu1 %vm12521_vm6, %v15598_v47  ;;  %9118 = vmatprep.subr.bf16.mxu0 %v15004_v11  ;;  %v15611_v47 = vld [vmem:[#allocation128_spill] sm:$0xff] }
 0x70d   :  { %v3523_v48 = vmul.f32 0.088388346, %v1432_v56  ;;  %v1442_v16 = vadd.f32 %v12545_v38, %v15611_v47 }
 0x70f   :  { %v3525_v30 = vmul.f32 0.088388346, %v1442_v16 }
 0x712   :  { %7989 = vmatmul.mubr.msk.f32.vlgmr.msra.gmra.mrb[78].mxu0 %vm3544_vm5, %v3512_v49 }
 0x713   :  { %8085 = vmatmul.mubr.msk.f32.vlgmr.msra.gmra.mrb[138].mxu1 %vm3544_vm5, %v3512_v49  ;;  %7990 = vmatprep.mubr.msk.f32.mxu0 %vm3544_vm5, %v3513_v33  ;;  %v3515_v49 = vmul.f32 0.088388346, %v1392_v28  ;;  %v15614_v28 = vld [vmem:[#allocation133_spill] sm:$0xff] }
 0x714   :  { %8086 = vmatprep.mubr.msk.f32.mxu1 %vm3544_vm5, %v3513_v33  ;;  %9120 = vmatpush1.bf16.msra.mxu0 %v11531_v10  ;;  %v1397_v10 = vadd.f32 %v12545_v38, %v15602_v35 }
 0x715   :  { %9121 = vmatprep.subr.bf16.mxu0 %v15004_v11 }
 0x716   :  { %7991 = vmatmul.mubr.msk.f32.gmra.mrb[80].mxu0 %vm3544_vm5, %v3513_v33 }
 0x717   :  { %8087 = vmatmul.mubr.msk.f32.gmra.mrb[140].mxu1 %vm3544_vm5, %v3513_v33  ;;  %7992 = vmatprep.mubr.msk.f32.mxu0 %vm3544_vm5, %v3514_v39  ;;  %v15612_v33 = vld [vmem:[#allocation131_spill] sm:$0xff] }
 0x718   :  { %8088 = vmatprep.mubr.msk.f32.mxu1 %vm3544_vm5, %v3514_v39  ;;  %9123 = vmatpush1.bf16.msra.mxu0 %v11564_v61  ;;  %v3516_v61 = vmul.f32 0.088388346, %v1397_v10  ;;  %v15616_v10 = vld [vmem:[#allocation135_spill] sm:$0xff] }
 0x719   :  { %9124 = vmatprep.subr.bf16.mxu0 %v15004_v11 }
 0x71a   :  { %7993 = vmatmul.mubr.msk.f32.gmra.mrb[82].mxu0 %vm3544_vm5, %v3514_v39 }
 0x71b   :  { %8089 = vmatmul.mubr.msk.f32.gmra.mrb[142].mxu1 %vm3544_vm5, %v3514_v39  ;;  %7994 = vmatprep.mubr.msk.f32.mxu0 %vm3544_vm5, %v3515_v49  ;;  %v15615_v39 = vld [vmem:[#allocation132_spill] sm:$0xff] }
 0x71c   :  { %8090 = vmatprep.mubr.msk.f32.mxu1 %vm3544_vm5, %v3515_v49  ;;  %9126 = vmatpush1.bf16.msra.mxu0 %v11590_v52  ;;  %v1407_v52 = vadd.f32 %v12545_v38, %v15604_v50 }
 0x71d   :  { %9127 = vmatprep.subr.bf16.mxu0 %v15004_v11 }
 0x71e   :  { %7995 = vmatmul.mubr.msk.f32.gmra.mrb[84].mxu0 %vm3544_vm5, %v3515_v49 }
 0x71f   :  { %8091 = vmatmul.mubr.msk.f32.gmra.mrb[144].mxu1 %vm3544_vm5, %v3515_v49  ;;  %7996 = vmatprep.mubr.msk.f32.mxu0 %vm3544_vm5, %v3516_v61  ;;  %v1462_v49 = vadd.f32 %v12545_v38, %v15615_v39 }
 0x720   :  { %8092 = vmatprep.mubr.msk.f32.mxu1 %vm3544_vm5, %v3516_v61  ;;  %9129 = vmatpush1.bf16.msra.mxu0 %v11617_v62  ;;  %v3518_v62 = vmul.f32 0.088388346, %v1407_v52  ;;  %v15619_v52 = vld [vmem:[#allocation136_spill] sm:$0xff] }
 0x721   :  { %9130 = vmatprep.subr.bf16.mxu0 %v15004_v11  ;;  %v3529_v35 = vmul.f32 0.088388346, %v1462_v49  ;;  %v1482_v23 = vadd.f32 %v12545_v38, %v15619_v52 }
 0x722   :  { %7997 = vmatmul.mubr.msk.f32.gmra.mrb[86].mxu0 %vm3544_vm5, %v3516_v61 }
 0x723   :  { %8093 = vmatmul.mubr.msk.f32.gmra.mrb[146].mxu1 %vm3544_vm5, %v3516_v61  ;;  %7998 = vmatprep.mubr.msk.f32.mxu0 %vm3544_vm5, %v3517_v37 }
 0x724   :  { %8094 = vmatprep.mubr.msk.f32.mxu1 %vm3544_vm5, %v3517_v37  ;;  %9132 = vmatpush1.bf16.msra.mxu0 %v11653_v1  ;;  %v1417_v1 = vadd.f32 %v12545_v38, %v15606_v31 }
 0x725   :  { %9133 = vmatprep.subr.bf16.mxu0 %v15004_v11 }
 0x726   :  { %7999 = vmatmul.mubr.msk.f32.gmra.mrb[88].mxu0 %vm3544_vm5, %v3517_v37 }
 0x727   :  { %8095 = vmatmul.mubr.msk.f32.gmra.mrb[148].mxu1 %vm3544_vm5, %v3517_v37  ;;  %8000 = vmatprep.mubr.msk.f32.mxu0 %vm3544_vm5, %v3518_v62  ;;  %v15618_v37 = vld [vmem:[#allocation137_spill] sm:$0xff] }
 0x728   :  { %8096 = vmatprep.mubr.msk.f32.mxu1 %vm3544_vm5, %v3518_v62  ;;  %9135 = vmatpush1.bf16.msra.mxu0 %v11780_v58  ;;  %v3520_v58 = vmul.f32 0.088388346, %v1417_v1  ;;  %v1477_v50 = vadd.f32 %v12545_v38, %v15618_v37  ;;  %v15621_v1 = vld [vmem:[#allocation138_spill] sm:$0xff] }
 0x729   :  { %9136 = vmatprep.subr.bf16.mxu0 %v15004_v11  ;;  %v1492_v45 = vadd.f32 %v12545_v38, %v15621_v1 }
 0x72a   :  { %8001 = vmatmul.mubr.msk.f32.gmra.mrb[90].mxu0 %vm3544_vm5, %v3518_v62  ;;  %v3532_v5 = vmul.f32 0.088388346, %v1477_v50 }
 0x72b   :  { %8097 = vmatmul.mubr.msk.f32.gmra.mrb[150].mxu1 %vm3544_vm5, %v3518_v62  ;;  %8002 = vmatprep.mubr.msk.f32.mxu0 %vm3544_vm5, %v3519_v3  ;;  %v3533_v62 = vmul.f32 0.088388346, %v1482_v23 }
 0x72c   :  { %8098 = vmatprep.mubr.msk.f32.mxu1 %vm3544_vm5, %v3519_v3  ;;  %9138 = vmatpush1.bf16.msra.mxu0 %v11890_v26  ;;  %v1427_v26 = vadd.f32 %v12545_v38, %v15608_v51 }
 0x72d   :  { %9139 = vmatprep.subr.bf16.mxu0 %v15004_v11 }
 0x72e   :  { %8003 = vmatmul.mubr.msk.f32.gmra.mrb[92].mxu0 %vm3544_vm5, %v3519_v3 }
 0x72f   :  { %8099 = vmatmul.mubr.msk.f32.gmra.mrb[152].mxu1 %vm3544_vm5, %v3519_v3  ;;  %8004 = vmatprep.mubr.msk.f32.mxu0 %vm3544_vm5, %v3520_v58  ;;  %v15620_v3 = vld [vmem:[#allocation139_spill] sm:$0xff] }
 0x730   :  { %8100 = vmatprep.mubr.msk.f32.mxu1 %vm3544_vm5, %v3520_v58  ;;  %9141 = vmatpush1.bf16.msra.mxu0 %v11993_v17  ;;  %v3522_v17 = vmul.f32 0.088388346, %v1427_v26  ;;  %v1487_v31 = vadd.f32 %v12545_v38, %v15620_v3  ;;  %v15623_v26 = vld [vmem:[#allocation140_spill] sm:$0xff] }
 0x731   :  { %9142 = vmatprep.subr.bf16.mxu0 %v15004_v11  ;;  %v1502_v27 = vadd.f32 %v12545_v38, %v15623_v26 }
 0x732   :  { %8005 = vmatmul.mubr.msk.f32.gmra.mrb[94].mxu0 %vm3544_vm5, %v3520_v58  ;;  %v3534_v63 = vmul.f32 0.088388346, %v1487_v31 }
 0x733   :  { %8101 = vmatmul.mubr.msk.f32.gmra.mrb[154].mxu1 %vm3544_vm5, %v3520_v58  ;;  %8006 = vmatprep.mubr.msk.f32.mxu0 %vm3544_vm5, %v3521_v55  ;;  %v3535_v58 = vmul.f32 0.088388346, %v1492_v45 }
 0x734   :  { %8102 = vmatprep.mubr.msk.f32.mxu1 %vm3544_vm5, %v3521_v55  ;;  %9144 = vmatpush1.bf16.msra.mxu0 %v11525_v25  ;;  %v1437_v25 = vadd.f32 %v12545_v38, %v15610_v40 }
 0x735   :  { %9145 = vmatprep.subr.bf16.mxu0 %v15004_v11 }
 0x736   :  { %8007 = vmatmul.mubr.msk.f32.gmra.mrb[96].mxu0 %vm3544_vm5, %v3521_v55 }
 0x737   :  { %8103 = vmatmul.mubr.msk.f32.gmra.mrb[156].mxu1 %vm3544_vm5, %v3521_v55  ;;  %8008 = vmatprep.mubr.msk.f32.mxu0 %vm3544_vm5, %v3522_v17  ;;  %v15622_v55 = vld [vmem:[#allocation141_spill] sm:$0xff] }
 0x738   :  { %8104 = vmatprep.mubr.msk.f32.mxu1 %vm3544_vm5, %v3522_v17  ;;  %9147 = vmatpush1.bf16.msra.mxu0 %v11549_v12  ;;  %v3524_v12 = vmul.f32 0.088388346, %v1437_v25  ;;  %v1497_v51 = vadd.f32 %v12545_v38, %v15622_v55  ;;  %v15625_v25 = vld [vmem:[#allocation142_spill] sm:$0xff] }
 0x739   :  { %9148 = vmatprep.subr.bf16.mxu0 %v15004_v11  ;;  %v1512_v47 = vadd.f32 %v12545_v38, %v15625_v25 }
 0x73a   :  { %8009 = vmatmul.mubr.msk.f32.gmra.mrb[98].mxu0 %vm3544_vm5, %v3522_v17  ;;  %v3536_v56 = vmul.f32 0.088388346, %v1497_v51 }
 0x73b   :  { %8105 = vmatmul.mubr.msk.f32.gmra.mrb[158].mxu1 %vm3544_vm5, %v3522_v17  ;;  %8010 = vmatprep.mubr.msk.f32.mxu0 %vm3544_vm5, %v3523_v48  ;;  %v3537_v17 = vmul.f32 0.088388346, %v1502_v27 }
 0x73c   :  { %8106 = vmatprep.mubr.msk.f32.mxu1 %vm3544_vm5, %v3523_v48  ;;  %9150 = vmatpush1.bf16.msra.mxu0 %v11566_v20  ;;  %v1447_v20 = vadd.f32 %v12545_v38, %v15612_v33 }
 0x73d   :  { %9151 = vmatprep.subr.bf16.mxu0 %v15004_v11 }
 0x73e   :  { %8011 = vmatmul.mubr.msk.f32.gmra.mrb[100].mxu0 %vm3544_vm5, %v3523_v48 }
 0x73f   :  { %8107 = vmatmul.mubr.msk.f32.gmra.mrb[160].mxu1 %vm3544_vm5, %v3523_v48  ;;  %8012 = vmatprep.mubr.msk.f32.mxu0 %vm3544_vm5, %v3524_v12  ;;  %v15624_v48 = vld [vmem:[#allocation143_spill] sm:$0xff] }
 0x740   :  { %8108 = vmatprep.mubr.msk.f32.mxu1 %vm3544_vm5, %v3524_v12  ;;  %9153 = vmatpush1.bf16.msra.mxu0 %v11592_v57  ;;  %v3526_v57 = vmul.f32 0.088388346, %v1447_v20  ;;  %v1507_v40 = vadd.f32 %v12545_v38, %v15624_v48  ;;  %v15627_v20 = vld [vmem:[#allocation144_spill] sm:$0xff] }
 0x741   :  { %9154 = vmatprep.subr.bf16.mxu0 %v15004_v11  ;;  %v1522_v44 = vadd.f32 %v12545_v38, %v15627_v20 }
 0x742   :  { %8013 = vmatmul.mubr.msk.f32.gmra.mrb[102].mxu0 %vm3544_vm5, %v3524_v12  ;;  %v3538_v16 = vmul.f32 0.088388346, %v1507_v40 }
 0x743   :  { %8109 = vmatmul.mubr.msk.f32.gmra.mrb[162].mxu1 %vm3544_vm5, %v3524_v12  ;;  %8014 = vmatprep.mubr.msk.f32.mxu0 %vm3544_vm5, %v3525_v30  ;;  %v3539_v12 = vmul.f32 0.088388346, %v1512_v47 }
 0x744   :  { %8110 = vmatprep.mubr.msk.f32.mxu1 %vm3544_vm5, %v3525_v30  ;;  %9156 = vmatpush1.bf16.msra.mxu0 %v11625_v0  ;;  %v1457_v0 = vadd.f32 %v12545_v38, %v15614_v28 }
 0x745   :  { %9157 = vmatprep.subr.bf16.mxu0 %v15004_v11 }
 0x746   :  { %8015 = vmatmul.mubr.msk.f32.gmra.mrb[104].mxu0 %vm3544_vm5, %v3525_v30 }
 0x747   :  { %8111 = vmatmul.mubr.msk.f32.gmra.mrb[164].mxu1 %vm3544_vm5, %v3525_v30  ;;  %8016 = vmatprep.mubr.msk.f32.mxu0 %vm3544_vm5, %v3526_v57  ;;  %v15626_v30 = vld [vmem:[#allocation145_spill] sm:$0xff] }
 0x748   :  { %8112 = vmatprep.mubr.msk.f32.mxu1 %vm3544_vm5, %v3526_v57  ;;  %9159 = vmatpush1.bf16.msra.mxu0 %v11663_v14  ;;  %v3528_v14 = vmul.f32 0.088388346, %v1457_v0  ;;  %v1517_v33 = vadd.f32 %v12545_v38, %v15626_v30  ;;  %v15629_v0 = vld [vmem:[#allocation146_spill] sm:$0xff] }
 0x749   :  { %9160 = vmatprep.subr.bf16.mxu0 %v15004_v11  ;;  %v1532_v39 = vadd.f32 %v12545_v38, %v15629_v0 }
 0x74a   :  { %8017 = vmatmul.mubr.msk.f32.gmra.mrb[106].mxu0 %vm3544_vm5, %v3526_v57  ;;  %v3540_v53 = vmul.f32 0.088388346, %v1517_v33 }
 0x74b   :  { %8113 = vmatmul.mubr.msk.f32.gmra.mrb[166].mxu1 %vm3544_vm5, %v3526_v57  ;;  %8018 = vmatprep.mubr.msk.f32.mxu0 %vm3544_vm5, %v3527_v19  ;;  %v3541_v57 = vmul.f32 0.088388346, %v1522_v44 }
 0x74c   :  { %8114 = vmatprep.mubr.msk.f32.mxu1 %vm3544_vm5, %v3527_v19  ;;  %9162 = vmatpush1.bf16.msra.mxu0 %v11853_v2  ;;  %v1467_v2 = vadd.f32 %v12545_v38, %v15616_v10 }
 0x74d   :  { %9163 = vmatprep.subr.bf16.mxu0 %v15004_v11 }
 0x74e   :  { %8019 = vmatmul.mubr.msk.f32.gmra.mrb[108].mxu0 %vm3544_vm5, %v3527_v19  ;;  %v3530_v61 = vmul.f32 0.088388346, %v1467_v2 }
 0x74f   :  { %8115 = vmatmul.mubr.msk.f32.gmra.mrb[168].mxu1 %vm3544_vm5, %v3527_v19  ;;  %8020 = vmatprep.mubr.msk.f32.mxu0 %vm3544_vm5, %v3528_v14  ;;  %v15628_v19 = vld [vmem:[#allocation147_spill] sm:$0xff] }
 0x750   :  { %8116 = vmatprep.mubr.msk.f32.mxu1 %vm3544_vm5, %v3528_v14  ;;  %9165 = vmatpush1.bf16.msra.mxu0 %v11956_v59  ;;  %v3531_v59 = vmul.f32 0.088388346, %v1472_v9  ;;  %v1527_v28 = vadd.f32 %v12545_v38, %v15628_v19 }
 0x751   :  { %9166 = vmatprep.subr.bf16.mxu0 %v15004_v11 }
 0x752   :  { %8021 = vmatmul.mubr.msk.f32.gmra.mrb[110].mxu0 %vm3544_vm5, %v3528_v14  ;;  %v3542_v49 = vmul.f32 0.088388346, %v1527_v28 }
 0x753   :  { %8117 = vmatmul.mubr.msk.f32.gmra.mrb[170].mxu1 %vm3544_vm5, %v3528_v14  ;;  %8022 = vmatprep.mubr.msk.f32.mxu0 %vm3544_vm5, %v3529_v35  ;;  %v3543_v14 = vmul.f32 0.088388346, %v1532_v39 }
 0x754   :  { %8118 = vmatprep.mubr.msk.f32.mxu1 %vm3544_vm5, %v3529_v35 }
 0x756   :  { %8023 = vmatmul.mubr.msk.f32.gmra.mrb[112].mxu0 %vm3544_vm5, %v3529_v35 }
 0x757   :  { %8119 = vmatmul.mubr.msk.f32.gmra.mrb[172].mxu1 %vm3544_vm5, %v3529_v35  ;;  %8024 = vmatprep.mubr.msk.f32.mxu0 %vm3544_vm5, %v3530_v61 }
 0x758   :  { %8120 = vmatprep.mubr.msk.f32.mxu1 %vm3544_vm5, %v3530_v61 }
 0x75a   :  { %8025 = vmatmul.mubr.msk.f32.gmra.mrb[114].mxu0 %vm3544_vm5, %v3530_v61 }
 0x75b   :  { %8121 = vmatmul.mubr.msk.f32.gmra.mrb[174].mxu1 %vm3544_vm5, %v3530_v61  ;;  %8026 = vmatprep.mubr.msk.f32.mxu0 %vm3544_vm5, %v3531_v59 }
 0x75c   :  { %8122 = vmatprep.mubr.msk.f32.mxu1 %vm3544_vm5, %v3531_v59 }
 0x75e   :  { %8027 = vmatmul.mubr.msk.f32.gmra.mrb[116].mxu0 %vm3544_vm5, %v3531_v59 }
 0x75f   :  { %8123 = vmatmul.mubr.msk.f32.gmra.mrb[176].mxu1 %vm3544_vm5, %v3531_v59  ;;  %8028 = vmatprep.mubr.msk.f32.mxu0 %vm3544_vm5, %v3532_v5  ;;  %v10084_v59 = vld [vmem:[%s14862_s8] sm:$0x3] }
 0x760   :  { %8124 = vmatprep.mubr.msk.f32.mxu1 %vm3544_vm5, %v3532_v5  ;;  %v2213_v37 = vrot.slane %v10084_v59, 1 }
 0x762   :  { %8029 = vmatmul.mubr.msk.f32.gmra.mrb[118].mxu0 %vm3544_vm5, %v3532_v5  ;;  %v2215_v23 = vadd.f32 %v10084_v59, %v2213_v37 }
 0x763   :  { %8125 = vmatmul.mubr.msk.f32.gmra.mrb[178].mxu1 %vm3544_vm5, %v3532_v5  ;;  %8030 = vmatprep.mubr.msk.f32.mxu0 %vm3544_vm5, %v3533_v62 }
 0x764   :  { %8126 = vmatprep.mubr.msk.f32.mxu1 %vm3544_vm5, %v3533_v62 }
 0x766   :  { %8031 = vmatmul.mubr.msk.f32.gmra.mrb[120].mxu0 %vm3544_vm5, %v3533_v62 }
 0x767   :  { %8127 = vmatmul.mubr.msk.f32.gmra.mrb[180].mxu1 %vm3544_vm5, %v3533_v62  ;;  %8032 = vmatprep.mubr.msk.f32.mxu0 %vm3544_vm5, %v3534_v63 }
 0x768   :  { %8128 = vmatprep.mubr.msk.f32.mxu1 %vm3544_vm5, %v3534_v63 }
 0x76a   :  { %8033 = vmatmul.mubr.msk.f32.gmra.mrb[122].mxu0 %vm3544_vm5, %v3534_v63 }
 0x76b   :  { %8129 = vmatmul.mubr.msk.f32.gmra.mrb[182].mxu1 %vm3544_vm5, %v3534_v63  ;;  %8034 = vmatprep.mubr.msk.f32.mxu0 %vm3544_vm5, %v3535_v58 }
 0x76c   :  { %8130 = vmatprep.mubr.msk.f32.mxu1 %vm3544_vm5, %v3535_v58 }
 0x76e   :  { %8035 = vmatmul.mubr.msk.f32.gmra.mrb[124].mxu0 %vm3544_vm5, %v3535_v58 }
 0x76f   :  { %8131 = vmatmul.mubr.msk.f32.gmra.mrb[184].mxu1 %vm3544_vm5, %v3535_v58  ;;  %8036 = vmatprep.mubr.msk.f32.mxu0 %vm3544_vm5, %v3536_v56 }
 0x770   :  { %8132 = vmatprep.mubr.msk.f32.mxu1 %vm3544_vm5, %v3536_v56 }
 0x772   :  { %8037 = vmatmul.mubr.msk.f32.gmra.mrb[126].mxu0 %vm3544_vm5, %v3536_v56 }
 0x773   :  { %8133 = vmatmul.mubr.msk.f32.gmra.mrb[186].mxu1 %vm3544_vm5, %v3536_v56  ;;  %8038 = vmatprep.mubr.msk.f32.mxu0 %vm3544_vm5, %v3537_v17 }
 0x774   :  { %8134 = vmatprep.mubr.msk.f32.mxu1 %vm3544_vm5, %v3537_v17 }
 0x776   :  { %8039 = vmatmul.mubr.msk.f32.gmra.mrb[128].mxu0 %vm3544_vm5, %v3537_v17 }
 0x777   :  { %8135 = vmatmul.mubr.msk.f32.gmra.mrb[188].mxu1 %vm3544_vm5, %v3537_v17  ;;  %8040 = vmatprep.mubr.msk.f32.mxu0 %vm3544_vm5, %v3538_v16 }
 0x778   :  { %8136 = vmatprep.mubr.msk.f32.mxu1 %vm3544_vm5, %v3538_v16 }
 0x77a   :  { %8041 = vmatmul.mubr.msk.f32.gmra.mrb[130].mxu0 %vm3544_vm5, %v3538_v16 }
 0x77b   :  { %8137 = vmatmul.mubr.msk.f32.gmra.mrb[190].mxu1 %vm3544_vm5, %v3538_v16  ;;  %8042 = vmatprep.mubr.msk.f32.mxu0 %vm3544_vm5, %v3539_v12 }
 0x77c   :  { %8138 = vmatprep.mubr.msk.f32.mxu1 %vm3544_vm5, %v3539_v12 }
 0x77e   :  { %8043 = vmatmul.mubr.msk.f32.gmra.mrb[132].mxu0 %vm3544_vm5, %v3539_v12 }
 0x77f   :  { %8139 = vmatmul.mubr.msk.f32.gmra.mrb[192].mxu1 %vm3544_vm5, %v3539_v12  ;;  %8044 = vmatprep.mubr.msk.f32.mxu0 %vm3544_vm5, %v3540_v53 }
 0x780   :  { %8140 = vmatprep.mubr.msk.f32.mxu1 %vm3544_vm5, %v3540_v53 }
 0x782   :  { %8045 = vmatmul.mubr.msk.f32.gmra.mrb[134].mxu0 %vm3544_vm5, %v3540_v53 }
 0x783   :  { %8141 = vmatmul.mubr.msk.f32.gmra.mrb[194].mxu1 %vm3544_vm5, %v3540_v53  ;;  %8046 = vmatprep.mubr.msk.f32.mxu0 %vm3544_vm5, %v3541_v57 }
 0x784   :  { %8142 = vmatprep.mubr.msk.f32.mxu1 %vm3544_vm5, %v3541_v57 }
 0x786   :  { %8047 = vmatmul.mubr.msk.f32.gmra.mrb[136].mxu0 %vm3544_vm5, %v3541_v57 }
 0x787   :  { %8143 = vmatmul.mubr.msk.f32.gmra.mrb[196].mxu1 %vm3544_vm5, %v3541_v57  ;;  %8048 = vmatprep.mubr.msk.f32.mxu0 %vm3544_vm5, %v3542_v49 }
 0x788   :  { %8144 = vmatprep.mubr.msk.f32.mxu1 %vm3544_vm5, %v3542_v49 }
 0x78a   :  { %8049 = vmatmul.mubr.msk.f32.gmra.mrb[138].mxu0 %vm3544_vm5, %v3542_v49 }
 0x78b   :  { %8145 = vmatmul.mubr.msk.f32.gmra.mrb[198].mxu1 %vm3544_vm5, %v3542_v49  ;;  %8050 = vmatprep.mubr.msk.f32.mxu0 %vm3544_vm5, %v3543_v14 }
 0x78c   :  { %8146 = vmatprep.mubr.msk.f32.mxu1 %vm3544_vm5, %v3543_v14 }
 0x78e   :  { %8051 = vmatmul.mubr.msk.f32.gmra.mrb[140].mxu0 %vm3544_vm5, %v3543_v14 }
 0x78f   :  { %8147 = vmatmul.mubr.msk.f32.gmra.mrb[200].mxu1 %vm3544_vm5, %v3543_v14 }
 0x7a5   :  { %v7918_v38 = vpop.f32.mrb[76].mxu0 }
 0x7a6   :  { %v7953_v35 = vpop.f32.mrb[136].mxu1  ;;  %v7919_v10 = vpop.f32.mrb[77].mxu0 }
 0x7a7   :  { %v7920_v2 = vadd.f32 %v7919_v10, %v7918_v38  ;;  %v7954_v34 = vpop.f32.mrb[137].mxu1 }
 0x7a8   :  { %v7955_v9 = vadd.f32 %v7954_v34, %v7953_v35 }
 0x7aa   :  { %v3468_v61 = vadd.f32 %v7955_v9, %v7920_v2 }
 0x7ac   :  { %v3480_v50 = vmul.f32 0.2, %v3468_v61 }
 0x7ae   :  { %v3482_v52 = vrot.slane %v3480_v50, 7 }
 0x7b0   :  { %v3484_v5 = vsub.f32 %v12484_v8, %v3482_v52 }
 0x7b2   :  { %v3491_v62 = vrot.slane %v3484_v5, 1 }
 0x7b4   :  { %v3493_v3 = vsub.f32 %v2215_v23, %v3491_v62  ;;  %v3495_v31 = vadd.f32 %v3491_v62, %v2215_v23 }
 0x7b6   :  { %v3496_v1 = vmul.f32 0.5, %v3495_v31  ;;  %v3494_v45 = vmul.f32 0.5, %v3493_v3 }
 0x7b8   :  { %v3498_v63 = vrot.slane %v3496_v1, 7 }
 0x7ba   :  { %v12936_v58 = vsel %vm2784_vm4, %v3494_v45, %v3498_v63 }
 0x7bb   :  { %15630 = vst [vmem:[#allocation73_spill] sm:$0xff] %v12936_v58  ;;  %8180 = vmatprep.mubr.msk.f32.mxu1 %vm1631_vm2, %v12936_v58 }
 0x7e5   :  { %v12940_v55 = vpop.f32.mrb[78].mxu0 }
 0x7e6   :  { %v12942_v51 = vpop.f32.mrb[138].mxu1  ;;  %v12944_v26 = vpop.f32.mrb[79].mxu0 }
 0x7e7   :  { %v12946_v27 = vpop.f32.mrb[139].mxu1  ;;  %v4347_v8 = vmax.f32 %v12940_v55, %v12944_v26 }
 0x7e8   :  { %15631 = vst [vmem:[#allocation15_spill] sm:$0xff] %v12946_v27 }
 0x7e9   :  { %4348 = vmax.xlane.f32.xlu0 %v4347_v8  ;;  %v12952_v17 = vpop.f32.mrb[80].mxu0 }
 0x7ea   :  { %v12954_v48 = vpop.f32.mrb[140].mxu1  ;;  %v12956_v40 = vpop.f32.mrb[81].mxu0 }
 0x7eb   :  { %v12958_v25 = vpop.f32.mrb[141].mxu1  ;;  %v4350_v47 = vmax.f32 %v12952_v17, %v12956_v40 }
 0x7ed   :  { %4351 = vmax.xlane.f32.xlu1 %v4350_v47  ;;  %v12964_v12 = vpop.f32.mrb[82].mxu0 }
 0x7ee   :  { %v12966_v30 = vpop.f32.mrb[142].mxu1  ;;  %v12968_v33 = vpop.f32.mrb[83].mxu0 }
 0x7ef   :  { %v12970_v20 = vpop.f32.mrb[143].mxu1  ;;  %v4353_v44 = vmax.f32 %v12964_v12, %v12968_v33 }
 0x7f0   :  { %15632 = vst [vmem:[#allocation100_spill] sm:$0xff] %v12970_v20 }
 0x7f1   :  { %4354 = vmax.xlane.f32.xlu1 %v4353_v44  ;;  %v12976_v57 = vpop.f32.mrb[84].mxu0 }
 0x7f2   :  { %v12978_v19 = vpop.f32.mrb[144].mxu1  ;;  %v12980_v28 = vpop.f32.mrb[85].mxu0 }
 0x7f3   :  { %v12982_v0 = vpop.f32.mrb[145].mxu1  ;;  %v4356_v39 = vmax.f32 %v12976_v57, %v12980_v28 }
 0x7f4   :  { %15633 = vst [vmem:[#allocation115_spill] sm:$0xff] %v12982_v0 }
 0x7f5   :  { %4357 = vmax.xlane.f32.xlu1 %v4356_v39  ;;  %v12988_v14 = vpop.f32.mrb[86].mxu0 }
 0x7f6   :  { %v12990_v38 = vpop.f32.mrb[146].mxu1  ;;  %v12992_v35 = vpop.f32.mrb[87].mxu0 }
 0x7f7   :  { %v12994_v10 = vpop.f32.mrb[147].mxu1  ;;  %v4359_v2 = vmax.f32 %v12988_v14, %v12992_v35 }
 0x7f9   :  { %4360 = vmax.xlane.f32.xlu1 %v4359_v2  ;;  %v13000_v9 = vpop.f32.mrb[88].mxu0 }
 0x7fa   :  { %v13002_v61 = vpop.f32.mrb[148].mxu1  ;;  %v13004_v59 = vpop.f32.mrb[89].mxu0 }
 0x7fb   :  { %v13006_v37 = vpop.f32.mrb[149].mxu1  ;;  %v4362_v50 = vmax.f32 %v13000_v9, %v13004_v59 }
 0x7fd   :  { %4363 = vmax.xlane.f32.xlu1 %v4362_v50  ;;  %v13012_v23 = vpop.f32.mrb[90].mxu0 }
 0x7fe   :  { %v13014_v5 = vpop.f32.mrb[150].mxu1  ;;  %v13016_v62 = vpop.f32.mrb[91].mxu0 }
 0x7ff   :  { %v13018_v3 = vpop.f32.mrb[151].mxu1  ;;  %v4365_v31 = vmax.f32 %v13012_v23, %v13016_v62 }
 0x801   :  { %4366 = vmax.xlane.f32.xlu1 %v4365_v31  ;;  %v13024_v45 = vpop.f32.mrb[92].mxu0 }
 0x802   :  { %v13026_v63 = vpop.f32.mrb[152].mxu1  ;;  %v13028_v8 = vpop.f32.mrb[93].mxu0 }
 0x803   :  { %v13030_v47 = vpop.f32.mrb[153].mxu1  ;;  %v4368_v44 = vmax.f32 %v13024_v45, %v13028_v8 }
 0x805   :  { %4369 = vmax.xlane.f32.xlu0 %v4368_v44  ;;  %v13036_v2 = vpop.f32.mrb[94].mxu0 }
 0x806   :  { %v13038_v50 = vpop.f32.mrb[154].mxu1  ;;  %v13040_v31 = vpop.f32.mrb[95].mxu0 }
 0x807   :  { %v13042_v11 = vpop.f32.mrb[155].mxu1  ;;  %v4371_v1 = vmax.f32 %v13036_v2, %v13040_v31 }
 0x809   :  { %4372 = vmax.xlane.f32.xlu1 %v4371_v1  ;;  %v13048_v34 = vpop.f32.mrb[96].mxu0 }
 0x80a   :  { %v13050_v49 = vpop.f32.mrb[156].mxu1  ;;  %v13052_v44 = vpop.f32.mrb[97].mxu0 }
 0x80b   :  { %v13054_v39 = vpop.f32.mrb[157].mxu1  ;;  %v4374_v53 = vmax.f32 %v13048_v34, %v13052_v44 }
 0x80d   :  { %4375 = vmax.xlane.f32.xlu0 %v4374_v53  ;;  %v13060_v56 = vpop.f32.mrb[98].mxu0 }
 0x80e   :  { %v13062_v58 = vpop.f32.mrb[158].mxu1  ;;  %v13064_v1 = vpop.f32.mrb[99].mxu0 }
 0x80f   :  { %v13066_v52 = vpop.f32.mrb[159].mxu1  ;;  %v4377_v36 = vmax.f32 %v13060_v56, %v13064_v1 }
 0x811   :  { %4378 = vmax.xlane.f32.xlu1 %v4377_v36  ;;  %v13072_v18 = vpop.f32.mrb[100].mxu0 }
 0x812   :  { %15634 = vst [vmem:[#allocation56_spill] sm:$0xff] %v13072_v18  ;;  %v13074_v15 = vpop.f32.mrb[160].mxu1  ;;  %v13076_v53 = vpop.f32.mrb[101].mxu0 }
 0x813   :  { %15635 = vst [vmem:[#allocation57_spill] sm:$0xff] %v13076_v53  ;;  %v13078_v16 = vpop.f32.mrb[161].mxu1  ;;  %v4380_v22 = vmax.f32 %v13072_v18, %v13076_v53 }
 0x815   :  { %4381 = vmax.xlane.f32.xlu0 %v4380_v22  ;;  %v13084_v46 = vpop.f32.mrb[102].mxu0 }
 0x816   :  { %15636 = vst [vmem:[#allocation92_spill] sm:$0xff] %v13084_v46  ;;  %v13086_v54 = vpop.f32.mrb[162].mxu1  ;;  %v13088_v36 = vpop.f32.mrb[103].mxu0 }
 0x817   :  { %15637 = vst [vmem:[#allocation93_spill] sm:$0xff] %v13088_v36  ;;  %v13090_v4 = vpop.f32.mrb[163].mxu1  ;;  %v4383_v6 = vmax.f32 %v13084_v46, %v13088_v36 }
 0x819   :  { %4384 = vmax.xlane.f32.xlu1 %v4383_v6  ;;  %v13096_v29 = vpop.f32.mrb[104].mxu0 }
 0x81a   :  { %15638 = vst [vmem:[#allocation74_spill] sm:$0xff] %v13096_v29  ;;  %v13098_v13 = vpop.f32.mrb[164].mxu1  ;;  %v13100_v22 = vpop.f32.mrb[105].mxu0 }
 0x81b   :  { %15639 = vst [vmem:[#allocation75_spill] sm:$0xff] %v13100_v22  ;;  %v13102_v21 = vpop.f32.mrb[165].mxu1  ;;  %v4386_v60 = vmax.f32 %v13096_v29, %v13100_v22 }
 0x81d   :  { %4387 = vmax.xlane.f32.xlu0 %v4386_v60  ;;  %v13108_v43 = vpop.f32.mrb[106].mxu0 }
 0x81e   :  { %15640 = vst [vmem:[#allocation16_spill] sm:$0xff] %v13108_v43  ;;  %v13110_v24 = vpop.f32.mrb[166].mxu1  ;;  %v13112_v6 = vpop.f32.mrb[107].mxu0 }
 0x81f   :  { %15641 = vst [vmem:[#allocation101_spill] sm:$0xff] %v13112_v6  ;;  %v13114_v7 = vpop.f32.mrb[167].mxu1  ;;  %v4389_v41 = vmax.f32 %v13108_v43, %v13112_v6 }
 0x821   :  { %4390 = vmax.xlane.f32.xlu1 %v4389_v41  ;;  %v13120_v22 = vpop.f32.mrb[108].mxu0 }
 0x822   :  { %15642 = vst [vmem:[#allocation58_spill] sm:$0xff] %v13120_v22  ;;  %v13122_v29 = vpop.f32.mrb[168].mxu1  ;;  %v13124_v60 = vpop.f32.mrb[109].mxu0 }
 0x823   :  { %15643 = vst [vmem:[#allocation59_spill] sm:$0xff] %v13122_v29  ;;  %15644 = vst [vmem:[#allocation2_spill] sm:$0xff] %v13124_v60  ;;  %v13126_v42 = vpop.f32.mrb[169].mxu1  ;;  %v4392_v36 = vmax.f32 %v13120_v22, %v13124_v60 }
 0x824   :  { %15645 = vst [vmem:[#allocation48_spill] sm:$0xff] %v13126_v42 }
 0x825   :  { %4393 = vmax.xlane.f32.xlu0 %v4392_v36  ;;  %v13132_v6 = vpop.f32.mrb[110].mxu0 }
 0x826   :  { %15646 = vst [vmem:[#allocation78_spill] sm:$0xff] %v13132_v6  ;;  %v13134_v43 = vpop.f32.mrb[170].mxu1  ;;  %v13136_v41 = vpop.f32.mrb[111].mxu0 }
 0x827   :  { %15647 = vst [vmem:[#allocation79_spill] sm:$0xff] %v13134_v43  ;;  %15648 = vst [vmem:[#allocation102_spill] sm:$0xff] %v13136_v41  ;;  %v13138_v32 = vpop.f32.mrb[171].mxu1  ;;  %v4395_v53 = vmax.f32 %v13132_v6, %v13136_v41 }
 0x828   :  { %15649 = vst [vmem:[#allocation103_spill] sm:$0xff] %v13138_v32 }
 0x829   :  { %4396 = vmax.xlane.f32.xlu1 %v4395_v53  ;;  %v13144_v60 = vpop.f32.mrb[112].mxu0 }
 0x82a   :  { %15650 = vst [vmem:[#allocation60_spill] sm:$0xff] %v13144_v60  ;;  %v13146_v22 = vpop.f32.mrb[172].mxu1  ;;  %v13148_v36 = vpop.f32.mrb[113].mxu0 }
 0x82b   :  { %15651 = vst [vmem:[#allocation61_spill] sm:$0xff] %v13146_v22  ;;  %15652 = vst [vmem:[#allocation94_spill] sm:$0xff] %v13148_v36  ;;  %v13150_v46 = vpop.f32.mrb[173].mxu1  ;;  %v4398_v42 = vmax.f32 %v13144_v60, %v13148_v36 }
 0x82c   :  { %15653 = vst [vmem:[#allocation95_spill] sm:$0xff] %v13150_v46 }
 0x82d   :  { %4399 = vmax.xlane.f32.xlu0 %v4398_v42  ;;  %v13156_v41 = vpop.f32.mrb[114].mxu0 }
 0x82e   :  { %15654 = vst [vmem:[#allocation46_spill] sm:$0xff] %v13156_v41  ;;  %v13158_v6 = vpop.f32.mrb[174].mxu1  ;;  %v13160_v53 = vpop.f32.mrb[115].mxu0 }
 0x82f   :  { %15655 = vst [vmem:[#allocation80_spill] sm:$0xff] %v13158_v6  ;;  %15656 = vst [vmem:[#allocation104_spill] sm:$0xff] %v13160_v53  ;;  %v13162_v18 = vpop.f32.mrb[175].mxu1  ;;  %v4401_v32 = vmax.f32 %v13156_v41, %v13160_v53 }
 0x830   :  { %15657 = vst [vmem:[#allocation105_spill] sm:$0xff] %v13162_v18 }
 0x831   :  { %4402 = vmax.xlane.f32.xlu1 %v4401_v32  ;;  %v13168_v36 = vpop.f32.mrb[116].mxu0 }
 0x832   :  { %15658 = vst [vmem:[#allocation62_spill] sm:$0xff] %v13168_v36  ;;  %v13170_v60 = vpop.f32.mrb[176].mxu1  ;;  %v13172_v42 = vpop.f32.mrb[117].mxu0 }
 0x833   :  { %15659 = vst [vmem:[#allocation63_spill] sm:$0xff] %v13170_v60  ;;  %15660 = vst [vmem:[#allocation51_spill] sm:$0xff] %v13172_v42  ;;  %v13174_v29 = vpop.f32.mrb[177].mxu1  ;;  %v4404_v46 = vmax.f32 %v13168_v36, %v13172_v42 }
 0x834   :  { %15661 = vst [vmem:[#allocation96_spill] sm:$0xff] %v13174_v29 }
 0x835   :  { %4405 = vmax.xlane.f32.xlu0 %v4404_v46  ;;  %v13180_v53 = vpop.f32.mrb[118].mxu0 }
 0x836   :  { %15662 = vst [vmem:[#allocation83_spill] sm:$0xff] %v13180_v53  ;;  %v13182_v41 = vpop.f32.mrb[178].mxu1  ;;  %v13184_v32 = vpop.f32.mrb[119].mxu0 }
 0x837   :  { %15663 = vst [vmem:[#allocation84_spill] sm:$0xff] %v13182_v41  ;;  %15664 = vst [vmem:[#allocation106_spill] sm:$0xff] %v13184_v32  ;;  %v13186_v43 = vpop.f32.mrb[179].mxu1  ;;  %v4407_v18 = vmax.f32 %v13180_v53, %v13184_v32 }
 0x838   :  { %15665 = vst [vmem:[#allocation107_spill] sm:$0xff] %v13186_v43 }
 0x839   :  { %4408 = vmax.xlane.f32.xlu1 %v4407_v18  ;;  %v13192_v42 = vpop.f32.mrb[120].mxu0 }
 0x83a   :  { %15666 = vst [vmem:[#allocation64_spill] sm:$0xff] %v13192_v42  ;;  %v13194_v36 = vpop.f32.mrb[180].mxu1  ;;  %v13196_v46 = vpop.f32.mrb[121].mxu0 }
 0x83b   :  { %15667 = vst [vmem:[#allocation65_spill] sm:$0xff] %v13194_v36  ;;  %15668 = vst [vmem:[#allocation98_spill] sm:$0xff] %v13196_v46  ;;  %v13198_v22 = vpop.f32.mrb[181].mxu1  ;;  %v4410_v29 = vmax.f32 %v13192_v42, %v13196_v46 }
 0x83c   :  { %15669 = vst [vmem:[#allocation99_spill] sm:$0xff] %v13198_v22 }
 0x83d   :  { %4411 = vmax.xlane.f32.xlu0 %v4410_v29  ;;  %v13204_v32 = vpop.f32.mrb[122].mxu0 }
 0x83e   :  { %15670 = vst [vmem:[#allocation85_spill] sm:$0xff] %v13204_v32  ;;  %v13206_v53 = vpop.f32.mrb[182].mxu1  ;;  %v13208_v18 = vpop.f32.mrb[123].mxu0 }
 0x83f   :  { %15671 = vst [vmem:[#allocation86_spill] sm:$0xff] %v13206_v53  ;;  %15672 = vst [vmem:[#allocation108_spill] sm:$0xff] %v13208_v18  ;;  %v13210_v6 = vpop.f32.mrb[183].mxu1  ;;  %v4413_v43 = vmax.f32 %v13204_v32, %v13208_v18 }
 0x840   :  { %15673 = vst [vmem:[#allocation109_spill] sm:$0xff] %v13210_v6 }
 0x841   :  { %4414 = vmax.xlane.f32.xlu1 %v4413_v43  ;;  %v13216_v46 = vpop.f32.mrb[124].mxu0 }
 0x842   :  { %15674 = vst [vmem:[#allocation66_spill] sm:$0xff] %v13216_v46  ;;  %v13218_v42 = vpop.f32.mrb[184].mxu1  ;;  %v13220_v29 = vpop.f32.mrb[125].mxu0 }
 0x843   :  { %15675 = vst [vmem:[#allocation67_spill] sm:$0xff] %v13218_v42  ;;  %15676 = vst [vmem:[#allocation7_spill] sm:$0xff] %v13220_v29  ;;  %v4416_v60 = vmax.f32 %v13216_v46, %v13220_v29  ;;  %v13224_v22 = vpop.f32.mrb[185].mxu1 }
 0x844   :  { %15677 = vst [vmem:[#allocation9_spill] sm:$0xff] %v13224_v22 }
 0x845   :  { %4417 = vmax.xlane.f32.xlu1 %v4416_v60  ;;  %v13228_v18 = vpop.f32.mrb[126].mxu0 }
 0x846   :  { %15678 = vst [vmem:[#allocation88_spill] sm:$0xff] %v13228_v18  ;;  %v13230_v32 = vpop.f32.mrb[186].mxu1  ;;  %v13232_v43 = vpop.f32.mrb[127].mxu0 }
 0x847   :  { %15679 = vst [vmem:[#allocation90_spill] sm:$0xff] %v13230_v32  ;;  %15680 = vst [vmem:[#allocation110_spill] sm:$0xff] %v13232_v43  ;;  %v4419_v41 = vmax.f32 %v13228_v18, %v13232_v43  ;;  %v13236_v6 = vpop.f32.mrb[187].mxu1 }
 0x848   :  { %15681 = vst [vmem:[#allocation111_spill] sm:$0xff] %v13236_v6 }
 0x849   :  { %4420 = vmax.xlane.f32.xlu1 %v4419_v41  ;;  %v13240_v46 = vpop.f32.mrb[128].mxu0 }
 0x84a   :  { %15682 = vst [vmem:[#allocation68_spill] sm:$0xff] %v13240_v46  ;;  %v13242_v53 = vpop.f32.mrb[188].mxu1  ;;  %v13244_v60 = vpop.f32.mrb[129].mxu0 }
 0x84b   :  { %15683 = vst [vmem:[#allocation69_spill] sm:$0xff] %v13242_v53  ;;  %15684 = vst [vmem:[#allocation8_spill] sm:$0xff] %v13244_v60  ;;  %v4422_v36 = vmax.f32 %v13240_v46, %v13244_v60  ;;  %v13248_v22 = vpop.f32.mrb[189].mxu1 }
 0x84c   :  { %15685 = vst [vmem:[#allocation5_spill] sm:$0xff] %v13248_v22 }
 0x84d   :  { %4423 = vmax.xlane.f32.xlu1 %v4422_v36  ;;  %v13252_v18 = vpop.f32.mrb[130].mxu0 }
 0x84e   :  { %15686 = vst [vmem:[#allocation47_spill] sm:$0xff] %v13252_v18  ;;  %v13254_v42 = vpop.f32.mrb[190].mxu1  ;;  %v13256_v41 = vpop.f32.mrb[131].mxu0 }
 0x84f   :  { %15687 = vst [vmem:[#allocation91_spill] sm:$0xff] %v13254_v42  ;;  %15688 = vst [vmem:[#allocation112_spill] sm:$0xff] %v13256_v41  ;;  %v4425_v29 = vmax.f32 %v13252_v18, %v13256_v41  ;;  %v13260_v6 = vpop.f32.mrb[191].mxu1 }
 0x850   :  { %15689 = vst [vmem:[#allocation113_spill] sm:$0xff] %v13260_v6 }
 0x851   :  { %4426 = vmax.xlane.f32.xlu1 %v4425_v29  ;;  %v13264_v46 = vpop.f32.mrb[132].mxu0 }
 0x852   :  { %15690 = vst [vmem:[#allocation70_spill] sm:$0xff] %v13264_v46  ;;  %v13266_v32 = vpop.f32.mrb[192].mxu1  ;;  %v13268_v36 = vpop.f32.mrb[133].mxu0 }
 0x853   :  { %15691 = vst [vmem:[#allocation71_spill] sm:$0xff] %v13266_v32  ;;  %15692 = vst [vmem:[#allocation10_spill] sm:$0xff] %v13268_v36  ;;  %v4428_v43 = vmax.f32 %v13264_v46, %v13268_v36  ;;  %v13272_v22 = vpop.f32.mrb[193].mxu1 }
 0x854   :  { %15693 = vst [vmem:[#allocation13_spill] sm:$0xff] %v13272_v22 }
 0x855   :  { %4429 = vmax.xlane.f32.xlu1 %v4428_v43  ;;  %v13276_v18 = vpop.f32.mrb[134].mxu0 }
 0x856   :  { %15694 = vst [vmem:[#allocation114_spill] sm:$0xff] %v13276_v18  ;;  %v13278_v53 = vpop.f32.mrb[194].mxu1  ;;  %v13280_v29 = vpop.f32.mrb[135].mxu0 }
 0x857   :  { %15695 = vst [vmem:[#allocation119_spill] sm:$0xff] %v13278_v53  ;;  %15696 = vst [vmem:[#allocation118_spill] sm:$0xff] %v13280_v29  ;;  %v4431_v60 = vmax.f32 %v13276_v18, %v13280_v29  ;;  %v13284_v6 = vpop.f32.mrb[195].mxu1 }
 0x858   :  { %15697 = vst [vmem:[#allocation121_spill] sm:$0xff] %v13284_v6 }
 0x859   :  { %4432 = vmax.xlane.f32.xlu1 %v4431_v60  ;;  %v13288_v46 = vpop.f32.mrb[136].mxu0 }
 0x85a   :  { %15698 = vst [vmem:[#allocation120_spill] sm:$0xff] %v13288_v46  ;;  %v13290_v42 = vpop.f32.mrb[196].mxu1  ;;  %v13292_v43 = vpop.f32.mrb[137].mxu0 }
 0x85b   :  { %15699 = vst [vmem:[#allocation123_spill] sm:$0xff] %v13292_v43  ;;  %v4434_v41 = vmax.f32 %v13288_v46, %v13292_v43  ;;  %v13296_v22 = vpop.f32.mrb[197].mxu1  ;;  %v15710_v43 = vmax.f32 %v12966_v30, %v12970_v20 }
 0x85c   :  { %15700 = vst [vmem:[#allocation122_spill] sm:$0xff] %v13296_v22 }
 0x85d   :  { %4435 = vmax.xlane.f32.xlu1 %v4434_v41  ;;  %v13300_v18 = vpop.f32.mrb[138].mxu0 }
 0x85e   :  { %15701 = vst [vmem:[#allocation125_spill] sm:$0xff] %v13300_v18  ;;  %v13302_v32 = vpop.f32.mrb[198].mxu1  ;;  %v13304_v60 = vpop.f32.mrb[139].mxu0 }
 0x85f   :  { %15702 = vst [vmem:[#allocation124_spill] sm:$0xff] %v13304_v60  ;;  %v4437_v36 = vmax.f32 %v13300_v18, %v13304_v60  ;;  %v13308_v6 = vpop.f32.mrb[199].mxu1  ;;  %v15708_v18 = vmax.f32 %v12942_v51, %v12946_v27 }
 0x860   :  { %15703 = vst [vmem:[#allocation127_spill] sm:$0xff] %v13308_v6 }
 0x861   :  { %4438 = vmax.xlane.f32.xlu1 %v4437_v36  ;;  %v13312_v46 = vpop.f32.mrb[140].mxu0  ;;  %v15709_v36 = vmax.f32 %v12954_v48, %v12958_v25 }
 0x862   :  { %15704 = vst [vmem:[#allocation126_spill] sm:$0xff] %v13312_v46  ;;  %v13314_v53 = vpop.f32.mrb[200].mxu1  ;;  %v13316_v41 = vpop.f32.mrb[141].mxu0 }
 0x863   :  { %15705 = vst [vmem:[#allocation129_spill] sm:$0xff] %v13314_v53  ;;  %15706 = vst [vmem:[#allocation128_spill] sm:$0xff] %v13316_v41  ;;  %v4440_v29 = vmax.f32 %v13312_v46, %v13316_v41  ;;  %v13320_v22 = vpop.f32.mrb[201].mxu1  ;;  %v15711_v41 = vmax.f32 %v12978_v19, %v12982_v0 }
 0x864   :  { %15707 = vst [vmem:[#allocation131_spill] sm:$0xff] %v13320_v22 }
 0x865   :  { %4441 = vmax.xlane.f32.xlu1 %v4440_v29 }
 0x869   :  { %4828 = vmax.xlane.f32.xlu1 %v15708_v18  ;;  %v15712_v18 = vmax.f32 %v12990_v38, %v12994_v10 }
 0x86d   :  { %4831 = vmax.xlane.f32.xlu1 %v15709_v36 }
 0x871   :  { %4834 = vmax.xlane.f32.xlu1 %v15710_v43 }
 0x875   :  { %4837 = vmax.xlane.f32.xlu1 %v15711_v41 }
 0x876   :  { %v4349_v46 = vpop.xlane.xlu0 %4348 }
 0x877   :  { %v4443_v60 = vsub.f32 %v12940_v55, %v4349_v46  ;;  %v4444_v29 = vsub.f32 %v12944_v26, %v4349_v46  ;;  %v15713_v55 = vmax.f32 %v13002_v61, %v13006_v37 }
 0x879   :  { %v4507_v22 = vmul.f32 1.442695, %v4443_v60  ;;  %v4509_v27 = vmul.f32 1.442695, %v4444_v29  ;;  %4840 = vmax.xlane.f32.xlu1 %v15712_v18 }
 0x87a   :  { %v4352_v36 = vpop.xlane.xlu1 %4351 }
 0x87b   :  { %9611 = vpow2.f32 %v4507_v22  ;;  %v4445_v20 = vsub.f32 %v12952_v17, %v4352_v36  ;;  %v4446_v43 = vsub.f32 %v12956_v40, %v4352_v36  ;;  %v15714_v17 = vmax.f32 %v13014_v5, %v13018_v3 }
 0x87c   :  { %9613 = vpow2.f32 %v4509_v27 }
 0x87d   :  { %v4511_v0 = vmul.f32 1.442695, %v4445_v20  ;;  %v4513_v41 = vmul.f32 1.442695, %v4446_v43  ;;  %4843 = vmax.xlane.f32.xlu1 %v15713_v55 }
 0x87e   :  { %v4355_v26 = vpop.xlane.xlu1 %4354 }
 0x87f   :  { %9615 = vpow2.f32 %v4511_v0  ;;  %v4447_v46 = vsub.f32 %v12964_v12, %v4355_v26  ;;  %v4448_v60 = vsub.f32 %v12968_v33, %v4355_v26  ;;  %v15715_v33 = vmax.f32 %v13026_v63, %v13030_v47 }
 0x880   :  { %9617 = vpow2.f32 %v4513_v41 }
 0x881   :  { %v4515_v29 = vmul.f32 1.442695, %v4447_v46  ;;  %v4517_v22 = vmul.f32 1.442695, %v4448_v60  ;;  %4846 = vmax.xlane.f32.xlu1 %v15714_v17  ;;  %v15716_v60 = vmax.f32 %v13038_v50, %v13042_v11 }
 0x882   :  { %v4358_v27 = vpop.xlane.xlu1 %4357 }
 0x883   :  { %9619 = vpow2.f32 %v4515_v29  ;;  %v4449_v40 = vsub.f32 %v12976_v57, %v4358_v27  ;;  %v4450_v20 = vsub.f32 %v12980_v28, %v4358_v27 }
 0x884   :  { %9621 = vpow2.f32 %v4517_v22 }
 0x885   :  { %v13353_v18 = vpop.eup %9611  ;;  %v4519_v0 = vmul.f32 1.442695, %v4449_v40  ;;  %v4521_v12 = vmul.f32 1.442695, %v4450_v20  ;;  %4849 = vmax.xlane.f32.xlu1 %v15715_v33 }
 0x886   :  { %v13358_v36 = vpop.eup %9613  ;;  %v4361_v43 = vpop.xlane.xlu1 %4360 }
 0x887   :  { %9623 = vpow2.f32 %v4519_v0  ;;  %v4451_v41 = vsub.f32 %v12988_v14, %v4361_v43  ;;  %v4452_v55 = vsub.f32 %v12992_v35, %v4361_v43  ;;  %v4635_v57 = vadd.f32 %v13358_v36, %v13353_v18 }
 0x888   :  { %9625 = vpow2.f32 %v4521_v12  ;;  %v15717_v0 = vmax.f32 %v13050_v49, %v13054_v39 }
 0x889   :  { %v13364_v28 = vpop.eup %9615  ;;  %v4523_v26 = vmul.f32 1.442695, %v4451_v41  ;;  %v4525_v46 = vmul.f32 1.442695, %v4452_v55  ;;  %4636 = vadd.xlane.f32.xlu0 %v4635_v57  ;;  %4852 = vmax.xlane.f32.xlu1 %v15716_v60 }
 0x88a   :  { %v13369_v29 = vpop.eup %9617  ;;  %v4364_v22 = vpop.xlane.xlu1 %4363 }
 0x88b   :  { %9627 = vpow2.f32 %v4523_v26  ;;  %v4453_v14 = vsub.f32 %v13000_v9, %v4364_v22  ;;  %v4454_v35 = vsub.f32 %v13004_v59, %v4364_v22  ;;  %v4638_v17 = vadd.f32 %v13369_v29, %v13364_v28 }
 0x88c   :  { %9629 = vpow2.f32 %v4525_v46  ;;  %v15718_v26 = vmax.f32 %v13062_v58, %v13066_v52 }
 0x88d   :  { %v13375_v27 = vpop.eup %9619  ;;  %v4527_v40 = vmul.f32 1.442695, %v4453_v14  ;;  %v4529_v20 = vmul.f32 1.442695, %v4454_v35  ;;  %4639 = vadd.xlane.f32.xlu0 %v4638_v17  ;;  %4855 = vmax.xlane.f32.xlu1 %v15717_v0 }
 0x88e   :  { %v13380_v12 = vpop.eup %9621  ;;  %v4367_v33 = vpop.xlane.xlu1 %4366 }
 0x88f   :  { %9631 = vpow2.f32 %v4527_v40  ;;  %v4455_v9 = vsub.f32 %v13012_v23, %v4367_v33  ;;  %v4456_v59 = vsub.f32 %v13016_v62, %v4367_v33  ;;  %v4641_v43 = vadd.f32 %v13380_v12, %v13375_v27 }
 0x890   :  { %9633 = vpow2.f32 %v4529_v20  ;;  %v15719_v40 = vmax.f32 %v13074_v15, %v13078_v16 }
 0x891   :  { %v13386_v41 = vpop.eup %9623  ;;  %v4531_v55 = vmul.f32 1.442695, %v4455_v9  ;;  %v4533_v57 = vmul.f32 1.442695, %v4456_v59  ;;  %4642 = vadd.xlane.f32.xlu0 %v4641_v43  ;;  %4858 = vmax.xlane.f32.xlu1 %v15718_v26 }
 0x892   :  { %v13391_v46 = vpop.eup %9625  ;;  %v4370_v60 = vpop.xlane.xlu0 %4369 }
 0x893   :  { %9635 = vpow2.f32 %v4531_v55  ;;  %v4457_v23 = vsub.f32 %v13024_v45, %v4370_v60  ;;  %v4458_v62 = vsub.f32 %v13028_v8, %v4370_v60  ;;  %v4644_v22 = vadd.f32 %v13391_v46, %v13386_v41 }
 0x894   :  { %9637 = vpow2.f32 %v4533_v57  ;;  %v15721_v55 = vmax.f32 %v13086_v54, %v13090_v4 }
 0x895   :  { %v13397_v14 = vpop.eup %9627  ;;  %v4535_v35 = vmul.f32 1.442695, %v4457_v23  ;;  %v4537_v17 = vmul.f32 1.442695, %v4458_v62  ;;  %4645 = vadd.xlane.f32.xlu0 %v4644_v22  ;;  %4861 = vmax.xlane.f32.xlu1 %v15719_v40 }
 0x896   :  { %v13402_v20 = vpop.eup %9629  ;;  %v4373_v0 = vpop.xlane.xlu1 %4372 }
 0x897   :  { %9639 = vpow2.f32 %v4535_v35  ;;  %v4459_v45 = vsub.f32 %v13036_v2, %v4373_v0  ;;  %v4460_v8 = vsub.f32 %v13040_v31, %v4373_v0  ;;  %v4647_v33 = vadd.f32 %v13402_v20, %v13397_v14 }
 0x898   :  { %9641 = vpow2.f32 %v4537_v17  ;;  %v15723_v35 = vmax.f32 %v13098_v13, %v13102_v21 }
 0x899   :  { %v13408_v9 = vpop.eup %9631  ;;  %v4539_v59 = vmul.f32 1.442695, %v4459_v45  ;;  %v4541_v43 = vmul.f32 1.442695, %v4460_v8  ;;  %4648 = vadd.xlane.f32.xlu0 %v4647_v33  ;;  %4864 = vmax.xlane.f32.xlu1 %v15721_v55 }
 0x89a   :  { %15720 = vst [vmem:[#allocation130_spill] sm:$0xff] %v13408_v9  ;;  %v13413_v57 = vpop.eup %9633  ;;  %v4376_v26 = vpop.xlane.xlu0 %4375 }
 0x89b   :  { %9643 = vpow2.f32 %v4539_v59  ;;  %v4461_v2 = vsub.f32 %v13048_v34, %v4376_v26  ;;  %v4462_v31 = vsub.f32 %v13052_v44, %v4376_v26  ;;  %v4650_v60 = vadd.f32 %v13413_v57, %v13408_v9 }
 0x89c   :  { %9645 = vpow2.f32 %v4541_v43  ;;  %v15726_v59 = vmax.f32 %v13110_v24, %v13114_v7 }
 0x89d   :  { %v13419_v23 = vpop.eup %9635  ;;  %v4543_v62 = vmul.f32 1.442695, %v4461_v2  ;;  %v4545_v22 = vmul.f32 1.442695, %v4462_v31  ;;  %4651 = vadd.xlane.f32.xlu0 %v4650_v60  ;;  %4867 = vmax.xlane.f32.xlu1 %v15723_v35  ;;  %v15731_v35 = vld [vmem:[#allocation59_spill] sm:$0xff] }
 0x89e   :  { %15722 = vst [vmem:[#allocation133_spill] sm:$0xff] %v13419_v23  ;;  %v13424_v17 = vpop.eup %9637  ;;  %v4379_v40 = vpop.xlane.xlu1 %4378 }
 0x89f   :  { %15724 = vst [vmem:[#allocation132_spill] sm:$0xff] %v13424_v17  ;;  %9647 = vpow2.f32 %v4543_v62  ;;  %v4463_v34 = vsub.f32 %v13060_v56, %v4379_v40  ;;  %v4464_v44 = vsub.f32 %v13064_v1, %v4379_v40  ;;  %v4653_v0 = vadd.f32 %v13424_v17, %v13419_v23  ;;  %v15728_v56 = vld [vmem:[#allocation56_spill] sm:$0xff]  ;;  %v15729_v1 = vld [vmem:[#allocation57_spill] sm:$0xff] }
 0x8a0   :  { %9649 = vpow2.f32 %v4545_v22  ;;  %v15732_v40 = vld [vmem:[#allocation48_spill] sm:$0xff] }
 0x8a1   :  { %v13430_v45 = vpop.eup %9639  ;;  %v4547_v8 = vmul.f32 1.442695, %v4463_v34  ;;  %v4549_v33 = vmul.f32 1.442695, %v4464_v44  ;;  %4654 = vadd.xlane.f32.xlu0 %v4653_v0  ;;  %4870 = vmax.xlane.f32.xlu1 %v15726_v59  ;;  %v15733_v34 = vmax.f32 %v15731_v35, %v15732_v40 }
 0x8a2   :  { %15725 = vst [vmem:[#allocation135_spill] sm:$0xff] %v13430_v45  ;;  %v13435_v43 = vpop.eup %9641  ;;  %v4382_v55 = vpop.xlane.xlu0 %4381 }
 0x8a3   :  { %15727 = vst [vmem:[#allocation134_spill] sm:$0xff] %v13435_v43  ;;  %9651 = vpow2.f32 %v4547_v8  ;;  %v4465_v26 = vsub.f32 %v15728_v56, %v4382_v55  ;;  %v4466_v2 = vsub.f32 %v15729_v1, %v4382_v55  ;;  %v4656_v31 = vadd.f32 %v13435_v43, %v13430_v45  ;;  %v15735_v8 = vld [vmem:[#allocation92_spill] sm:$0xff]  ;;  %v15736_v55 = vld [vmem:[#allocation93_spill] sm:$0xff]  ;;  %v15739_v45 = vld [vmem:[#allocation103_spill] sm:$0xff] }
 0x8a4   :  { %9653 = vpow2.f32 %v4549_v33 }
 0x8a5   :  { %v13441_v60 = vpop.eup %9643  ;;  %v4551_v62 = vmul.f32 1.442695, %v4465_v26  ;;  %v4553_v22 = vmul.f32 1.442695, %v4466_v2  ;;  %4657 = vadd.xlane.f32.xlu0 %v4656_v31  ;;  %4873 = vmax.xlane.f32.xlu1 %v15733_v34  ;;  %v15738_v31 = vld [vmem:[#allocation79_spill] sm:$0xff] }
 0x8a6   :  { %15730 = vst [vmem:[#allocation137_spill] sm:$0xff] %v13441_v60  ;;  %v13446_v44 = vpop.eup %9645  ;;  %v4385_v0 = vpop.xlane.xlu1 %4384  ;;  %v15740_v34 = vmax.f32 %v15738_v31, %v15739_v45 }
 0x8a7   :  { %15734 = vst [vmem:[#allocation136_spill] sm:$0xff] %v13446_v44  ;;  %9655 = vpow2.f32 %v4551_v62  ;;  %v4467_v59 = vsub.f32 %v15735_v8, %v4385_v0  ;;  %v4468_v56 = vsub.f32 %v15736_v55, %v4385_v0  ;;  %v4659_v33 = vadd.f32 %v13446_v44, %v13441_v60  ;;  %v15742_v8 = vld [vmem:[#allocation74_spill] sm:$0xff]  ;;  %v15743_v0 = vld [vmem:[#allocation75_spill] sm:$0xff] }
 0x8a8   :  { %9657 = vpow2.f32 %v4553_v22  ;;  %v15746_v44 = vld [vmem:[#allocation95_spill] sm:$0xff] }
 0x8a9   :  { %v13452_v1 = vpop.eup %9647  ;;  %v4555_v26 = vmul.f32 1.442695, %v4467_v59  ;;  %v4557_v2 = vmul.f32 1.442695, %v4468_v56  ;;  %4660 = vadd.xlane.f32.xlu0 %v4659_v33  ;;  %4876 = vmax.xlane.f32.xlu1 %v15740_v34  ;;  %v15745_v33 = vld [vmem:[#allocation61_spill] sm:$0xff] }
 0x8aa   :  { %15737 = vst [vmem:[#allocation139_spill] sm:$0xff] %v13452_v1  ;;  %v13457_v43 = vpop.eup %9649  ;;  %v4388_v62 = vpop.xlane.xlu0 %4387  ;;  %v15747_v34 = vmax.f32 %v15745_v33, %v15746_v44 }
 0x8ab   :  { %15741 = vst [vmem:[#allocation138_spill] sm:$0xff] %v13457_v43  ;;  %9659 = vpow2.f32 %v4555_v26  ;;  %v4469_v23 = vsub.f32 %v15742_v8, %v4388_v62  ;;  %v4470_v55 = vsub.f32 %v15743_v0, %v4388_v62  ;;  %v4662_v22 = vadd.f32 %v13457_v43, %v13452_v1  ;;  %v15749_v8 = vld [vmem:[#allocation16_spill] sm:$0xff]  ;;  %v15750_v62 = vld [vmem:[#allocation101_spill] sm:$0xff] }
 0x8ac   :  { %9661 = vpow2.f32 %v4557_v2  ;;  %v15753_v43 = vld [vmem:[#allocation105_spill] sm:$0xff] }
 0x8ad   :  { %v13463_v60 = vpop.eup %9651  ;;  %v4559_v59 = vmul.f32 1.442695, %v4469_v23  ;;  %v4561_v56 = vmul.f32 1.442695, %v4470_v55  ;;  %4663 = vadd.xlane.f32.xlu0 %v4662_v22  ;;  %4879 = vmax.xlane.f32.xlu1 %v15747_v34  ;;  %v15752_v22 = vld [vmem:[#allocation80_spill] sm:$0xff] }
 0x8ae   :  { %15744 = vst [vmem:[#allocation141_spill] sm:$0xff] %v13463_v60  ;;  %v13468_v17 = vpop.eup %9653  ;;  %v4391_v26 = vpop.xlane.xlu1 %4390  ;;  %v15754_v34 = vmax.f32 %v15752_v22, %v15753_v43 }
 0x8af   :  { %15748 = vst [vmem:[#allocation140_spill] sm:$0xff] %v13468_v17  ;;  %9663 = vpow2.f32 %v4559_v59  ;;  %v4471_v9 = vsub.f32 %v15749_v8, %v4391_v26  ;;  %v4472_v0 = vsub.f32 %v15750_v62, %v4391_v26  ;;  %v4665_v2 = vadd.f32 %v13468_v17, %v13463_v60  ;;  %v15756_v8 = vld [vmem:[#allocation58_spill] sm:$0xff]  ;;  %v15760_v17 = vld [vmem:[#allocation96_spill] sm:$0xff] }
 0x8b0   :  { %9665 = vpow2.f32 %v4561_v56  ;;  %v15757_v26 = vld [vmem:[#allocation2_spill] sm:$0xff] }
 0x8b1   :  { %v13474_v1 = vpop.eup %9655  ;;  %v4563_v23 = vmul.f32 1.442695, %v4471_v9  ;;  %v4565_v55 = vmul.f32 1.442695, %v4472_v0  ;;  %4666 = vadd.xlane.f32.xlu0 %v4665_v2  ;;  %4882 = vmax.xlane.f32.xlu1 %v15754_v34  ;;  %v15759_v2 = vld [vmem:[#allocation63_spill] sm:$0xff] }
 0x8b2   :  { %15751 = vst [vmem:[#allocation143_spill] sm:$0xff] %v13474_v1  ;;  %v13479_v44 = vpop.eup %9657  ;;  %v4394_v59 = vpop.xlane.xlu0 %4393  ;;  %v15761_v34 = vmax.f32 %v15759_v2, %v15760_v17 }
 0x8b3   :  { %15755 = vst [vmem:[#allocation142_spill] sm:$0xff] %v13479_v44  ;;  %9667 = vpow2.f32 %v4563_v23  ;;  %v4473_v33 = vsub.f32 %v15756_v8, %v4394_v59  ;;  %v4474_v62 = vsub.f32 %v15757_v26, %v4394_v59  ;;  %v4668_v56 = vadd.f32 %v13479_v44, %v13474_v1  ;;  %v15763_v8 = vld [vmem:[#allocation78_spill] sm:$0xff]  ;;  %v15767_v44 = vld [vmem:[#allocation107_spill] sm:$0xff] }
 0x8b4   :  { %9669 = vpow2.f32 %v4565_v55  ;;  %v15764_v59 = vld [vmem:[#allocation102_spill] sm:$0xff] }
 0x8b5   :  { %v13485_v60 = vpop.eup %9659  ;;  %v4567_v9 = vmul.f32 1.442695, %v4473_v33  ;;  %v4569_v0 = vmul.f32 1.442695, %v4474_v62  ;;  %4669 = vadd.xlane.f32.xlu0 %v4668_v56  ;;  %4885 = vmax.xlane.f32.xlu1 %v15761_v34  ;;  %v15766_v56 = vld [vmem:[#allocation84_spill] sm:$0xff] }
 0x8b6   :  { %15758 = vst [vmem:[#allocation145_spill] sm:$0xff] %v13485_v60  ;;  %v13490_v43 = vpop.eup %9661  ;;  %v4397_v23 = vpop.xlane.xlu1 %4396  ;;  %v15768_v34 = vmax.f32 %v15766_v56, %v15767_v44 }
 0x8b7   :  { %15762 = vst [vmem:[#allocation144_spill] sm:$0xff] %v13490_v43  ;;  %9671 = vpow2.f32 %v4567_v9  ;;  %v4475_v22 = vsub.f32 %v15763_v8, %v4397_v23  ;;  %v4476_v26 = vsub.f32 %v15764_v59, %v4397_v23  ;;  %v4671_v55 = vadd.f32 %v13490_v43, %v13485_v60  ;;  %v15770_v8 = vld [vmem:[#allocation60_spill] sm:$0xff]  ;;  %v15771_v23 = vld [vmem:[#allocation94_spill] sm:$0xff]  ;;  %v15774_v43 = vld [vmem:[#allocation99_spill] sm:$0xff] }
 0x8b8   :  { %9673 = vpow2.f32 %v4569_v0 }
 0x8b9   :  { %v13496_v1 = vpop.eup %9663  ;;  %v4571_v33 = vmul.f32 1.442695, %v4475_v22  ;;  %v4573_v62 = vmul.f32 1.442695, %v4476_v26  ;;  %4672 = vadd.xlane.f32.xlu0 %v4671_v55  ;;  %4888 = vmax.xlane.f32.xlu1 %v15768_v34  ;;  %v15773_v55 = vld [vmem:[#allocation65_spill] sm:$0xff] }
 0x8ba   :  { %15765 = vst [vmem:[#allocation147_spill] sm:$0xff] %v13496_v1  ;;  %v13501_v17 = vpop.eup %9665  ;;  %v4400_v9 = vpop.xlane.xlu0 %4399  ;;  %v15775_v34 = vmax.f32 %v15773_v55, %v15774_v43 }
 0x8bb   :  { %15769 = vst [vmem:[#allocation146_spill] sm:$0xff] %v13501_v17  ;;  %9675 = vpow2.f32 %v4571_v33  ;;  %v4477_v2 = vsub.f32 %v15770_v8, %v4400_v9  ;;  %v4478_v59 = vsub.f32 %v15771_v23, %v4400_v9  ;;  %v4674_v0 = vadd.f32 %v13501_v17, %v13496_v1  ;;  %v15777_v8 = vld [vmem:[#allocation46_spill] sm:$0xff]  ;;  %v15778_v9 = vld [vmem:[#allocation104_spill] sm:$0xff]  ;;  %v15781_v17 = vld [vmem:[#allocation109_spill] sm:$0xff] }
 0x8bc   :  { %9677 = vpow2.f32 %v4573_v62 }
 0x8bd   :  { %v13507_v60 = vpop.eup %9667  ;;  %v4575_v22 = vmul.f32 1.442695, %v4477_v2  ;;  %v4577_v26 = vmul.f32 1.442695, %v4478_v59  ;;  %4675 = vadd.xlane.f32.xlu0 %v4674_v0  ;;  %4891 = vmax.xlane.f32.xlu1 %v15775_v34  ;;  %v15780_v0 = vld [vmem:[#allocation86_spill] sm:$0xff] }
 0x8be   :  { %15772 = vst [vmem:[#allocation56_spill] sm:$0xff] %v13507_v60  ;;  %v13512_v44 = vpop.eup %9669  ;;  %v4403_v33 = vpop.xlane.xlu1 %4402  ;;  %v15782_v34 = vmax.f32 %v15780_v0, %v15781_v17 }
 0x8bf   :  { %15776 = vst [vmem:[#allocation57_spill] sm:$0xff] %v13512_v44  ;;  %9679 = vpow2.f32 %v4575_v22  ;;  %v4479_v56 = vsub.f32 %v15777_v8, %v4403_v33  ;;  %v4480_v23 = vsub.f32 %v15778_v9, %v4403_v33  ;;  %v4677_v62 = vadd.f32 %v13512_v44, %v13507_v60  ;;  %v15784_v8 = vld [vmem:[#allocation62_spill] sm:$0xff]  ;;  %v15785_v33 = vld [vmem:[#allocation51_spill] sm:$0xff]  ;;  %v15788_v44 = vld [vmem:[#allocation9_spill] sm:$0xff] }
 0x8c0   :  { %9681 = vpow2.f32 %v4577_v26 }
 0x8c1   :  { %v13518_v1 = vpop.eup %9671  ;;  %v4579_v2 = vmul.f32 1.442695, %v4479_v56  ;;  %v4581_v59 = vmul.f32 1.442695, %v4480_v23  ;;  %4678 = vadd.xlane.f32.xlu0 %v4677_v62  ;;  %4894 = vmax.xlane.f32.xlu1 %v15782_v34  ;;  %v15787_v62 = vld [vmem:[#allocation67_spill] sm:$0xff] }
 0x8c2   :  { %15779 = vst [vmem:[#allocation59_spill] sm:$0xff] %v13518_v1  ;;  %v13523_v43 = vpop.eup %9673  ;;  %v4406_v22 = vpop.xlane.xlu0 %4405  ;;  %v15789_v34 = vmax.f32 %v15787_v62, %v15788_v44 }
 0x8c3   :  { %15783 = vst [vmem:[#allocation48_spill] sm:$0xff] %v13523_v43  ;;  %9683 = vpow2.f32 %v4579_v2  ;;  %v4481_v55 = vsub.f32 %v15784_v8, %v4406_v22  ;;  %v4482_v9 = vsub.f32 %v15785_v33, %v4406_v22  ;;  %v4680_v26 = vadd.f32 %v13523_v43, %v13518_v1  ;;  %v15791_v8 = vld [vmem:[#allocation83_spill] sm:$0xff]  ;;  %v15792_v22 = vld [vmem:[#allocation106_spill] sm:$0xff] }
 0x8c4   :  { %9685 = vpow2.f32 %v4581_v59  ;;  %v15795_v43 = vld [vmem:[#allocation111_spill] sm:$0xff] }
 0x8c5   :  { %v13529_v60 = vpop.eup %9675  ;;  %v4583_v56 = vmul.f32 1.442695, %v4481_v55  ;;  %v4585_v23 = vmul.f32 1.442695, %v4482_v9  ;;  %4681 = vadd.xlane.f32.xlu0 %v4680_v26  ;;  %4897 = vmax.xlane.f32.xlu1 %v15789_v34  ;;  %v15794_v26 = vld [vmem:[#allocation90_spill] sm:$0xff] }
 0x8c6   :  { %15786 = vst [vmem:[#allocation92_spill] sm:$0xff] %v13529_v60  ;;  %v13534_v17 = vpop.eup %9677  ;;  %v4409_v2 = vpop.xlane.xlu1 %4408  ;;  %v15796_v34 = vmax.f32 %v15794_v26, %v15795_v43 }
 0x8c7   :  { %15790 = vst [vmem:[#allocation93_spill] sm:$0xff] %v13534_v17  ;;  %9687 = vpow2.f32 %v4583_v56  ;;  %v4483_v0 = vsub.f32 %v15791_v8, %v4409_v2  ;;  %v4484_v33 = vsub.f32 %v15792_v22, %v4409_v2  ;;  %v4683_v59 = vadd.f32 %v13534_v17, %v13529_v60  ;;  %v15798_v8 = vld [vmem:[#allocation64_spill] sm:$0xff]  ;;  %v15799_v2 = vld [vmem:[#allocation98_spill] sm:$0xff]  ;;  %v15802_v17 = vld [vmem:[#allocation5_spill] sm:$0xff] }
 0x8c8   :  { %9689 = vpow2.f32 %v4585_v23 }
 0x8c9   :  { %v13540_v1 = vpop.eup %9679  ;;  %v4587_v55 = vmul.f32 1.442695, %v4483_v0  ;;  %v4589_v9 = vmul.f32 1.442695, %v4484_v33  ;;  %4684 = vadd.xlane.f32.xlu0 %v4683_v59  ;;  %4900 = vmax.xlane.f32.xlu1 %v15796_v34  ;;  %v15801_v59 = vld [vmem:[#allocation69_spill] sm:$0xff] }
 0x8ca   :  { %15793 = vst [vmem:[#allocation79_spill] sm:$0xff] %v13540_v1  ;;  %v13545_v44 = vpop.eup %9681  ;;  %v4412_v56 = vpop.xlane.xlu0 %4411  ;;  %v15803_v34 = vmax.f32 %v15801_v59, %v15802_v17 }
 0x8cb   :  { %15797 = vst [vmem:[#allocation103_spill] sm:$0xff] %v13545_v44  ;;  %9691 = vpow2.f32 %v4587_v55  ;;  %v4485_v62 = vsub.f32 %v15798_v8, %v4412_v56  ;;  %v4486_v22 = vsub.f32 %v15799_v2, %v4412_v56  ;;  %v4686_v23 = vadd.f32 %v13545_v44, %v13540_v1  ;;  %v15805_v8 = vld [vmem:[#allocation85_spill] sm:$0xff]  ;;  %v15806_v56 = vld [vmem:[#allocation108_spill] sm:$0xff] }
 0x8cc   :  { %9693 = vpow2.f32 %v4589_v9  ;;  %v15809_v44 = vld [vmem:[#allocation113_spill] sm:$0xff] }
 0x8cd   :  { %v13551_v60 = vpop.eup %9683  ;;  %v4591_v0 = vmul.f32 1.442695, %v4485_v62  ;;  %v4593_v33 = vmul.f32 1.442695, %v4486_v22  ;;  %4687 = vadd.xlane.f32.xlu0 %v4686_v23  ;;  %4903 = vmax.xlane.f32.xlu1 %v15803_v34  ;;  %v15808_v23 = vld [vmem:[#allocation91_spill] sm:$0xff] }
 0x8ce   :  { %15800 = vst [vmem:[#allocation74_spill] sm:$0xff] %v13551_v60  ;;  %v13556_v43 = vpop.eup %9685  ;;  %v4415_v55 = vpop.xlane.xlu1 %4414  ;;  %v15810_v34 = vmax.f32 %v15808_v23, %v15809_v44 }
 0x8cf   :  { %15804 = vst [vmem:[#allocation75_spill] sm:$0xff] %v13556_v43  ;;  %9695 = vpow2.f32 %v4591_v0  ;;  %v4487_v26 = vsub.f32 %v15805_v8, %v4415_v55  ;;  %v4488_v2 = vsub.f32 %v15806_v56, %v4415_v55  ;;  %v4689_v9 = vadd.f32 %v13556_v43, %v13551_v60  ;;  %v15812_v8 = vld [vmem:[#allocation66_spill] sm:$0xff]  ;;  %v15813_v55 = vld [vmem:[#allocation7_spill] sm:$0xff]  ;;  %v15816_v43 = vld [vmem:[#allocation13_spill] sm:$0xff] }
 0x8d0   :  { %9697 = vpow2.f32 %v4593_v33 }
 0x8d1   :  { %v13562_v1 = vpop.eup %9687  ;;  %v4595_v62 = vmul.f32 1.442695, %v4487_v26  ;;  %v4597_v22 = vmul.f32 1.442695, %v4488_v2  ;;  %4690 = vadd.xlane.f32.xlu0 %v4689_v9  ;;  %4906 = vmax.xlane.f32.xlu1 %v15810_v34  ;;  %v15815_v9 = vld [vmem:[#allocation71_spill] sm:$0xff] }
 0x8d2   :  { %15807 = vst [vmem:[#allocation16_spill] sm:$0xff] %v13562_v1  ;;  %v13567_v17 = vpop.eup %9689  ;;  %v4418_v0 = vpop.xlane.xlu1 %4417  ;;  %v15817_v34 = vmax.f32 %v15815_v9, %v15816_v43 }
 0x8d3   :  { %15811 = vst [vmem:[#allocation101_spill] sm:$0xff] %v13567_v17  ;;  %9699 = vpow2.f32 %v4595_v62  ;;  %v4489_v59 = vsub.f32 %v15812_v8, %v4418_v0  ;;  %v4490_v56 = vsub.f32 %v15813_v55, %v4418_v0  ;;  %v4692_v33 = vadd.f32 %v13567_v17, %v13562_v1  ;;  %v15819_v8 = vld [vmem:[#allocation88_spill] sm:$0xff]  ;;  %v15820_v0 = vld [vmem:[#allocation110_spill] sm:$0xff]  ;;  %v15823_v17 = vld [vmem:[#allocation121_spill] sm:$0xff] }
 0x8d4   :  { %9701 = vpow2.f32 %v4597_v22 }
 0x8d5   :  { %v13573_v60 = vpop.eup %9691  ;;  %v4599_v26 = vmul.f32 1.442695, %v4489_v59  ;;  %v4601_v2 = vmul.f32 1.442695, %v4490_v56  ;;  %4693 = vadd.xlane.f32.xlu0 %v4692_v33  ;;  %4909 = vmax.xlane.f32.xlu1 %v15817_v34  ;;  %v15822_v33 = vld [vmem:[#allocation119_spill] sm:$0xff] }
 0x8d6   :  { %15814 = vst [vmem:[#allocation58_spill] sm:$0xff] %v13573_v60  ;;  %v13578_v44 = vpop.eup %9693  ;;  %v4421_v62 = vpop.xlane.xlu1 %4420  ;;  %v15824_v34 = vmax.f32 %v15822_v33, %v15823_v17 }
 0x8d7   :  { %15818 = vst [vmem:[#allocation2_spill] sm:$0xff] %v13578_v44  ;;  %9703 = vpow2.f32 %v4599_v26  ;;  %v4491_v23 = vsub.f32 %v15819_v8, %v4421_v62  ;;  %v4492_v55 = vsub.f32 %v15820_v0, %v4421_v62  ;;  %v4695_v22 = vadd.f32 %v13578_v44, %v13573_v60  ;;  %v15826_v8 = vld [vmem:[#allocation68_spill] sm:$0xff] }
 0x8d8   :  { %9705 = vpow2.f32 %v4601_v2  ;;  %v15827_v62 = vld [vmem:[#allocation8_spill] sm:$0xff] }
 0x8d9   :  { %v13584_v1 = vpop.eup %9695  ;;  %v4603_v59 = vmul.f32 1.442695, %v4491_v23  ;;  %v4605_v56 = vmul.f32 1.442695, %v4492_v55  ;;  %4696 = vadd.xlane.f32.xlu0 %v4695_v22  ;;  %4912 = vmax.xlane.f32.xlu1 %v15824_v34  ;;  %v15829_v22 = vld [vmem:[#allocation122_spill] sm:$0xff] }
 0x8da   :  { %15821 = vst [vmem:[#allocation78_spill] sm:$0xff] %v13584_v1  ;;  %v13589_v43 = vpop.eup %9697  ;;  %v4424_v26 = vpop.xlane.xlu1 %4423  ;;  %v15830_v34 = vmax.f32 %v13290_v42, %v15829_v22 }
 0x8db   :  { %15825 = vst [vmem:[#allocation102_spill] sm:$0xff] %v13589_v43  ;;  %9707 = vpow2.f32 %v4603_v59  ;;  %v4493_v9 = vsub.f32 %v15826_v8, %v4424_v26  ;;  %v4494_v0 = vsub.f32 %v15827_v62, %v4424_v26  ;;  %v4698_v2 = vadd.f32 %v13589_v43, %v13584_v1  ;;  %v15832_v8 = vld [vmem:[#allocation47_spill] sm:$0xff]  ;;  %v15833_v26 = vld [vmem:[#allocation112_spill] sm:$0xff] }
 0x8dc   :  { %9709 = vpow2.f32 %v4605_v56 }
 0x8dd   :  { %v13595_v60 = vpop.eup %9699  ;;  %v4607_v23 = vmul.f32 1.442695, %v4493_v9  ;;  %v4609_v55 = vmul.f32 1.442695, %v4494_v0  ;;  %4699 = vadd.xlane.f32.xlu0 %v4698_v2  ;;  %4915 = vmax.xlane.f32.xlu1 %v15830_v34  ;;  %v15835_v2 = vmax.f32 %v13302_v32, %v13308_v6 }
 0x8de   :  { %15828 = vst [vmem:[#allocation60_spill] sm:$0xff] %v13595_v60  ;;  %v13600_v44 = vpop.eup %9701  ;;  %v4427_v59 = vpop.xlane.xlu1 %4426 }
 0x8df   :  { %15831 = vst [vmem:[#allocation94_spill] sm:$0xff] %v13600_v44  ;;  %9711 = vpow2.f32 %v4607_v23  ;;  %v4495_v17 = vsub.f32 %v15832_v8, %v4427_v59  ;;  %v4496_v62 = vsub.f32 %v15833_v26, %v4427_v59  ;;  %v4701_v56 = vadd.f32 %v13600_v44, %v13595_v60  ;;  %v15837_v8 = vld [vmem:[#allocation70_spill] sm:$0xff] }
 0x8e0   :  { %9713 = vpow2.f32 %v4609_v55  ;;  %v15838_v59 = vld [vmem:[#allocation10_spill] sm:$0xff] }
 0x8e1   :  { %v13606_v1 = vpop.eup %9703  ;;  %v4611_v9 = vmul.f32 1.442695, %v4495_v17  ;;  %v4613_v0 = vmul.f32 1.442695, %v4496_v62  ;;  %4702 = vadd.xlane.f32.xlu0 %v4701_v56  ;;  %4918 = vmax.xlane.f32.xlu1 %v15835_v2  ;;  %v15840_v56 = vld [vmem:[#allocation131_spill] sm:$0xff] }
 0x8e2   :  { %15834 = vst [vmem:[#allocation46_spill] sm:$0xff] %v13606_v1  ;;  %v13611_v34 = vpop.eup %9705  ;;  %v4430_v23 = vpop.xlane.xlu1 %4429  ;;  %v15841_v2 = vmax.f32 %v13314_v53, %v15840_v56 }
 0x8e3   :  { %15836 = vst [vmem:[#allocation104_spill] sm:$0xff] %v13611_v34  ;;  %9715 = vpow2.f32 %v4611_v9  ;;  %v4497_v43 = vsub.f32 %v15837_v8, %v4430_v23  ;;  %v4498_v26 = vsub.f32 %v15838_v59, %v4430_v23  ;;  %v4704_v55 = vadd.f32 %v13611_v34, %v13606_v1  ;;  %v15843_v8 = vld [vmem:[#allocation114_spill] sm:$0xff]  ;;  %v15847_v34 = vld [vmem:[#allocation120_spill] sm:$0xff] }
 0x8e4   :  { %9717 = vpow2.f32 %v4613_v0  ;;  %v15844_v23 = vld [vmem:[#allocation118_spill] sm:$0xff] }
 0x8e5   :  { %v13617_v60 = vpop.eup %9707  ;;  %v4615_v17 = vmul.f32 1.442695, %v4497_v43  ;;  %v4617_v62 = vmul.f32 1.442695, %v4498_v26  ;;  %4705 = vadd.xlane.f32.xlu0 %v4704_v55  ;;  %4921 = vmax.xlane.f32.xlu1 %v15841_v2 }
 0x8e6   :  { %15839 = vst [vmem:[#allocation62_spill] sm:$0xff] %v13617_v60  ;;  %v13622_v44 = vpop.eup %9709  ;;  %v4433_v9 = vpop.xlane.xlu1 %4432 }
 0x8e7   :  { %15842 = vst [vmem:[#allocation51_spill] sm:$0xff] %v13622_v44  ;;  %9719 = vpow2.f32 %v4615_v17  ;;  %v4499_v6 = vsub.f32 %v15843_v8, %v4433_v9  ;;  %v4500_v59 = vsub.f32 %v15844_v23, %v4433_v9  ;;  %v4707_v0 = vadd.f32 %v13622_v44, %v13617_v60  ;;  %v15848_v17 = vld [vmem:[#allocation123_spill] sm:$0xff] }
 0x8e8   :  { %9721 = vpow2.f32 %v4617_v62 }
 0x8e9   :  { %v13628_v1 = vpop.eup %9711  ;;  %v4619_v43 = vmul.f32 1.442695, %v4499_v6  ;;  %v4621_v26 = vmul.f32 1.442695, %v4500_v59  ;;  %4708 = vadd.xlane.f32.xlu0 %v4707_v0  ;;  %v15850_v0 = vld [vmem:[#allocation125_spill] sm:$0xff] }
 0x8ea   :  { %15845 = vst [vmem:[#allocation83_spill] sm:$0xff] %v13628_v1  ;;  %v13630_v55 = vpop.eup %9713  ;;  %v4436_v2 = vpop.xlane.xlu1 %4435 }
 0x8eb   :  { %15846 = vst [vmem:[#allocation106_spill] sm:$0xff] %v13630_v55  ;;  %9723 = vpow2.f32 %v4619_v43  ;;  %v4501_v56 = vsub.f32 %v15847_v34, %v4436_v2  ;;  %v4502_v53 = vsub.f32 %v15848_v17, %v4436_v2  ;;  %v4710_v9 = vadd.f32 %v13630_v55, %v13628_v1  ;;  %v15851_v43 = vld [vmem:[#allocation124_spill] sm:$0xff] }
 0x8ec   :  { %9725 = vpow2.f32 %v4621_v26 }
 0x8ed   :  { %v13636_v8 = vpop.eup %9715  ;;  %v4623_v62 = vmul.f32 1.442695, %v4501_v56  ;;  %v4625_v23 = vmul.f32 1.442695, %v4502_v53  ;;  %4711 = vadd.xlane.f32.xlu0 %v4710_v9  ;;  %v15852_v9 = vld [vmem:[#allocation126_spill] sm:$0xff] }
 0x8ee   :  { %15849 = vst [vmem:[#allocation64_spill] sm:$0xff] %v13636_v8  ;;  %v13638_v6 = vpop.eup %9717  ;;  %v4439_v59 = vpop.xlane.xlu1 %4438 }
 0x8ef   :  { %9727 = vpow2.f32 %v4623_v62  ;;  %v4503_v60 = vsub.f32 %v15850_v0, %v4439_v59  ;;  %v4504_v44 = vsub.f32 %v15851_v43, %v4439_v59  ;;  %v4713_v34 = vadd.f32 %v13638_v6, %v13636_v8  ;;  %v15853_v62 = vld [vmem:[#allocation128_spill] sm:$0xff] }
 0x8f0   :  { %9729 = vpow2.f32 %v4625_v23 }
 0x8f1   :  { %v13644_v2 = vpop.eup %9719  ;;  %v4627_v26 = vmul.f32 1.442695, %v4503_v60  ;;  %v4629_v17 = vmul.f32 1.442695, %v4504_v44  ;;  %4714 = vadd.xlane.f32.xlu0 %v4713_v34 }
 0x8f2   :  { %v13646_v56 = vpop.eup %9721  ;;  %v4442_v53 = vpop.xlane.xlu1 %4441 }
 0x8f3   :  { %9731 = vpow2.f32 %v4627_v26  ;;  %v4505_v1 = vsub.f32 %v15852_v9, %v4442_v53  ;;  %v4506_v55 = vsub.f32 %v15853_v62, %v4442_v53  ;;  %v4716_v59 = vadd.f32 %v13646_v56, %v13644_v2  ;;  %v15855_v26 = vld [vmem:[#allocation15_spill] sm:$0xff] }
 0x8f4   :  { %9733 = vpow2.f32 %v4629_v17 }
 0x8f5   :  { %v13652_v0 = vpop.eup %9723  ;;  %v4631_v23 = vmul.f32 1.442695, %v4505_v1  ;;  %v4633_v43 = vmul.f32 1.442695, %v4506_v55  ;;  %4717 = vadd.xlane.f32.xlu0 %v4716_v59 }
 0x8f6   :  { %15854 = vst [vmem:[#allocation98_spill] sm:$0xff] %v13652_v0  ;;  %v13654_v60 = vpop.eup %9725  ;;  %v4829_v44 = vpop.xlane.xlu1 %4828 }
 0x8f7   :  { %9735 = vpow2.f32 %v4631_v23  ;;  %v4923_v34 = vsub.f32 %v12942_v51, %v4829_v44  ;;  %v4924_v8 = vsub.f32 %v15855_v26, %v4829_v44  ;;  %v4719_v53 = vadd.f32 %v13654_v60, %v13652_v0 }
 0x8f8   :  { %9737 = vpow2.f32 %v4633_v43 }
 0x8f9   :  { %v13660_v9 = vpop.eup %9727  ;;  %v4987_v17 = vmul.f32 1.442695, %v4923_v34  ;;  %v4989_v62 = vmul.f32 1.442695, %v4924_v8  ;;  %4720 = vadd.xlane.f32.xlu0 %v4719_v53 }
 0x8fa   :  { %15856 = vst [vmem:[#allocation85_spill] sm:$0xff] %v13660_v9  ;;  %v13662_v1 = vpop.eup %9729  ;;  %v4832_v55 = vpop.xlane.xlu1 %4831 }
 0x8fb   :  { %9739 = vpow2.f32 %v4987_v17  ;;  %v4925_v59 = vsub.f32 %v12954_v48, %v4832_v55  ;;  %v4926_v23 = vsub.f32 %v12958_v25, %v4832_v55  ;;  %v4722_v51 = vadd.f32 %v13662_v1, %v13660_v9  ;;  %v15857_v17 = vld [vmem:[#allocation100_spill] sm:$0xff] }
 0x8fc   :  { %9741 = vpow2.f32 %v4989_v62 }
 0x8fd   :  { %v13668_v44 = vpop.eup %9731  ;;  %v4991_v43 = vmul.f32 1.442695, %v4925_v59  ;;  %v4993_v26 = vmul.f32 1.442695, %v4926_v23  ;;  %4723 = vadd.xlane.f32.xlu0 %v4722_v51 }
 0x8fe   :  { %v13670_v34 = vpop.eup %9733  ;;  %v4835_v8 = vpop.xlane.xlu1 %4834 }
 0x8ff   :  { %9743 = vpow2.f32 %v4991_v43  ;;  %v4927_v53 = vsub.f32 %v12966_v30, %v4835_v8  ;;  %v4928_v0 = vsub.f32 %v15857_v17, %v4835_v8  ;;  %v4725_v48 = vadd.f32 %v13670_v34, %v13668_v44  ;;  %v15858_v43 = vld [vmem:[#allocation115_spill] sm:$0xff] }
 0x900   :  { %9745 = vpow2.f32 %v4993_v26 }
 0x901   :  { %v13676_v25 = vpop.eup %9735  ;;  %v4995_v62 = vmul.f32 1.442695, %v4927_v53  ;;  %v4997_v55 = vmul.f32 1.442695, %v4928_v0  ;;  %4726 = vadd.xlane.f32.xlu0 %v4725_v48 }
 0x902   :  { %v13678_v59 = vpop.eup %9737  ;;  %v4838_v23 = vpop.xlane.xlu1 %4837 }
 0x903   :  { %9747 = vpow2.f32 %v4995_v62  ;;  %v4929_v51 = vsub.f32 %v12978_v19, %v4838_v23  ;;  %v4930_v9 = vsub.f32 %v15858_v43, %v4838_v23  ;;  %v4728_v30 = vadd.f32 %v13678_v59, %v13676_v25 }
 0x904   :  { %9749 = vpow2.f32 %v4997_v55 }
 0x905   :  { %v13684_v8 = vpop.eup %9739  ;;  %v4999_v26 = vmul.f32 1.442695, %v4929_v51  ;;  %v5001_v17 = vmul.f32 1.442695, %v4930_v9  ;;  %4729 = vadd.xlane.f32.xlu0 %v4728_v30 }
 0x906   :  { %v13686_v53 = vpop.eup %9741  ;;  %v4841_v0 = vpop.xlane.xlu1 %4840 }
 0x907   :  { %9751 = vpow2.f32 %v4999_v26  ;;  %v4931_v48 = vsub.f32 %v12990_v38, %v4841_v0  ;;  %v4932_v62 = vsub.f32 %v12994_v10, %v4841_v0  ;;  %v5115_v19 = vadd.f32 %v13686_v53, %v13684_v8 }
 0x908   :  { %9753 = vpow2.f32 %v5001_v17 }
 0x909   :  { %v13692_v23 = vpop.eup %9743  ;;  %v5003_v55 = vmul.f32 1.442695, %v4931_v48  ;;  %v5005_v43 = vmul.f32 1.442695, %v4932_v62  ;;  %5116 = vadd.xlane.f32.xlu0 %v5115_v19 }
 0x90a   :  { %v13694_v51 = vpop.eup %9745  ;;  %v4844_v9 = vpop.xlane.xlu1 %4843 }
 0x90b   :  { %9755 = vpow2.f32 %v5003_v55  ;;  %v4933_v30 = vsub.f32 %v13002_v61, %v4844_v9  ;;  %v4934_v26 = vsub.f32 %v13006_v37, %v4844_v9  ;;  %v5118_v38 = vadd.f32 %v13694_v51, %v13692_v23 }
 0x90c   :  { %9757 = vpow2.f32 %v5005_v43 }
 0x90d   :  { %v13700_v10 = vpop.eup %9747  ;;  %v5007_v17 = vmul.f32 1.442695, %v4933_v30  ;;  %v5009_v0 = vmul.f32 1.442695, %v4934_v26  ;;  %5119 = vadd.xlane.f32.xlu0 %v5118_v38 }
 0x90e   :  { %v13702_v48 = vpop.eup %9749  ;;  %v4847_v62 = vpop.xlane.xlu1 %4846 }
 0x90f   :  { %9759 = vpow2.f32 %v5007_v17  ;;  %v4935_v19 = vsub.f32 %v13014_v5, %v4847_v62  ;;  %v4936_v55 = vsub.f32 %v13018_v3, %v4847_v62  ;;  %v5121_v61 = vadd.f32 %v13702_v48, %v13700_v10 }
 0x910   :  { %9761 = vpow2.f32 %v5009_v0 }
 0x911   :  { %v13708_v37 = vpop.eup %9751  ;;  %v5011_v43 = vmul.f32 1.442695, %v4935_v19  ;;  %v5013_v9 = vmul.f32 1.442695, %v4936_v55  ;;  %5122 = vadd.xlane.f32.xlu0 %v5121_v61 }
 0x912   :  { %15859 = vst [vmem:[#allocation108_spill] sm:$0xff] %v13708_v37  ;;  %v13710_v30 = vpop.eup %9753  ;;  %v4850_v26 = vpop.xlane.xlu1 %4849 }
 0x913   :  { %9763 = vpow2.f32 %v5011_v43  ;;  %v4937_v38 = vsub.f32 %v13026_v63, %v4850_v26  ;;  %v4938_v17 = vsub.f32 %v13030_v47, %v4850_v26  ;;  %v5124_v5 = vadd.f32 %v13710_v30, %v13708_v37 }
 0x914   :  { %9765 = vpow2.f32 %v5013_v9 }
 0x915   :  { %v13716_v3 = vpop.eup %9755  ;;  %v5015_v0 = vmul.f32 1.442695, %v4937_v38  ;;  %v5017_v62 = vmul.f32 1.442695, %v4938_v17  ;;  %5125 = vadd.xlane.f32.xlu0 %v5124_v5 }
 0x916   :  { %v13718_v19 = vpop.eup %9757  ;;  %v4637_v55 = vpop.xlane.xlu0 %4636 }
 0x917   :  { %v4853_v61 = vpop.xlane.xlu1 %4852  ;;  %9767 = vpow2.f32 %v5015_v0  ;;  %v5127_v47 = vadd.f32 %v13718_v19, %v13716_v3 }
 0x918   :  { %v4939_v43 = vsub.f32 %v13038_v50, %v4853_v61  ;;  %v4940_v63 = vsub.f32 %v13042_v11, %v4853_v61  ;;  %9769 = vpow2.f32 %v5017_v62 }
 0x919   :  { %v13724_v26 = vpop.eup %9759  ;;  %9771 = vrcp.f32 %v4637_v55  ;;  %5128 = vadd.xlane.f32.xlu0 %v5127_v47 }
 0x91a   :  { %15860 = vst [vmem:[#allocation66_spill] sm:$0xff] %v13724_v26  ;;  %v5019_v9 = vmul.f32 1.442695, %v4939_v43  ;;  %v5021_v38 = vmul.f32 1.442695, %v4940_v63  ;;  %v13726_v17 = vpop.eup %9761  ;;  %v4640_v5 = vpop.xlane.xlu0 %4639 }
 0x91b   :  { %v4856_v37 = vpop.xlane.xlu1 %4855  ;;  %v5130_v11 = vadd.f32 %v13726_v17, %v13724_v26 }
 0x91c   :  { %9773 = vpow2.f32 %v5019_v9  ;;  %v4941_v0 = vsub.f32 %v13050_v49, %v4856_v37  ;;  %v4942_v50 = vsub.f32 %v13054_v39, %v4856_v37 }
 0x91d   :  { %9775 = vpow2.f32 %v5021_v38  ;;  %v13732_v62 = vpop.eup %9763  ;;  %5131 = vadd.xlane.f32.xlu0 %v5130_v11 }
 0x91e   :  { %9777 = vrcp.f32 %v4640_v5  ;;  %v5023_v55 = vmul.f32 1.442695, %v4941_v0  ;;  %v5025_v61 = vmul.f32 1.442695, %v4942_v50  ;;  %v13734_v43 = vpop.eup %9765  ;;  %v4643_v63 = vpop.xlane.xlu0 %4642 }
 0x91f   :  { %v4859_v47 = vpop.xlane.xlu1 %4858  ;;  %v5133_v39 = vadd.f32 %v13734_v43, %v13732_v62 }
 0x920   :  { %9779 = vpow2.f32 %v5023_v55  ;;  %v4943_v9 = vsub.f32 %v13062_v58, %v4859_v47  ;;  %v4944_v49 = vsub.f32 %v13066_v52, %v4859_v47 }
 0x921   :  { %9781 = vpow2.f32 %v5025_v61  ;;  %v13740_v37 = vpop.eup %9767  ;;  %5134 = vadd.xlane.f32.xlu0 %v5133_v39 }
 0x922   :  { %9783 = vrcp.f32 %v4643_v63  ;;  %v5027_v38 = vmul.f32 1.442695, %v4943_v9  ;;  %v5029_v5 = vmul.f32 1.442695, %v4944_v49  ;;  %v13742_v0 = vpop.eup %9769  ;;  %v4646_v50 = vpop.xlane.xlu0 %4645 }
 0x923   :  { %v4862_v11 = vpop.xlane.xlu1 %4861  ;;  %v9772_v26 = vpop.eup %9771  ;;  %v5136_v55 = vadd.f32 %v13742_v0, %v13740_v37 }
 0x924   :  { %9785 = vpow2.f32 %v5027_v38  ;;  %v4945_v58 = vsub.f32 %v13074_v15, %v4862_v11  ;;  %v4946_v52 = vsub.f32 %v13078_v16, %v4862_v11  ;;  %v4764_v61 = vmul.f32 %v9772_v26, %v13358_v36 }
 0x925   :  { %9787 = vpow2.f32 %v5029_v5  ;;  %v4763_v63 = vmul.f32 %v9772_v26, %v13353_v18  ;;  %5137 = vadd.xlane.f32.xlu0 %v5136_v55  ;;  %v15861_v26 = vld [vmem:[#allocation76_spill] sm:$0xff] }
 0x926   :  { %v13750_v47 = vpop.eup %9773  ;;  %9789 = vrcp.f32 %v4646_v50  ;;  %v5031_v9 = vmul.f32 1.442695, %v4945_v58  ;;  %v5033_v49 = vmul.f32 1.442695, %v4946_v52  ;;  %5371 = vmatprep.mubr.f32.mxu0 %v4764_v61  ;;  %v4649_v15 = vpop.xlane.xlu0 %4648  ;;  %v15862_v61 = vmov 0.0|0.0  }
 0x927   :  { %v13752_v39 = vpop.eup %9775  ;;  %v4865_v38 = vpop.xlane.xlu1 %4864  ;;  %5372 = vmatmul.mubr.f32.vlgmr.msra.gmra.mrb[142].mxu0 %v4763_v63 }
 0x928   :  { %v9778_v16 = vpop.eup %9777  ;;  %9791 = vpow2.f32 %v5031_v9  ;;  %v4947_v5 = vsub.f32 %v13086_v54, %v4865_v38  ;;  %v4948_v36 = vsub.f32 %v13090_v4, %v4865_v38  ;;  %v5139_v18 = vadd.f32 %v13752_v39, %v13750_v47  ;;  %9168 = vmatpush1.bf16.msra.mxu0 %v15861_v26 }
 0x929   :  { %9793 = vpow2.f32 %v5033_v49  ;;  %v4766_v50 = vmul.f32 %v9778_v16, %v13369_v29  ;;  %v4765_v11 = vmul.f32 %v9778_v16, %v13364_v28  ;;  %9169 = vmatprep.subr.bf16.mxu0 %v15862_v61 }
 0x92a   :  { %v13761_v58 = vpop.eup %9779  ;;  %9795 = vrcp.f32 %v4649_v15  ;;  %v5035_v52 = vmul.f32 1.442695, %v4947_v5  ;;  %v5037_v55 = vmul.f32 1.442695, %v4948_v36  ;;  %5140 = vadd.xlane.f32.xlu0 %v5139_v18  ;;  %v4652_v4 = vpop.xlane.xlu0 %4651  ;;  %v15863_v15 = vld [vmem:[#allocation81_spill] sm:$0xff] }
 0x92b   :  { %v13764_v54 = vpop.eup %9781  ;;  %5376 = vmatprep.mubr.f32.mxu0 %v4766_v50  ;;  %v4868_v63 = vpop.xlane.xlu1 %4867 }
 0x92c   :  { %v9784_v9 = vpop.eup %9783  ;;  %9797 = vpow2.f32 %v5035_v52  ;;  %5377 = vmatmul.mubr.f32.gmra.mrb[144].mxu0 %v4765_v11  ;;  %v4949_v29 = vsub.f32 %v13098_v13, %v4868_v63  ;;  %v4950_v28 = vsub.f32 %v13102_v21, %v4868_v63  ;;  %v5142_v49 = vadd.f32 %v13764_v54, %v13761_v58  ;;  %v15864_v52 = vld [vmem:[#allocation89_spill] sm:$0xff] }
 0x92d   :  { %9799 = vpow2.f32 %v5037_v55  ;;  %9171 = vmatpush1.bf16.msra.mxu0 %v15863_v15  ;;  %v4768_v38 = vmul.f32 %v9784_v9, %v13380_v12  ;;  %v4767_v16 = vmul.f32 %v9784_v9, %v13375_v27 }
 0x92e   :  { %v13773_v5 = vpop.eup %9785  ;;  %9801 = vrcp.f32 %v4652_v4  ;;  %v5039_v36 = vmul.f32 1.442695, %v4949_v29  ;;  %v5041_v18 = vmul.f32 1.442695, %v4950_v28  ;;  %9172 = vmatprep.subr.bf16.mxu0 %v15862_v61  ;;  %5143 = vadd.xlane.f32.xlu0 %v5142_v49  ;;  %v4655_v21 = vpop.xlane.xlu0 %4654 }
 0x92f   :  { %v13776_v13 = vpop.eup %9787  ;;  %5381 = vmatprep.mubr.f32.mxu0 %v4768_v38  ;;  %v4871_v26 = vpop.xlane.xlu1 %4870  ;;  %v15865_v38 = vld [vmem:[#allocation52_spill] sm:$0xff] }
 0x930   :  { %v9790_v50 = vpop.eup %9789  ;;  %9803 = vpow2.f32 %v5039_v36  ;;  %5382 = vmatmul.mubr.f32.gmra.mrb[146].mxu0 %v4767_v16  ;;  %v4951_v12 = vsub.f32 %v13110_v24, %v4871_v26  ;;  %v4952_v27 = vsub.f32 %v13114_v7, %v4871_v26  ;;  %v5145_v11 = vadd.f32 %v13776_v13, %v13773_v5 }
 0x931   :  { %9805 = vpow2.f32 %v5041_v18  ;;  %9174 = vmatpush1.bf16.msra.mxu0 %v15864_v52  ;;  %v4770_v55 = vmul.f32 %v9790_v50, %v13391_v46  ;;  %v4769_v4 = vmul.f32 %v9790_v50, %v13386_v41 }
 0x932   :  { %v13785_v63 = vpop.eup %9791  ;;  %9807 = vrcp.f32 %v4655_v21  ;;  %v5043_v9 = vmul.f32 1.442695, %v4951_v12  ;;  %v5045_v29 = vmul.f32 1.442695, %v4952_v27  ;;  %9175 = vmatprep.subr.bf16.mxu0 %v15862_v61  ;;  %5146 = vadd.xlane.f32.xlu1 %v5145_v11  ;;  %v4658_v7 = vpop.xlane.xlu0 %4657  ;;  %v15866_v11 = vld [vmem:[#allocation49_spill] sm:$0xff] }
 0x933   :  { %v13788_v24 = vpop.eup %9793  ;;  %5386 = vmatprep.mubr.f32.mxu0 %v4770_v55  ;;  %v4874_v28 = vpop.xlane.xlu1 %4873  ;;  %v15867_v55 = vld [vmem:[#allocation130_spill] sm:$0xff] }
 0x934   :  { %v9796_v49 = vpop.eup %9795  ;;  %9809 = vpow2.f32 %v5043_v9  ;;  %5387 = vmatmul.mubr.f32.gmra.mrb[148].mxu0 %v4769_v4  ;;  %v4953_v46 = vsub.f32 %v15731_v35, %v4874_v28  ;;  %v4954_v41 = vsub.f32 %v15732_v40, %v4874_v28  ;;  %v5148_v15 = vadd.f32 %v13788_v24, %v13785_v63 }
 0x935   :  { %9811 = vpow2.f32 %v5045_v29  ;;  %9177 = vmatpush1.bf16.msra.mxu0 %v15865_v38  ;;  %v4772_v16 = vmul.f32 %v9796_v49, %v13402_v20  ;;  %v4771_v36 = vmul.f32 %v9796_v49, %v13397_v14 }
 0x936   :  { %v13797_v18 = vpop.eup %9797  ;;  %9813 = vrcp.f32 %v4658_v7  ;;  %v5047_v21 = vmul.f32 1.442695, %v4953_v46  ;;  %v5049_v26 = vmul.f32 1.442695, %v4954_v41  ;;  %9178 = vmatprep.subr.bf16.mxu0 %v15862_v61  ;;  %5149 = vadd.xlane.f32.xlu0 %v5148_v15  ;;  %v4661_v40 = vpop.xlane.xlu0 %4660  ;;  %v15868_v46 = vld [vmem:[#allocation61_spill] sm:$0xff]  ;;  %v15869_v41 = vld [vmem:[#allocation95_spill] sm:$0xff] }
 0x937   :  { %v13800_v35 = vpop.eup %9799  ;;  %5391 = vmatprep.mubr.f32.mxu0 %v4772_v16  ;;  %v4877_v50 = vpop.xlane.xlu1 %4876  ;;  %v15870_v16 = vld [vmem:[#allocation50_spill] sm:$0xff] }
 0x938   :  { %v9802_v12 = vpop.eup %9801  ;;  %9815 = vpow2.f32 %v5047_v21  ;;  %5392 = vmatmul.mubr.f32.gmra.mrb[150].mxu0 %v4771_v36  ;;  %v4955_v20 = vsub.f32 %v15738_v31, %v4877_v50  ;;  %v4956_v14 = vsub.f32 %v15739_v45, %v4877_v50  ;;  %v5151_v27 = vadd.f32 %v13800_v35, %v13797_v18  ;;  %v15871_v36 = vld [vmem:[#allocation132_spill] sm:$0xff] }
 0x939   :  { %9817 = vpow2.f32 %v5049_v26  ;;  %9180 = vmatpush1.bf16.msra.mxu0 %v15866_v11  ;;  %v4774_v52 = vmul.f32 %v9802_v12, %v13413_v57  ;;  %v4773_v4 = vmul.f32 %v9802_v12, %v15867_v55  ;;  %v15872_v26 = vld [vmem:[#allocation133_spill] sm:$0xff]  ;;  %v15873_v55 = vld [vmem:[#allocation80_spill] sm:$0xff] }
 0x93a   :  { %v13809_v9 = vpop.eup %9803  ;;  %9819 = vrcp.f32 %v4661_v40  ;;  %v5051_v29 = vmul.f32 1.442695, %v4955_v20  ;;  %v5053_v7 = vmul.f32 1.442695, %v4956_v14  ;;  %9181 = vmatprep.subr.bf16.mxu0 %v15862_v61  ;;  %5152 = vadd.xlane.f32.xlu1 %v5151_v27  ;;  %v4664_v45 = vpop.xlane.xlu0 %4663 }
 0x93b   :  { %v13812_v31 = vpop.eup %9805  ;;  %5396 = vmatprep.mubr.f32.mxu0 %v4774_v52  ;;  %v4880_v28 = vpop.xlane.xlu1 %4879 }
 0x93c   :  { %v9808_v49 = vpop.eup %9807  ;;  %9821 = vpow2.f32 %v5051_v29  ;;  %5397 = vmatmul.mubr.f32.gmra.mrb[152].mxu0 %v4773_v4  ;;  %v4957_v57 = vsub.f32 %v15868_v46, %v4880_v28  ;;  %v4958_v15 = vsub.f32 %v15869_v41, %v4880_v28  ;;  %v5154_v38 = vadd.f32 %v13812_v31, %v13809_v9  ;;  %v15874_v29 = vld [vmem:[#allocation105_spill] sm:$0xff]  ;;  %v15875_v28 = vld [vmem:[#allocation11_spill] sm:$0xff] }
 0x93d   :  { %9823 = vpow2.f32 %v5053_v7  ;;  %9183 = vmatpush1.bf16.msra.mxu0 %v15870_v16  ;;  %v4776_v21 = vmul.f32 %v9808_v49, %v15871_v36  ;;  %v4775_v40 = vmul.f32 %v9808_v49, %v15872_v26  ;;  %v15876_v49 = vld [vmem:[#allocation134_spill] sm:$0xff] }
 0x93e   :  { %v13821_v50 = vpop.eup %9809  ;;  %9825 = vrcp.f32 %v4664_v45  ;;  %v5055_v12 = vmul.f32 1.442695, %v4957_v57  ;;  %v5057_v20 = vmul.f32 1.442695, %v4958_v15  ;;  %9184 = vmatprep.subr.bf16.mxu0 %v15862_v61  ;;  %5155 = vadd.xlane.f32.xlu0 %v5154_v38  ;;  %v4667_v27 = vpop.xlane.xlu0 %4666  ;;  %v15877_v57 = vld [vmem:[#allocation135_spill] sm:$0xff] }
 0x93f   :  { %v13824_v14 = vpop.eup %9811  ;;  %5401 = vmatprep.mubr.f32.mxu0 %v4776_v21  ;;  %v4883_v11 = vpop.xlane.xlu1 %4882 }
 0x940   :  { %v9814_v52 = vpop.eup %9813  ;;  %9827 = vpow2.f32 %v5055_v12  ;;  %5402 = vmatmul.mubr.f32.gmra.mrb[154].mxu0 %v4775_v40  ;;  %v4959_v4 = vsub.f32 %v15873_v55, %v4883_v11  ;;  %v4960_v7 = vsub.f32 %v15874_v29, %v4883_v11  ;;  %v5157_v45 = vadd.f32 %v13824_v14, %v13821_v50  ;;  %v15878_v12 = vld [vmem:[#allocation63_spill] sm:$0xff]  ;;  %v15879_v11 = vld [vmem:[#allocation96_spill] sm:$0xff]  ;;  %v15880_v55 = vld [vmem:[#allocation14_spill] sm:$0xff] }
 0x941   :  { %9829 = vpow2.f32 %v5057_v20  ;;  %9186 = vmatpush1.bf16.msra.mxu0 %v15875_v28  ;;  %v4778_v46 = vmul.f32 %v9814_v52, %v15876_v49  ;;  %v4777_v41 = vmul.f32 %v9814_v52, %v15877_v57 }
 0x942   :  { %v13833_v15 = vpop.eup %9815  ;;  %9831 = vrcp.f32 %v4667_v27  ;;  %v5059_v38 = vmul.f32 1.442695, %v4959_v4  ;;  %v5061_v16 = vmul.f32 1.442695, %v4960_v7  ;;  %9187 = vmatprep.subr.bf16.mxu0 %v15862_v61  ;;  %5158 = vadd.xlane.f32.xlu1 %v5157_v45  ;;  %v4670_v21 = vpop.xlane.xlu0 %4669  ;;  %v15881_v4 = vld [vmem:[#allocation136_spill] sm:$0xff]  ;;  %v15882_v7 = vld [vmem:[#allocation137_spill] sm:$0xff] }
 0x943   :  { %v13836_v36 = vpop.eup %9817  ;;  %5406 = vmatprep.mubr.f32.mxu0 %v4778_v46  ;;  %v4886_v26 = vpop.xlane.xlu1 %4885 }
 0x944   :  { %v9820_v40 = vpop.eup %9819  ;;  %9833 = vpow2.f32 %v5059_v38  ;;  %5407 = vmatmul.mubr.f32.gmra.mrb[156].mxu0 %v4777_v41  ;;  %v4961_v20 = vsub.f32 %v15878_v12, %v4886_v26  ;;  %v4962_v52 = vsub.f32 %v15879_v11, %v4886_v26  ;;  %v5160_v27 = vadd.f32 %v13836_v36, %v13833_v15  ;;  %v15885_v26 = vld [vmem:[#allocation84_spill] sm:$0xff]  ;;  %v15886_v11 = vld [vmem:[#allocation107_spill] sm:$0xff] }
 0x945   :  { %9835 = vpow2.f32 %v5061_v16  ;;  %9189 = vmatpush1.bf16.msra.mxu0 %v15880_v55  ;;  %v4780_v29 = vmul.f32 %v9820_v40, %v15881_v4  ;;  %v4779_v45 = vmul.f32 %v9820_v40, %v15882_v7  ;;  %v15889_v55 = vld [vmem:[#allocation139_spill] sm:$0xff] }
 0x946   :  { %v13845_v28 = vpop.eup %9821  ;;  %9837 = vrcp.f32 %v4670_v21  ;;  %v5063_v49 = vmul.f32 1.442695, %v4961_v20  ;;  %v5065_v46 = vmul.f32 1.442695, %v4962_v52  ;;  %9190 = vmatprep.subr.bf16.mxu0 %v15862_v61  ;;  %5161 = vadd.xlane.f32.xlu0 %v5160_v27  ;;  %v4673_v41 = vpop.xlane.xlu0 %4672  ;;  %v15887_v20 = vld [vmem:[#allocation77_spill] sm:$0xff]  ;;  %v15888_v52 = vld [vmem:[#allocation138_spill] sm:$0xff] }
 0x947   :  { %15883 = vst [vmem:[#allocation7_spill] sm:$0xff] %v13845_v28  ;;  %v13848_v57 = vpop.eup %9823  ;;  %5411 = vmatprep.mubr.f32.mxu0 %v4780_v29  ;;  %v4889_v38 = vpop.xlane.xlu1 %4888 }
 0x948   :  { %15884 = vst [vmem:[#allocation88_spill] sm:$0xff] %v13848_v57  ;;  %v9826_v16 = vpop.eup %9825  ;;  %9839 = vpow2.f32 %v5063_v49  ;;  %5412 = vmatmul.mubr.f32.gmra.mrb[158].mxu0 %v4779_v45  ;;  %v4963_v12 = vsub.f32 %v15885_v26, %v4889_v38  ;;  %v4964_v40 = vsub.f32 %v15886_v11, %v4889_v38  ;;  %v5163_v21 = vadd.f32 %v13848_v57, %v13845_v28  ;;  %v15892_v11 = vld [vmem:[#allocation65_spill] sm:$0xff] }
 0x949   :  { %9841 = vpow2.f32 %v5065_v46  ;;  %9192 = vmatpush1.bf16.msra.mxu0 %v15887_v20  ;;  %v4782_v27 = vmul.f32 %v9826_v16, %v15888_v52  ;;  %v4781_v4 = vmul.f32 %v9826_v16, %v15889_v55  ;;  %v15893_v52 = vld [vmem:[#allocation99_spill] sm:$0xff]  ;;  %v15896_v55 = vld [vmem:[#allocation141_spill] sm:$0xff] }
 0x94a   :  { %v13857_v29 = vpop.eup %9827  ;;  %9843 = vrcp.f32 %v4673_v41  ;;  %v5067_v7 = vmul.f32 1.442695, %v4963_v12  ;;  %v5069_v49 = vmul.f32 1.442695, %v4964_v40  ;;  %9193 = vmatprep.subr.bf16.mxu0 %v15862_v61  ;;  %5164 = vadd.xlane.f32.xlu1 %v5163_v21  ;;  %v4676_v38 = vpop.xlane.xlu0 %4675  ;;  %v15894_v12 = vld [vmem:[#allocation82_spill] sm:$0xff]  ;;  %v15895_v40 = vld [vmem:[#allocation140_spill] sm:$0xff] }
 0x94b   :  { %15890 = vst [vmem:[#allocation110_spill] sm:$0xff] %v13857_v29  ;;  %v13860_v45 = vpop.eup %9829  ;;  %5416 = vmatprep.mubr.f32.mxu0 %v4782_v27  ;;  %v4892_v26 = vpop.xlane.xlu1 %4891 }
 0x94c   :  { %15891 = vst [vmem:[#allocation119_spill] sm:$0xff] %v13860_v45  ;;  %v9832_v46 = vpop.eup %9831  ;;  %9845 = vpow2.f32 %v5067_v7  ;;  %5417 = vmatmul.mubr.f32.gmra.mrb[160].mxu0 %v4781_v4  ;;  %v4965_v20 = vsub.f32 %v15892_v11, %v4892_v26  ;;  %v4966_v16 = vsub.f32 %v15893_v52, %v4892_v26  ;;  %v5166_v41 = vadd.f32 %v13860_v45, %v13857_v29  ;;  %v15899_v52 = vld [vmem:[#allocation86_spill] sm:$0xff] }
 0x94d   :  { %9847 = vpow2.f32 %v5069_v49  ;;  %9195 = vmatpush1.bf16.msra.mxu0 %v15894_v12  ;;  %v4784_v21 = vmul.f32 %v9832_v46, %v15895_v40  ;;  %v4783_v28 = vmul.f32 %v9832_v46, %v15896_v55  ;;  %v15900_v40 = vld [vmem:[#allocation109_spill] sm:$0xff]  ;;  %v15903_v55 = vld [vmem:[#allocation143_spill] sm:$0xff] }
 0x94e   :  { %v13869_v27 = vpop.eup %9833  ;;  %9849 = vrcp.f32 %v4676_v38  ;;  %v5071_v57 = vmul.f32 1.442695, %v4965_v20  ;;  %v5073_v7 = vmul.f32 1.442695, %v4966_v16  ;;  %9196 = vmatprep.subr.bf16.mxu0 %v15862_v61  ;;  %5167 = vadd.xlane.f32.xlu0 %v5166_v41  ;;  %v4679_v26 = vpop.xlane.xlu0 %4678  ;;  %v15901_v20 = vld [vmem:[#allocation87_spill] sm:$0xff]  ;;  %v15902_v16 = vld [vmem:[#allocation142_spill] sm:$0xff] }
 0x94f   :  { %15897 = vst [vmem:[#allocation68_spill] sm:$0xff] %v13869_v27  ;;  %v13872_v4 = vpop.eup %9835  ;;  %5421 = vmatprep.mubr.f32.mxu0 %v4784_v21  ;;  %v4895_v11 = vpop.xlane.xlu1 %4894 }
 0x950   :  { %15898 = vst [vmem:[#allocation8_spill] sm:$0xff] %v13872_v4  ;;  %v9838_v49 = vpop.eup %9837  ;;  %9851 = vpow2.f32 %v5071_v57  ;;  %5422 = vmatmul.mubr.f32.gmra.mrb[162].mxu0 %v4783_v28  ;;  %v4967_v12 = vsub.f32 %v15899_v52, %v4895_v11  ;;  %v4968_v46 = vsub.f32 %v15900_v40, %v4895_v11  ;;  %v5169_v38 = vadd.f32 %v13872_v4, %v13869_v27  ;;  %v15906_v40 = vld [vmem:[#allocation67_spill] sm:$0xff] }
 0x951   :  { %9853 = vpow2.f32 %v5073_v7  ;;  %9198 = vmatpush1.bf16.msra.mxu0 %v15901_v20  ;;  %v4786_v41 = vmul.f32 %v9838_v49, %v15902_v16  ;;  %v4785_v29 = vmul.f32 %v9838_v49, %v15903_v55  ;;  %v15907_v16 = vld [vmem:[#allocation9_spill] sm:$0xff] }
 0x952   :  { %v13881_v21 = vpop.eup %9839  ;;  %9855 = vrcp.f32 %v4679_v26  ;;  %v5075_v45 = vmul.f32 1.442695, %v4967_v12  ;;  %v5077_v57 = vmul.f32 1.442695, %v4968_v46  ;;  %9199 = vmatprep.subr.bf16.mxu0 %v15862_v61  ;;  %5170 = vadd.xlane.f32.xlu1 %v5169_v38  ;;  %v4682_v11 = vpop.xlane.xlu0 %4681  ;;  %v15908_v12 = vld [vmem:[#allocation3_spill] sm:$0xff]  ;;  %v15909_v46 = vld [vmem:[#allocation144_spill] sm:$0xff] }
 0x953   :  { %15904 = vst [vmem:[#allocation122_spill] sm:$0xff] %v13881_v21  ;;  %v13884_v28 = vpop.eup %9841  ;;  %5426 = vmatprep.mubr.f32.mxu0 %v4786_v41  ;;  %v4898_v52 = vpop.xlane.xlu1 %4897  ;;  %v15910_v55 = vld [vmem:[#allocation145_spill] sm:$0xff] }
 0x954   :  { %15905 = vst [vmem:[#allocation47_spill] sm:$0xff] %v13884_v28  ;;  %v9844_v7 = vpop.eup %9843  ;;  %9857 = vpow2.f32 %v5075_v45  ;;  %5427 = vmatmul.mubr.f32.gmra.mrb[164].mxu0 %v4785_v29  ;;  %v4969_v20 = vsub.f32 %v15906_v40, %v4898_v52  ;;  %v4970_v49 = vsub.f32 %v15907_v16, %v4898_v52  ;;  %v5172_v26 = vadd.f32 %v13884_v28, %v13881_v21  ;;  %v15913_v16 = vld [vmem:[#allocation90_spill] sm:$0xff] }
 0x955   :  { %9859 = vpow2.f32 %v5077_v57  ;;  %9201 = vmatpush1.bf16.msra.mxu0 %v15908_v12  ;;  %v4788_v38 = vmul.f32 %v9844_v7, %v15909_v46  ;;  %v4787_v27 = vmul.f32 %v9844_v7, %v15910_v55  ;;  %v15914_v46 = vld [vmem:[#allocation111_spill] sm:$0xff] }
 0x956   :  { %v13893_v41 = vpop.eup %9845  ;;  %9861 = vrcp.f32 %v4682_v11  ;;  %v5079_v4 = vmul.f32 1.442695, %v4969_v20  ;;  %v5081_v45 = vmul.f32 1.442695, %v4970_v49  ;;  %9202 = vmatprep.subr.bf16.mxu0 %v15862_v61  ;;  %5173 = vadd.xlane.f32.xlu0 %v5172_v26  ;;  %v4685_v52 = vpop.xlane.xlu0 %4684  ;;  %v15915_v20 = vld [vmem:[#allocation4_spill] sm:$0xff]  ;;  %v15916_v49 = vld [vmem:[#allocation146_spill] sm:$0xff] }
 0x957   :  { %15911 = vst [vmem:[#allocation112_spill] sm:$0xff] %v13893_v41  ;;  %v13896_v29 = vpop.eup %9847  ;;  %5431 = vmatprep.mubr.f32.mxu0 %v4788_v38  ;;  %v4901_v40 = vpop.xlane.xlu1 %4900  ;;  %v15917_v55 = vld [vmem:[#allocation147_spill] sm:$0xff] }
 0x958   :  { %15912 = vst [vmem:[#allocation70_spill] sm:$0xff] %v13896_v29  ;;  %v9850_v57 = vpop.eup %9849  ;;  %9863 = vpow2.f32 %v5079_v4  ;;  %5432 = vmatmul.mubr.f32.gmra.mrb[166].mxu0 %v4787_v27  ;;  %v4971_v12 = vsub.f32 %v15913_v16, %v4901_v40  ;;  %v4972_v7 = vsub.f32 %v15914_v46, %v4901_v40  ;;  %v5175_v11 = vadd.f32 %v13896_v29, %v13893_v41  ;;  %v15920_v46 = vld [vmem:[#allocation69_spill] sm:$0xff] }
 0x959   :  { %9865 = vpow2.f32 %v5081_v45  ;;  %9204 = vmatpush1.bf16.msra.mxu0 %v15915_v20  ;;  %v4790_v26 = vmul.f32 %v9850_v57, %v15916_v49  ;;  %v4789_v21 = vmul.f32 %v9850_v57, %v15917_v55  ;;  %v15921_v49 = vld [vmem:[#allocation5_spill] sm:$0xff]  ;;  %v15924_v55 = vld [vmem:[#allocation56_spill] sm:$0xff] }
 0x95a   :  { %v13905_v38 = vpop.eup %9851  ;;  %9867 = vrcp.f32 %v4685_v52  ;;  %v5083_v28 = vmul.f32 1.442695, %v4971_v12  ;;  %v5085_v4 = vmul.f32 1.442695, %v4972_v7  ;;  %9205 = vmatprep.subr.bf16.mxu0 %v15862_v61  ;;  %5176 = vadd.xlane.f32.xlu1 %v5175_v11  ;;  %v4688_v40 = vpop.xlane.xlu0 %4687  ;;  %v15922_v12 = vld [vmem:[#allocation97_spill] sm:$0xff] }
 0x95b   :  { %15918 = vst [vmem:[#allocation10_spill] sm:$0xff] %v13905_v38  ;;  %v13908_v27 = vpop.eup %9853  ;;  %5436 = vmatprep.mubr.f32.mxu0 %v4790_v26  ;;  %v4904_v16 = vpop.xlane.xlu1 %4903  ;;  %v15923_v7 = vld [vmem:[#allocation57_spill] sm:$0xff] }
 0x95c   :  { %15919 = vst [vmem:[#allocation114_spill] sm:$0xff] %v13908_v27  ;;  %v9856_v45 = vpop.eup %9855  ;;  %9869 = vpow2.f32 %v5083_v28  ;;  %5437 = vmatmul.mubr.f32.gmra.mrb[168].mxu0 %v4789_v21  ;;  %v4973_v20 = vsub.f32 %v15920_v46, %v4904_v16  ;;  %v4974_v57 = vsub.f32 %v15921_v49, %v4904_v16  ;;  %v5178_v52 = vadd.f32 %v13908_v27, %v13905_v38  ;;  %v15926_v49 = vld [vmem:[#allocation91_spill] sm:$0xff] }
 0x95d   :  { %9871 = vpow2.f32 %v5085_v4  ;;  %9207 = vmatpush1.bf16.msra.mxu0 %v15922_v12  ;;  %v4792_v11 = vmul.f32 %v9856_v45, %v15923_v7  ;;  %v4791_v41 = vmul.f32 %v9856_v45, %v15924_v55  ;;  %v15927_v7 = vld [vmem:[#allocation113_spill] sm:$0xff]  ;;  %v15930_v55 = vld [vmem:[#allocation59_spill] sm:$0xff] }
 0x95e   :  { %v13917_v26 = vpop.eup %9857  ;;  %9873 = vrcp.f32 %v4688_v40  ;;  %v5087_v29 = vmul.f32 1.442695, %v4973_v20  ;;  %v5089_v28 = vmul.f32 1.442695, %v4974_v57  ;;  %9208 = vmatprep.subr.bf16.mxu0 %v15862_v61  ;;  %5179 = vadd.xlane.f32.xlu0 %v5178_v52  ;;  %v4691_v16 = vpop.xlane.xlu0 %4690  ;;  %v15928_v20 = vld [vmem:[#allocation6_spill] sm:$0xff]  ;;  %v15929_v57 = vld [vmem:[#allocation48_spill] sm:$0xff] }
 0x95f   :  { %15925 = vst [vmem:[#allocation118_spill] sm:$0xff] %v13917_v26  ;;  %v13920_v21 = vpop.eup %9859  ;;  %5441 = vmatprep.mubr.f32.mxu0 %v4792_v11  ;;  %v4907_v46 = vpop.xlane.xlu1 %4906 }
 0x960   :  { %v9862_v4 = vpop.eup %9861  ;;  %9875 = vpow2.f32 %v5087_v29  ;;  %5442 = vmatmul.mubr.f32.gmra.mrb[170].mxu0 %v4791_v41  ;;  %v4975_v12 = vsub.f32 %v15926_v49, %v4907_v46  ;;  %v4976_v45 = vsub.f32 %v15927_v7, %v4907_v46  ;;  %v5181_v40 = vadd.f32 %v13920_v21, %v13917_v26  ;;  %v15932_v7 = vld [vmem:[#allocation71_spill] sm:$0xff] }
 0x961   :  { %9877 = vpow2.f32 %v5089_v28  ;;  %9210 = vmatpush1.bf16.msra.mxu0 %v15928_v20  ;;  %v4794_v52 = vmul.f32 %v9862_v4, %v15929_v57  ;;  %v4793_v38 = vmul.f32 %v9862_v4, %v15930_v55  ;;  %v15933_v57 = vld [vmem:[#allocation13_spill] sm:$0xff] }
 0x962   :  { %v13929_v11 = vpop.eup %9863  ;;  %9879 = vrcp.f32 %v4691_v16  ;;  %v5091_v27 = vmul.f32 1.442695, %v4975_v12  ;;  %v5093_v29 = vmul.f32 1.442695, %v4976_v45  ;;  %9211 = vmatprep.subr.bf16.mxu0 %v15862_v61  ;;  %5182 = vadd.xlane.f32.xlu1 %v5181_v40  ;;  %v4694_v46 = vpop.xlane.xlu0 %4693  ;;  %v15934_v12 = vld [vmem:[#allocation12_spill] sm:$0xff]  ;;  %v15935_v61 = vld [vmem:[#allocation93_spill] sm:$0xff] }
 0x963   :  { %15931 = vst [vmem:[#allocation120_spill] sm:$0xff] %v13929_v11  ;;  %v13932_v41 = vpop.eup %9865  ;;  %5446 = vmatprep.mubr.f32.mxu0 %v4794_v52  ;;  %v4910_v49 = vpop.xlane.xlu1 %4909  ;;  %v15936_v40 = vld [vmem:[#allocation92_spill] sm:$0xff] }
 0x964   :  { %v9868_v28 = vpop.eup %9867  ;;  %9881 = vpow2.f32 %v5091_v27  ;;  %5447 = vmatmul.mubr.f32.gmra.mrb[172].mxu0 %v4793_v38  ;;  %v4977_v20 = vsub.f32 %v15932_v7, %v4910_v49  ;;  %v4978_v4 = vsub.f32 %v15933_v57, %v4910_v49  ;;  %v5184_v16 = vadd.f32 %v13932_v41, %v13929_v11 }
 0x965   :  { %9883 = vpow2.f32 %v5093_v29  ;;  %9213 = vmatpush1.bf16.msra.mxu0 %v15934_v12  ;;  %v4796_v45 = vmul.f32 %v9868_v28, %v15935_v61  ;;  %v4795_v55 = vmul.f32 %v9868_v28, %v15936_v40  ;;  %v15937_v12 = vld [vmem:[#allocation121_spill] sm:$0xff] }
 0x966   :  { %v13941_v52 = vpop.eup %9869  ;;  %9885 = vrcp.f32 %v4694_v46  ;;  %v5095_v26 = vmul.f32 1.442695, %v4977_v20  ;;  %v5097_v27 = vmul.f32 1.442695, %v4978_v4  ;;  %5185 = vadd.xlane.f32.xlu0 %v5184_v16  ;;  %v4697_v49 = vpop.xlane.xlu0 %4696  ;;  %v15938_v46 = vld [vmem:[#allocation103_spill] sm:$0xff] }
 0x967   :  { %v13943_v38 = vpop.eup %9871  ;;  %5451 = vmatprep.mubr.f32.mxu0 %v4796_v45  ;;  %v4913_v7 = vpop.xlane.xlu1 %4912  ;;  %v15939_v4 = vld [vmem:[#allocation79_spill] sm:$0xff] }
 0x968   :  { %v9874_v57 = vpop.eup %9873  ;;  %9887 = vpow2.f32 %v5095_v26  ;;  %5452 = vmatmul.mubr.f32.gmra.mrb[174].mxu0 %v4795_v55  ;;  %v4979_v29 = vsub.f32 %v15822_v33, %v4913_v7  ;;  %v4980_v61 = vsub.f32 %v15937_v12, %v4913_v7  ;;  %v5187_v28 = vadd.f32 %v13943_v38, %v13941_v52 }
 0x969   :  { %9889 = vpow2.f32 %v5097_v27  ;;  %v4798_v20 = vmul.f32 %v9874_v57, %v15938_v46  ;;  %v4797_v16 = vmul.f32 %v9874_v57, %v15939_v4 }
 0x96a   :  { %v13951_v40 = vpop.eup %9875  ;;  %9891 = vrcp.f32 %v4697_v49  ;;  %v5099_v45 = vmul.f32 1.442695, %v4979_v29  ;;  %v5101_v11 = vmul.f32 1.442695, %v4980_v61  ;;  %5188 = vadd.xlane.f32.xlu1 %v5187_v28  ;;  %v4700_v33 = vpop.xlane.xlu0 %4699  ;;  %v15942_v49 = vld [vmem:[#allocation75_spill] sm:$0xff]  ;;  %v15943_v61 = vld [vmem:[#allocation74_spill] sm:$0xff] }
 0x96b   :  { %15940 = vst [vmem:[#allocation123_spill] sm:$0xff] %v13951_v40  ;;  %v13953_v26 = vpop.eup %9877  ;;  %5456 = vmatprep.mubr.f32.mxu0 %v4798_v20  ;;  %v4916_v55 = vpop.xlane.xlu1 %4915 }
 0x96c   :  { %15941 = vst [vmem:[#allocation125_spill] sm:$0xff] %v13953_v26  ;;  %v9880_v7 = vpop.eup %9879  ;;  %9893 = vpow2.f32 %v5099_v45  ;;  %5457 = vmatmul.mubr.f32.gmra.mrb[176].mxu0 %v4797_v16  ;;  %v4981_v27 = vsub.f32 %v13290_v42, %v4916_v55  ;;  %v4982_v12 = vsub.f32 %v15829_v22, %v4916_v55  ;;  %v5190_v57 = vadd.f32 %v13953_v26, %v13951_v40  ;;  %v15946_v55 = vld [vmem:[#allocation127_spill] sm:$0xff]  ;;  %v15980_v26 = vld [vmem:[#allocation18_spill] sm:$0xff] }
 0x96d   :  { %9895 = vpow2.f32 %v5101_v11  ;;  %v4800_v29 = vmul.f32 %v9880_v7, %v15942_v49  ;;  %v4799_v28 = vmul.f32 %v9880_v7, %v15943_v61 }
 0x96e   :  { %v13961_v46 = vpop.eup %9881  ;;  %9897 = vrcp.f32 %v4700_v33  ;;  %v5103_v20 = vmul.f32 1.442695, %v4981_v27  ;;  %v5105_v4 = vmul.f32 1.442695, %v4982_v12  ;;  %5191 = vadd.xlane.f32.xlu0 %v5190_v57  ;;  %v4703_v42 = vpop.xlane.xlu0 %4702  ;;  %v15947_v33 = vld [vmem:[#allocation101_spill] sm:$0xff]  ;;  %v15948_v12 = vld [vmem:[#allocation16_spill] sm:$0xff] }
 0x96f   :  { %15944 = vst [vmem:[#allocation124_spill] sm:$0xff] %v13961_v46  ;;  %v13963_v45 = vpop.eup %9883  ;;  %5461 = vmatprep.mubr.f32.mxu0 %v4800_v29  ;;  %v4919_v16 = vpop.xlane.xlu1 %4918 }
 0x970   :  { %15945 = vst [vmem:[#allocation126_spill] sm:$0xff] %v13963_v45  ;;  %v9886_v22 = vpop.eup %9885  ;;  %9899 = vpow2.f32 %v5103_v20  ;;  %5462 = vmatmul.mubr.f32.gmra.mrb[178].mxu0 %v4799_v28  ;;  %v4983_v11 = vsub.f32 %v13302_v32, %v4919_v16  ;;  %v4984_v49 = vsub.f32 %v15946_v55, %v4919_v16  ;;  %v5193_v7 = vadd.f32 %v13963_v45, %v13961_v46  ;;  %v15951_v55 = vld [vmem:[#allocation129_spill] sm:$0xff]  ;;  %v15952_v46 = vld [vmem:[#allocation131_spill] sm:$0xff] }
 0x971   :  { %9901 = vpow2.f32 %v5105_v4  ;;  %v4802_v27 = vmul.f32 %v9886_v22, %v15947_v33  ;;  %v4801_v57 = vmul.f32 %v9886_v22, %v15948_v12 }
 0x972   :  { %v13971_v61 = vpop.eup %9887  ;;  %9903 = vrcp.f32 %v4703_v42  ;;  %v5107_v29 = vmul.f32 1.442695, %v4983_v11  ;;  %v5109_v40 = vmul.f32 1.442695, %v4984_v49  ;;  %5194 = vadd.xlane.f32.xlu1 %v5193_v7  ;;  %v4706_v32 = vpop.xlane.xlu0 %4705  ;;  %v15953_v42 = vld [vmem:[#allocation2_spill] sm:$0xff] }
 0x973   :  { %15949 = vst [vmem:[#allocation128_spill] sm:$0xff] %v13971_v61  ;;  %v13973_v20 = vpop.eup %9889  ;;  %5466 = vmatprep.mubr.f32.mxu0 %v4802_v27  ;;  %v4922_v28 = vpop.xlane.xlu1 %4921  ;;  %v15954_v49 = vld [vmem:[#allocation58_spill] sm:$0xff] }
 0x974   :  { %15950 = vst [vmem:[#allocation15_spill] sm:$0xff] %v13973_v20  ;;  %v9892_v16 = vpop.eup %9891  ;;  %9905 = vpow2.f32 %v5107_v29  ;;  %5467 = vmatmul.mubr.f32.gmra.mrb[180].mxu0 %v4801_v57  ;;  %v4985_v4 = vsub.f32 %v15951_v55, %v4922_v28  ;;  %v4986_v33 = vsub.f32 %v15952_v46, %v4922_v28  ;;  %v5196_v22 = vadd.f32 %v13973_v20, %v13971_v61  ;;  %v15957_v46 = vld [vmem:[#allocation102_spill] sm:$0xff] }
 0x975   :  { %9907 = vpow2.f32 %v5109_v40  ;;  %v4804_v11 = vmul.f32 %v9892_v16, %v15953_v42  ;;  %v4803_v7 = vmul.f32 %v9892_v16, %v15954_v49  ;;  %v15958_v16 = vld [vmem:[#allocation78_spill] sm:$0xff] }
 0x976   :  { %v13981_v12 = vpop.eup %9893  ;;  %9909 = vrcp.f32 %v4706_v32  ;;  %v5111_v27 = vmul.f32 1.442695, %v4985_v4  ;;  %v5113_v45 = vmul.f32 1.442695, %v4986_v33  ;;  %5197 = vadd.xlane.f32.xlu0 %v5196_v22  ;;  %v4709_v57 = vpop.xlane.xlu0 %4708  ;;  %v13996_v22 = vld [vmem:[%s14860_s2] ss:$0 sm:$0xff] }
 0x977   :  { %15955 = vst [vmem:[#allocation100_spill] sm:$0xff] %v13981_v12  ;;  %v13983_v29 = vpop.eup %9895  ;;  %5471 = vmatprep.mubr.f32.mxu0 %v4804_v11  ;;  %v15961_v11 = vld [vmem:[#allocation33_spill] sm:$0xff]  ;;  %v15978_v61 = vld [vmem:[#allocation62_spill] sm:$0xff] }
 0x978   :  { %15956 = vst [vmem:[#allocation115_spill] sm:$0xff] %v13983_v29  ;;  %v9898_v55 = vpop.eup %9897  ;;  %9911 = vpow2.f32 %v5111_v27  ;;  %5472 = vmatmul.mubr.f32.gmra.mrb[182].mxu0 %v4803_v7  ;;  %v5199_v40 = vadd.f32 %v13983_v29, %v13981_v12  ;;  %v15963_v27 = vld [vmem:[#allocation94_spill] sm:$0xff] }
 0x979   :  { %9913 = vpow2.f32 %v5113_v45  ;;  %v4806_v28 = vmul.f32 %v9898_v55, %v15957_v46  ;;  %v4805_v42 = vmul.f32 %v9898_v55, %v15958_v16  ;;  %v14000_v45 = vadd.f32 %v13996_v22, %v15961_v11  ;;  %v15964_v55 = vld [vmem:[#allocation60_spill] sm:$0xff] }
 0x97a   :  { %v13989_v49 = vpop.eup %9899  ;;  %9915 = vrcp.f32 %v4709_v57  ;;  %5200 = vadd.xlane.f32.xlu1 %v5199_v40  ;;  %v4712_v4 = vpop.xlane.xlu0 %4711  ;;  %v15967_v16 = vld [vmem:[#allocation32_spill] sm:$0xff] }
 0x97b   :  { %15959 = vst [vmem:[#allocation76_spill] sm:$0xff] %v13989_v49  ;;  %v13991_v32 = vpop.eup %9901  ;;  %5476 = vmatprep.mubr.f32.mxu0 %v4806_v28  ;;  %15962 = vst [vmem:[#allocation89_spill] sm:$0xff] %v14000_v45  ;;  %9917 = vrcp.f32 %v4712_v4  ;;  %v14012_v12 = vadd.f32 %v13996_v22, %v15967_v16  ;;  %v1615_v4 = vmul.f32 %v14000_v45, %v14000_v45 }
 0x97c   :  { %15960 = vst [vmem:[#allocation81_spill] sm:$0xff] %v13991_v32  ;;  %v9904_v33 = vpop.eup %9903  ;;  %5477 = vmatmul.mubr.f32.gmra.mrb[184].mxu0 %v4805_v42  ;;  %v5202_v7 = vadd.f32 %v13991_v32, %v13989_v49  ;;  %v15972_v32 = vld [vmem:[#allocation46_spill] sm:$0xff] }
 0x97d   :  { %v4808_v57 = vmul.f32 %v9904_v33, %v15963_v27  ;;  %v4807_v40 = vmul.f32 %v9904_v33, %v15964_v55  ;;  %15968 = vst [vmem:[#allocation130_spill] sm:$0xff] %v14012_v12  ;;  %v15969_v27 = vld [vmem:[#allocation117_spill] sm:$0xff]  ;;  %v15971_v55 = vld [vmem:[#allocation104_spill] sm:$0xff] }
 0x97e   :  { %v14006_v46 = vpop.eup %9905  ;;  %5203 = vadd.xlane.f32.xlu0 %v5202_v7  ;;  %v4715_v11 = vpop.xlane.xlu0 %4714  ;;  %v14020_v7 = vadd.f32 %v13996_v22, %v15969_v27  ;;  %v1872_v27 = vsel %vm1631_vm2, %v1615_v4, 0.0  ;;  %v15979_v4 = vld [vmem:[#allocation106_spill] sm:$0xff] }
 0x97f   :  { %15965 = vst [vmem:[#allocation52_spill] sm:$0xff] %v14006_v46  ;;  %v14008_v28 = vpop.eup %9907  ;;  %5481 = vmatprep.mubr.f32.mxu0 %v4808_v57  ;;  %9919 = vrcp.f32 %v4715_v11 }
 0x980   :  { %15966 = vst [vmem:[#allocation49_spill] sm:$0xff] %v14008_v28  ;;  %v9910_v42 = vpop.eup %9909  ;;  %5482 = vmatmul.mubr.f32.gmra.mrb[186].mxu0 %v4807_v40  ;;  %v5205_v33 = vadd.f32 %v14008_v28, %v14006_v46  ;;  %15970 = vst [vmem:[#allocation61_spill] sm:$0xff] %v14020_v7  ;;  %v1616_v40 = vmul.f32 %v14012_v12, %v14012_v12  ;;  %v15975_v46 = vld [vmem:[#allocation35_spill] sm:$0xff] }
 0x981   :  { %v4810_v49 = vmul.f32 %v9910_v42, %v15971_v55  ;;  %v4809_v16 = vmul.f32 %v9910_v42, %v15972_v32  ;;  %v14032_v28 = vadd.f32 %v13996_v22, %v15975_v46  ;;  %v15976_v42 = vld [vmem:[#allocation116_spill] sm:$0xff]  ;;  %v15977_v55 = vld [vmem:[#allocation51_spill] sm:$0xff] }
 0x982   :  { %v14024_v29 = vpop.eup %9911  ;;  %5206 = vadd.xlane.f32.xlu1 %v5205_v33  ;;  %v4718_v11 = vpop.xlane.xlu0 %4717  ;;  %v14039_v33 = vadd.f32 %v13996_v22, %v15976_v42  ;;  %v15981_v42 = vld [vmem:[#allocation34_spill] sm:$0xff] }
 0x983   :  { %15973 = vst [vmem:[#allocation95_spill] sm:$0xff] %v14024_v29  ;;  %v14026_v57 = vpop.eup %9913  ;;  %5486 = vmatprep.mubr.f32.mxu0 %v4810_v49  ;;  %9921 = vrcp.f32 %v4718_v11  ;;  %v1599_v49 = vmul.f32 %v14020_v7, %v14020_v7 }
 0x984   :  { %15974 = vst [vmem:[#allocation50_spill] sm:$0xff] %v14026_v57  ;;  %v9916_v45 = vpop.eup %9915  ;;  %5487 = vmatmul.mubr.f32.gmra.mrb[188].mxu0 %v4809_v16  ;;  %v5208_v32 = vadd.f32 %v14026_v57, %v14024_v29  ;;  %v14048_v29 = vadd.f32 %v13996_v22, %v15980_v26  ;;  %v14052_v57 = vadd.f32 %v13996_v22, %v15981_v42  ;;  %v1875_v26 = vsel %vm1631_vm2, %v1616_v40, 0.0 }
 0x985   :  { %v4812_v12 = vmul.f32 %v9916_v45, %v15977_v55  ;;  %v4811_v20 = vmul.f32 %v9916_v45, %v15978_v61  ;;  %v9918_v46 = vpop.eup %9917  ;;  %v15982_v55 = vld [vmem:[#allocation83_spill] sm:$0xff]  ;;  %v1617_v61 = vmul.f32 %v14032_v28, %v14032_v28  ;;  %v1824_v45 = vsel %vm1631_vm2, %v1599_v49, 0.0  ;;  %v15985_v49 = vld [vmem:[#allocation38_spill] sm:$0xff] }
 0x986   :  { %1873 = vadd.xlane.f32.xlu1 %v1872_v27  ;;  %5209 = vadd.xlane.f32.xlu0 %v5208_v32  ;;  %v4721_v16 = vpop.xlane.xlu0 %4720  ;;  %v4814_v11 = vmul.f32 %v9918_v46, %v15979_v4  ;;  %v4813_v7 = vmul.f32 %v9918_v46, %v15982_v55  ;;  %v1601_v4 = vmul.f32 %v14048_v29, %v14048_v29 }
 0x987   :  { %5491 = vmatprep.mubr.f32.mxu0 %v4812_v12  ;;  %9923 = vrcp.f32 %v4721_v16  ;;  %v1600_v12 = vmul.f32 %v14039_v33, %v14039_v33  ;;  %v15983_v16 = vld [vmem:[#allocation17_spill] sm:$0xff]  ;;  %v1618_v40 = vmul.f32 %v14052_v57, %v14052_v57  ;;  %v14073_v55 = vadd.f32 %v13996_v22, %v15985_v49 }
 0x988   :  { %5492 = vmatmul.mubr.f32.gmra.mrb[190].mxu0 %v4811_v20  ;;  %v14064_v46 = vadd.f32 %v13996_v22, %v15983_v16 }
 0x989   :  { %5496 = vmatprep.mubr.f32.mxu0 %v4814_v11  ;;  %v9920_v27 = vpop.eup %9919  ;;  %v15984_v11 = vld [vmem:[#allocation64_spill] sm:$0xff]  ;;  %v1619_v49 = vmul.f32 %v14073_v55, %v14073_v55 }
 0x98a   :  { %1825 = vadd.xlane.f32.xlu1 %v1824_v45  ;;  %1876 = vadd.xlane.f32.xlu0 %v1875_v26  ;;  %v4724_v32 = vpop.xlane.xlu0 %4723  ;;  %v4816_v20 = vmul.f32 %v9920_v27, %v13638_v6  ;;  %v4815_v42 = vmul.f32 %v9920_v27, %v15984_v11  ;;  %v1878_v6 = vsel %vm1631_vm2, %v1617_v61, 0.0  ;;  %v1827_v45 = vsel %vm1631_vm2, %v1600_v12, 0.0  ;;  %v15988_v61 = vld [vmem:[#allocation37_spill] sm:$0xff] }
 0x98b   :  { %9925 = vrcp.f32 %v4724_v32  ;;  %v1602_v27 = vmul.f32 %v14064_v46, %v14064_v46  ;;  %v15986_v32 = vld [vmem:[#allocation20_spill] sm:$0xff]  ;;  %v14087_v12 = vadd.f32 %v13996_v22, %v15988_v61 }
 0x98c   :  { %5497 = vmatmul.mubr.f32.gmra.mrb[192].mxu0 %v4813_v7  ;;  %v14082_v11 = vadd.f32 %v13996_v22, %v15986_v32 }
 0x98d   :  { %5501 = vmatprep.mubr.f32.mxu0 %v4816_v20  ;;  %v9922_v26 = vpop.eup %9921 }
 0x98e   :  { %1879 = vadd.xlane.f32.xlu1 %v1878_v6  ;;  %1828 = vadd.xlane.f32.xlu0 %v1827_v45  ;;  %v4727_v16 = vpop.xlane.xlu0 %4726  ;;  %v4818_v7 = vmul.f32 %v9922_v26, %v13646_v56  ;;  %15987 = vst [vmem:[#allocation132_spill] sm:$0xff] %v14082_v11  ;;  %v4817_v20 = vmul.f32 %v9922_v26, %v13644_v2  ;;  %v1830_v56 = vsel %vm1631_vm2, %v1601_v4, 0.0  ;;  %v1881_v6 = vsel %vm1631_vm2, %v1618_v40, 0.0  ;;  %v15992_v40 = vld [vmem:[#allocation41_spill] sm:$0xff] }
 0x98f   :  { %9927 = vrcp.f32 %v4727_v16  ;;  %v15989_v16 = vld [vmem:[#allocation19_spill] sm:$0xff]  ;;  %v1603_v26 = vmul.f32 %v14082_v11, %v14082_v11  ;;  %v1620_v4 = vmul.f32 %v14087_v12, %v14087_v12 }
 0x990   :  { %5502 = vmatmul.mubr.f32.gmra.mrb[194].mxu0 %v4815_v42  ;;  %v14096_v2 = vadd.f32 %v13996_v22, %v15989_v16 }
 0x991   :  { %5506 = vmatprep.mubr.f32.mxu0 %v4818_v7  ;;  %v9924_v45 = vpop.eup %9923  ;;  %v15991_v7 = vld [vmem:[#allocation98_spill] sm:$0xff] }
 0x992   :  { %1831 = vadd.xlane.f32.xlu1 %v1830_v56  ;;  %1882 = vadd.xlane.f32.xlu0 %v1881_v6  ;;  %v4730_v32 = vpop.xlane.xlu0 %4729  ;;  %v4820_v42 = vmul.f32 %v9924_v45, %v13654_v60  ;;  %15990 = vst [vmem:[#allocation133_spill] sm:$0xff] %v14096_v2  ;;  %v4819_v61 = vmul.f32 %v9924_v45, %v15991_v7  ;;  %v1884_v60 = vsel %vm1631_vm2, %v1619_v49, 0.0  ;;  %v1833_v6 = vsel %vm1631_vm2, %v1602_v27, 0.0  ;;  %v15995_v49 = vld [vmem:[#allocation40_spill] sm:$0xff] }
 0x993   :  { %9929 = vrcp.f32 %v4730_v32  ;;  %v14105_v56 = vadd.f32 %v13996_v22, %v15992_v40  ;;  %v1604_v45 = vmul.f32 %v14096_v2, %v14096_v2  ;;  %v15993_v32 = vld [vmem:[#allocation22_spill] sm:$0xff]  ;;  %v14119_v27 = vadd.f32 %v13996_v22, %v15995_v49 }
 0x994   :  { %5507 = vmatmul.mubr.f32.gmra.mrb[196].mxu0 %v4817_v20  ;;  %v14114_v7 = vadd.f32 %v13996_v22, %v15993_v32 }
 0x995   :  { %5511 = vmatprep.mubr.f32.mxu0 %v4820_v42  ;;  %v9926_v16 = vpop.eup %9925  ;;  %v15994_v42 = vld [vmem:[#allocation85_spill] sm:$0xff] }
 0x996   :  { %1885 = vadd.xlane.f32.xlu1 %v1884_v60  ;;  %1834 = vadd.xlane.f32.xlu0 %v1833_v6  ;;  %v5117_v11 = vpop.xlane.xlu0 %5116  ;;  %v4822_v20 = vmul.f32 %v9926_v16, %v13662_v1  ;;  %v4821_v40 = vmul.f32 %v9926_v16, %v15994_v42  ;;  %v1621_v60 = vmul.f32 %v14105_v56, %v14105_v56  ;;  %v1836_v1 = vsel %vm1631_vm2, %v1603_v26, 0.0 }
 0x997   :  { %9931 = vrcp.f32 %v5117_v11  ;;  %v1887_v6 = vsel %vm1631_vm2, %v1620_v4, 0.0  ;;  %v1605_v42 = vmul.f32 %v14114_v7, %v14114_v7  ;;  %v1622_v26 = vmul.f32 %v14119_v27, %v14119_v27  ;;  %v15997_v4 = vld [vmem:[#allocation43_spill] sm:$0xff] }
 0x998   :  { %5512 = vmatmul.mubr.f32.gmra.mrb[198].mxu0 %v4819_v61  ;;  %v15996_v61 = vld [vmem:[#allocation21_spill] sm:$0xff]  ;;  %v14137_v49 = vadd.f32 %v13996_v22, %v15997_v4 }
 0x999   :  { %5516 = vmatprep.mubr.f32.mxu0 %v4822_v20  ;;  %v9928_v2 = vpop.eup %9927  ;;  %v14128_v16 = vadd.f32 %v13996_v22, %v15996_v61 }
 0x99a   :  { %1837 = vadd.xlane.f32.xlu1 %v1836_v1  ;;  %1888 = vadd.xlane.f32.xlu0 %v1887_v6  ;;  %v5120_v32 = vpop.xlane.xlu0 %5119  ;;  %v4824_v11 = vmul.f32 %v9928_v2, %v13670_v34  ;;  %v4823_v20 = vmul.f32 %v9928_v2, %v13668_v44  ;;  %v1890_v34 = vsel %vm1631_vm2, %v1621_v60, 0.0  ;;  %v1839_v1 = vsel %vm1631_vm2, %v1604_v45, 0.0  ;;  %v15998_v2 = vld [vmem:[#allocation24_spill] sm:$0xff]  ;;  %v15999_v60 = vld [vmem:[#allocation39_spill] sm:$0xff] }
 0x99b   :  { %9933 = vrcp.f32 %v5120_v32  ;;  %v1606_v44 = vmul.f32 %v14128_v16, %v14128_v16  ;;  %v14146_v32 = vadd.f32 %v13996_v22, %v15998_v2  ;;  %v14151_v45 = vadd.f32 %v13996_v22, %v15999_v60 }
 0x99c   :  { %5517 = vmatmul.mubr.f32.gmra.mrb[200].mxu0 %v4821_v40  ;;  %v1623_v4 = vmul.f32 %v14137_v49, %v14137_v49 }
 0x99d   :  { %5521 = vmatprep.mubr.f32.mxu0 %v4824_v11  ;;  %v9930_v6 = vpop.eup %9929 }
 0x99e   :  { %1891 = vadd.xlane.f32.xlu1 %v1890_v34  ;;  %1840 = vadd.xlane.f32.xlu0 %v1839_v1  ;;  %v5123_v61 = vpop.xlane.xlu0 %5122  ;;  %v4826_v40 = vmul.f32 %v9930_v6, %v13678_v59  ;;  %v4825_v11 = vmul.f32 %v9930_v6, %v13676_v25  ;;  %v1842_v59 = vsel %vm1631_vm2, %v1605_v42, 0.0  ;;  %v1893_v34 = vsel %vm1631_vm2, %v1622_v26, 0.0  ;;  %v16001_v26 = vld [vmem:[#allocation42_spill] sm:$0xff] }
 0x99f   :  { %9935 = vrcp.f32 %v5123_v61  ;;  %v16000_v61 = vld [vmem:[#allocation23_spill] sm:$0xff]  ;;  %v1607_v6 = vmul.f32 %v14146_v32, %v14146_v32  ;;  %v1624_v42 = vmul.f32 %v14151_v45, %v14151_v45 }
 0x9a0   :  { %5522 = vmatmul.mubr.f32.gmra.mrb[202].mxu0 %v4823_v20  ;;  %v14160_v25 = vadd.f32 %v13996_v22, %v16000_v61 }
 0x9a1   :  { %5526 = vmatprep.mubr.f32.mxu0 %v4826_v40  ;;  %v9932_v1 = vpop.eup %9931  ;;  %v14169_v40 = vadd.f32 %v13996_v22, %v16001_v26 }
 0x9a2   :  { %1843 = vadd.xlane.f32.xlu1 %v1842_v59  ;;  %1894 = vadd.xlane.f32.xlu0 %v1893_v34  ;;  %v5126_v2 = vpop.xlane.xlu0 %5125  ;;  %v5244_v20 = vmul.f32 %v9932_v1, %v13686_v53  ;;  %v5243_v60 = vmul.f32 %v9932_v1, %v13684_v8  ;;  %v1896_v53 = vsel %vm1631_vm2, %v1623_v4, 0.0  ;;  %v1845_v59 = vsel %vm1631_vm2, %v1606_v44, 0.0  ;;  %v16002_v1 = vld [vmem:[#allocation26_spill] sm:$0xff]  ;;  %v16003_v4 = vld [vmem:[#allocation45_spill] sm:$0xff] }
 0x9a3   :  { %9937 = vrcp.f32 %v5126_v2  ;;  %v14178_v2 = vadd.f32 %v13996_v22, %v16002_v1  ;;  %v14183_v44 = vadd.f32 %v13996_v22, %v16003_v4  ;;  %v1625_v26 = vmul.f32 %v14169_v40, %v14169_v40 }
 0x9a4   :  { %5527 = vmatmul.mubr.f32.gmra.mrb[204].mxu0 %v4825_v11  ;;  %v1608_v11 = vmul.f32 %v14160_v25, %v14160_v25 }
 0x9a5   :  { %5596 = vmatprep.mubr.f32.mxu0 %v5244_v20  ;;  %v9934_v34 = vpop.eup %9933 }
 0x9a6   :  { %1897 = vadd.xlane.f32.xlu1 %v1896_v53  ;;  %1846 = vadd.xlane.f32.xlu0 %v1845_v59  ;;  %v5129_v61 = vpop.xlane.xlu0 %5128  ;;  %v5246_v8 = vmul.f32 %v9934_v34, %v13694_v51  ;;  %v5245_v20 = vmul.f32 %v9934_v34, %v13692_v23  ;;  %v1848_v51 = vsel %vm1631_vm2, %v1607_v6, 0.0  ;;  %v1899_v53 = vsel %vm1631_vm2, %v1624_v42, 0.0  ;;  %v16006_v42 = vld [vmem:[#allocation53_spill] sm:$0xff] }
 0x9a7   :  { %9939 = vrcp.f32 %v5129_v61  ;;  %v16004_v61 = vld [vmem:[#allocation25_spill] sm:$0xff]  ;;  %v1609_v34 = vmul.f32 %v14178_v2, %v14178_v2  ;;  %v1626_v6 = vmul.f32 %v14183_v44, %v14183_v44  ;;  %v14201_v4 = vadd.f32 %v13996_v22, %v16006_v42 }
 0x9a8   :  { %5597 = vmatmul.mubr.f32.vlgmr.msra.gmra.mrb[142].mxu0 %v5243_v60  ;;  %v14192_v23 = vadd.f32 %v13996_v22, %v16004_v61 }
 0x9a9   :  { %5601 = vmatprep.mubr.f32.mxu0 %v5246_v8  ;;  %v9936_v59 = vpop.eup %9935 }
 0x9aa   :  { %1849 = vadd.xlane.f32.xlu1 %v1848_v51  ;;  %1900 = vadd.xlane.f32.xlu0 %v1899_v53  ;;  %v5132_v1 = vpop.xlane.xlu0 %5131  ;;  %v5248_v60 = vmul.f32 %v9936_v59, %v13702_v48  ;;  %16005 = vst [vmem:[#allocation80_spill] sm:$0xff] %v14192_v23  ;;  %v5247_v8 = vmul.f32 %v9936_v59, %v13700_v10  ;;  %v1902_v48 = vsel %vm1631_vm2, %v1625_v26, 0.0  ;;  %v1851_v51 = vsel %vm1631_vm2, %v1608_v11, 0.0  ;;  %v16007_v59 = vld [vmem:[#allocation28_spill] sm:$0xff] }
 0x9ab   :  { %9941 = vrcp.f32 %v5132_v1  ;;  %v1610_v10 = vmul.f32 %v14192_v23, %v14192_v23  ;;  %v14210_v1 = vadd.f32 %v13996_v22, %v16007_v59  ;;  %v16009_v26 = vld [vmem:[#allocation44_spill] sm:$0xff] }
 0x9ac   :  { %5602 = vmatmul.mubr.f32.gmra.mrb[144].mxu0 %v5245_v20  ;;  %v14215_v11 = vadd.f32 %v13996_v22, %v16009_v26 }
 0x9ad   :  { %5606 = vmatprep.mubr.f32.mxu0 %v5248_v60  ;;  %v9938_v53 = vpop.eup %9937  ;;  %v16008_v60 = vld [vmem:[#allocation108_spill] sm:$0xff] }
 0x9ae   :  { %1903 = vadd.xlane.f32.xlu1 %v1902_v48  ;;  %1852 = vadd.xlane.f32.xlu0 %v1851_v51  ;;  %v5135_v61 = vpop.xlane.xlu0 %5134  ;;  %v5250_v20 = vmul.f32 %v9938_v53, %v13710_v30  ;;  %v5249_v42 = vmul.f32 %v9938_v53, %v16008_v60  ;;  %v1627_v48 = vmul.f32 %v14201_v4, %v14201_v4  ;;  %v1854_v30 = vsel %vm1631_vm2, %v1609_v34, 0.0 }
 0x9af   :  { %9943 = vrcp.f32 %v5135_v61  ;;  %v1905_v51 = vsel %vm1631_vm2, %v1626_v6, 0.0  ;;  %v16010_v61 = vld [vmem:[#allocation27_spill] sm:$0xff]  ;;  %v1611_v60 = vmul.f32 %v14210_v1, %v14210_v1  ;;  %v1628_v34 = vmul.f32 %v14215_v11, %v14215_v11 }
 0x9b0   :  { %5607 = vmatmul.mubr.f32.gmra.mrb[146].mxu0 %v5247_v8  ;;  %v14224_v53 = vadd.f32 %v13996_v22, %v16010_v61  ;;  %v16012_v6 = vld [vmem:[#allocation55_spill] sm:$0xff] }
 0x9b1   :  { %5611 = vmatprep.mubr.f32.mxu0 %v5250_v20  ;;  %v9940_v23 = vpop.eup %9939  ;;  %v14233_v26 = vadd.f32 %v13996_v22, %v16012_v6 }
 0x9b2   :  { %1855 = vadd.xlane.f32.xlu1 %v1854_v30  ;;  %1906 = vadd.xlane.f32.xlu0 %v1905_v51  ;;  %v5138_v59 = vpop.xlane.xlu0 %5137  ;;  %v5252_v8 = vmul.f32 %v9940_v23, %v13718_v19  ;;  %16011 = vst [vmem:[#allocation105_spill] sm:$0xff] %v14224_v53  ;;  %v5251_v20 = vmul.f32 %v9940_v23, %v13716_v3  ;;  %v1908_v19 = vsel %vm1631_vm2, %v1627_v48, 0.0  ;;  %v1857_v30 = vsel %vm1631_vm2, %v1610_v10, 0.0  ;;  %v16013_v23 = vld [vmem:[#allocation30_spill] sm:$0xff] }
 0x9b3   :  { %9945 = vrcp.f32 %v5138_v59  ;;  %v1612_v3 = vmul.f32 %v14224_v53, %v14224_v53  ;;  %v14242_v59 = vadd.f32 %v13996_v22, %v16013_v23  ;;  %v16015_v48 = vld [vmem:[#allocation54_spill] sm:$0xff] }
 0x9b4   :  { %5612 = vmatmul.mubr.f32.gmra.mrb[148].mxu0 %v5249_v42  ;;  %v14247_v10 = vadd.f32 %v13996_v22, %v16015_v48 }
 0x9b5   :  { %5616 = vmatprep.mubr.f32.mxu0 %v5252_v8  ;;  %v9942_v51 = vpop.eup %9941  ;;  %v16014_v8 = vld [vmem:[#allocation66_spill] sm:$0xff]  ;;  %v1863_v48 = vsel %vm1631_vm2, %v1612_v3, 0.0 }
 0x9b6   :  { %1909 = vadd.xlane.f32.xlu1 %v1908_v19  ;;  %1858 = vadd.xlane.f32.xlu0 %v1857_v30  ;;  %v5254_v42 = vmul.f32 %v9942_v51, %v13726_v17  ;;  %v5253_v6 = vmul.f32 %v9942_v51, %v16014_v8  ;;  %v1629_v19 = vmul.f32 %v14233_v26, %v14233_v26  ;;  %v1860_v17 = vsel %vm1631_vm2, %v1611_v60, 0.0 }
 0x9b7   :  { %v5141_v61 = vpop.xlane.xlu0 %5140  ;;  %v1911_v30 = vsel %vm1631_vm2, %v1628_v34, 0.0  ;;  %v1630_v60 = vmul.f32 %v14247_v10, %v14247_v10 }
 0x9b8   :  { %5617 = vmatmul.mubr.f32.gmra.mrb[150].mxu0 %v5251_v20  ;;  %9947 = vrcp.f32 %v5141_v61  ;;  %v16016_v61 = vld [vmem:[#allocation29_spill] sm:$0xff]  ;;  %v1914_v34 = vsel %vm1631_vm2, %v1629_v19, 0.0 }
 0x9b9   :  { %5621 = vmatprep.mubr.f32.mxu0 %v5254_v42  ;;  %v9944_v53 = vpop.eup %9943  ;;  %v14256_v51 = vadd.f32 %v13996_v22, %v16016_v61  ;;  %v1613_v42 = vmul.f32 %v14242_v59, %v14242_v59  ;;  %v1917_v19 = vsel %vm1631_vm2, %v1630_v60, 0.0  ;;  %v16017_v61 = vld [vmem:[#allocation72_spill] sm:$0xff] }
 0x9ba   :  { %1861 = vadd.xlane.f32.xlu1 %v1860_v17  ;;  %1912 = vadd.xlane.f32.xlu0 %v1911_v30  ;;  %v5256_v20 = vmul.f32 %v9944_v53, %v13734_v43  ;;  %v5255_v8 = vmul.f32 %v9944_v53, %v13732_v62 }
 0x9bb   :  { %v5144_v23 = vpop.xlane.xlu0 %5143  ;;  %v1614_v53 = vmul.f32 %v14256_v51, %v14256_v51  ;;  %v1866_v17 = vsel %vm1631_vm2, %v1613_v42, 0.0 }
 0x9bc   :  { %5622 = vmatmul.mubr.f32.gmra.mrb[152].mxu0 %v5253_v6  ;;  %9949 = vrcp.f32 %v5144_v23 }
 0x9bd   :  { %5626 = vmatprep.mubr.f32.mxu0 %v5256_v20  ;;  %v9946_v43 = vpop.eup %9945 }
 0x9be   :  { %1915 = vadd.xlane.f32.xlu1 %v1914_v34  ;;  %1864 = vadd.xlane.f32.xlu0 %v1863_v48  ;;  %v5258_v6 = vmul.f32 %v9946_v43, %v13742_v0  ;;  %v5257_v62 = vmul.f32 %v9946_v43, %v13740_v37  ;;  %v1869_v37 = vsel %vm1631_vm2, %v1614_v53, 0.0 }
 0x9bf   :  { %v5147_v22 = vpop.xlane.xlu1 %5146 }
 0x9c0   :  { %5627 = vmatmul.mubr.f32.gmra.mrb[154].mxu0 %v5255_v8  ;;  %9951 = vrcp.f32 %v5147_v22 }
 0x9c1   :  { %5631 = vmatprep.mubr.f32.mxu0 %v5258_v6 }
 0x9c2   :  { %v9948_v30 = vpop.eup %9947  ;;  %1867 = vadd.xlane.f32.xlu1 %v1866_v17  ;;  %1918 = vadd.xlane.f32.xlu0 %v1917_v19 }
 0x9c3   :  { %v5150_v3 = vpop.xlane.xlu0 %5149  ;;  %v5260_v23 = vmul.f32 %v9948_v30, %v13752_v39  ;;  %v5259_v0 = vmul.f32 %v9948_v30, %v13750_v47 }
 0x9c4   :  { %5632 = vmatmul.mubr.f32.gmra.mrb[156].mxu0 %v5257_v62  ;;  %9953 = vrcp.f32 %v5150_v3 }
 0x9c5   :  { %5636 = vmatprep.mubr.f32.mxu0 %v5260_v23 }
 0x9c6   :  { %v9950_v20 = vpop.eup %9949  ;;  %3478 = vadd.xlane.f32.xlu1 %v16017_v61  ;;  %1870 = vadd.xlane.f32.xlu0 %v1869_v37 }
 0x9c7   :  { %v5153_v8 = vpop.xlane.xlu1 %5152  ;;  %v5262_v42 = vmul.f32 %v9950_v20, %v13764_v54  ;;  %v5261_v60 = vmul.f32 %v9950_v20, %v13761_v58  ;;  %v16018_v20 = vld [vmem:[#allocation88_spill] sm:$0xff] }
 0x9c8   :  { %5637 = vmatmul.mubr.f32.gmra.mrb[158].mxu0 %v5259_v0  ;;  %9955 = vrcp.f32 %v5153_v8 }
 0x9c9   :  { %5641 = vmatprep.mubr.f32.mxu0 %v5262_v42 }
 0x9ca   :  { %v9952_v39 = vpop.eup %9951 }
 0x9cb   :  { %v5156_v34 = vpop.xlane.xlu0 %5155  ;;  %v5264_v48 = vmul.f32 %v9952_v39, %v13776_v13  ;;  %v5263_v47 = vmul.f32 %v9952_v39, %v13773_v5 }
 0x9cc   :  { %5642 = vmatmul.mubr.f32.gmra.mrb[160].mxu0 %v5261_v60  ;;  %9957 = vrcp.f32 %v5156_v34  ;;  %v16020_v60 = vld [vmem:[#allocation119_spill] sm:$0xff] }
 0x9cd   :  { %5646 = vmatprep.mubr.f32.mxu0 %v5264_v48 }
 0x9ce   :  { %v9954_v43 = vpop.eup %9953 }
 0x9cf   :  { %v5159_v22 = vpop.xlane.xlu1 %5158  ;;  %v5266_v6 = vmul.f32 %v9954_v43, %v13788_v24  ;;  %v5265_v54 = vmul.f32 %v9954_v43, %v13785_v63 }
 0x9d0   :  { %5647 = vmatmul.mubr.f32.gmra.mrb[162].mxu0 %v5263_v47  ;;  %9959 = vrcp.f32 %v5159_v22  ;;  %v16022_v47 = vld [vmem:[#allocation8_spill] sm:$0xff] }
 0x9d1   :  { %5651 = vmatprep.mubr.f32.mxu0 %v5266_v6  ;;  %v16023_v22 = vld [vmem:[#allocation68_spill] sm:$0xff] }
 0x9d2   :  { %v9956_v58 = vpop.eup %9955 }
 0x9d3   :  { %v5162_v62 = vpop.xlane.xlu0 %5161  ;;  %v5268_v53 = vmul.f32 %v9956_v58, %v13800_v35  ;;  %v5267_v13 = vmul.f32 %v9956_v58, %v13797_v18 }
 0x9d4   :  { %5652 = vmatmul.mubr.f32.gmra.mrb[164].mxu0 %v5265_v54  ;;  %9961 = vrcp.f32 %v5162_v62  ;;  %v16024_v62 = vld [vmem:[#allocation47_spill] sm:$0xff] }
 0x9d5   :  { %5656 = vmatprep.mubr.f32.mxu0 %v5268_v53 }
 0x9d6   :  { %v9958_v5 = vpop.eup %9957 }
 0x9d7   :  { %v5165_v17 = vpop.xlane.xlu1 %5164  ;;  %v5270_v19 = vmul.f32 %v9958_v5, %v13812_v31  ;;  %v5269_v24 = vmul.f32 %v9958_v5, %v13809_v9 }
 0x9d8   :  { %5657 = vmatmul.mubr.f32.gmra.mrb[166].mxu0 %v5267_v13  ;;  %9963 = vrcp.f32 %v5165_v17  ;;  %v16025_v13 = vld [vmem:[#allocation122_spill] sm:$0xff] }
 0x9d9   :  { %5661 = vmatprep.mubr.f32.mxu0 %v5270_v19 }
 0x9da   :  { %v9960_v63 = vpop.eup %9959 }
 0x9db   :  { %v5168_v30 = vpop.xlane.xlu0 %5167  ;;  %v5272_v3 = vmul.f32 %v9960_v63, %v13824_v14  ;;  %v5271_v35 = vmul.f32 %v9960_v63, %v13821_v50  ;;  %v16019_v14 = vld [vmem:[#allocation7_spill] sm:$0xff] }
 0x9dc   :  { %5662 = vmatmul.mubr.f32.gmra.mrb[168].mxu0 %v5269_v24  ;;  %9965 = vrcp.f32 %v5168_v30  ;;  %v16026_v24 = vld [vmem:[#allocation70_spill] sm:$0xff]  ;;  %v16027_v30 = vld [vmem:[#allocation112_spill] sm:$0xff] }
 0x9dd   :  { %5666 = vmatprep.mubr.f32.mxu0 %v5272_v3 }
 0x9de   :  { %v9962_v18 = vpop.eup %9961 }
 0x9df   :  { %v5171_v23 = vpop.xlane.xlu1 %5170  ;;  %v5274_v0 = vmul.f32 %v9962_v18, %v13836_v36  ;;  %v5273_v31 = vmul.f32 %v9962_v18, %v13833_v15  ;;  %v16021_v36 = vld [vmem:[#allocation110_spill] sm:$0xff] }
 0x9e0   :  { %5667 = vmatmul.mubr.f32.gmra.mrb[170].mxu0 %v5271_v35  ;;  %9967 = vrcp.f32 %v5171_v23  ;;  %v16028_v23 = vld [vmem:[#allocation114_spill] sm:$0xff] }
 0x9e1   :  { %5671 = vmatprep.mubr.f32.mxu0 %v5274_v0 }
 0x9e2   :  { %v9964_v9 = vpop.eup %9963 }
 0x9e3   :  { %v5174_v37 = vpop.xlane.xlu0 %5173  ;;  %v5276_v61 = vmul.f32 %v9964_v9, %v16018_v20  ;;  %v5275_v8 = vmul.f32 %v9964_v9, %v16019_v14  ;;  %v16030_v14 = vld [vmem:[#allocation118_spill] sm:$0xff] }
 0x9e4   :  { %5672 = vmatmul.mubr.f32.gmra.mrb[172].mxu0 %v5273_v31  ;;  %9969 = vrcp.f32 %v5174_v37  ;;  %v16029_v31 = vld [vmem:[#allocation10_spill] sm:$0xff] }
 0x9e5   :  { %5676 = vmatprep.mubr.f32.mxu0 %v5276_v61 }
 0x9e6   :  { %v9966_v50 = vpop.eup %9965 }
 0x9e7   :  { %v5177_v42 = vpop.xlane.xlu1 %5176  ;;  %v5278_v39 = vmul.f32 %v9966_v50, %v16020_v60  ;;  %v5277_v34 = vmul.f32 %v9966_v50, %v16021_v36 }
 0x9e8   :  { %5677 = vmatmul.mubr.f32.gmra.mrb[174].mxu0 %v5275_v8  ;;  %9971 = vrcp.f32 %v5177_v42 }
 0x9e9   :  { %5681 = vmatprep.mubr.f32.mxu0 %v5278_v39  ;;  %v16031_v39 = vld [vmem:[#allocation120_spill] sm:$0xff] }
 0x9ea   :  { %v9968_v15 = vpop.eup %9967 }
 0x9eb   :  { %v5180_v48 = vpop.xlane.xlu0 %5179  ;;  %v5280_v43 = vmul.f32 %v9968_v15, %v16022_v47  ;;  %v5279_v6 = vmul.f32 %v9968_v15, %v16023_v22  ;;  %v16032_v22 = vld [vmem:[#allocation125_spill] sm:$0xff] }
 0x9ec   :  { %5682 = vmatmul.mubr.f32.gmra.mrb[176].mxu0 %v5277_v34  ;;  %9973 = vrcp.f32 %v5180_v48 }
 0x9ed   :  { %5686 = vmatprep.mubr.f32.mxu0 %v5280_v43 }
 0x9ee   :  { %v9970_v54 = vpop.eup %9969 }
 0x9ef   :  { %v5183_v58 = vpop.xlane.xlu1 %5182  ;;  %v5282_v53 = vmul.f32 %v9970_v54, %v16024_v62  ;;  %v5281_v5 = vmul.f32 %v9970_v54, %v16025_v13 }
 0x9f0   :  { %5687 = vmatmul.mubr.f32.gmra.mrb[178].mxu0 %v5279_v6  ;;  %9975 = vrcp.f32 %v5183_v58 }
 0x9f1   :  { %5691 = vmatprep.mubr.f32.mxu0 %v5282_v53  ;;  %v16034_v53 = vld [vmem:[#allocation126_spill] sm:$0xff] }
 0x9f2   :  { %v9972_v17 = vpop.eup %9971 }
 0x9f3   :  { %v5186_v19 = vpop.xlane.xlu0 %5185  ;;  %v5284_v63 = vmul.f32 %v9972_v17, %v16026_v24  ;;  %v5283_v3 = vmul.f32 %v9972_v17, %v16027_v30 }
 0x9f4   :  { %5692 = vmatmul.mubr.f32.gmra.mrb[180].mxu0 %v5281_v5  ;;  %9977 = vrcp.f32 %v5186_v19  ;;  %v16036_v19 = vld [vmem:[#allocation15_spill] sm:$0xff] }
 0x9f5   :  { %5696 = vmatprep.mubr.f32.mxu0 %v5284_v63  ;;  %v16037_v63 = vld [vmem:[#allocation128_spill] sm:$0xff] }
 0x9f6   :  { %v9974_v35 = vpop.eup %9973 }
 0x9f7   :  { %v5189_v18 = vpop.xlane.xlu1 %5188  ;;  %v5286_v0 = vmul.f32 %v9974_v35, %v16028_v23  ;;  %v5285_v9 = vmul.f32 %v9974_v35, %v16029_v31  ;;  %v16038_v23 = vld [vmem:[#allocation115_spill] sm:$0xff] }
 0x9f8   :  { %5697 = vmatmul.mubr.f32.gmra.mrb[182].mxu0 %v5283_v3  ;;  %9979 = vrcp.f32 %v5189_v18 }
 0x9f9   :  { %5701 = vmatprep.mubr.f32.mxu0 %v5286_v0 }
 0x9fa   :  { %v9976_v37 = vpop.eup %9975 }
 0x9fb   :  { %v5192_v20 = vpop.xlane.xlu0 %5191  ;;  %v5288_v61 = vmul.f32 %v9976_v37, %v13920_v21  ;;  %v5287_v8 = vmul.f32 %v9976_v37, %v16030_v14 }
 0x9fc   :  { %5702 = vmatmul.mubr.f32.gmra.mrb[184].mxu0 %v5285_v9  ;;  %9981 = vrcp.f32 %v5192_v20  ;;  %v16039_v9 = vld [vmem:[#allocation100_spill] sm:$0xff] }
 0x9fd   :  { %5706 = vmatprep.mubr.f32.mxu0 %v5288_v61 }
 0x9fe   :  { %v9978_v50 = vpop.eup %9977 }
 0x9ff   :  { %v5195_v42 = vpop.xlane.xlu1 %5194  ;;  %v5290_v60 = vmul.f32 %v9978_v50, %v13932_v41  ;;  %v5289_v36 = vmul.f32 %v9978_v50, %v16031_v39  ;;  %v16033_v41 = vld [vmem:[#allocation123_spill] sm:$0xff]  ;;  %v16041_v39 = vld [vmem:[#allocation76_spill] sm:$0xff] }
 0xa00   :  { %5707 = vmatmul.mubr.f32.gmra.mrb[186].mxu0 %v5287_v8  ;;  %9983 = vrcp.f32 %v5195_v42  ;;  %v16040_v8 = vld [vmem:[#allocation81_spill] sm:$0xff] }
 0xa01   :  { %5711 = vmatprep.mubr.f32.mxu0 %v5290_v60 }
 0xa02   :  { %v9980_v34 = vpop.eup %9979 }
 0xa03   :  { %v5198_v15 = vpop.xlane.xlu0 %5197  ;;  %v5292_v48 = vmul.f32 %v9980_v34, %v13943_v38  ;;  %v5291_v21 = vmul.f32 %v9980_v34, %v13941_v52  ;;  %v16035_v38 = vld [vmem:[#allocation124_spill] sm:$0xff] }
 0xa04   :  { %5712 = vmatmul.mubr.f32.gmra.mrb[188].mxu0 %v5289_v36  ;;  %9985 = vrcp.f32 %v5198_v15 }
 0xa05   :  { %5716 = vmatprep.mubr.f32.mxu0 %v5292_v48 }
 0xa06   :  { %v9982_v47 = vpop.eup %9981 }
 0xa07   :  { %v5201_v43 = vpop.xlane.xlu1 %5200  ;;  %v5294_v6 = vmul.f32 %v9982_v47, %v16032_v22  ;;  %v5293_v54 = vmul.f32 %v9982_v47, %v16033_v41 }
 0xa08   :  { %5717 = vmatmul.mubr.f32.gmra.mrb[190].mxu0 %v5291_v21  ;;  %9987 = vrcp.f32 %v5201_v43  ;;  %v16042_v21 = vld [vmem:[#allocation49_spill] sm:$0xff] }
 0xa09   :  { %5721 = vmatprep.mubr.f32.mxu0 %v5294_v6  ;;  %v16043_v6 = vld [vmem:[#allocation52_spill] sm:$0xff] }
 0xa0a   :  { %v9984_v58 = vpop.eup %9983 }
 0xa0b   :  { %v5204_v62 = vpop.xlane.xlu0 %5203  ;;  %v5296_v13 = vmul.f32 %v9984_v58, %v16034_v53  ;;  %v5295_v5 = vmul.f32 %v9984_v58, %v16035_v38  ;;  %v16044_v53 = vld [vmem:[#allocation50_spill] sm:$0xff] }
 0xa0c   :  { %5722 = vmatmul.mubr.f32.gmra.mrb[192].mxu0 %v5293_v54  ;;  %9989 = vrcp.f32 %v5204_v62 }
 0xa0d   :  { %5726 = vmatprep.mubr.f32.mxu0 %v5296_v13 }
 0xa0e   :  { %v9986_v52 = vpop.eup %9985 }
 0xa0f   :  { %v5207_v17 = vpop.xlane.xlu1 %5206  ;;  %v5298_v24 = vmul.f32 %v9986_v52, %v16036_v19  ;;  %v5297_v30 = vmul.f32 %v9986_v52, %v16037_v63  ;;  %v16045_v52 = vld [vmem:[#allocation95_spill] sm:$0xff] }
 0xa10   :  { %5727 = vmatmul.mubr.f32.gmra.mrb[194].mxu0 %v5295_v5  ;;  %9991 = vrcp.f32 %v5207_v17 }
 0xa11   :  { %5731 = vmatprep.mubr.f32.mxu0 %v5298_v24 }
 0xa12   :  { %v9988_v3 = vpop.eup %9987 }
 0xa13   :  { %v5210_v35 = vpop.xlane.xlu0 %5209  ;;  %v1874_v18 = vpop.xlane.xlu1 %1873  ;;  %v5300_v0 = vmul.f32 %v9988_v3, %v16038_v23  ;;  %v5299_v37 = vmul.f32 %v9988_v3, %v16039_v9 }
 0xa14   :  { %5732 = vmatmul.mubr.f32.gmra.mrb[196].mxu0 %v5297_v30  ;;  %9993 = vrcp.f32 %v5210_v35  ;;  %v2000_v31 = vmax.f32 %v1874_v18, 1e-24  ;;  %v16046_v18 = vld [vmem:[#allocation89_spill] sm:$0xff] }
 0xa15   :  { %5736 = vmatprep.mubr.f32.mxu0 %v5300_v0  ;;  %v16047_v0 = vld [vmem:[#allocation130_spill] sm:$0xff] }
 0xa16   :  { %v9990_v20 = vpop.eup %9989  ;;  %9995 = vrsqrt.f32 %v2000_v31 }
 0xa17   :  { %v1877_v61 = vpop.xlane.xlu0 %1876  ;;  %v1826_v14 = vpop.xlane.xlu1 %1825  ;;  %v5302_v50 = vmul.f32 %v9990_v20, %v16040_v8  ;;  %v5301_v36 = vmul.f32 %v9990_v20, %v16041_v39 }
 0xa18   :  { %5737 = vmatmul.mubr.f32.gmra.mrb[198].mxu0 %v5299_v37  ;;  %v2001_v42 = vmax.f32 %v1877_v61, 1e-24  ;;  %v1984_v60 = vmax.f32 %v1826_v14, 1e-24 }
 0xa19   :  { %5741 = vmatprep.mubr.f32.mxu0 %v5302_v50 }
 0xa1a   :  { %v9992_v34 = vpop.eup %9991  ;;  %9997 = vrsqrt.f32 %v2001_v42  ;;  %v16048_v42 = vld [vmem:[#allocation61_spill] sm:$0xff] }
 0xa1b   :  { %v1829_v15 = vpop.xlane.xlu0 %1828  ;;  %v1880_v48 = vpop.xlane.xlu1 %1879  ;;  %v5304_v47 = vmul.f32 %v9992_v34, %v16042_v21  ;;  %9999 = vrsqrt.f32 %v1984_v60  ;;  %v5303_v41 = vmul.f32 %v9992_v34, %v16043_v6 }
 0xa1c   :  { %5742 = vmatmul.mubr.f32.gmra.mrb[200].mxu0 %v5301_v36  ;;  %v1985_v43 = vmax.f32 %v1829_v15, 1e-24  ;;  %v2002_v22 = vmax.f32 %v1880_v48, 1e-24 }
 0xa1d   :  { %5746 = vmatprep.mubr.f32.mxu0 %v5304_v47 }
 0xa1e   :  { %v9994_v54 = vpop.eup %9993  ;;  %10001 = vrsqrt.f32 %v1985_v43 }
 0xa1f   :  { %v1883_v58 = vpop.xlane.xlu0 %1882  ;;  %v1832_v62 = vpop.xlane.xlu1 %1831  ;;  %v5306_v13 = vmul.f32 %v9994_v54, %v16044_v53  ;;  %10003 = vrsqrt.f32 %v2002_v22  ;;  %v5305_v17 = vmul.f32 %v9994_v54, %v16045_v52 }
 0xa20   :  { %5747 = vmatmul.mubr.f32.gmra.mrb[202].mxu0 %v5303_v41  ;;  %v2003_v38 = vmax.f32 %v1883_v58, 1e-24  ;;  %v1986_v5 = vmax.f32 %v1832_v62, 1e-24  ;;  %v9996_v19 = vpop.eup %9995 }
 0xa21   :  { %5751 = vmatprep.mubr.f32.mxu0 %v5306_v13  ;;  %v14322_v23 = vmul.f32 %v9996_v19, %v16046_v18 }
 0xa22   :  { %10005 = vrsqrt.f32 %v2003_v38 }
 0xa23   :  { %v1835_v24 = vpop.xlane.xlu0 %1834  ;;  %v1886_v63 = vpop.xlane.xlu1 %1885  ;;  %10007 = vrsqrt.f32 %v1986_v5 }
 0xa24   :  { %v9998_v30 = vpop.eup %9997  ;;  %5752 = vmatmul.mubr.f32.gmra.mrb[204].mxu0 %v5305_v17  ;;  %v1987_v3 = vmax.f32 %v1835_v24, 1e-24  ;;  %v2004_v35 = vmax.f32 %v1886_v63, 1e-24 }
 0xa25   :  { %v14325_v31 = vmul.f32 %v9998_v30, %v16047_v0  ;;  %v10000_v9 = vpop.eup %9999 }
 0xa26   :  { %10009 = vrsqrt.f32 %v1987_v3  ;;  %v14330_v60 = vmul.f32 %v10000_v9, %v16048_v42 }
 0xa27   :  { %v1889_v37 = vpop.xlane.xlu0 %1888  ;;  %v1838_v20 = vpop.xlane.xlu1 %1837  ;;  %v9214_v61 = vpack.c.bf16 %v14325_v31, %v14322_v23  ;;  %10011 = vrsqrt.f32 %v2004_v35 }
 0xa28   :  { %v10002_v14 = vpop.eup %10001  ;;  %v2005_v8 = vmax.f32 %v1889_v37, 1e-24  ;;  %v1988_v50 = vmax.f32 %v1838_v20, 1e-24 }
 0xa29   :  { %v14333_v39 = vmul.f32 %v10002_v14, %v14039_v33  ;;  %9216 = vmatprep.subr.msk.bf16.mxu1 %vm11521_vm3, %v9214_v61  ;;  %v10004_v34 = vpop.eup %10003  ;;  %v16050_v61 = vld [vmem:[#allocation132_spill] sm:$0xff] }
 0xa2a   :  { %10013 = vrsqrt.f32 %v2005_v8  ;;  %v14342_v33 = vmul.f32 %v10004_v34, %v14032_v28  ;;  %v16051_v8 = vld [vmem:[#allocation133_spill] sm:$0xff] }
 0xa2b   :  { %v1841_v15 = vpop.xlane.xlu0 %1840  ;;  %v1892_v48 = vpop.xlane.xlu1 %1891  ;;  %v9217_v21 = vpack.c.bf16 %v14333_v39, %v14330_v60  ;;  %10015 = vrsqrt.f32 %v1988_v50 }
 0xa2c   :  { %v10006_v47 = vpop.eup %10005  ;;  %v1989_v43 = vmax.f32 %v1841_v15, 1e-24  ;;  %v2006_v22 = vmax.f32 %v1892_v48, 1e-24 }
 0xa2d   :  { %9219 = vmatpush3.bf16.xpose.msk.msra.mxu1 %vm11521_vm3, %v9217_v21  ;;  %v14345_v6 = vmul.f32 %v10006_v47, %v14052_v57  ;;  %v10008_v41 = vpop.eup %10007 }
 0xa2e   :  { %10017 = vrsqrt.f32 %v1989_v43  ;;  %v14350_v5 = vmul.f32 %v10008_v41, %v14048_v29 }
 0xa2f   :  { %v1895_v54 = vpop.xlane.xlu0 %1894  ;;  %v1844_v58 = vpop.xlane.xlu1 %1843  ;;  %v9220_v62 = vpack.c.bf16 %v14345_v6, %v14342_v33  ;;  %10019 = vrsqrt.f32 %v2006_v22 }
 0xa30   :  { %v10010_v53 = vpop.eup %10009  ;;  %v2007_v13 = vmax.f32 %v1895_v54, 1e-24  ;;  %v1990_v38 = vmax.f32 %v1844_v58, 1e-24 }
 0xa31   :  { %v14353_v28 = vmul.f32 %v10010_v53, %v14064_v46  ;;  %9222 = vmatprep.subr.msk.bf16.mxu1 %vm11521_vm3, %v9220_v62  ;;  %v10012_v57 = vpop.eup %10011 }
 0xa32   :  { %10021 = vrsqrt.f32 %v2007_v13  ;;  %v14362_v29 = vmul.f32 %v10012_v57, %v14073_v55 }
 0xa33   :  { %v1847_v52 = vpop.xlane.xlu0 %1846  ;;  %v1898_v17 = vpop.xlane.xlu1 %1897  ;;  %v9223_v19 = vpack.c.bf16 %v14353_v28, %v14350_v5  ;;  %10023 = vrsqrt.f32 %v1990_v38 }
 0xa34   :  { %v10014_v24 = vpop.eup %10013  ;;  %v1991_v63 = vmax.f32 %v1847_v52, 1e-24  ;;  %v2008_v30 = vmax.f32 %v1898_v17, 1e-24 }
 0xa35   :  { %9225 = vmatpush3.bf16.xpose.msk.msra.mxu1 %vm11521_vm3, %v9223_v19  ;;  %v14365_v46 = vmul.f32 %v10014_v24, %v14087_v12  ;;  %v10016_v3 = vpop.eup %10015 }
 0xa36   :  { %10025 = vrsqrt.f32 %v1991_v63  ;;  %v14370_v14 = vmul.f32 %v10016_v3, %v16050_v61 }
 0xa37   :  { %v1901_v35 = vpop.xlane.xlu0 %1900  ;;  %v1850_v18 = vpop.xlane.xlu1 %1849  ;;  %v9226_v0 = vpack.c.bf16 %v14365_v46, %v14362_v29  ;;  %10027 = vrsqrt.f32 %v2008_v30 }
 0xa38   :  { %v10018_v9 = vpop.eup %10017  ;;  %v2009_v37 = vmax.f32 %v1901_v35, 1e-24  ;;  %v1992_v20 = vmax.f32 %v1850_v18, 1e-24 }
 0xa39   :  { %v14373_v55 = vmul.f32 %v10018_v9, %v16051_v8  ;;  %9228 = vmatprep.subr.msk.bf16.mxu1 %vm11521_vm3, %v9226_v0  ;;  %v10020_v12 = vpop.eup %10019 }
 0xa3a   :  { %10029 = vrsqrt.f32 %v2009_v37  ;;  %v14382_v47 = vmul.f32 %v10020_v12, %v14105_v56 }
 0xa3b   :  { %v1853_v50 = vpop.xlane.xlu0 %1852  ;;  %v1904_v42 = vpop.xlane.xlu1 %1903  ;;  %v9229_v34 = vpack.c.bf16 %v14373_v55, %v14370_v14  ;;  %10031 = vrsqrt.f32 %v1992_v20 }
 0xa3c   :  { %v10022_v15 = vpop.eup %10021  ;;  %v1993_v48 = vmax.f32 %v1853_v50, 1e-24  ;;  %v2010_v21 = vmax.f32 %v1904_v42, 1e-24 }
 0xa3d   :  { %9231 = vmatpush3.bf16.xpose.msk.msra.mxu1 %vm11521_vm3, %v9229_v34  ;;  %v14385_v43 = vmul.f32 %v10022_v15, %v14119_v27  ;;  %v10024_v22 = vpop.eup %10023 }
 0xa3e   :  { %10033 = vrsqrt.f32 %v1993_v48  ;;  %v14390_v38 = vmul.f32 %v10024_v22, %v14114_v7 }
 0xa3f   :  { %v1907_v41 = vpop.xlane.xlu0 %1906  ;;  %v1856_v54 = vpop.xlane.xlu1 %1855  ;;  %v9232_v58 = vpack.c.bf16 %v14385_v43, %v14382_v47  ;;  %10035 = vrsqrt.f32 %v2010_v21 }
 0xa40   :  { %v10026_v62 = vpop.eup %10025  ;;  %v2011_v53 = vmax.f32 %v1907_v41, 1e-24  ;;  %v1994_v13 = vmax.f32 %v1856_v54, 1e-24 }
 0xa41   :  { %v14393_v56 = vmul.f32 %v10026_v62, %v14128_v16  ;;  %9234 = vmatprep.subr.msk.bf16.mxu1 %vm11521_vm3, %v9232_v58  ;;  %v10028_v27 = vpop.eup %10027 }
 0xa42   :  { %10037 = vrsqrt.f32 %v2011_v53  ;;  %v14402_v7 = vmul.f32 %v10028_v27, %v14137_v49  ;;  %v16052_v53 = vld [vmem:[#allocation80_spill] sm:$0xff] }
 0xa43   :  { %v1859_v57 = vpop.xlane.xlu0 %1858  ;;  %v1910_v52 = vpop.xlane.xlu1 %1909  ;;  %v9235_v17 = vpack.c.bf16 %v14393_v56, %v14390_v38  ;;  %10039 = vrsqrt.f32 %v1994_v13 }
 0xa44   :  { %v10030_v19 = vpop.eup %10029  ;;  %v1995_v24 = vmax.f32 %v1859_v57, 1e-24  ;;  %v2012_v63 = vmax.f32 %v1910_v52, 1e-24 }
 0xa45   :  { %9237 = vmatpush3.bf16.xpose.msk.msra.mxu1 %vm11521_vm3, %v9235_v17  ;;  %v14405_v16 = vmul.f32 %v10030_v19, %v14151_v45  ;;  %v10032_v30 = vpop.eup %10031 }
 0xa46   :  { %10041 = vrsqrt.f32 %v1995_v24  ;;  %v14410_v20 = vmul.f32 %v10032_v30, %v14146_v32 }
 0xa47   :  { %v1913_v3 = vpop.xlane.xlu0 %1912  ;;  %v1862_v35 = vpop.xlane.xlu1 %1861  ;;  %v9238_v18 = vpack.c.bf16 %v14405_v16, %v14402_v7  ;;  %10043 = vrsqrt.f32 %v2012_v63 }
 0xa48   :  { %v10034_v0 = vpop.eup %10033  ;;  %v2013_v9 = vmax.f32 %v1913_v3, 1e-24  ;;  %v1996_v37 = vmax.f32 %v1862_v35, 1e-24 }
 0xa49   :  { %v14413_v49 = vmul.f32 %v10034_v0, %v14160_v25  ;;  %9240 = vmatprep.subr.msk.bf16.mxu1 %vm11521_vm3, %v9238_v18  ;;  %v10036_v45 = vpop.eup %10035 }
 0xa4a   :  { %10045 = vrsqrt.f32 %v2013_v9  ;;  %v14422_v32 = vmul.f32 %v10036_v45, %v14169_v40 }
 0xa4b   :  { %v1865_v61 = vpop.xlane.xlu0 %1864  ;;  %v1916_v8 = vpop.xlane.xlu1 %1915  ;;  %v9241_v12 = vpack.c.bf16 %v14413_v49, %v14410_v20  ;;  %10047 = vrsqrt.f32 %v1996_v37  ;;  %v16053_v37 = vld [vmem:[#allocation31_spill] sm:$0xff] }
 0xa4c   :  { %v10038_v50 = vpop.eup %10037  ;;  %v1997_v42 = vmax.f32 %v1865_v61, 1e-24  ;;  %v2014_v34 = vmax.f32 %v1916_v8, 1e-24  ;;  %v16054_v8 = vld [vmem:[#allocation105_spill] sm:$0xff] }
 0xa4d   :  { %9243 = vmatpush3.bf16.xpose.msk.msra.mxu1 %vm11521_vm3, %v9241_v12  ;;  %v14425_v25 = vmul.f32 %v10038_v50, %v14183_v44  ;;  %v10040_v15 = vpop.eup %10039 }
 0xa4e   :  { %10049 = vrsqrt.f32 %v1997_v42  ;;  %v14430_v62 = vmul.f32 %v10040_v15, %v14178_v2  ;;  %v10086_v2 = vld [vmem:[%s14864_s9] sm:$0x3] }
 0xa4f   :  { %v1919_v48 = vpop.xlane.xlu0 %1918  ;;  %v1868_v21 = vpop.xlane.xlu1 %1867  ;;  %v9244_v22 = vpack.c.bf16 %v14425_v25, %v14422_v32  ;;  %10051 = vrsqrt.f32 %v2014_v34  ;;  %v2220_v19 = vrot.slane %v10086_v2, 1 }
 0xa50   :  { %v10042_v41 = vpop.eup %10041  ;;  %v2015_v54 = vmax.f32 %v1919_v48, 1e-24  ;;  %v1998_v58 = vmax.f32 %v1868_v21, 1e-24 }
 0xa51   :  { %v14433_v40 = vmul.f32 %v10042_v41, %v16052_v53  ;;  %9246 = vmatprep.subr.msk.bf16.mxu1 %vm11521_vm3, %v9244_v22  ;;  %v10044_v44 = vpop.eup %10043  ;;  %v2222_v9 = vadd.f32 %v10086_v2, %v2220_v19 }
 0xa52   :  { %10053 = vrsqrt.f32 %v2015_v54  ;;  %v14445_v63 = vmul.f32 %v10044_v44, %v14201_v4 }
 0xa53   :  { %v1871_v13 = vpop.xlane.xlu0 %1870  ;;  %v3479_v27 = vpop.xlane.xlu1 %3478  ;;  %v9247_v57 = vpack.c.bf16 %v14433_v40, %v14430_v62  ;;  %10055 = vrsqrt.f32 %v1998_v58 }
 0xa54   :  { %v10046_v52 = vpop.eup %10045  ;;  %v1999_v17 = vmax.f32 %v1871_v13, 1e-24  ;;  %v3485_v24 = vmul.f32 0.2, %v3479_v27  ;;  %v16055_v27 = vld [vmem:[#allocation73_spill] sm:$0xff] }
 0xa55   :  { %9249 = vmatpush3.bf16.xpose.msk.msra.mxu1 %vm11521_vm3, %v9247_v57  ;;  %v14448_v30 = vmul.f32 %v10046_v52, %v14215_v11  ;;  %v10048_v3 = vpop.eup %10047  ;;  %v5789_v52 = vmul.f32 0.7, %v14330_v60 }
 0xa56   :  { %10057 = vrsqrt.f32 %v1999_v17  ;;  %v3487_v35 = vrot.slane %v3485_v24, 7  ;;  %v14454_v61 = vmul.f32 %v10048_v3, %v14210_v1 }
 0xa57   :  { %v9250_v18 = vpack.c.bf16 %v14448_v30, %v14445_v63 }
 0xa58   :  { %v10050_v0 = vpop.eup %10049  ;;  %v3489_v45 = vsub.f32 %v16053_v37, %v3487_v35  ;;  %v5790_v35 = vmul.f32 0.7, %v14333_v39 }
 0xa59   :  { %v14457_v12 = vmul.f32 %v10050_v0, %v16054_v8  ;;  %9252 = vmatprep.subr.msk.bf16.mxu1 %vm11521_vm3, %v9250_v18  ;;  %v10052_v4 = vpop.eup %10051  ;;  %v5806_v0 = vmul.f32 0.7, %v14325_v31  ;;  %v5807_v31 = vmul.f32 0.7, %v14342_v33 }
 0xa5a   :  { %v3502_v11 = vrot.slane %v3489_v45, 1  ;;  %v14466_v1 = vmul.f32 %v10052_v4, %v14233_v26  ;;  %v5791_v4 = vmul.f32 0.7, %v14350_v5 }
 0xa5b   :  { %v9253_v50 = vpack.c.bf16 %v14457_v12, %v14454_v61 }
 0xa5c   :  { %v10054_v42 = vpop.eup %10053  ;;  %v3504_v34 = vsub.f32 %v2222_v9, %v3502_v11  ;;  %v3506_v15 = vadd.f32 %v3502_v11, %v2222_v9 }
 0xa5d   :  { %9255 = vmatpush3.bf16.xpose.msk.msra.mxu1 %vm11521_vm3, %v9253_v50  ;;  %v14469_v48 = vmul.f32 %v10054_v42, %v14247_v10  ;;  %v10056_v21 = vpop.eup %10055 }
 0xa5e   :  { %v3507_v22 = vmul.f32 0.5, %v3506_v15  ;;  %v3505_v58 = vmul.f32 0.5, %v3504_v34  ;;  %v14474_v44 = vmul.f32 %v10056_v21, %v14242_v59  ;;  %v5792_v15 = vmul.f32 0.7, %v14353_v28 }
 0xa5f   :  { %v9256_v41 = vpack.c.bf16 %v14469_v48, %v14466_v1 }
 0xa60   :  { %v10058_v54 = vpop.eup %10057  ;;  %v3509_v53 = vrot.slane %v3507_v22, 7 }
 0xa61   :  { %v14477_v13 = vmul.f32 %v10058_v54, %v14256_v51  ;;  %9258 = vmatprep.subr.msk.bf16.mxu1 %vm11521_vm3, %v9256_v41 }
 0xa62   :  { %v3511_v26 = vsel %vm2784_vm4, %v3505_v58, %v3509_v53 }
 0xa63   :  { %5887 = vperm.xlu0 %9433, %v3511_v26   ;;  %v9259_v10 = vpack.c.bf16 %v14477_v13, %v14474_v44  ;;  %v5793_v26 = vmul.f32 0.7, %v14370_v14 }
 0xa65   :  { %9261 = vmatpush3.bf16.xpose.msk.msra.mxu1 %vm11521_vm3, %v9259_v10 }
 0xa6c   :  { %8181 = vmatmul.mubr.msk.f32.vlgmr.msra.gmra.mrb[202].mxu1 %vm1631_vm2, %v16055_v27 }
 0xa6d   :  { %8214 = vmatprep.mubr.msk.f32.mxu1 %vm1631_vm2, %v16055_v27 }
 0xa7b   :  { %v5598_v59 = vpop.f32.mrb[142].mxu0 }
 0xa7c   :  { %v14490_v51 = vmul.f32 0.5, %v5598_v59  ;;  %v5600_v57 = vpop.f32.mrb[143].mxu0 }
 0xa7e   :  { %v5821_v17 = vmul.f32 0.3, %v14490_v51 }
 0xa7f   :  { %v5603_v2 = vpop.f32.mrb[144].mxu0 }
 0xa80   :  { %v14494_v19 = vadd.f32 %v5821_v17, %v5789_v52  ;;  %v14496_v24 = vmul.f32 0.5, %v5603_v2  ;;  %v5605_v3 = vpop.f32.mrb[145].mxu0  ;;  %v5794_v17 = vmul.f32 0.7, %v14373_v55 }
 0xa82   :  { %v5822_v18 = vmul.f32 0.3, %v14496_v24 }
 0xa83   :  { %v5608_v9 = vpop.f32.mrb[146].mxu0 }
 0xa84   :  { %v14502_v37 = vadd.f32 %v5822_v18, %v5790_v35  ;;  %v14504_v45 = vmul.f32 0.5, %v5608_v9  ;;  %v5610_v60 = vpop.f32.mrb[147].mxu0 }
 0xa85   :  { %v5800_v60 = vmul.f32 0.7, %v14433_v40 }
 0xa86   :  { %v5823_v11 = vmul.f32 0.3, %v14504_v45 }
 0xa87   :  { %v5613_v50 = vpop.f32.mrb[148].mxu0 }
 0xa88   :  { %v14510_v39 = vadd.f32 %v5823_v11, %v5791_v4  ;;  %v14512_v42 = vmul.f32 0.5, %v5613_v50  ;;  %v5615_v34 = vpop.f32.mrb[149].mxu0  ;;  %v5795_v4 = vmul.f32 0.7, %v14390_v38 }
 0xa8a   :  { %v5824_v21 = vmul.f32 0.3, %v14512_v42  ;;  %v16059_v33 = vpack.c.bf16 %v14512_v42, %v14504_v45 }
 0xa8b   :  { %v5618_v41 = vpop.f32.mrb[150].mxu0 }
 0xa8c   :  { %v14518_v54 = vadd.f32 %v5824_v21, %v5792_v15  ;;  %v14520_v58 = vmul.f32 0.5, %v5618_v41  ;;  %v5620_v5 = vpop.f32.mrb[151].mxu0  ;;  %v5796_v21 = vmul.f32 0.7, %v14393_v56 }
 0xa8e   :  { %v5825_v10 = vmul.f32 0.3, %v14520_v58 }
 0xa8f   :  { %v5623_v59 = vpop.f32.mrb[152].mxu0 }
 0xa90   :  { %v14526_v28 = vadd.f32 %v5825_v10, %v5793_v26  ;;  %v14528_v57 = vmul.f32 0.5, %v5623_v59  ;;  %v5625_v52 = vpop.f32.mrb[153].mxu0 }
 0xa92   :  { %v5826_v2 = vmul.f32 0.3, %v14528_v57 }
 0xa93   :  { %v5628_v35 = vpop.f32.mrb[154].mxu0 }
 0xa94   :  { %v14534_v18 = vadd.f32 %v5826_v2, %v5794_v17  ;;  %v14536_v9 = vmul.f32 0.5, %v5628_v35  ;;  %v5630_v14 = vpop.f32.mrb[155].mxu0  ;;  %v5797_v17 = vmul.f32 0.7, %v14410_v20 }
 0xa96   :  { %v5827_v11 = vmul.f32 0.3, %v14536_v9 }
 0xa97   :  { %v5633_v50 = vpop.f32.mrb[156].mxu0 }
 0xa98   :  { %v14542_v55 = vadd.f32 %v5827_v11, %v5795_v4  ;;  %v14544_v34 = vmul.f32 0.5, %v5633_v50  ;;  %v5635_v15 = vpop.f32.mrb[157].mxu0  ;;  %v5798_v11 = vmul.f32 0.7, %v14413_v49 }
 0xa9a   :  { %v5828_v41 = vmul.f32 0.3, %v14544_v34 }
 0xa9b   :  { %v5638_v26 = vpop.f32.mrb[158].mxu0 }
 0xa9c   :  { %v14550_v10 = vadd.f32 %v5828_v41, %v5796_v21  ;;  %v14552_v59 = vmul.f32 0.5, %v5638_v26  ;;  %v5640_v38 = vpop.f32.mrb[159].mxu0 }
 0xa9e   :  { %v5829_v2 = vmul.f32 0.3, %v14552_v59 }
 0xa9f   :  { %v5643_v35 = vpop.f32.mrb[160].mxu0 }
 0xaa0   :  { %v14558_v56 = vadd.f32 %v5829_v2, %v5797_v17  ;;  %v14560_v14 = vmul.f32 0.5, %v5643_v35  ;;  %v5645_v4 = vpop.f32.mrb[161].mxu0  ;;  %v5799_v17 = vmul.f32 0.7, %v14430_v62 }
 0xaa2   :  { %v5830_v50 = vmul.f32 0.3, %v14560_v14 }
 0xaa3   :  { %v5648_v21 = vpop.f32.mrb[162].mxu0 }
 0xaa4   :  { %v14566_v41 = vadd.f32 %v5830_v50, %v5798_v11  ;;  %v14568_v26 = vmul.f32 0.5, %v5648_v21  ;;  %v5650_v20 = vpop.f32.mrb[163].mxu0  ;;  %v5802_v50 = vmul.f32 0.7, %v14457_v12 }
 0xaa6   :  { %v5831_v2 = vmul.f32 0.3, %v14568_v26 }
 0xaa7   :  { %v5653_v35 = vpop.f32.mrb[164].mxu0 }
 0xaa8   :  { %v14574_v49 = vadd.f32 %v5831_v2, %v5799_v17  ;;  %v14576_v4 = vmul.f32 0.5, %v5653_v35  ;;  %v5655_v52 = vpop.f32.mrb[165].mxu0  ;;  %v5801_v2 = vmul.f32 0.7, %v14454_v61 }
 0xaaa   :  { %v5832_v11 = vmul.f32 0.3, %v14576_v4 }
 0xaab   :  { %v5658_v21 = vpop.f32.mrb[166].mxu0 }
 0xaac   :  { %v14582_v20 = vadd.f32 %v5832_v11, %v5800_v60  ;;  %v14584_v38 = vmul.f32 0.5, %v5658_v21  ;;  %v5660_v62 = vpop.f32.mrb[167].mxu0  ;;  %v5804_v11 = vmul.f32 0.7, %v14477_v13 }
 0xaae   :  { %v5833_v52 = vmul.f32 0.3, %v14584_v38 }
 0xaaf   :  { %v5663_v35 = vpop.f32.mrb[168].mxu0 }
 0xab0   :  { %v14590_v40 = vadd.f32 %v5833_v52, %v5801_v2  ;;  %v14592_v53 = vmul.f32 0.5, %v5663_v35  ;;  %v5665_v8 = vpop.f32.mrb[169].mxu0  ;;  %v5803_v52 = vmul.f32 0.7, %v14474_v44 }
 0xab2   :  { %16056 = vst [vmem:[#allocation11_spill] sm:$0xff] %v14590_v40  ;;  %v5834_v60 = vmul.f32 0.3, %v14592_v53 }
 0xab3   :  { %v5668_v21 = vpop.f32.mrb[170].mxu0 }
 0xab4   :  { %v14598_v62 = vadd.f32 %v5834_v60, %v5802_v50  ;;  %v14600_v17 = vmul.f32 0.5, %v5668_v21  ;;  %v5670_v61 = vpop.f32.mrb[171].mxu0 }
 0xab6   :  { %16057 = vst [vmem:[#allocation134_spill] sm:$0xff] %v14598_v62  ;;  %v5835_v8 = vmul.f32 0.3, %v14600_v17 }
 0xab7   :  { %v5673_v35 = vpop.f32.mrb[172].mxu0 }
 0xab8   :  { %v14606_v12 = vadd.f32 %v5835_v8, %v5803_v52  ;;  %v14608_v15 = vmul.f32 0.5, %v5673_v35  ;;  %v5675_v5 = vpop.f32.mrb[173].mxu0  ;;  %v5805_v52 = vmul.f32 0.7, %v14322_v23  ;;  %v16058_v23 = vpack.c.bf16 %v14496_v24, %v14490_v51 }
 0xaba   :  { %v5836_v50 = vmul.f32 0.3, %v14608_v15 }
 0xabb   :  { %v5678_v21 = vpop.f32.mrb[174].mxu0 }
 0xabc   :  { %v14614_v61 = vadd.f32 %v5836_v50, %v5804_v11  ;;  %v5773_v2 = vmul.f32 0.5, %v5678_v21  ;;  %v5680_v44 = vpop.f32.mrb[175].mxu0 }
 0xabe   :  { %v9355_v3 = vpack.c.bf16 %v14614_v61, %v14606_v12  ;;  %v5837_v8 = vmul.f32 0.3, %v5773_v2 }
 0xabf   :  { %v5683_v35 = vpop.f32.mrb[176].mxu0 }
 0xac0   :  { %v14619_v5 = vadd.f32 %v5837_v8, %v5805_v52  ;;  %v5774_v13 = vmul.f32 0.5, %v5683_v35  ;;  %v5685_v22 = vpop.f32.mrb[177].mxu0  ;;  %v5808_v52 = vmul.f32 0.7, %v14345_v6  ;;  %v5809_v6 = vmul.f32 0.7, %v14362_v29 }
 0xac1   :  { %v16060_v29 = vpack.c.bf16 %v14528_v57, %v14520_v58 }
 0xac2   :  { %v5838_v40 = vmul.f32 0.3, %v5774_v13  ;;  %v9262_v60 = vpack.c.bf16 %v5774_v13, %v5773_v2 }
 0xac3   :  { %v5688_v62 = vpop.f32.mrb[178].mxu0 }
 0xac4   :  { %v14622_v11 = vadd.f32 %v5838_v40, %v5806_v0  ;;  %v5775_v50 = vmul.f32 0.5, %v5688_v62  ;;  %v5690_v21 = vpop.f32.mrb[179].mxu0  ;;  %9264 = vmatprep.subr.msk.bf16.mxu1 %vm11521_vm3, %v9262_v60 }
 0xac5   :  { %9267 = vmatpush3.bf16.xpose.msk.msra.mxu1 %vm11521_vm3, %v16058_v23 }
 0xac6   :  { %v9310_v22 = vpack.c.bf16 %v14622_v11, %v14619_v5  ;;  %v5839_v2 = vmul.f32 0.3, %v5775_v50 }
 0xac7   :  { %v5693_v44 = vpop.f32.mrb[180].mxu0 }
 0xac8   :  { %v14634_v0 = vadd.f32 %v5839_v2, %v5807_v31  ;;  %v5776_v40 = vmul.f32 0.5, %v5693_v44  ;;  %v5695_v62 = vpop.f32.mrb[181].mxu0 }
 0xaca   :  { %v5840_v60 = vmul.f32 0.3, %v5776_v40  ;;  %v9268_v8 = vpack.c.bf16 %v5776_v40, %v5775_v50  ;;  %v5810_v40 = vmul.f32 0.7, %v14365_v46  ;;  %v5811_v46 = vmul.f32 0.7, %v14382_v47 }
 0xacb   :  { %v5698_v35 = vpop.f32.mrb[182].mxu0  ;;  %v16061_v47 = vpack.c.bf16 %v14544_v34, %v14536_v9 }
 0xacc   :  { %v14637_v51 = vadd.f32 %v5840_v60, %v5808_v52  ;;  %v5777_v24 = vmul.f32 0.5, %v5698_v35  ;;  %v5700_v13 = vpop.f32.mrb[183].mxu0  ;;  %9270 = vmatprep.subr.msk.bf16.mxu1 %vm11521_vm3, %v9268_v8 }
 0xacd   :  { %9273 = vmatpush3.bf16.xpose.msk.msra.mxu1 %vm11521_vm3, %v16059_v33 }
 0xace   :  { %v9316_v21 = vpack.c.bf16 %v14637_v51, %v14634_v0  ;;  %v5841_v50 = vmul.f32 0.3, %v5777_v24 }
 0xacf   :  { %v5703_v23 = vpop.f32.mrb[184].mxu0 }
 0xad0   :  { %v14649_v31 = vadd.f32 %v5841_v50, %v5809_v6  ;;  %v5778_v2 = vmul.f32 0.5, %v5703_v23  ;;  %v5705_v44 = vpop.f32.mrb[185].mxu0  ;;  %v5812_v23 = vmul.f32 0.7, %v14385_v43  ;;  %v5813_v43 = vmul.f32 0.7, %v14402_v7 }
 0xad1   :  { %v16062_v7 = vpack.c.bf16 %v14560_v14, %v14552_v59  ;;  %v16063_v14 = vpack.c.bf16 %v14576_v4, %v14568_v26  ;;  %v16064_v26 = vpack.c.bf16 %v14592_v53, %v14584_v38  ;;  %v5819_v4 = vmul.f32 0.7, %v14466_v1 }
 0xad2   :  { %v5842_v62 = vmul.f32 0.3, %v5778_v2  ;;  %v9274_v52 = vpack.c.bf16 %v5778_v2, %v5777_v24  ;;  %v16065_v53 = vpack.c.bf16 %v14608_v15, %v14600_v17  ;;  %v16067_v15 = vpack.c.bf16 %v14518_v54, %v14510_v39 }
 0xad3   :  { %v5708_v60 = vpop.f32.mrb[186].mxu0  ;;  %v16070_v39 = vpack.c.bf16 %v14566_v41, %v14558_v56  ;;  %v16071_v54 = vpack.c.bf16 %v14582_v20, %v14574_v49 }
 0xad4   :  { %v14652_v45 = vadd.f32 %v5842_v62, %v5810_v40  ;;  %v5779_v42 = vmul.f32 0.5, %v5708_v60  ;;  %v5710_v8 = vpop.f32.mrb[187].mxu0  ;;  %9276 = vmatprep.subr.msk.bf16.mxu1 %vm11521_vm3, %v9274_v52 }
 0xad5   :  { %9279 = vmatpush3.bf16.xpose.msk.msra.mxu1 %vm11521_vm3, %v16060_v29 }
 0xad6   :  { %v9322_v35 = vpack.c.bf16 %v14652_v45, %v14649_v31  ;;  %v5843_v24 = vmul.f32 0.3, %v5779_v42 }
 0xad7   :  { %v5713_v13 = vpop.f32.mrb[188].mxu0 }
 0xad8   :  { %v14664_v33 = vadd.f32 %v5843_v24, %v5811_v46  ;;  %v5780_v6 = vmul.f32 0.5, %v5713_v13  ;;  %v5715_v50 = vpop.f32.mrb[189].mxu0  ;;  %v5814_v24 = vmul.f32 0.7, %v14405_v16 }
 0xada   :  { %v5844_v2 = vmul.f32 0.3, %v5780_v6  ;;  %v9280_v44 = vpack.c.bf16 %v5780_v6, %v5779_v42 }
 0xadb   :  { %v5718_v40 = vpop.f32.mrb[190].mxu0 }
 0xadc   :  { %v14667_v58 = vadd.f32 %v5844_v2, %v5812_v23  ;;  %v5781_v57 = vmul.f32 0.5, %v5718_v40  ;;  %v5720_v62 = vpop.f32.mrb[191].mxu0  ;;  %9282 = vmatprep.subr.msk.bf16.mxu1 %vm11521_vm3, %v9280_v44  ;;  %v5815_v44 = vmul.f32 0.7, %v14422_v32 }
 0xadd   :  { %9285 = vmatpush3.bf16.xpose.msk.msra.mxu1 %vm11521_vm3, %v16061_v47 }
 0xade   :  { %v9328_v52 = vpack.c.bf16 %v14667_v58, %v14664_v33  ;;  %v5845_v60 = vmul.f32 0.3, %v5781_v57 }
 0xadf   :  { %v5723_v42 = vpop.f32.mrb[192].mxu0 }
 0xae0   :  { %v14679_v8 = vadd.f32 %v5845_v60, %v5813_v43  ;;  %v5782_v29 = vmul.f32 0.5, %v5723_v42  ;;  %v5725_v46 = vpop.f32.mrb[193].mxu0  ;;  %v5816_v43 = vmul.f32 0.7, %v14425_v25 }
 0xae2   :  { %v5846_v13 = vmul.f32 0.3, %v5782_v29  ;;  %v9286_v6 = vpack.c.bf16 %v5782_v29, %v5781_v57 }
 0xae3   :  { %v5728_v50 = vpop.f32.mrb[194].mxu0 }
 0xae4   :  { %v5878_v9 = vadd.f32 %v5846_v13, %v5814_v24  ;;  %v5783_v34 = vmul.f32 0.5, %v5728_v50  ;;  %v5730_v23 = vpop.f32.mrb[195].mxu0  ;;  %9288 = vmatprep.subr.msk.bf16.mxu1 %vm11521_vm3, %v9286_v6 }
 0xae5   :  { %9291 = vmatpush3.bf16.xpose.msk.msra.mxu1 %vm11521_vm3, %v16062_v7 }
 0xae6   :  { %v9334_v2 = vpack.c.bf16 %v5878_v9, %v14679_v8  ;;  %v5847_v16 = vmul.f32 0.3, %v5783_v34  ;;  %v5817_v8 = vmul.f32 0.7, %v14445_v63 }
 0xae7   :  { %v5733_v40 = vpop.f32.mrb[196].mxu0 }
 0xae8   :  { %v5879_v57 = vadd.f32 %v5847_v16, %v5815_v44  ;;  %v5784_v62 = vmul.f32 0.5, %v5733_v40  ;;  %v5735_v47 = vpop.f32.mrb[197].mxu0 }
 0xaea   :  { %v5848_v60 = vmul.f32 0.3, %v5784_v62  ;;  %v9292_v42 = vpack.c.bf16 %v5784_v62, %v5783_v34  ;;  %v5818_v34 = vmul.f32 0.7, %v14448_v30 }
 0xaeb   :  { %v5738_v29 = vpop.f32.mrb[198].mxu0 }
 0xaec   :  { %v5880_v46 = vadd.f32 %v5848_v60, %v5816_v43  ;;  %v5785_v24 = vmul.f32 0.5, %v5738_v29  ;;  %v5740_v59 = vpop.f32.mrb[199].mxu0  ;;  %9294 = vmatprep.subr.msk.bf16.mxu1 %vm11521_vm3, %v9292_v42  ;;  %v5820_v42 = vmul.f32 0.7, %v14469_v48  ;;  %v16066_v48 = vpack.c.bf16 %v14502_v37, %v14494_v19 }
 0xaed   :  { %9297 = vmatpush3.bf16.xpose.msk.msra.mxu1 %vm11521_vm3, %v16063_v14  ;;  %v16068_v19 = vpack.c.bf16 %v14534_v18, %v14526_v28  ;;  %v16069_v37 = vpack.c.bf16 %v14550_v10, %v14542_v55  ;;  %v16072_v28 = vld [vmem:[#allocation134_spill] sm:$0xff]  ;;  %v16073_v18 = vld [vmem:[#allocation11_spill] sm:$0xff]  ;;  %v14789_v10 = vpop.permute.xlu0 %5887 }
 0xaee   :  { %v9340_v32 = vpack.c.bf16 %v5880_v46, %v5879_v57  ;;  %v5849_v13 = vmul.f32 0.3, %v5785_v24  ;;  %v16074_v55 = vpack.c.bf16 %v16072_v28, %v16073_v18 }
 0xaef   :  { %v5743_v25 = vpop.f32.mrb[200].mxu0 }
 0xaf0   :  { %v5881_v6 = vadd.f32 %v5849_v13, %v5817_v8  ;;  %v5786_v50 = vmul.f32 0.5, %v5743_v25  ;;  %v5745_v9 = vpop.f32.mrb[201].mxu0 }
 0xaf2   :  { %v5850_v23 = vmul.f32 0.3, %v5786_v50  ;;  %v9298_v7 = vpack.c.bf16 %v5786_v50, %v5785_v24 }
 0xaf3   :  { %v5748_v44 = vpop.f32.mrb[202].mxu0 }
 0xaf4   :  { %v5882_v16 = vadd.f32 %v5850_v23, %v5818_v34  ;;  %v5787_v40 = vmul.f32 0.5, %v5748_v44  ;;  %v5750_v62 = vpop.f32.mrb[203].mxu0  ;;  %9300 = vmatprep.subr.msk.bf16.mxu1 %vm11521_vm3, %v9298_v7 }
 0xaf5   :  { %9303 = vmatpush3.bf16.xpose.msk.msra.mxu1 %vm11521_vm3, %v16064_v26 }
 0xaf6   :  { %v9346_v63 = vpack.c.bf16 %v5882_v16, %v5881_v6  ;;  %v5851_v57 = vmul.f32 0.3, %v5787_v40 }
 0xaf7   :  { %v5753_v30 = vpop.f32.mrb[204].mxu0 }
 0xaf8   :  { %v5883_v47 = vadd.f32 %v5851_v57, %v5819_v4  ;;  %v5788_v43 = vmul.f32 0.5, %v5753_v30  ;;  %v5755_v60 = vpop.f32.mrb[205].mxu0 }
 0xafa   :  { %v5852_v29 = vmul.f32 0.3, %v5788_v43  ;;  %v9304_v46 = vpack.c.bf16 %v5788_v43, %v5787_v40  ;;  %v10089_v43 = vmov 1983009808  }
 0xafb   :  { %v6526_v60 = vunpack.c.l.s4 %v10089_v43 }
 0xafc   :  { %v5884_v24 = vadd.f32 %v5852_v29, %v5820_v42  ;;  %9306 = vmatprep.subr.msk.bf16.mxu1 %vm11521_vm3, %v9304_v46 }
 0xafd   :  { %9309 = vmatpush3.bf16.xpose.msk.msra.mxu1 %vm11521_vm3, %v16065_v53  ;;  %v6527_v42 = vunpack.c.0.s8 %v6526_v60  ;;  %v16075_v53 = vld [vmem:[#allocation148_spill] sm:$0xff] }
 0xafe   :  { %v9352_v1 = vpack.c.bf16 %v5884_v24, %v5883_v47  ;;  %9312 = vmatprep.subr.msk.bf16.mxu1 %vm11521_vm3, %v9310_v22 }
 0xb04   :  { %8215 = vmatmul.mubr.msk.f32.vlgmr.msra.gmra.mrb[204].mxu1 %vm1631_vm2, %v16055_v27 }
 0xb05   :  { %9315 = vmatpush3.bf16.xpose.msk.msra.mxu1 %vm11521_vm3, %v16066_v48  ;;  %8248 = vmatprep.mubr.msk.f32.mxu1 %vm1631_vm2, %v16055_v27 }
 0xb06   :  { %9318 = vmatprep.subr.msk.bf16.mxu1 %vm11521_vm3, %v9316_v21 }
 0xb0d   :  { %9321 = vmatpush3.bf16.xpose.msk.msra.mxu1 %vm11521_vm3, %v16067_v15 }
 0xb0e   :  { %9324 = vmatprep.subr.msk.bf16.mxu1 %vm11521_vm3, %v9322_v35 }
 0xb15   :  { %9327 = vmatpush3.bf16.xpose.msk.msra.mxu1 %vm11521_vm3, %v16068_v19 }
 0xb16   :  { %9330 = vmatprep.subr.msk.bf16.mxu1 %vm11521_vm3, %v9328_v52 }
 0xb1d   :  { %9333 = vmatpush3.bf16.xpose.msk.msra.mxu1 %vm11521_vm3, %v16069_v37 }
 0xb1e   :  { %9336 = vmatprep.subr.msk.bf16.mxu1 %vm11521_vm3, %v9334_v2 }
 0xb25   :  { %9339 = vmatpush3.bf16.xpose.msk.msra.mxu1 %vm11521_vm3, %v16070_v39 }
 0xb26   :  { %9342 = vmatprep.subr.msk.bf16.mxu1 %vm11521_vm3, %v9340_v32 }
 0xb2d   :  { %9345 = vmatpush3.bf16.xpose.msk.msra.mxu1 %vm11521_vm3, %v16071_v54 }
 0xb2e   :  { %9348 = vmatprep.subr.msk.bf16.mxu1 %vm11521_vm3, %v9346_v63 }
 0xb35   :  { %9351 = vmatpush3.bf16.xpose.msk.msra.mxu1 %vm11521_vm3, %v16074_v55 }
 0xb36   :  { %9354 = vmatprep.subr.msk.bf16.mxu1 %vm11521_vm3, %v9352_v1  ;;  %v14808_v1 = vsub.s32 %v6527_v42, %v16075_v53 }
 0xb3d   :  { %9357 = vmatpush3.bf16.xpose.msk.msra.mxu1 %vm11521_vm3, %v9355_v3 }
 0xb3f   :  { %v6247_v56 = vpop.f32.mrb[202].mxu1 }
 0xb40   :  { %v14792_v41 = vadd.f32 %v6247_v56, %v14789_v10  ;;  %v6249_v38 = vpop.f32.mrb[203].mxu1 }
 0xb41   :  { %v6250_v49 = vadd.f32 %v6249_v38, %v14789_v10 }
 0xb42   :  { %v6395_v20 = vsel %vm6394_vm7, %v14792_v41, -inf }
 0xb43   :  { %v6396_v17 = vrot.slane %v6395_v20, 4  ;;  %v6402_v5 = vsel %vm6394_vm7, %v6250_v49, -inf  ;;  %v6678_v12 = vcombine.low %v14792_v41, %v6250_v49 }
 0xb44   :  { %v6403_v36 = vrot.slane %v6402_v5, 4  ;;  %8249 = vmatmul.mubr.msk.f32.vlgmr.msra.gmra.mrb[206].mxu1 %vm1631_vm2, %v16055_v27 }
 0xb45   :  { %v6397_v3 = vmax.f32 %v6395_v20, %v6396_v17  ;;  %v6686_v28 = vrot.slane %v6678_v12, %v14808_v1 }
 0xb46   :  { %v6404_v61 = vmax.f32 %v6402_v5, %v6403_v36 }
 0xb47   :  { %v6398_v11 = vrot.slane %v6397_v3, 2 }
 0xb48   :  { %v6405_v22 = vrot.slane %v6404_v61, 2 }
 0xb49   :  { %v6399_v0 = vmax.f32 %v6397_v3, %v6398_v11 }
 0xb4a   :  { %v6406_v51 = vmax.f32 %v6404_v61, %v6405_v22 }
 0xb4b   :  { %v6400_v21 = vrot.slane %v6399_v0, 1 }
 0xb4c   :  { %v6407_v31 = vrot.slane %v6406_v51, 1 }
 0xb4d   :  { %v6401_v45 = vmax.f32 %v6399_v0, %v6400_v21 }
 0xb4e   :  { %v6408_v35 = vmax.f32 %v6406_v51, %v6407_v31 }
 0xb4f   :  { %v6437_v33 = vsub.f32 %v14792_v41, %v6401_v45 }
 0xb50   :  { %v6438_v58 = vsub.f32 %v6250_v49, %v6408_v35 }
 0xb51   :  { %v6443_v52 = vmul.f32 1.442695, %v6437_v33 }
 0xb52   :  { %v6445_v2 = vmul.f32 1.442695, %v6438_v58 }
 0xb53   :  { %10059 = vpow2.f32 %v6443_v52 }
 0xb54   :  { %10061 = vpow2.f32 %v6445_v2 }
 0xb5d   :  { %v10060_v59 = vpop.eup %10059 }
 0xb5e   :  { %v10062_v14 = vpop.eup %10061  ;;  %v6455_v27 = vsel %vm6394_vm7, %v10060_v59, 0.0 }
 0xb5f   :  { %v6456_v32 = vrot.slane %v6455_v27, 4  ;;  %v6462_v8 = vsel %vm6394_vm7, %v10062_v14, 0.0 }
 0xb60   :  { %v6463_v13 = vrot.slane %v6462_v8, 4 }
 0xb61   :  { %v6457_v25 = vadd.f32 %v6456_v32, %v6455_v27 }
 0xb62   :  { %v6464_v6 = vadd.f32 %v6463_v13, %v6462_v8 }
 0xb63   :  { %v6458_v50 = vrot.slane %v6457_v25, 2 }
 0xb64   :  { %v6465_v9 = vrot.slane %v6464_v6, 2 }
 0xb65   :  { %v6459_v34 = vadd.f32 %v6458_v50, %v6457_v25 }
 0xb66   :  { %v6466_v23 = vadd.f32 %v6465_v9, %v6464_v6 }
 0xb67   :  { %v6460_v7 = vrot.slane %v6459_v34, 1 }
 0xb68   :  { %v6467_v44 = vrot.slane %v6466_v23, 1 }
 0xb69   :  { %v6461_v16 = vadd.f32 %v6460_v7, %v6459_v34 }
 0xb6a   :  { %v6468_v40 = vadd.f32 %v6467_v44, %v6466_v23 }
 0xb6b   :  { %10063 = vlog2.f32 %v6461_v16 }
 0xb6c   :  { %10065 = vlog2.f32 %v6468_v40 }
 0xb75   :  { %v10064_v62 = vpop.eup %10063 }
 0xb76   :  { %v10066_v26 = vpop.eup %10065  ;;  %v6498_v63 = vmul.f32 0.6931472, %v10064_v62  ;;  %v6509_v62 = vld [vmem:[%s14868_s7] sm:$0xff] }
 0xb77   :  { %v6500_v4 = vmul.f32 0.6931472, %v10066_v26 }
 0xb78   :  { %v6511_v57 = vsub.f32 %v6437_v33, %v6498_v63 }
 0xb79   :  { %v6512_v30 = vsub.f32 %v6438_v58, %v6500_v4 }
 0xb7b   :  { %v14804_v47 = vcombine.low %v6511_v57, %v6512_v30 }
 0xb7d   :  { %v6531_v16 = vrot.slane %v14804_v47, %v14808_v1 }
 0xbd7   :  { %v6318_v29 = vpop.f32.mrb[204].mxu1 }
 0xbd8   :  { %v6319_v46 = vadd.f32 %v6318_v29, %v14789_v10  ;;  %v6320_v24 = vpop.f32.mrb[205].mxu1 }
 0xbd9   :  { %v6321_v48 = vadd.f32 %v6320_v24, %v14789_v10 }
 0xbda   :  { %v6409_v15 = vsel %vm6394_vm7, %v6319_v46, -inf }
 0xbdb   :  { %v6410_v19 = vrot.slane %v6409_v15, 4  ;;  %v6416_v37 = vsel %vm6394_vm7, %v6321_v48, -inf  ;;  %v6679_v39 = vcombine.low %v6319_v46, %v6321_v48 }
 0xbdc   :  { %v6417_v54 = vrot.slane %v6416_v37, 4 }
 0xbdd   :  { %v6411_v18 = vmax.f32 %v6409_v15, %v6410_v19  ;;  %v6693_v55 = vrot.slane %v6679_v39, %v14808_v1 }
 0xbde   :  { %v6418_v56 = vmax.f32 %v6416_v37, %v6417_v54 }
 0xbdf   :  { %v6412_v41 = vrot.slane %v6411_v18, 2  ;;  %v6694_v38 = vcombine.low %v6686_v28, %v6693_v55 }
 0xbe0   :  { %v6419_v49 = vrot.slane %v6418_v56, 2 }
 0xbe1   :  { %v6413_v20 = vmax.f32 %v6411_v18, %v6412_v41  ;;  %6705 = vst [vmem:[%s14867_s10] sm:$0xff] %v6694_v38 }
 0xbe2   :  { %v6420_v17 = vmax.f32 %v6418_v56, %v6419_v49 }
 0xbe3   :  { %v6414_v5 = vrot.slane %v6413_v20, 1 }
 0xbe4   :  { %v6421_v36 = vrot.slane %v6420_v17, 1 }
 0xbe5   :  { %v6415_v3 = vmax.f32 %v6413_v20, %v6414_v5 }
 0xbe6   :  { %v6422_v61 = vmax.f32 %v6420_v17, %v6421_v36 }
 0xbe7   :  { %v6439_v11 = vsub.f32 %v6319_v46, %v6415_v3 }
 0xbe8   :  { %v6440_v22 = vsub.f32 %v6321_v48, %v6422_v61 }
 0xbe9   :  { %v6447_v12 = vmul.f32 1.442695, %v6439_v11 }
 0xbea   :  { %v6449_v0 = vmul.f32 1.442695, %v6440_v22 }
 0xbeb   :  { %10067 = vpow2.f32 %v6447_v12 }
 0xbec   :  { %10069 = vpow2.f32 %v6449_v0 }
 0xbf5   :  { %v10068_v51 = vpop.eup %10067 }
 0xbf6   :  { %v10070_v21 = vpop.eup %10069  ;;  %v6469_v31 = vsel %vm6394_vm7, %v10068_v51, 0.0 }
 0xbf7   :  { %v6470_v45 = vrot.slane %v6469_v31, 4  ;;  %v6476_v35 = vsel %vm6394_vm7, %v10070_v21, 0.0 }
 0xbf8   :  { %v6477_v33 = vrot.slane %v6476_v35, 4 }
 0xbf9   :  { %v6471_v58 = vadd.f32 %v6470_v45, %v6469_v31 }
 0xbfa   :  { %v6478_v52 = vadd.f32 %v6477_v33, %v6476_v35 }
 0xbfb   :  { %v6472_v2 = vrot.slane %v6471_v58, 2 }
 0xbfc   :  { %v6479_v59 = vrot.slane %v6478_v52, 2 }
 0xbfd   :  { %v6473_v14 = vadd.f32 %v6472_v2, %v6471_v58 }
 0xbfe   :  { %v6480_v27 = vadd.f32 %v6479_v59, %v6478_v52 }
 0xbff   :  { %v6474_v32 = vrot.slane %v6473_v14, 1 }
 0xc00   :  { %v6481_v8 = vrot.slane %v6480_v27, 1 }
 0xc01   :  { %v6475_v13 = vadd.f32 %v6474_v32, %v6473_v14 }
 0xc02   :  { %v6482_v25 = vadd.f32 %v6481_v8, %v6480_v27 }
 0xc03   :  { %10071 = vlog2.f32 %v6475_v13 }
 0xc04   :  { %10073 = vlog2.f32 %v6482_v25 }
 0xc0d   :  { %v10072_v6 = vpop.eup %10071 }
 0xc0e   :  { %v10074_v50 = vpop.eup %10073  ;;  %v6502_v9 = vmul.f32 0.6931472, %v10072_v6 }
 0xc0f   :  { %v6504_v34 = vmul.f32 0.6931472, %v10074_v50 }
 0xc10   :  { %v6513_v23 = vsub.f32 %v6439_v11, %v6502_v9 }
 0xc11   :  { %v6514_v7 = vsub.f32 %v6440_v22, %v6504_v34 }
 0xc13   :  { %v6524_v44 = vcombine.low %v6513_v23, %v6514_v7 }
 0xc15   :  { %v6538_v40 = vrot.slane %v6524_v44, %v14808_v1 }
 0xc17   :  { %v6539_v26 = vcombine.low %v6531_v16, %v6538_v40  ;;  %v6389_v63 = vpop.f32.mrb[206].mxu1 }
 0xc18   :  { %v6390_v4 = vadd.f32 %v6389_v63, %v14789_v10  ;;  %v6391_v57 = vpop.f32.mrb[207].mxu1 }
 0xc19   :  { %v6550_v30 = vmul.f32 %v6539_v26, %v6509_v62  ;;  %v6392_v43 = vadd.f32 %v6391_v57, %v14789_v10 }
 0xc1a   :  { %v6423_v60 = vsel %vm6394_vm7, %v6390_v4, -inf }
 0xc1b   :  { %v6424_v42 = vrot.slane %v6423_v60, 4  ;;  %v6430_v29 = vsel %vm6394_vm7, %v6392_v43, -inf  ;;  %v6695_v47 = vcombine.low %v6390_v4, %v6392_v43  ;;  %v6561_v46 = vrot.slane %v6550_v30, %v14808_v1 }
 0xc1c   :  { %v6431_v24 = vrot.slane %v6430_v29, 4  ;;  %v6554_v53 = vcombine.high %v6550_v30, %v6550_v30 }
 0xc1d   :  { %v6425_v48 = vmax.f32 %v6423_v60, %v6424_v42  ;;  %7347 = vst.sshfl [vmem:[%s14867_s10 + $0x8] sm:$0x33 pattern:$0x76325410] %v6695_v47  ;;  %v6569_v15 = vcombine.high %v6561_v46, %v6561_v46  ;;  %v6585_v19 = vsel %vm6394_vm7, %v6561_v46, 0.0 }
 0xc1e   :  { %v6432_v37 = vmax.f32 %v6430_v29, %v6431_v24  ;;  %v6586_v10 = vrot.slane %v6585_v19, 4  ;;  %v6568_v39 = vrot.slane %v6554_v53, %v14808_v1 }
 0xc1f   :  { %v6426_v54 = vrot.slane %v6425_v48, 2  ;;  %v6592_v28 = vsel %vm6394_vm7, %v6569_v15, 0.0 }
 0xc20   :  { %v6433_v18 = vrot.slane %v6432_v37, 2  ;;  %v6587_v55 = vadd.f32 %v6586_v10, %v6585_v19  ;;  %v6593_v56 = vrot.slane %v6592_v28, 4  ;;  %v6570_v41 = vcombine.high %v6568_v39, %v6568_v39 }
 0xc21   :  { %v6427_v38 = vmax.f32 %v6425_v48, %v6426_v54  ;;  %v6599_v49 = vsel %vm6394_vm7, %v6568_v39, 0.0 }
 0xc22   :  { %v6434_v20 = vmax.f32 %v6432_v37, %v6433_v18  ;;  %v6588_v17 = vrot.slane %v6587_v55, 2  ;;  %v6594_v5 = vadd.f32 %v6593_v56, %v6592_v28  ;;  %v6600_v36 = vrot.slane %v6599_v49, 4 }
 0xc23   :  { %v6428_v3 = vrot.slane %v6427_v38, 1  ;;  %v6606_v61 = vsel %vm6394_vm7, %v6570_v41, 0.0 }
 0xc24   :  { %v6435_v11 = vrot.slane %v6434_v20, 1  ;;  %v6589_v22 = vadd.f32 %v6588_v17, %v6587_v55  ;;  %v6595_v12 = vrot.slane %v6594_v5, 2  ;;  %v6601_v0 = vadd.f32 %v6600_v36, %v6599_v49  ;;  %v6510_v17 = vld [vmem:[%s14868_s7 + $0x8] sm:$0xf] }
 0xc25   :  { %v6429_v51 = vmax.f32 %v6427_v38, %v6428_v3  ;;  %v6607_v21 = vrot.slane %v6606_v61, 4 }
 0xc26   :  { %v6436_v31 = vmax.f32 %v6434_v20, %v6435_v11  ;;  %v6590_v45 = vrot.slane %v6589_v22, 1  ;;  %v6596_v35 = vadd.f32 %v6595_v12, %v6594_v5  ;;  %v6602_v33 = vrot.slane %v6601_v0, 2 }
 0xc27   :  { %v6441_v58 = vsub.f32 %v6390_v4, %v6429_v51  ;;  %v6608_v52 = vadd.f32 %v6607_v21, %v6606_v61 }
 0xc28   :  { %v6442_v2 = vsub.f32 %v6392_v43, %v6436_v31  ;;  %v6591_v59 = vadd.f32 %v6590_v45, %v6589_v22  ;;  %v6597_v14 = vrot.slane %v6596_v35, 1  ;;  %v6603_v27 = vadd.f32 %v6602_v33, %v6601_v0 }
 0xc29   :  { %v6451_v32 = vmul.f32 1.442695, %v6441_v58  ;;  %v6609_v8 = vrot.slane %v6608_v52, 2 }
 0xc2a   :  { %v6453_v13 = vmul.f32 1.442695, %v6442_v2  ;;  %v6598_v25 = vadd.f32 %v6597_v14, %v6596_v35  ;;  %v6627_v6 = vsub.f32 0.0, %v6591_v59  ;;  %v6604_v50 = vrot.slane %v6603_v27, 1 }
 0xc2b   :  { %10075 = vpow2.f32 %v6451_v32  ;;  %v6610_v9 = vadd.f32 %v6609_v8, %v6608_v52 }
 0xc2c   :  { %10077 = vpow2.f32 %v6453_v13  ;;  %v6628_v34 = vsub.f32 0.0, %v6598_v25  ;;  %v6605_v23 = vadd.f32 %v6604_v50, %v6603_v27  ;;  %v6633_v44 = vsel %vm2784_vm4, %v6627_v6, 0.0 }
 0xc2d   :  { %v6611_v7 = vrot.slane %v6610_v9, 1 }
 0xc2e   :  { %v6634_v16 = vsel %vm2784_vm4, %v6628_v34, 0.0  ;;  %v6629_v26 = vsub.f32 0.0, %v6605_v23 }
 0xc2f   :  { %v6635_v40 = vadd.f32 %v6634_v16, %v6633_v44  ;;  %v6612_v62 = vadd.f32 %v6611_v7, %v6610_v9 }
 0xc30   :  { %v6646_v4 = vsel %vm2784_vm4, %v6629_v26, 0.0 }
 0xc31   :  { %6636 = vadd.xlane.f32.xlu1 %v6635_v40  ;;  %v6630_v63 = vsub.f32 0.0, %v6612_v62 }
 0xc33   :  { %v6647_v57 = vsel %vm2784_vm4, %v6630_v63, 0.0 }
 0xc34   :  { %v6648_v30 = vadd.f32 %v6647_v57, %v6646_v4 }
 0xc35   :  { %v10076_v43 = vpop.eup %10075 }
 0xc36   :  { %v10078_v60 = vpop.eup %10077  ;;  %v6483_v42 = vsel %vm6394_vm7, %v10076_v43, 0.0  ;;  %6649 = vadd.xlane.f32.xlu1 %v6648_v30 }
 0xc37   :  { %v6484_v29 = vrot.slane %v6483_v42, 4  ;;  %v6490_v47 = vsel %vm6394_vm7, %v10078_v60, 0.0 }
 0xc38   :  { %v6491_v46 = vrot.slane %v6490_v47, 4 }
 0xc39   :  { %v6485_v24 = vadd.f32 %v6484_v29, %v6483_v42 }
 0xc3a   :  { %v6492_v53 = vadd.f32 %v6491_v46, %v6490_v47  ;;  %v16076_v47 = vlaneseq }
 0xc3b   :  { %v6486_v48 = vrot.slane %v6485_v24, 2 }
 0xc3c   :  { %v6493_v15 = vrot.slane %v6492_v53, 2  ;;  %v6708_v46 = vand.u32 127, %v16076_v47 }
 0xc3d   :  { %v6487_v19 = vadd.f32 %v6486_v48, %v6485_v24 }
 0xc3e   :  { %v6494_v37 = vadd.f32 %v6493_v15, %v6492_v53  ;;  %vm6710_vm8 = vcmp.eq.s32.totalorder %v6708_v46, 1  ;;  %vm6709_vm9 = vcmp.eq.s32.totalorder %v6708_v46, 0 }
 0xc3f   :  { %v6488_v10 = vrot.slane %v6487_v19, 1 }
 0xc40   :  { %v6495_v39 = vrot.slane %v6494_v37, 1 }
 0xc41   :  { %v6489_v54 = vadd.f32 %v6488_v10, %v6487_v19 }
 0xc42   :  { %v6496_v28 = vadd.f32 %v6495_v39, %v6494_v37 }
 0xc43   :  { %10079 = vlog2.f32 %v6489_v54 }
 0xc44   :  { %10081 = vlog2.f32 %v6496_v28 }
 0xc4d   :  { %v10080_v18 = vpop.eup %10079 }
 0xc4e   :  { %v10082_v55 = vpop.eup %10081  ;;  %v6506_v56 = vmul.f32 0.6931472, %v10080_v18 }
 0xc4f   :  { %v6508_v41 = vmul.f32 0.6931472, %v10082_v55 }
 0xc50   :  { %v6515_v38 = vsub.f32 %v6441_v58, %v6506_v56 }
 0xc51   :  { %v6516_v49 = vsub.f32 %v6442_v2, %v6508_v41 }
 0xc53   :  { %v6540_v20 = vcombine.low %v6515_v38, %v6516_v49 }
 0xc55   :  { %v6547_v5 = vrot.slane %v6540_v20, %v14808_v1 }
 0xc57   :  { %v6551_v36 = vmul.f32 %v6547_v5, %v6510_v17 }
 0xc59   :  { %v6577_v3 = vrot.slane %v6551_v36, %v14808_v1 }
 0xc5b   :  { %v6578_v61 = vcombine.high %v6577_v3, %v6577_v3  ;;  %v6613_v11 = vsel %vm6394_vm7, %v6577_v3, 0.0 }
 0xc5c   :  { %v6614_v22 = vrot.slane %v6613_v11, 4 }
 0xc5d   :  { %v6620_v12 = vsel %vm6394_vm7, %v6578_v61, 0.0 }
 0xc5e   :  { %v6615_v0 = vadd.f32 %v6614_v22, %v6613_v11  ;;  %v6621_v51 = vrot.slane %v6620_v12, 4 }
 0xc60   :  { %v6616_v21 = vrot.slane %v6615_v0, 2  ;;  %v6622_v31 = vadd.f32 %v6621_v51, %v6620_v12 }
 0xc62   :  { %v6617_v45 = vadd.f32 %v6616_v21, %v6615_v0  ;;  %v6623_v35 = vrot.slane %v6622_v31, 2 }
 0xc64   :  { %v6618_v33 = vrot.slane %v6617_v45, 1  ;;  %v6624_v58 = vadd.f32 %v6623_v35, %v6622_v31 }
 0xc66   :  { %v6619_v52 = vadd.f32 %v6618_v33, %v6617_v45  ;;  %v6625_v2 = vrot.slane %v6624_v58, 1 }
 0xc68   :  { %v6626_v59 = vadd.f32 %v6625_v2, %v6624_v58  ;;  %v6631_v14 = vsub.f32 0.0, %v6619_v52 }
 0xc6a   :  { %v6632_v27 = vsub.f32 0.0, %v6626_v59  ;;  %v6659_v1 = vsel %vm2784_vm4, %v6631_v14, 0.0 }
 0xc6c   :  { %v6660_v32 = vsel %vm2784_vm4, %v6632_v27, 0.0 }
 0xc6d   :  { %v6661_v8 = vadd.f32 %v6660_v32, %v6659_v1 }
 0xc6f   :  { %6662 = vadd.xlane.f32.xlu1 %v6661_v8 }
 0xcbe   :  { %v6637_v13 = vpop.xlane.xlu1 %6636 }
 0xcbf   :  { %v6638_v25 = vrot.slane %v6637_v13, 4 }
 0xcc1   :  { %v6639_v6 = vadd.f32 %v6638_v25, %v6637_v13 }
 0xcc3   :  { %v6640_v50 = vrot.slane %v6639_v6, 2  ;;  %v6650_v9 = vpop.xlane.xlu1 %6649 }
 0xcc4   :  { %v6651_v34 = vrot.slane %v6650_v9, 4 }
 0xcc5   :  { %v6641_v23 = vadd.f32 %v6640_v50, %v6639_v6 }
 0xcc6   :  { %v6652_v7 = vadd.f32 %v6651_v34, %v6650_v9 }
 0xcc7   :  { %v6642_v44 = vrot.slane %v6641_v23, 1 }
 0xcc8   :  { %v6653_v16 = vrot.slane %v6652_v7, 2 }
 0xcc9   :  { %v6643_v40 = vadd.f32 %v6642_v44, %v6641_v23 }
 0xcca   :  { %v6654_v62 = vadd.f32 %v6653_v16, %v6652_v7 }
 0xccb   :  { %9424 = vpush %v6643_v40 }
 0xccc   :  { %v6655_v26 = vrot.slane %v6654_v62, 1 }
 0xcce   :  { %v6656_v63 = vadd.f32 %v6655_v26, %v6654_v62 }
 0xcd0   :  { %9426 = vpush %v6656_v63 }
 0xcfc   :  { %v6663_v4 = vpop.xlane.xlu1 %6662  ;;  %s9425_s7 = spop %9424 }
 0xcfd   :  { %v6664_v57 = vrot.slane %v6663_v4, 4  ;;  %s6645_s13 = smul.f32 0.00390625, %s9425_s7 }
 0xcff   :  { %v6665_v30 = vadd.f32 %v6664_v57, %v6663_v4  ;;  %v6714_v48 = vstv %s6645_s13 }
 0xd01   :  { %v6666_v43 = vrot.slane %v6665_v30, 2  ;;  %s9427_s30 = spop %9426 }
 0xd02   :  { %s6658_s12 = smul.f32 0.00390625, %s9427_s30 }
 0xd03   :  { %v6667_v60 = vadd.f32 %v6666_v43, %v6665_v30 }
 0xd04   :  { %v6711_v24 = vstv %s6658_s12 }
 0xd05   :  { %v6668_v42 = vrot.slane %v6667_v60, 1 }
 0xd07   :  { %v6669_v29 = vadd.f32 %v6668_v42, %v6667_v60 }
 0xd09   :  { %9428 = vpush %v6669_v29 }
 0xd3a   :  { %s9429_s0 = spop %9428 }
 0xd3b   :  { %s6671_s14 = smul.f32 0.00390625, %s9429_s0 }
 0xd3d   :  { %v6712_v53 = vstv %s6671_s14 }
 0xd3e   :  { %v6713_v15 = vsel %vm6710_vm8, %v6711_v24, %v6712_v53 }
 0xd3f   :  { %v6715_v19 = vsel %vm6709_vm9, %v6714_v48, %v6713_v15 }
 0xd40   :  { %6717 = vst.msk [vmem:[%s14869_s11] sm:$0x1] %vm6716_vm10, %v6715_v19 }

</bundles_post_ra>
